<compile_context>
chip_gen: v6e
topology: v6e:2x2x1
jax: 0.10.0
libtpu: 0.0.40
codegen_flags: <defaults>
</compile_context>

<pallas_src>
import math

import jax
import jax.numpy as jnp
from jax import lax
from jax.experimental import pallas as pl
from jax.experimental.pallas import tpu as pltpu

LANES = 128          # TPU lane width; all channel dims are padded to this
FC_HIDDEN = 512      # matches nn.Linear(cfg[-1], 512)
BN_EPS = 1e-5


def _round_up(x, m):
    return ((x + m - 1) // m) * m


# ---------------------------------------------------------------------------
# Fused kernel (one grid program per batch element)
# ---------------------------------------------------------------------------

def _store_halo(pref, interior, h, w):
    """Zero only the 1-px halo border of `pref` and write the interior."""
    dt = pref.dtype
    wp = pref.shape[2]
    zrow = jnp.zeros((1, 1, wp, LANES), dt)
    pref[:, 0:1, :, :] = zrow                       # top border row
    pref[:, h + 1:h + 2, :, :] = zrow               # bottom border row
    zcol = jnp.zeros((1, h, 1, LANES), dt)
    pref[:, 1:1 + h, 0:1, :] = zcol                 # left border column
    pref[:, 1:1 + h, w + 1:w + 2, :] = zcol         # right border column
    pref[:, 1:1 + h, 1:1 + w, :] = interior.astype(dt)


def build_fused_kernel(plan):
    """plan: tuple of (input_h, input_w, fuse_maxpool_after) per conv layer."""
    n_conv = len(plan)

    def kernel(*refs):
        # refs = [x, (w, bias) * n_conv, fc1_w, fc1_b, fc2_w, fc2_b,
        #         out, halo_scratch * n_conv]
        x_ref = refs[0]
        conv_refs = refs[1:1 + 2 * n_conv]
        fc1w_ref, fc1b_ref, fc2w_ref, fc2b_ref = refs[1 + 2 * n_conv:5 + 2 * n_conv]
        out_ref = refs[5 + 2 * n_conv]
        pad_refs = refs[6 + 2 * n_conv:]

        # Network input (already lane-padded, bf16) -> first halo buffer.
        h0, w0, _ = plan[0]
        _store_halo(pad_refs[0], x_ref[...], h0, w0)

        y = None
        ho = wo = None
        for li, (h, w, pool) in enumerate(plan):
            w_ref = conv_refs[2 * li]        # (9*128, 128) bf16, BN scale folded in
            b_ref = conv_refs[2 * li + 1]    # (1, 128) f32 folded BN bias
            pr = pad_refs[li]                # (1, h+2, Wp, 128) bf16
            m = h * w

            # im2col: 9 shifted taps lane-concatenated -> single long-K matmul.
            taps = [pr[:, kh:kh + h, kw:kw + w, :]
                    for kh in range(3) for kw in range(3)]
            im2col = jnp.concatenate(taps, axis=-1).reshape(m, 9 * LANES)
            acc = jnp.dot(im2col, w_ref[...],
                          preferred_element_type=jnp.float32)        # (m, 128) f32

            # folded BN bias + ReLU, in f32
            y = jnp.maximum(acc + b_ref[...], 0.0).reshape(1, h, w, LANES)
            ho, wo = h, w

            if pool:  # fused nn.MaxPool2d(2, 2)
                yr = y.reshape(1, h // 2, 2, w, LANES)
                yr = jnp.maximum(yr[:, :, 0], yr[:, :, 1])            # rows
                yc = yr.reshape(1, h // 2, w // 2, 2, LANES)
                y = jnp.maximum(yc[:, :, :, 0], yc[:, :, :, 1])       # cols
                ho, wo = h // 2, w // 2

            if li + 1 < n_conv:
                # pool result goes straight into the next layer's halo interior
                _store_halo(pad_refs[li + 1], y, ho, wo)

        # nn.AvgPool2d(2): features are (1, 2, 2, 128) -> (1, 128).
        feat = (y[:, 0, 0] + y[:, 0, 1] + y[:, 1, 0] + y[:, 1, 1]) * 0.25

        # classifier: Linear(cfg[-1], 512) -> ReLU -> Linear(512, num_classes)
        h1 = jnp.dot(feat.astype(fc1w_ref.dtype), fc1w_ref[...],
                     preferred_element_type=jnp.float32) + fc1b_ref[...]
        h1 = jnp.maximum(h1, 0.0)
        logits = jnp.dot(h1.astype(fc2w_ref.dtype), fc2w_ref[...],
                         preferred_element_type=jnp.float32) + fc2b_ref[...]
        out_ref[...] = logits.reshape(1, 1, LANES).astype(out_ref.dtype)

    return kernel


# ---------------------------------------------------------------------------
# Static plan + parameter preparation
# ---------------------------------------------------------------------------

def build_plan(cfg, h, w):
    """Per-conv-layer schedule: (input_h, input_w, fuse_maxpool_after)."""
    plan = []
    for v in cfg:
        if v == "M":
            if not plan or plan[-1][2]:
                # TODO(synk): a leading / consecutive 'M' would need a dedicated
                # standalone pooling stage inside the fused kernel.
                raise NotImplementedError("'M' must directly follow a conv layer")
            ph, pw, _ = plan[-1]
            assert ph % 2 == 0 and pw % 2 == 0, "maxpool needs even spatial dims"
            plan[-1] = (ph, pw, True)
            h, w = h // 2, w // 2
        else:
            plan.append((h, w, False))
    return tuple(plan), h, w


def prepare_params(params, cfg, num_classes):
    """Pad channels to 128 lanes, fold BN scale into the conv weights (f32),
    reshape to im2col layout, cast matmul operands to bf16."""
    conv_ch = [v for v in cfg if v != "M"]
    kp = {"conv": [], "num_classes": num_classes}
    in_ch = 3
    for i, cout in enumerate(conv_ch):
        w = params["conv_w"][i]                                   # (3,3,cin,cout)
        scale = params["bn_scale"][i]                             # (cout,)
        w_folded = w * scale[None, None, None, :]                 # fold BN scale in f32
        wp = jnp.zeros((3, 3, LANES, LANES), jnp.float32)
        wp = wp.at[:, :, :in_ch, :cout].set(w_folded)
        wp = wp.reshape(9 * LANES, LANES).astype(jnp.bfloat16)    # im2col weight
        bp = jnp.zeros((1, LANES), jnp.float32).at[0, :cout].set(params["bn_bias"][i])
        kp["conv"].append((wp, bp))
        in_ch = cout
    fc1 = jnp.zeros((LANES, FC_HIDDEN), jnp.float32).at[:in_ch, :].set(params["fc1_w"])
    kp["fc1_w"] = fc1.astype(jnp.bfloat16)
    kp["fc1_b"] = params["fc1_b"].reshape(1, FC_HIDDEN).astype(jnp.float32)
    fc2 = jnp.zeros((FC_HIDDEN, LANES), jnp.float32).at[:, :num_classes].set(params["fc2_w"])
    kp["fc2_w"] = fc2.astype(jnp.bfloat16)
    kp["fc2_b"] = jnp.zeros((1, LANES), jnp.float32).at[0, :num_classes].set(params["fc2_b"])
    return kp


# ---------------------------------------------------------------------------
# Forward pass (mirrors VGG_CIFAR.forward)
# ---------------------------------------------------------------------------

def vgg_forward(kparams, x_nchw, cfg):
    B, cin, H, W = x_nchw.shape
    x_nhwc = jnp.transpose(x_nchw, (0, 2, 3, 1)).astype(jnp.float32)
    # one-time lane padding of the network input; all per-layer halo padding
    # happens inside the kernel in VMEM scratch.
    xp = jnp.pad(x_nhwc, ((0, 0), (0, 0), (0, 0), (0, LANES - cin))).astype(jnp.bfloat16)

    plan, hf, wf = build_plan(cfg, H, W)
    # AvgPool2d(2) + flatten feeding Linear(cfg[-1], 512) requires 2x2 features.
    assert hf == 2 and wf == 2, "cfg / input spatial must reduce the features to 2x2"

    conv_flat, conv_specs = [], []
    for (wp, bp) in kparams["conv"]:
        conv_flat += [wp, bp]
        conv_specs += [pl.BlockSpec((9 * LANES, LANES), lambda b: (0, 0)),
                       pl.BlockSpec((1, LANES), lambda b: (0, 0))]

    in_specs = ([pl.BlockSpec((1, H, W, LANES), lambda b: (b, 0, 0, 0))]
                + conv_specs
                + [pl.BlockSpec((LANES, FC_HIDDEN), lambda b: (0, 0)),
                   pl.BlockSpec((1, FC_HIDDEN), lambda b: (0, 0)),
                   pl.BlockSpec((FC_HIDDEN, LANES), lambda b: (0, 0)),
                   pl.BlockSpec((1, LANES), lambda b: (0, 0))])

    # halo scratch: width rounded to a multiple of 8 so row bases stay
    # sublane-aligned (the extra columns are never read).
    scratch = [pltpu.VMEM((1, h + 2, _round_up(w + 2, 8), LANES), jnp.bfloat16)
               for (h, w, _) in plan]

    out_padded = pl.pallas_call(
        build_fused_kernel(plan),
        out_shape=jax.ShapeDtypeStruct((B, 1, LANES), jnp.float32),
        grid_spec=pltpu.PrefetchScalarGridSpec(
            num_scalar_prefetch=0,
            grid=(B,),
            in_specs=in_specs,
            out_specs=pl.BlockSpec((1, 1, LANES), lambda b: (b, 0, 0)),
            scratch_shapes=scratch),
        compiler_params=pltpu.CompilerParams(
            dimension_semantics=("parallel",)),
    )(xp, *conv_flat,
      kparams["fc1_w"], kparams["fc1_b"], kparams["fc2_w"], kparams["fc2_b"])
    return out_padded[:, 0, :kparams["num_classes"]]


# ---------------------------------------------------------------------------
# Parameter init (eval-mode BatchNorm folded into scale/bias)
# ---------------------------------------------------------------------------

def init_params(key, cfg, num_classes=10):
    params = {"conv_w": [], "bn_scale": [], "bn_bias": []}
    in_ch = 3
    for v in cfg:
        if v == "M":
            continue
        key, kw, kg, kb, km, kv = jax.random.split(key, 6)
        w = jax.random.normal(kw, (3, 3, in_ch, v), jnp.float32) * (
            1.0 / math.sqrt(9.0 * in_ch))
        gamma = 1.0 + 0.1 * jax.random.normal(kg, (v,), jnp.float32)
        beta = 0.1 * jax.random.normal(kb, (v,), jnp.float32)
        r_mean = 0.1 * jax.random.normal(km, (v,), jnp.float32)
        r_var = 1.0 + 0.1 * jax.random.uniform(kv, (v,), jnp.float32)
        scale = gamma / jnp.sqrt(r_var + BN_EPS)     # eval-mode BN folded
        bias = beta - r_mean * scale
        params["conv_w"].append(w)
        params["bn_scale"].append(scale)
        params["bn_bias"].append(bias)
        in_ch = v
    key, k1, k2, k3, k4 = jax.random.split(key, 5)
    params["fc1_w"] = jax.random.normal(k1, (in_ch, FC_HIDDEN), jnp.float32) * (
        1.0 / math.sqrt(in_ch))
    params["fc1_b"] = 0.01 * jax.random.normal(k2, (FC_HIDDEN,), jnp.float32)
    params["fc2_w"] = jax.random.normal(k3, (FC_HIDDEN, num_classes), jnp.float32) * (
        1.0 / math.sqrt(float(FC_HIDDEN)))
    params["fc2_b"] = 0.01 * jax.random.normal(k4, (num_classes,), jnp.float32)
    return params


# ---------------------------------------------------------------------------
# Pure-JAX reference (mirrors the kernel's bf16 rounding points; math in f32)
# ---------------------------------------------------------------------------

def vgg_forward_ref(params, x_nchw, cfg):
    q = lambda a: a.astype(jnp.bfloat16).astype(jnp.float32)
    conv_ch = [v for v in cfg if v != "M"]
    n_conv = len(conv_ch)
    cfg_l = list(cfg)

    x = q(jnp.transpose(x_nchw, (0, 2, 3, 1)).astype(jnp.float32))
    ci = 0
    i = 0
    y = None
    while i < len(cfg_l):
        assert cfg_l[i] != "M"
        # BN scale folded into the weights in f32, then bf16-rounded (as in kernel)
        w = q(params["conv_w"][ci] * params["bn_scale"][ci][None, None, None, :])
        dn = lax.conv_dimension_numbers(x.shape, w.shape, ("NHWC", "HWIO", "NHWC"))
        y = lax.conv_general_dilated(x, w, (1, 1), "SAME", dimension_numbers=dn)
        y = jnp.maximum(y + params["bn_bias"][ci], 0.0)
        ci += 1
        if i + 1 < len(cfg_l) and cfg_l[i + 1] == "M":
            y = lax.reduce_window(y, -jnp.inf, lax.max,
                                  (1, 2, 2, 1), (1, 2, 2, 1), "VALID")
            i += 1
        i += 1
        if ci < n_conv:
            x = q(y)   # kernel stores inter-layer activations in bf16 VMEM
    y = lax.reduce_window(y, 0.0, lax.add, (1, 2, 2, 1), (1, 2, 2, 1),
                          "VALID") * 0.25
    feat = q(y.reshape(y.shape[0], -1))
    h = jnp.maximum(jnp.dot(feat, q(params["fc1_w"])) + params["fc1_b"], 0.0)
    return jnp.dot(q(h), q(params["fc2_w"])) + params["fc2_b"]


# ---------------------------------------------------------------------------
# Main
# ---------------------------------------------------------------------------

if __name__ == "__main__":
    # Small cfg consistent with the module: 'M' entries are 2x2 maxpools; with
    # three of them plus the final AvgPool2d(2), a 16x16 input reduces to 1x1 so
    # the flatten feeds Linear(cfg[-1], 512) exactly as the module requires.
    cfg = [8, "M", 16, "M", 32, "M", 32]
    num_classes = 10
    B, C, Hs, Ws = 2, 3, 16, 16

    key = jax.random.PRNGKey(0)
    key, kx = jax.random.split(key)
    x = jax.random.normal(kx, (B, C, Hs, Ws), jnp.float32)
    params = init_params(key, cfg, num_classes)
    kparams = prepare_params(params, cfg, num_classes)

    out = jax.block_until_ready(vgg_forward(kparams, x, cfg))
    ref = jax.block_until_ready(vgg_forward_ref(params, x, cfg))

    assert out.shape == (B, num_classes), out.shape
    if not jnp.allclose(out, ref, atol=1e-2, rtol=1e-2):
        err = float(jnp.max(jnp.abs(out - ref)))
        raise AssertionError(f"Pallas output mismatch vs JAX reference (max |err|={err})")

    print("KERNEL_OK")
</pallas_src>

<mosaic_0001>
module attributes {stable_mosaic.version = 11 : i64} {
  func.func @kernel(%arg0: i32, %arg1: memref<1x16x16x128xbf16, #tpu.memory_space<vmem>>, %arg2: memref<1152x128xbf16, #tpu.memory_space<vmem>>, %arg3: memref<1x128xf32, #tpu.memory_space<vmem>>, %arg4: memref<1152x128xbf16, #tpu.memory_space<vmem>>, %arg5: memref<1x128xf32, #tpu.memory_space<vmem>>, %arg6: memref<1152x128xbf16, #tpu.memory_space<vmem>>, %arg7: memref<1x128xf32, #tpu.memory_space<vmem>>, %arg8: memref<1152x128xbf16, #tpu.memory_space<vmem>>, %arg9: memref<1x128xf32, #tpu.memory_space<vmem>>, %arg10: memref<128x512xbf16, #tpu.memory_space<vmem>>, %arg11: memref<1x512xf32, #tpu.memory_space<vmem>>, %arg12: memref<512x128xbf16, #tpu.memory_space<vmem>>, %arg13: memref<1x128xf32, #tpu.memory_space<vmem>>, %arg14: memref<1x1x128xf32, #tpu.memory_space<vmem>>, %arg15: memref<1x18x24x128xbf16, #tpu.memory_space<vmem>>, %arg16: memref<1x10x16x128xbf16, #tpu.memory_space<vmem>>, %arg17: memref<1x6x8x128xbf16, #tpu.memory_space<vmem>>, %arg18: memref<1x4x8x128xbf16, #tpu.memory_space<vmem>>) attributes {dimension_semantics = [#tpu.dimension_semantics<parallel>], iteration_bounds = array<i64: 2>, scalar_prefetch = 0 : i64, scratch_operands = 4 : i64, tpu.core_type = #tpu.core_type<tc>, window_params = [{transform_indices = @transform_0, window_bounds = array<i64: 1, 16, 16, 128>}, {pipeline_mode = #tpu.pipeline_mode<synchronous>, transform_indices = @transform_1, window_bounds = array<i64: 1152, 128>}, {pipeline_mode = #tpu.pipeline_mode<synchronous>, transform_indices = @transform_2, window_bounds = array<i64: 1, 128>}, {pipeline_mode = #tpu.pipeline_mode<synchronous>, transform_indices = @transform_3, window_bounds = array<i64: 1152, 128>}, {pipeline_mode = #tpu.pipeline_mode<synchronous>, transform_indices = @transform_4, window_bounds = array<i64: 1, 128>}, {pipeline_mode = #tpu.pipeline_mode<synchronous>, transform_indices = @transform_5, window_bounds = array<i64: 1152, 128>}, {pipeline_mode = #tpu.pipeline_mode<synchronous>, transform_indices = @transform_6, window_bounds = array<i64: 1, 128>}, {pipeline_mode = #tpu.pipeline_mode<synchronous>, transform_indices = @transform_7, window_bounds = array<i64: 1152, 128>}, {pipeline_mode = #tpu.pipeline_mode<synchronous>, transform_indices = @transform_8, window_bounds = array<i64: 1, 128>}, {pipeline_mode = #tpu.pipeline_mode<synchronous>, transform_indices = @transform_9, window_bounds = array<i64: 128, 512>}, {pipeline_mode = #tpu.pipeline_mode<synchronous>, transform_indices = @transform_10, window_bounds = array<i64: 1, 512>}, {pipeline_mode = #tpu.pipeline_mode<synchronous>, transform_indices = @transform_11, window_bounds = array<i64: 512, 128>}, {pipeline_mode = #tpu.pipeline_mode<synchronous>, transform_indices = @transform_12, window_bounds = array<i64: 1, 128>}, {transform_indices = @transform_13, window_bounds = array<i64: 1, 1, 128>}]} {
    %c0 = arith.constant 0 : index
    %c0_0 = arith.constant 0 : index
    %c0_1 = arith.constant 0 : index
    %c0_2 = arith.constant 0 : index
    %0 = vector.load %arg1[%c0, %c0_0, %c0_1, %c0_2] : memref<1x16x16x128xbf16, #tpu.memory_space<vmem>>, vector<1x16x16x128xbf16>
    %cst = arith.constant 0.000000e+00 : bf16
    %1 = vector.broadcast %cst : bf16 to vector<1x1x24x128xbf16>
    %c0_3 = arith.constant 0 : index
    %c0_4 = arith.constant 0 : index
    %c0_5 = arith.constant 0 : index
    %c0_6 = arith.constant 0 : index
    %2 = vector.load %arg15[%c0_3, %c0_4, %c0_5, %c0_6] : memref<1x18x24x128xbf16, #tpu.memory_space<vmem>>, vector<1x1x24x128xbf16>
    tpu.vector_store %arg15[%c0_3, %c0_4, %c0_5, %c0_6], %1 {strides = array<i32>} : memref<1x18x24x128xbf16, #tpu.memory_space<vmem>>, vector<1x1x24x128xbf16>,
    %c0_7 = arith.constant 0 : index
    %c17 = arith.constant 17 : index
    %c0_8 = arith.constant 0 : index
    %c0_9 = arith.constant 0 : index
    %3 = vector.load %arg15[%c0_7, %c17, %c0_8, %c0_9] : memref<1x18x24x128xbf16, #tpu.memory_space<vmem>>, vector<1x1x24x128xbf16>
    tpu.vector_store %arg15[%c0_7, %c17, %c0_8, %c0_9], %1 {strides = array<i32>} : memref<1x18x24x128xbf16, #tpu.memory_space<vmem>>, vector<1x1x24x128xbf16>,
    %cst_10 = arith.constant 0.000000e+00 : bf16
    %4 = vector.broadcast %cst_10 : bf16 to vector<1x16x1x128xbf16>
    %c0_11 = arith.constant 0 : index
    %c1 = arith.constant 1 : index
    %c0_12 = arith.constant 0 : index
    %c0_13 = arith.constant 0 : index
    %5 = vector.load %arg15[%c0_11, %c1, %c0_12, %c0_13] : memref<1x18x24x128xbf16, #tpu.memory_space<vmem>>, vector<1x16x1x128xbf16>
    tpu.vector_store %arg15[%c0_11, %c1, %c0_12, %c0_13], %4 {strides = array<i32>} : memref<1x18x24x128xbf16, #tpu.memory_space<vmem>>, vector<1x16x1x128xbf16>,
    %c0_14 = arith.constant 0 : index
    %c1_15 = arith.constant 1 : index
    %c17_16 = arith.constant 17 : index
    %c0_17 = arith.constant 0 : index
    %6 = vector.load %arg15[%c0_14, %c1_15, %c17_16, %c0_17] : memref<1x18x24x128xbf16, #tpu.memory_space<vmem>>, vector<1x16x1x128xbf16>
    tpu.vector_store %arg15[%c0_14, %c1_15, %c17_16, %c0_17], %4 {strides = array<i32>} : memref<1x18x24x128xbf16, #tpu.memory_space<vmem>>, vector<1x16x1x128xbf16>,
    %c0_18 = arith.constant 0 : index
    %c1_19 = arith.constant 1 : index
    %c1_20 = arith.constant 1 : index
    %c0_21 = arith.constant 0 : index
    %7 = vector.load %arg15[%c0_18, %c1_19, %c1_20, %c0_21] : memref<1x18x24x128xbf16, #tpu.memory_space<vmem>>, vector<1x16x16x128xbf16>
    tpu.vector_store %arg15[%c0_18, %c1_19, %c1_20, %c0_21], %0 {strides = array<i32>} : memref<1x18x24x128xbf16, #tpu.memory_space<vmem>>, vector<1x16x16x128xbf16>,
    %c0_22 = arith.constant 0 : index
    %c0_23 = arith.constant 0 : index
    %c0_24 = arith.constant 0 : index
    %c0_25 = arith.constant 0 : index
    %8 = vector.load %arg15[%c0_22, %c0_23, %c0_24, %c0_25] : memref<1x18x24x128xbf16, #tpu.memory_space<vmem>>, vector<1x16x16x128xbf16>
    %c0_26 = arith.constant 0 : index
    %c0_27 = arith.constant 0 : index
    %c1_28 = arith.constant 1 : index
    %c0_29 = arith.constant 0 : index
    %9 = vector.load %arg15[%c0_26, %c0_27, %c1_28, %c0_29] : memref<1x18x24x128xbf16, #tpu.memory_space<vmem>>, vector<1x16x16x128xbf16>
    %c0_30 = arith.constant 0 : index
    %c0_31 = arith.constant 0 : index
    %c2 = arith.constant 2 : index
    %c0_32 = arith.constant 0 : index
    %10 = vector.load %arg15[%c0_30, %c0_31, %c2, %c0_32] : memref<1x18x24x128xbf16, #tpu.memory_space<vmem>>, vector<1x16x16x128xbf16>
    %c0_33 = arith.constant 0 : index
    %c1_34 = arith.constant 1 : index
    %c0_35 = arith.constant 0 : index
    %c0_36 = arith.constant 0 : index
    %11 = vector.load %arg15[%c0_33, %c1_34, %c0_35, %c0_36] : memref<1x18x24x128xbf16, #tpu.memory_space<vmem>>, vector<1x16x16x128xbf16>
    %c0_37 = arith.constant 0 : index
    %c1_38 = arith.constant 1 : index
    %c1_39 = arith.constant 1 : index
    %c0_40 = arith.constant 0 : index
    %12 = vector.load %arg15[%c0_37, %c1_38, %c1_39, %c0_40] : memref<1x18x24x128xbf16, #tpu.memory_space<vmem>>, vector<1x16x16x128xbf16>
    %c0_41 = arith.constant 0 : index
    %c1_42 = arith.constant 1 : index
    %c2_43 = arith.constant 2 : index
    %c0_44 = arith.constant 0 : index
    %13 = vector.load %arg15[%c0_41, %c1_42, %c2_43, %c0_44] : memref<1x18x24x128xbf16, #tpu.memory_space<vmem>>, vector<1x16x16x128xbf16>
    %c0_45 = arith.constant 0 : index
    %c2_46 = arith.constant 2 : index
    %c0_47 = arith.constant 0 : index
    %c0_48 = arith.constant 0 : index
    %14 = vector.load %arg15[%c0_45, %c2_46, %c0_47, %c0_48] : memref<1x18x24x128xbf16, #tpu.memory_space<vmem>>, vector<1x16x16x128xbf16>
    %c0_49 = arith.constant 0 : index
    %c2_50 = arith.constant 2 : index
    %c1_51 = arith.constant 1 : index
    %c0_52 = arith.constant 0 : index
    %15 = vector.load %arg15[%c0_49, %c2_50, %c1_51, %c0_52] : memref<1x18x24x128xbf16, #tpu.memory_space<vmem>>, vector<1x16x16x128xbf16>
    %c0_53 = arith.constant 0 : index
    %c2_54 = arith.constant 2 : index
    %c2_55 = arith.constant 2 : index
    %c0_56 = arith.constant 0 : index
    %16 = vector.load %arg15[%c0_53, %c2_54, %c2_55, %c0_56] : memref<1x18x24x128xbf16, #tpu.memory_space<vmem>>, vector<1x16x16x128xbf16>
    %17 = tpu.concatenate %8, %9, %10, %11, %12, %13, %14, %15, %16 in 3 : vector<1x16x16x128xbf16>, vector<1x16x16x128xbf16>, vector<1x16x16x128xbf16>, vector<1x16x16x128xbf16>, vector<1x16x16x128xbf16>, vector<1x16x16x128xbf16>, vector<1x16x16x128xbf16>, vector<1x16x16x128xbf16>, vector<1x16x16x128xbf16> -> vector<1x16x16x1152xbf16>
    %18 = vector.shape_cast %17 : vector<1x16x16x1152xbf16> to vector<256x1152xbf16>
    %c0_57 = arith.constant 0 : index
    %c0_58 = arith.constant 0 : index
    %19 = vector.load %arg2[%c0_57, %c0_58] : memref<1152x128xbf16, #tpu.memory_space<vmem>>, vector<1152x128xbf16>
    %cst_59 = arith.constant dense<0.000000e+00> : vector<256x128xf32>
    %20 = tpu.matmul %18, %19, %cst_59 {dimension_numbers = #tpu.dot_dimension_numbers<[1], [0], [0], [1], [0, 0, 1, 1], [], []>} : vector<256x1152xbf16>, vector<1152x128xbf16>, vector<256x128xf32> -> vector<256x128xf32>
    %c0_60 = arith.constant 0 : index
    %c0_61 = arith.constant 0 : index
    %21 = vector.load %arg3[%c0_60, %c0_61] : memref<1x128xf32, #tpu.memory_space<vmem>>, vector<1x128xf32>
    %22 = vector.broadcast %21 : vector<1x128xf32> to vector<256x128xf32>
    %23 = arith.addf %20, %22 : vector<256x128xf32>
    %cst_62 = arith.constant 0.000000e+00 : f32
    %24 = vector.broadcast %cst_62 : f32 to vector<256x128xf32>
    %25 = arith.maximumf %23, %24 : vector<256x128xf32>
    %26 = vector.shape_cast %25 : vector<256x128xf32> to vector<1x16x16x128xf32>
    %27 = vector.shape_cast %26 : vector<1x16x16x128xf32> to vector<1x8x2x16x128xf32>
    %28 = vector.extract_strided_slice %27 {offsets = [0, 0, 0, 0, 0], sizes = [1, 8, 1, 16, 128], strides = [1, 1, 1, 1, 1]} : vector<1x8x2x16x128xf32> to vector<1x8x1x16x128xf32>
    %29 = vector.shape_cast %28 : vector<1x8x1x16x128xf32> to vector<1x8x16x128xf32>
    %30 = vector.extract_strided_slice %27 {offsets = [0, 0, 1, 0, 0], sizes = [1, 8, 1, 16, 128], strides = [1, 1, 1, 1, 1]} : vector<1x8x2x16x128xf32> to vector<1x8x1x16x128xf32>
    %31 = vector.shape_cast %30 : vector<1x8x1x16x128xf32> to vector<1x8x16x128xf32>
    %32 = arith.maximumf %29, %31 : vector<1x8x16x128xf32>
    %33 = vector.shape_cast %32 : vector<1x8x16x128xf32> to vector<1x8x8x2x128xf32>
    %34 = vector.extract_strided_slice %33 {offsets = [0, 0, 0, 0, 0], sizes = [1, 8, 8, 1, 128], strides = [1, 1, 1, 1, 1]} : vector<1x8x8x2x128xf32> to vector<1x8x8x1x128xf32>
    %35 = vector.shape_cast %34 : vector<1x8x8x1x128xf32> to vector<1x8x8x128xf32>
    %36 = vector.extract_strided_slice %33 {offsets = [0, 0, 0, 1, 0], sizes = [1, 8, 8, 1, 128], strides = [1, 1, 1, 1, 1]} : vector<1x8x8x2x128xf32> to vector<1x8x8x1x128xf32>
    %37 = vector.shape_cast %36 : vector<1x8x8x1x128xf32> to vector<1x8x8x128xf32>
    %38 = arith.maximumf %35, %37 : vector<1x8x8x128xf32>
    %cst_63 = arith.constant 0.000000e+00 : bf16
    %39 = vector.broadcast %cst_63 : bf16 to vector<1x1x16x128xbf16>
    %c0_64 = arith.constant 0 : index
    %c0_65 = arith.constant 0 : index
    %c0_66 = arith.constant 0 : index
    %c0_67 = arith.constant 0 : index
    %40 = vector.load %arg16[%c0_64, %c0_65, %c0_66, %c0_67] : memref<1x10x16x128xbf16, #tpu.memory_space<vmem>>, vector<1x1x16x128xbf16>
    tpu.vector_store %arg16[%c0_64, %c0_65, %c0_66, %c0_67], %39 {strides = array<i32>} : memref<1x10x16x128xbf16, #tpu.memory_space<vmem>>, vector<1x1x16x128xbf16>,
    %c0_68 = arith.constant 0 : index
    %c9 = arith.constant 9 : index
    %c0_69 = arith.constant 0 : index
    %c0_70 = arith.constant 0 : index
    %41 = vector.load %arg16[%c0_68, %c9, %c0_69, %c0_70] : memref<1x10x16x128xbf16, #tpu.memory_space<vmem>>, vector<1x1x16x128xbf16>
    tpu.vector_store %arg16[%c0_68, %c9, %c0_69, %c0_70], %39 {strides = array<i32>} : memref<1x10x16x128xbf16, #tpu.memory_space<vmem>>, vector<1x1x16x128xbf16>,
    %cst_71 = arith.constant 0.000000e+00 : bf16
    %42 = vector.broadcast %cst_71 : bf16 to vector<1x8x1x128xbf16>
    %c0_72 = arith.constant 0 : index
    %c1_73 = arith.constant 1 : index
    %c0_74 = arith.constant 0 : index
    %c0_75 = arith.constant 0 : index
    %43 = vector.load %arg16[%c0_72, %c1_73, %c0_74, %c0_75] : memref<1x10x16x128xbf16, #tpu.memory_space<vmem>>, vector<1x8x1x128xbf16>
    tpu.vector_store %arg16[%c0_72, %c1_73, %c0_74, %c0_75], %42 {strides = array<i32>} : memref<1x10x16x128xbf16, #tpu.memory_space<vmem>>, vector<1x8x1x128xbf16>,
    %c0_76 = arith.constant 0 : index
    %c1_77 = arith.constant 1 : index
    %c9_78 = arith.constant 9 : index
    %c0_79 = arith.constant 0 : index
    %44 = vector.load %arg16[%c0_76, %c1_77, %c9_78, %c0_79] : memref<1x10x16x128xbf16, #tpu.memory_space<vmem>>, vector<1x8x1x128xbf16>
    tpu.vector_store %arg16[%c0_76, %c1_77, %c9_78, %c0_79], %42 {strides = array<i32>} : memref<1x10x16x128xbf16, #tpu.memory_space<vmem>>, vector<1x8x1x128xbf16>,
    %45 = arith.truncf %38 : vector<1x8x8x128xf32> to vector<1x8x8x128xbf16>
    %c0_80 = arith.constant 0 : index
    %c1_81 = arith.constant 1 : index
    %c1_82 = arith.constant 1 : index
    %c0_83 = arith.constant 0 : index
    %46 = vector.load %arg16[%c0_80, %c1_81, %c1_82, %c0_83] : memref<1x10x16x128xbf16, #tpu.memory_space<vmem>>, vector<1x8x8x128xbf16>
    tpu.vector_store %arg16[%c0_80, %c1_81, %c1_82, %c0_83], %45 {strides = array<i32>} : memref<1x10x16x128xbf16, #tpu.memory_space<vmem>>, vector<1x8x8x128xbf16>,
    %c0_84 = arith.constant 0 : index
    %c0_85 = arith.constant 0 : index
    %c0_86 = arith.constant 0 : index
    %c0_87 = arith.constant 0 : index
    %47 = vector.load %arg16[%c0_84, %c0_85, %c0_86, %c0_87] : memref<1x10x16x128xbf16, #tpu.memory_space<vmem>>, vector<1x8x8x128xbf16>
    %c0_88 = arith.constant 0 : index
    %c0_89 = arith.constant 0 : index
    %c1_90 = arith.constant 1 : index
    %c0_91 = arith.constant 0 : index
    %48 = vector.load %arg16[%c0_88, %c0_89, %c1_90, %c0_91] : memref<1x10x16x128xbf16, #tpu.memory_space<vmem>>, vector<1x8x8x128xbf16>
    %c0_92 = arith.constant 0 : index
    %c0_93 = arith.constant 0 : index
    %c2_94 = arith.constant 2 : index
    %c0_95 = arith.constant 0 : index
    %49 = vector.load %arg16[%c0_92, %c0_93, %c2_94, %c0_95] : memref<1x10x16x128xbf16, #tpu.memory_space<vmem>>, vector<1x8x8x128xbf16>
    %c0_96 = arith.constant 0 : index
    %c1_97 = arith.constant 1 : index
    %c0_98 = arith.constant 0 : index
    %c0_99 = arith.constant 0 : index
    %50 = vector.load %arg16[%c0_96, %c1_97, %c0_98, %c0_99] : memref<1x10x16x128xbf16, #tpu.memory_space<vmem>>, vector<1x8x8x128xbf16>
    %c0_100 = arith.constant 0 : index
    %c1_101 = arith.constant 1 : index
    %c1_102 = arith.constant 1 : index
    %c0_103 = arith.constant 0 : index
    %51 = vector.load %arg16[%c0_100, %c1_101, %c1_102, %c0_103] : memref<1x10x16x128xbf16, #tpu.memory_space<vmem>>, vector<1x8x8x128xbf16>
    %c0_104 = arith.constant 0 : index
    %c1_105 = arith.constant 1 : index
    %c2_106 = arith.constant 2 : index
    %c0_107 = arith.constant 0 : index
    %52 = vector.load %arg16[%c0_104, %c1_105, %c2_106, %c0_107] : memref<1x10x16x128xbf16, #tpu.memory_space<vmem>>, vector<1x8x8x128xbf16>
    %c0_108 = arith.constant 0 : index
    %c2_109 = arith.constant 2 : index
    %c0_110 = arith.constant 0 : index
    %c0_111 = arith.constant 0 : index
    %53 = vector.load %arg16[%c0_108, %c2_109, %c0_110, %c0_111] : memref<1x10x16x128xbf16, #tpu.memory_space<vmem>>, vector<1x8x8x128xbf16>
    %c0_112 = arith.constant 0 : index
    %c2_113 = arith.constant 2 : index
    %c1_114 = arith.constant 1 : index
    %c0_115 = arith.constant 0 : index
    %54 = vector.load %arg16[%c0_112, %c2_113, %c1_114, %c0_115] : memref<1x10x16x128xbf16, #tpu.memory_space<vmem>>, vector<1x8x8x128xbf16>
    %c0_116 = arith.constant 0 : index
    %c2_117 = arith.constant 2 : index
    %c2_118 = arith.constant 2 : index
    %c0_119 = arith.constant 0 : index
    %55 = vector.load %arg16[%c0_116, %c2_117, %c2_118, %c0_119] : memref<1x10x16x128xbf16, #tpu.memory_space<vmem>>, vector<1x8x8x128xbf16>
    %56 = tpu.concatenate %47, %48, %49, %50, %51, %52, %53, %54, %55 in 3 : vector<1x8x8x128xbf16>, vector<1x8x8x128xbf16>, vector<1x8x8x128xbf16>, vector<1x8x8x128xbf16>, vector<1x8x8x128xbf16>, vector<1x8x8x128xbf16>, vector<1x8x8x128xbf16>, vector<1x8x8x128xbf16>, vector<1x8x8x128xbf16> -> vector<1x8x8x1152xbf16>
    %57 = vector.shape_cast %56 : vector<1x8x8x1152xbf16> to vector<64x1152xbf16>
    %c0_120 = arith.constant 0 : index
    %c0_121 = arith.constant 0 : index
    %58 = vector.load %arg4[%c0_120, %c0_121] : memref<1152x128xbf16, #tpu.memory_space<vmem>>, vector<1152x128xbf16>
    %cst_122 = arith.constant dense<0.000000e+00> : vector<64x128xf32>
    %59 = tpu.matmul %57, %58, %cst_122 {dimension_numbers = #tpu.dot_dimension_numbers<[1], [0], [0], [1], [0, 0, 1, 1], [], []>} : vector<64x1152xbf16>, vector<1152x128xbf16>, vector<64x128xf32> -> vector<64x128xf32>
    %c0_123 = arith.constant 0 : index
    %c0_124 = arith.constant 0 : index
    %60 = vector.load %arg5[%c0_123, %c0_124] : memref<1x128xf32, #tpu.memory_space<vmem>>, vector<1x128xf32>
    %61 = vector.broadcast %60 : vector<1x128xf32> to vector<64x128xf32>
    %62 = arith.addf %59, %61 : vector<64x128xf32>
    %cst_125 = arith.constant 0.000000e+00 : f32
    %63 = vector.broadcast %cst_125 : f32 to vector<64x128xf32>
    %64 = arith.maximumf %62, %63 : vector<64x128xf32>
    %65 = vector.shape_cast %64 : vector<64x128xf32> to vector<1x8x8x128xf32>
    %66 = vector.shape_cast %65 : vector<1x8x8x128xf32> to vector<1x4x2x8x128xf32>
    %67 = vector.extract_strided_slice %66 {offsets = [0, 0, 0, 0, 0], sizes = [1, 4, 1, 8, 128], strides = [1, 1, 1, 1, 1]} : vector<1x4x2x8x128xf32> to vector<1x4x1x8x128xf32>
    %68 = vector.shape_cast %67 : vector<1x4x1x8x128xf32> to vector<1x4x8x128xf32>
    %69 = vector.extract_strided_slice %66 {offsets = [0, 0, 1, 0, 0], sizes = [1, 4, 1, 8, 128], strides = [1, 1, 1, 1, 1]} : vector<1x4x2x8x128xf32> to vector<1x4x1x8x128xf32>
    %70 = vector.shape_cast %69 : vector<1x4x1x8x128xf32> to vector<1x4x8x128xf32>
    %71 = arith.maximumf %68, %70 : vector<1x4x8x128xf32>
    %72 = vector.shape_cast %71 : vector<1x4x8x128xf32> to vector<1x4x4x2x128xf32>
    %73 = vector.extract_strided_slice %72 {offsets = [0, 0, 0, 0, 0], sizes = [1, 4, 4, 1, 128], strides = [1, 1, 1, 1, 1]} : vector<1x4x4x2x128xf32> to vector<1x4x4x1x128xf32>
    %74 = vector.shape_cast %73 : vector<1x4x4x1x128xf32> to vector<1x4x4x128xf32>
    %75 = vector.extract_strided_slice %72 {offsets = [0, 0, 0, 1, 0], sizes = [1, 4, 4, 1, 128], strides = [1, 1, 1, 1, 1]} : vector<1x4x4x2x128xf32> to vector<1x4x4x1x128xf32>
    %76 = vector.shape_cast %75 : vector<1x4x4x1x128xf32> to vector<1x4x4x128xf32>
    %77 = arith.maximumf %74, %76 : vector<1x4x4x128xf32>
    %cst_126 = arith.constant 0.000000e+00 : bf16
    %78 = vector.broadcast %cst_126 : bf16 to vector<1x1x8x128xbf16>
    %c0_127 = arith.constant 0 : index
    %c0_128 = arith.constant 0 : index
    %c0_129 = arith.constant 0 : index
    %c0_130 = arith.constant 0 : index
    %79 = vector.load %arg17[%c0_127, %c0_128, %c0_129, %c0_130] : memref<1x6x8x128xbf16, #tpu.memory_space<vmem>>, vector<1x1x8x128xbf16>
    tpu.vector_store %arg17[%c0_127, %c0_128, %c0_129, %c0_130], %78 {strides = array<i32>} : memref<1x6x8x128xbf16, #tpu.memory_space<vmem>>, vector<1x1x8x128xbf16>,
    %c0_131 = arith.constant 0 : index
    %c5 = arith.constant 5 : index
    %c0_132 = arith.constant 0 : index
    %c0_133 = arith.constant 0 : index
    %80 = vector.load %arg17[%c0_131, %c5, %c0_132, %c0_133] : memref<1x6x8x128xbf16, #tpu.memory_space<vmem>>, vector<1x1x8x128xbf16>
    tpu.vector_store %arg17[%c0_131, %c5, %c0_132, %c0_133], %78 {strides = array<i32>} : memref<1x6x8x128xbf16, #tpu.memory_space<vmem>>, vector<1x1x8x128xbf16>,
    %cst_134 = arith.constant 0.000000e+00 : bf16
    %81 = vector.broadcast %cst_134 : bf16 to vector<1x4x1x128xbf16>
    %c0_135 = arith.constant 0 : index
    %c1_136 = arith.constant 1 : index
    %c0_137 = arith.constant 0 : index
    %c0_138 = arith.constant 0 : index
    %82 = vector.load %arg17[%c0_135, %c1_136, %c0_137, %c0_138] : memref<1x6x8x128xbf16, #tpu.memory_space<vmem>>, vector<1x4x1x128xbf16>
    tpu.vector_store %arg17[%c0_135, %c1_136, %c0_137, %c0_138], %81 {strides = array<i32>} : memref<1x6x8x128xbf16, #tpu.memory_space<vmem>>, vector<1x4x1x128xbf16>,
    %c0_139 = arith.constant 0 : index
    %c1_140 = arith.constant 1 : index
    %c5_141 = arith.constant 5 : index
    %c0_142 = arith.constant 0 : index
    %83 = vector.load %arg17[%c0_139, %c1_140, %c5_141, %c0_142] : memref<1x6x8x128xbf16, #tpu.memory_space<vmem>>, vector<1x4x1x128xbf16>
    tpu.vector_store %arg17[%c0_139, %c1_140, %c5_141, %c0_142], %81 {strides = array<i32>} : memref<1x6x8x128xbf16, #tpu.memory_space<vmem>>, vector<1x4x1x128xbf16>,
    %84 = arith.truncf %77 : vector<1x4x4x128xf32> to vector<1x4x4x128xbf16>
    %c0_143 = arith.constant 0 : index
    %c1_144 = arith.constant 1 : index
    %c1_145 = arith.constant 1 : index
    %c0_146 = arith.constant 0 : index
    %85 = vector.load %arg17[%c0_143, %c1_144, %c1_145, %c0_146] : memref<1x6x8x128xbf16, #tpu.memory_space<vmem>>, vector<1x4x4x128xbf16>
    tpu.vector_store %arg17[%c0_143, %c1_144, %c1_145, %c0_146], %84 {strides = array<i32>} : memref<1x6x8x128xbf16, #tpu.memory_space<vmem>>, vector<1x4x4x128xbf16>,
    %c0_147 = arith.constant 0 : index
    %c0_148 = arith.constant 0 : index
    %c0_149 = arith.constant 0 : index
    %c0_150 = arith.constant 0 : index
    %86 = vector.load %arg17[%c0_147, %c0_148, %c0_149, %c0_150] : memref<1x6x8x128xbf16, #tpu.memory_space<vmem>>, vector<1x4x4x128xbf16>
    %c0_151 = arith.constant 0 : index
    %c0_152 = arith.constant 0 : index
    %c1_153 = arith.constant 1 : index
    %c0_154 = arith.constant 0 : index
    %87 = vector.load %arg17[%c0_151, %c0_152, %c1_153, %c0_154] : memref<1x6x8x128xbf16, #tpu.memory_space<vmem>>, vector<1x4x4x128xbf16>
    %c0_155 = arith.constant 0 : index
    %c0_156 = arith.constant 0 : index
    %c2_157 = arith.constant 2 : index
    %c0_158 = arith.constant 0 : index
    %88 = vector.load %arg17[%c0_155, %c0_156, %c2_157, %c0_158] : memref<1x6x8x128xbf16, #tpu.memory_space<vmem>>, vector<1x4x4x128xbf16>
    %c0_159 = arith.constant 0 : index
    %c1_160 = arith.constant 1 : index
    %c0_161 = arith.constant 0 : index
    %c0_162 = arith.constant 0 : index
    %89 = vector.load %arg17[%c0_159, %c1_160, %c0_161, %c0_162] : memref<1x6x8x128xbf16, #tpu.memory_space<vmem>>, vector<1x4x4x128xbf16>
    %c0_163 = arith.constant 0 : index
    %c1_164 = arith.constant 1 : index
    %c1_165 = arith.constant 1 : index
    %c0_166 = arith.constant 0 : index
    %90 = vector.load %arg17[%c0_163, %c1_164, %c1_165, %c0_166] : memref<1x6x8x128xbf16, #tpu.memory_space<vmem>>, vector<1x4x4x128xbf16>
    %c0_167 = arith.constant 0 : index
    %c1_168 = arith.constant 1 : index
    %c2_169 = arith.constant 2 : index
    %c0_170 = arith.constant 0 : index
    %91 = vector.load %arg17[%c0_167, %c1_168, %c2_169, %c0_170] : memref<1x6x8x128xbf16, #tpu.memory_space<vmem>>, vector<1x4x4x128xbf16>
    %c0_171 = arith.constant 0 : index
    %c2_172 = arith.constant 2 : index
    %c0_173 = arith.constant 0 : index
    %c0_174 = arith.constant 0 : index
    %92 = vector.load %arg17[%c0_171, %c2_172, %c0_173, %c0_174] : memref<1x6x8x128xbf16, #tpu.memory_space<vmem>>, vector<1x4x4x128xbf16>
    %c0_175 = arith.constant 0 : index
    %c2_176 = arith.constant 2 : index
    %c1_177 = arith.constant 1 : index
    %c0_178 = arith.constant 0 : index
    %93 = vector.load %arg17[%c0_175, %c2_176, %c1_177, %c0_178] : memref<1x6x8x128xbf16, #tpu.memory_space<vmem>>, vector<1x4x4x128xbf16>
    %c0_179 = arith.constant 0 : index
    %c2_180 = arith.constant 2 : index
    %c2_181 = arith.constant 2 : index
    %c0_182 = arith.constant 0 : index
    %94 = vector.load %arg17[%c0_179, %c2_180, %c2_181, %c0_182] : memref<1x6x8x128xbf16, #tpu.memory_space<vmem>>, vector<1x4x4x128xbf16>
    %95 = tpu.concatenate %86, %87, %88, %89, %90, %91, %92, %93, %94 in 3 : vector<1x4x4x128xbf16>, vector<1x4x4x128xbf16>, vector<1x4x4x128xbf16>, vector<1x4x4x128xbf16>, vector<1x4x4x128xbf16>, vector<1x4x4x128xbf16>, vector<1x4x4x128xbf16>, vector<1x4x4x128xbf16>, vector<1x4x4x128xbf16> -> vector<1x4x4x1152xbf16>
    %96 = vector.shape_cast %95 : vector<1x4x4x1152xbf16> to vector<16x1152xbf16>
    %c0_183 = arith.constant 0 : index
    %c0_184 = arith.constant 0 : index
    %97 = vector.load %arg6[%c0_183, %c0_184] : memref<1152x128xbf16, #tpu.memory_space<vmem>>, vector<1152x128xbf16>
    %cst_185 = arith.constant dense<0.000000e+00> : vector<16x128xf32>
    %98 = tpu.matmul %96, %97, %cst_185 {dimension_numbers = #tpu.dot_dimension_numbers<[1], [0], [0], [1], [0, 0, 1, 1], [], []>} : vector<16x1152xbf16>, vector<1152x128xbf16>, vector<16x128xf32> -> vector<16x128xf32>
    %c0_186 = arith.constant 0 : index
    %c0_187 = arith.constant 0 : index
    %99 = vector.load %arg7[%c0_186, %c0_187] : memref<1x128xf32, #tpu.memory_space<vmem>>, vector<1x128xf32>
    %100 = vector.broadcast %99 : vector<1x128xf32> to vector<16x128xf32>
    %101 = arith.addf %98, %100 : vector<16x128xf32>
    %cst_188 = arith.constant 0.000000e+00 : f32
    %102 = vector.broadcast %cst_188 : f32 to vector<16x128xf32>
    %103 = arith.maximumf %101, %102 : vector<16x128xf32>
    %104 = vector.shape_cast %103 : vector<16x128xf32> to vector<1x4x4x128xf32>
    %105 = vector.shape_cast %104 : vector<1x4x4x128xf32> to vector<1x2x2x4x128xf32>
    %106 = vector.extract_strided_slice %105 {offsets = [0, 0, 0, 0, 0], sizes = [1, 2, 1, 4, 128], strides = [1, 1, 1, 1, 1]} : vector<1x2x2x4x128xf32> to vector<1x2x1x4x128xf32>
    %107 = vector.shape_cast %106 : vector<1x2x1x4x128xf32> to vector<1x2x4x128xf32>
    %108 = vector.extract_strided_slice %105 {offsets = [0, 0, 1, 0, 0], sizes = [1, 2, 1, 4, 128], strides = [1, 1, 1, 1, 1]} : vector<1x2x2x4x128xf32> to vector<1x2x1x4x128xf32>
    %109 = vector.shape_cast %108 : vector<1x2x1x4x128xf32> to vector<1x2x4x128xf32>
    %110 = arith.maximumf %107, %109 : vector<1x2x4x128xf32>
    %111 = vector.shape_cast %110 : vector<1x2x4x128xf32> to vector<1x2x2x2x128xf32>
    %112 = vector.extract_strided_slice %111 {offsets = [0, 0, 0, 0, 0], sizes = [1, 2, 2, 1, 128], strides = [1, 1, 1, 1, 1]} : vector<1x2x2x2x128xf32> to vector<1x2x2x1x128xf32>
    %113 = vector.shape_cast %112 : vector<1x2x2x1x128xf32> to vector<1x2x2x128xf32>
    %114 = vector.extract_strided_slice %111 {offsets = [0, 0, 0, 1, 0], sizes = [1, 2, 2, 1, 128], strides = [1, 1, 1, 1, 1]} : vector<1x2x2x2x128xf32> to vector<1x2x2x1x128xf32>
    %115 = vector.shape_cast %114 : vector<1x2x2x1x128xf32> to vector<1x2x2x128xf32>
    %116 = arith.maximumf %113, %115 : vector<1x2x2x128xf32>
    %cst_189 = arith.constant 0.000000e+00 : bf16
    %117 = vector.broadcast %cst_189 : bf16 to vector<1x1x8x128xbf16>
    %c0_190 = arith.constant 0 : index
    %c0_191 = arith.constant 0 : index
    %c0_192 = arith.constant 0 : index
    %c0_193 = arith.constant 0 : index
    %118 = vector.load %arg18[%c0_190, %c0_191, %c0_192, %c0_193] : memref<1x4x8x128xbf16, #tpu.memory_space<vmem>>, vector<1x1x8x128xbf16>
    tpu.vector_store %arg18[%c0_190, %c0_191, %c0_192, %c0_193], %117 {strides = array<i32>} : memref<1x4x8x128xbf16, #tpu.memory_space<vmem>>, vector<1x1x8x128xbf16>,
    %c0_194 = arith.constant 0 : index
    %c3 = arith.constant 3 : index
    %c0_195 = arith.constant 0 : index
    %c0_196 = arith.constant 0 : index
    %119 = vector.load %arg18[%c0_194, %c3, %c0_195, %c0_196] : memref<1x4x8x128xbf16, #tpu.memory_space<vmem>>, vector<1x1x8x128xbf16>
    tpu.vector_store %arg18[%c0_194, %c3, %c0_195, %c0_196], %117 {strides = array<i32>} : memref<1x4x8x128xbf16, #tpu.memory_space<vmem>>, vector<1x1x8x128xbf16>,
    %cst_197 = arith.constant 0.000000e+00 : bf16
    %120 = vector.broadcast %cst_197 : bf16 to vector<1x2x1x128xbf16>
    %c0_198 = arith.constant 0 : index
    %c1_199 = arith.constant 1 : index
    %c0_200 = arith.constant 0 : index
    %c0_201 = arith.constant 0 : index
    %121 = vector.load %arg18[%c0_198, %c1_199, %c0_200, %c0_201] : memref<1x4x8x128xbf16, #tpu.memory_space<vmem>>, vector<1x2x1x128xbf16>
    tpu.vector_store %arg18[%c0_198, %c1_199, %c0_200, %c0_201], %120 {strides = array<i32>} : memref<1x4x8x128xbf16, #tpu.memory_space<vmem>>, vector<1x2x1x128xbf16>,
    %c0_202 = arith.constant 0 : index
    %c1_203 = arith.constant 1 : index
    %c3_204 = arith.constant 3 : index
    %c0_205 = arith.constant 0 : index
    %122 = vector.load %arg18[%c0_202, %c1_203, %c3_204, %c0_205] : memref<1x4x8x128xbf16, #tpu.memory_space<vmem>>, vector<1x2x1x128xbf16>
    tpu.vector_store %arg18[%c0_202, %c1_203, %c3_204, %c0_205], %120 {strides = array<i32>} : memref<1x4x8x128xbf16, #tpu.memory_space<vmem>>, vector<1x2x1x128xbf16>,
    %123 = arith.truncf %116 : vector<1x2x2x128xf32> to vector<1x2x2x128xbf16>
    %c0_206 = arith.constant 0 : index
    %c1_207 = arith.constant 1 : index
    %c1_208 = arith.constant 1 : index
    %c0_209 = arith.constant 0 : index
    %124 = vector.load %arg18[%c0_206, %c1_207, %c1_208, %c0_209] : memref<1x4x8x128xbf16, #tpu.memory_space<vmem>>, vector<1x2x2x128xbf16>
    tpu.vector_store %arg18[%c0_206, %c1_207, %c1_208, %c0_209], %123 {strides = array<i32>} : memref<1x4x8x128xbf16, #tpu.memory_space<vmem>>, vector<1x2x2x128xbf16>,
    %c0_210 = arith.constant 0 : index
    %c0_211 = arith.constant 0 : index
    %c0_212 = arith.constant 0 : index
    %c0_213 = arith.constant 0 : index
    %125 = vector.load %arg18[%c0_210, %c0_211, %c0_212, %c0_213] : memref<1x4x8x128xbf16, #tpu.memory_space<vmem>>, vector<1x2x2x128xbf16>
    %c0_214 = arith.constant 0 : index
    %c0_215 = arith.constant 0 : index
    %c1_216 = arith.constant 1 : index
    %c0_217 = arith.constant 0 : index
    %126 = vector.load %arg18[%c0_214, %c0_215, %c1_216, %c0_217] : memref<1x4x8x128xbf16, #tpu.memory_space<vmem>>, vector<1x2x2x128xbf16>
    %c0_218 = arith.constant 0 : index
    %c0_219 = arith.constant 0 : index
    %c2_220 = arith.constant 2 : index
    %c0_221 = arith.constant 0 : index
    %127 = vector.load %arg18[%c0_218, %c0_219, %c2_220, %c0_221] : memref<1x4x8x128xbf16, #tpu.memory_space<vmem>>, vector<1x2x2x128xbf16>
    %c0_222 = arith.constant 0 : index
    %c1_223 = arith.constant 1 : index
    %c0_224 = arith.constant 0 : index
    %c0_225 = arith.constant 0 : index
    %128 = vector.load %arg18[%c0_222, %c1_223, %c0_224, %c0_225] : memref<1x4x8x128xbf16, #tpu.memory_space<vmem>>, vector<1x2x2x128xbf16>
    %c0_226 = arith.constant 0 : index
    %c1_227 = arith.constant 1 : index
    %c1_228 = arith.constant 1 : index
    %c0_229 = arith.constant 0 : index
    %129 = vector.load %arg18[%c0_226, %c1_227, %c1_228, %c0_229] : memref<1x4x8x128xbf16, #tpu.memory_space<vmem>>, vector<1x2x2x128xbf16>
    %c0_230 = arith.constant 0 : index
    %c1_231 = arith.constant 1 : index
    %c2_232 = arith.constant 2 : index
    %c0_233 = arith.constant 0 : index
    %130 = vector.load %arg18[%c0_230, %c1_231, %c2_232, %c0_233] : memref<1x4x8x128xbf16, #tpu.memory_space<vmem>>, vector<1x2x2x128xbf16>
    %c0_234 = arith.constant 0 : index
    %c2_235 = arith.constant 2 : index
    %c0_236 = arith.constant 0 : index
    %c0_237 = arith.constant 0 : index
    %131 = vector.load %arg18[%c0_234, %c2_235, %c0_236, %c0_237] : memref<1x4x8x128xbf16, #tpu.memory_space<vmem>>, vector<1x2x2x128xbf16>
    %c0_238 = arith.constant 0 : index
    %c2_239 = arith.constant 2 : index
    %c1_240 = arith.constant 1 : index
    %c0_241 = arith.constant 0 : index
    %132 = vector.load %arg18[%c0_238, %c2_239, %c1_240, %c0_241] : memref<1x4x8x128xbf16, #tpu.memory_space<vmem>>, vector<1x2x2x128xbf16>
    %c0_242 = arith.constant 0 : index
    %c2_243 = arith.constant 2 : index
    %c2_244 = arith.constant 2 : index
    %c0_245 = arith.constant 0 : index
    %133 = vector.load %arg18[%c0_242, %c2_243, %c2_244, %c0_245] : memref<1x4x8x128xbf16, #tpu.memory_space<vmem>>, vector<1x2x2x128xbf16>
    %134 = tpu.concatenate %125, %126, %127, %128, %129, %130, %131, %132, %133 in 3 : vector<1x2x2x128xbf16>, vector<1x2x2x128xbf16>, vector<1x2x2x128xbf16>, vector<1x2x2x128xbf16>, vector<1x2x2x128xbf16>, vector<1x2x2x128xbf16>, vector<1x2x2x128xbf16>, vector<1x2x2x128xbf16>, vector<1x2x2x128xbf16> -> vector<1x2x2x1152xbf16>
    %135 = vector.shape_cast %134 : vector<1x2x2x1152xbf16> to vector<4x1152xbf16>
    %c0_246 = arith.constant 0 : index
    %c0_247 = arith.constant 0 : index
    %136 = vector.load %arg8[%c0_246, %c0_247] : memref<1152x128xbf16, #tpu.memory_space<vmem>>, vector<1152x128xbf16>
    %cst_248 = arith.constant dense<0.000000e+00> : vector<4x128xf32>
    %137 = tpu.matmul %135, %136, %cst_248 {dimension_numbers = #tpu.dot_dimension_numbers<[1], [0], [0], [1], [0, 0, 1, 1], [], []>} : vector<4x1152xbf16>, vector<1152x128xbf16>, vector<4x128xf32> -> vector<4x128xf32>
    %c0_249 = arith.constant 0 : index
    %c0_250 = arith.constant 0 : index
    %138 = vector.load %arg9[%c0_249, %c0_250] : memref<1x128xf32, #tpu.memory_space<vmem>>, vector<1x128xf32>
    %139 = vector.broadcast %138 : vector<1x128xf32> to vector<4x128xf32>
    %140 = arith.addf %137, %139 : vector<4x128xf32>
    %cst_251 = arith.constant 0.000000e+00 : f32
    %141 = vector.broadcast %cst_251 : f32 to vector<4x128xf32>
    %142 = arith.maximumf %140, %141 : vector<4x128xf32>
    %143 = vector.shape_cast %142 : vector<4x128xf32> to vector<1x2x2x128xf32>
    %144 = vector.extract_strided_slice %143 {offsets = [0, 0, 0, 0], sizes = [1, 1, 1, 128], strides = [1, 1, 1, 1]} : vector<1x2x2x128xf32> to vector<1x1x1x128xf32>
    %145 = vector.shape_cast %144 : vector<1x1x1x128xf32> to vector<1x128xf32>
    %146 = vector.extract_strided_slice %143 {offsets = [0, 0, 1, 0], sizes = [1, 1, 1, 128], strides = [1, 1, 1, 1]} : vector<1x2x2x128xf32> to vector<1x1x1x128xf32>
    %147 = vector.shape_cast %146 : vector<1x1x1x128xf32> to vector<1x128xf32>
    %148 = arith.addf %145, %147 : vector<1x128xf32>
    %149 = vector.extract_strided_slice %143 {offsets = [0, 1, 0, 0], sizes = [1, 1, 1, 128], strides = [1, 1, 1, 1]} : vector<1x2x2x128xf32> to vector<1x1x1x128xf32>
    %150 = vector.shape_cast %149 : vector<1x1x1x128xf32> to vector<1x128xf32>
    %151 = arith.addf %148, %150 : vector<1x128xf32>
    %152 = vector.extract_strided_slice %143 {offsets = [0, 1, 1, 0], sizes = [1, 1, 1, 128], strides = [1, 1, 1, 1]} : vector<1x2x2x128xf32> to vector<1x1x1x128xf32>
    %153 = vector.shape_cast %152 : vector<1x1x1x128xf32> to vector<1x128xf32>
    %154 = arith.addf %151, %153 : vector<1x128xf32>
    %cst_252 = arith.constant 2.500000e-01 : f32
    %155 = vector.broadcast %cst_252 : f32 to vector<1x128xf32>
    %156 = arith.mulf %154, %155 : vector<1x128xf32>
    %157 = arith.truncf %156 : vector<1x128xf32> to vector<1x128xbf16>
    %c0_253 = arith.constant 0 : index
    %c0_254 = arith.constant 0 : index
    %158 = vector.load %arg10[%c0_253, %c0_254] : memref<128x512xbf16, #tpu.memory_space<vmem>>, vector<128x512xbf16>
    %cst_255 = arith.constant dense<0.000000e+00> : vector<1x512xf32>
    %159 = tpu.matmul %157, %158, %cst_255 {dimension_numbers = #tpu.dot_dimension_numbers<[1], [0], [0], [1], [0, 0, 1, 1], [], []>} : vector<1x128xbf16>, vector<128x512xbf16>, vector<1x512xf32> -> vector<1x512xf32>
    %c0_256 = arith.constant 0 : index
    %c0_257 = arith.constant 0 : index
    %160 = vector.load %arg11[%c0_256, %c0_257] : memref<1x512xf32, #tpu.memory_space<vmem>>, vector<1x512xf32>
    %161 = arith.addf %159, %160 : vector<1x512xf32>
    %cst_258 = arith.constant 0.000000e+00 : f32
    %162 = vector.broadcast %cst_258 : f32 to vector<1x512xf32>
    %163 = arith.maximumf %161, %162 : vector<1x512xf32>
    %164 = arith.truncf %163 : vector<1x512xf32> to vector<1x512xbf16>
    %c0_259 = arith.constant 0 : index
    %c0_260 = arith.constant 0 : index
    %165 = vector.load %arg12[%c0_259, %c0_260] : memref<512x128xbf16, #tpu.memory_space<vmem>>, vector<512x128xbf16>
    %cst_261 = arith.constant dense<0.000000e+00> : vector<1x128xf32>
    %166 = tpu.matmul %164, %165, %cst_261 {dimension_numbers = #tpu.dot_dimension_numbers<[1], [0], [0], [1], [0, 0, 1, 1], [], []>} : vector<1x512xbf16>, vector<512x128xbf16>, vector<1x128xf32> -> vector<1x128xf32>
    %c0_262 = arith.constant 0 : index
    %c0_263 = arith.constant 0 : index
    %167 = vector.load %arg13[%c0_262, %c0_263] : memref<1x128xf32, #tpu.memory_space<vmem>>, vector<1x128xf32>
    %168 = arith.addf %166, %167 : vector<1x128xf32>
    %169 = vector.shape_cast %168 : vector<1x128xf32> to vector<1x1x128xf32>
    %c0_264 = arith.constant 0 : index
    %c0_265 = arith.constant 0 : index
    %c0_266 = arith.constant 0 : index
    %170 = vector.load %arg14[%c0_264, %c0_265, %c0_266] : memref<1x1x128xf32, #tpu.memory_space<vmem>>, vector<1x1x128xf32>
    tpu.vector_store %arg14[%c0_264, %c0_265, %c0_266], %169 {strides = array<i32>} : memref<1x1x128xf32, #tpu.memory_space<vmem>>, vector<1x1x128xf32>,
    return
  }
  func.func @transform_0(%arg0: i32) -> (i32, i32, i32, i32) {
    %c0_i32 = arith.constant 0 : i32
    %c0_i32_0 = arith.constant 0 : i32
    %c0_i32_1 = arith.constant 0 : i32
    %c0_i32_2 = arith.constant 0 : i32
    return %arg0, %c0_i32, %c0_i32_0, %c0_i32_1 : i32, i32, i32, i32
  }
  func.func @transform_1(%arg0: i32) -> (i32, i32) {
    %c0_i32 = arith.constant 0 : i32
    %c0_i32_0 = arith.constant 0 : i32
    %c0_i32_1 = arith.constant 0 : i32
    return %c0_i32, %c0_i32_0 : i32, i32
  }
  func.func @transform_2(%arg0: i32) -> (i32, i32) {
    %c0_i32 = arith.constant 0 : i32
    %c0_i32_0 = arith.constant 0 : i32
    %c0_i32_1 = arith.constant 0 : i32
    return %c0_i32, %c0_i32_0 : i32, i32
  }
  func.func @transform_3(%arg0: i32) -> (i32, i32) {
    %c0_i32 = arith.constant 0 : i32
    %c0_i32_0 = arith.constant 0 : i32
    %c0_i32_1 = arith.constant 0 : i32
    return %c0_i32, %c0_i32_0 : i32, i32
  }
  func.func @transform_4(%arg0: i32) -> (i32, i32) {
    %c0_i32 = arith.constant 0 : i32
    %c0_i32_0 = arith.constant 0 : i32
    %c0_i32_1 = arith.constant 0 : i32
    return %c0_i32, %c0_i32_0 : i32, i32
  }
  func.func @transform_5(%arg0: i32) -> (i32, i32) {
    %c0_i32 = arith.constant 0 : i32
    %c0_i32_0 = arith.constant 0 : i32
    %c0_i32_1 = arith.constant 0 : i32
    return %c0_i32, %c0_i32_0 : i32, i32
  }
  func.func @transform_6(%arg0: i32) -> (i32, i32) {
    %c0_i32 = arith.constant 0 : i32
    %c0_i32_0 = arith.constant 0 : i32
    %c0_i32_1 = arith.constant 0 : i32
    return %c0_i32, %c0_i32_0 : i32, i32
  }
  func.func @transform_7(%arg0: i32) -> (i32, i32) {
    %c0_i32 = arith.constant 0 : i32
    %c0_i32_0 = arith.constant 0 : i32
    %c0_i32_1 = arith.constant 0 : i32
    return %c0_i32, %c0_i32_0 : i32, i32
  }
  func.func @transform_8(%arg0: i32) -> (i32, i32) {
    %c0_i32 = arith.constant 0 : i32
    %c0_i32_0 = arith.constant 0 : i32
    %c0_i32_1 = arith.constant 0 : i32
    return %c0_i32, %c0_i32_0 : i32, i32
  }
  func.func @transform_9(%arg0: i32) -> (i32, i32) {
    %c0_i32 = arith.constant 0 : i32
    %c0_i32_0 = arith.constant 0 : i32
    %c0_i32_1 = arith.constant 0 : i32
    return %c0_i32, %c0_i32_0 : i32, i32
  }
  func.func @transform_10(%arg0: i32) -> (i32, i32) {
    %c0_i32 = arith.constant 0 : i32
    %c0_i32_0 = arith.constant 0 : i32
    %c0_i32_1 = arith.constant 0 : i32
    return %c0_i32, %c0_i32_0 : i32, i32
  }
  func.func @transform_11(%arg0: i32) -> (i32, i32) {
    %c0_i32 = arith.constant 0 : i32
    %c0_i32_0 = arith.constant 0 : i32
    %c0_i32_1 = arith.constant 0 : i32
    return %c0_i32, %c0_i32_0 : i32, i32
  }
  func.func @transform_12(%arg0: i32) -> (i32, i32) {
    %c0_i32 = arith.constant 0 : i32
    %c0_i32_0 = arith.constant 0 : i32
    %c0_i32_1 = arith.constant 0 : i32
    return %c0_i32, %c0_i32_0 : i32, i32
  }
  func.func @transform_13(%arg0: i32) -> (i32, i32, i32) {
    %c0_i32 = arith.constant 0 : i32
    %c0_i32_0 = arith.constant 0 : i32
    %c0_i32_1 = arith.constant 0 : i32
    return %arg0, %c0_i32, %c0_i32_0 : i32, i32, i32
  }
}

</mosaic_0001>

<bundles_post_ra>
// kernel: tpu_custom_call.1
= control target key start
LH: loop header
LB: loop body
LE: loop exit
PB: predicated region body
PF: predicated region fallthrough
CT: control target
= control target key end

     0   :  { %s16063_s0 = inlined_call_operand.hbm [shape: bf16[2,16,16,128], index: 0, kind: input, shape index: {}]   ;;  %s16064_s1 = inlined_call_operand.hbm [shape: bf16[1152,128], index: 1, kind: input, shape index: {}]   ;;  %s16065_s2 = inlined_call_operand.vmem [shape: f32[1,128], index: 2, kind: input, shape index: {}]   ;;  %s16066_s3 = inlined_call_operand.hbm [shape: bf16[1152,128], index: 3, kind: input, shape index: {}]   ;;  %s16067_s4 = inlined_call_operand.vmem [shape: f32[1,128], index: 4, kind: input, shape index: {}]   ;;  %s16068_s5 = inlined_call_operand.hbm [shape: bf16[1152,128], index: 5, kind: input, shape index: {}]   ;;  %s16069_s6 = inlined_call_operand.vmem [shape: f32[1,128], index: 6, kind: input, shape index: {}]   ;;  %s16070_s7 = inlined_call_operand.hbm [shape: bf16[1152,128], index: 7, kind: input, shape index: {}]   ;;  %s16071_s8 = inlined_call_operand.vmem [shape: f32[1,128], index: 8, kind: input, shape index: {}]   ;;  %s16072_s9 = inlined_call_operand.hbm [shape: bf16[128,512], index: 9, kind: input, shape index: {}]   ;;  %s16073_s10 = inlined_call_operand.vmem [shape: f32[1,512], index: 10, kind: input, shape index: {}]   ;;  %s16074_s11 = inlined_call_operand.hbm [shape: bf16[512,128], index: 11, kind: input, shape index: {}]   ;;  %s16075_s12 = inlined_call_operand.vmem [shape: f32[1,128], index: 12, kind: input, shape index: {}]   ;;  %s16076_s13 = inlined_call_operand.hbm [shape: f32[2,1,128], index: 13, kind: output, shape index: {}]  }
   0x1   :  { %16134 = sst [smem:[#allocation75_spill]] %s16064_s1 }
   0x2   :  { %16135 = sst [smem:[#allocation76_spill]] %s16066_s3 }
   0x3   :  { %16136 = sst [smem:[#allocation77_spill]] %s16068_s5 }
   0x4   :  { %16137 = sst [smem:[#allocation78_spill]] %s16070_s7 }
   0x5   :  { %16138 = sst [smem:[#allocation79_spill]] %s16072_s9 }
   0x6   :  { %16139 = sst [smem:[#allocation80_spill]] %s16074_s11 }
   0x7   :  { %18 = vsyncpa [#allocation7], 0 }
   0x8   :  { %20 = vsyncpa [#allocation7 + $0x1], 0 }
   0x9   :  { %21 = vsyncpa [#allocation10], 0 }
   0xa   :  { %22 = vsyncpa [#allocation13], 0 }
   0xb   :  { %23 = vsyncpa [#allocation16], 0 }
   0xc   :  { %24 = vsyncpa [#allocation8], 0 }
   0xd   :  { %26 = vsyncpa [#allocation8 + $0x1], 0  ;;  %s13389_s25 = smov 0   ;;  %s13391_s26 = smov 0  }
   0xe   :  { %s13393_s27 = smov 0   ;;  %s13395_s28 = smov 0  }
   0xf LB: > { %16140 = sst [smem:[#allocation24_spill]] %s13296_s27  ;;  %s13302_s29 = smov [#allocation9]   ;;  %s13300_s28 = sphi %s13395_s28, %s16443_s28   ;;  %s13296_s27 = sphi %s13393_s27, %s16445_s27   ;;  %s13292_s26 = sphi %s13391_s26, %s16447_s26   ;;  %s13288_s25 = sphi %s13389_s25, %s16446_s25  }
  0x10   : > { %s353_s30 = sshll.u32 %s13302_s29, 4  ;;  %s13410_s14 = sadd.s32 4294967295, %s13300_s28   ;;  %s354_s30 = int_to_ptr.vmem [resolvable:$true] %s353_s30 }
  0x11   : > { %p10386_p0 = scmp.ge.s32.totalorder %s13300_s28, 1  ;;  %p16082_p1 = scmp.eq.s32.totalorder %s13410_s14, 0 }
  0x12   : > { %p341_p2 = scmp.lt.s32.totalorder %s13300_s28, 3  ;;  %s13303_s16 = smov [#allocation12]  }
  0x13   : > { %s385_s17 = sshll.u32 %s13303_s16, 4  ;;  %s13304_s19 = smov [#allocation15]   ;;  %s13428_s17 = int_to_ptr.vmem [resolvable:$true] %s385_s17 }
  0x14   : > { %p13415_p3 = pnand %p10386_p0, %p341_p2  ;;  %s417_s20 = sshll.u32 %s13304_s19, 4  ;;  %s13430_s20 = int_to_ptr.vmem [resolvable:$true] %s417_s20 }
  0x15   : > { %s13051_s22 = scalar_lea.vmem %s354_s30, 9216  ;;  %p13059_p11 = scmp.lt.s32.totalorder %s354_s30, %s354_s30 }
  0x16   : > { %s16141_s15 = scalar_select %p13415_p3, 1, 0 }
  0x17   : > { %p12329_p5 = pneg %p13415_p3  ;;  %p13052_p8 = scmp.ne.s32.totalorder %s354_s30, %s13051_s22 }
  0x18   : > { %p13060_p12 = scmp.lt.s32.totalorder %s13051_s22, %s13051_s22 }
  0x19   : > { %p13424_p6 = pnand %p12329_p5, %p16082_p1 }
  0x1a   : > { %p13061_p13 = por %p13060_p12, %p13059_p11 }
  0x1b   : > { %p13434_p7 = pneg %p13424_p6 }
  0x1d   : > { %p13054_p9 = pnand %p13052_p8, %p13434_p7 }
  0x1f   : > { %p13055_p10 = pneg %p13054_p9 }
  0x21   : > { %p13062_p0 = pnand %p13061_p13, %p13055_p10 }
  0x23   : > { %13065 = shalt.err (!%p13062_p0)
}
  0x24   : > { %s16077_s23 = smov 64   ;;  %s16079_s24 = smov 4  }
  0x25   : > { %s16144_s1 = sld [smem:[#allocation75_spill]]  ;;  %s13077_s19 = scalar_lea.vmem %s13428_s17, 9216 }
  0x26   : > { %p13078_p2 = scmp.ne.s32.totalorder %s13428_s17, %s13077_s19  ;;  %p13085_p9 = scmp.lt.s32.totalorder %s13428_s17, %s13428_s17 }
  0x27   : > { %p13086_p10 = scmp.lt.s32.totalorder %s13077_s19, %s13077_s19 }
  0x28   : > { %p13080_p5 = pnand %p13078_p2, %p13434_p7 }
  0x29   : > { %p13087_p11 = por %p13086_p10, %p13085_p9 }
  0x2a   : > { %p13081_p8 = pneg %p13080_p5 }
  0x2b   : > { %12332 = dma.hbm_to_vmem [thread:$0]  (!%p13424_p6), %s16144_s1, 9216, %s354_s30, [#allocation10], %s16077_s23, %s16077_s23, %s16079_s24  }
  0x2c   : > { %p13088_p12 = pnand %p13087_p11, %p13081_p8 }
  0x2e   : > { %13091 = shalt.err (!%p13088_p12)
}
  0x2f   : > { %s16145_s5 = sld [smem:[#allocation77_spill]]  ;;  %s13103_s30 = scalar_lea.vmem %s13430_s20, 4096 }
  0x30   : > { %p13104_p13 = scmp.ne.s32.totalorder %s13430_s20, %s13103_s30  ;;  %p13111_p5 = scmp.lt.s32.totalorder %s13430_s20, %s13430_s20 }
  0x31   : > { %p13112_p8 = scmp.lt.s32.totalorder %s13103_s30, %s13103_s30 }
  0x32   : > { %p13106_p0 = pnand %p13104_p13, %p13434_p7 }
  0x33   : > { %p13113_p9 = por %p13112_p8, %p13111_p5 }
  0x34   : > { %p13107_p2 = pneg %p13106_p0 }
  0x35   : > { %12338 = dma.hbm_to_vmem [thread:$0]  (!%p13424_p6), %s16145_s5, 9216, %s13428_s17, [#allocation13], %s16077_s23, %s16077_s23, %s16079_s24  }
  0x36   : > { %p13114_p10 = pnand %p13113_p9, %p13107_p2 }
  0x38   : > { %13117 = shalt.err (!%p13114_p10)
}
  0x39   : > { %s13307_s16 = smov 256   ;;  %s13308_s19 = smov 16  }
  0x3a   : > { %s16146_s9 = sld [smem:[#allocation79_spill]]  ;;  %s13309_s17 = smov [#allocation11]  }
  0x3b   : > { %s369_s23 = sshll.u32 %s13309_s17, 4  ;;  %s13310_s24 = smov [#allocation14]   ;;  %s370_s23 = int_to_ptr.vmem [resolvable:$true] %s369_s23 }
  0x3c   : > { %s401_s1 = sshll.u32 %s13310_s24, 4  ;;  %s13129_s5 = scalar_lea.vmem %s370_s23, 9216  ;;  %s402_s1 = int_to_ptr.vmem [resolvable:$true] %s401_s1 }
  0x3d   : > { %p13130_p11 = scmp.ne.s32.totalorder %s370_s23, %s13129_s5  ;;  %p13137_p0 = scmp.lt.s32.totalorder %s370_s23, %s370_s23 }
  0x3e   : > { %p13138_p2 = scmp.lt.s32.totalorder %s13129_s5, %s13129_s5 }
  0x3f   : > { %p13132_p12 = pnand %p13130_p11, %p13434_p7 }
  0x40   : > { %12344 = dma.hbm_to_vmem [thread:$0]  (!%p13424_p6), %s16146_s9, 4096, %s13430_s20, [#allocation16], %s13307_s16, %s13307_s16, %s13308_s19  }
  0x41   : > { %p13133_p13 = pneg %p13132_p12  ;;  %p13139_p5 = por %p13138_p2, %p13137_p0 }
  0x43   : > { %p13140_p8 = pnand %p13139_p5, %p13133_p13 }
  0x45   : > { %13143 = shalt.err (!%p13140_p8)
}
  0x46   : > { %s16147_s30 = smov 4   ;;  %s16148_s22 = smov 64  }
  0x47   : > { %s16149_s3 = sld [smem:[#allocation76_spill]]  ;;  %s13155_s24 = scalar_lea.vmem %s402_s1, 9216 }
  0x48   : > { %p13156_p9 = scmp.ne.s32.totalorder %s402_s1, %s13155_s24  ;;  %p13163_p12 = scmp.lt.s32.totalorder %s402_s1, %s402_s1 }
  0x49   : > { %p13164_p0 = scmp.lt.s32.totalorder %s13155_s24, %s13155_s24 }
  0x4a   : > { %p13158_p10 = pnand %p13156_p9, %p13434_p7 }
  0x4b   : > { %p13165_p13 = por %p13164_p0, %p13163_p12 }
  0x4c   : > { %p13159_p11 = pneg %p13158_p10 }
  0x4d   : > { %12335 = dma.hbm_to_vmem [thread:$0]  (!%p13424_p6), %s16149_s3, 9216, %s370_s23, [#allocation10], %s16148_s22, %s16148_s22, %s16147_s30  }
  0x4e   : > { %p13166_p2 = pnand %p13165_p13, %p13159_p11 }
  0x50   : > { %13169 = shalt.err (!%p13166_p2)
}
  0x51   : > { %s16150_s7 = sld [smem:[#allocation78_spill]]  ;;  %s13311_s23 = smov [#allocation17]  }
  0x52   : > { %s433_s29 = sshll.u32 %s13311_s23, 4  ;;  %s434_s29 = int_to_ptr.vmem [resolvable:$true] %s433_s29 }
  0x53   : > { %s13181_s17 = scalar_lea.vmem %s434_s29, 4096  ;;  %p13189_p10 = scmp.lt.s32.totalorder %s434_s29, %s434_s29 }
  0x54   : > { %p13182_p5 = scmp.ne.s32.totalorder %s434_s29, %s13181_s17  ;;  %p13190_p11 = scmp.lt.s32.totalorder %s13181_s17, %s13181_s17 }
  0x56   : > { %p13184_p8 = pnand %p13182_p5, %p13434_p7  ;;  %p13191_p12 = por %p13190_p11, %p13189_p10 }
  0x57   : > { %12341 = dma.hbm_to_vmem [thread:$0]  (!%p13424_p6), %s16150_s7, 9216, %s402_s1, [#allocation13], %s16148_s22, %s16148_s22, %s16147_s30  }
  0x58   : > { %p13185_p9 = pneg %p13184_p8 }
  0x5a   : > { %p13192_p0 = pnand %p13191_p12, %p13185_p9 }
  0x5c   : > { %13195 = shalt.err (!%p13192_p0)
}
  0x5d   : > { %s16151_s11 = sld [smem:[#allocation80_spill]]  ;;  %s10385_s18 = sadd.s32 4294967294, %s13300_s28  }
  0x5e   : > { %s13507_s21 = sadd.s32 1, %s13300_s28   ;;  %s39_s24 = sadd.s32 1, %s13296_s27 }
  0x5f   : > { %16152 = sst [smem:[#allocation25_spill]] %s13507_s21  ;;  %s36_s16 = ssub.s32 %s13300_s28, %s13507_s21 }
  0x60   : > { %p37_p7 = scmp.eq.s32.totalorder %s36_s16, 0  ;;  %p46_p13 = scmp.ne.s32.totalorder %s13296_s27, %s13292_s26 }
  0x61   : > { %p47_p2 = scmp.eq.s32.totalorder %s13300_s28, 0  ;;  %p52_p5 = scmp.ne.s32.totalorder %s13292_s26, %s13288_s25 }
  0x62   : > { %s13518_s5 = scalar_select %p37_p7, %s13296_s27, %s39_s24  }
  0x63   : > { %12347 = dma.hbm_to_vmem [thread:$0]  (!%p13424_p6), %s16151_s11, 4096, %s434_s29, [#allocation16], %s16148_s22, %s16148_s22, %s16147_s30  }
  0x64   : > { %16153 = sst [smem:[#allocation26_spill]] %s13518_s5  ;;  %p13520_p8 = por %p47_p2, %p46_p13 }
  0x65   : > { %p13526_p6 = por %p16082_p1, %p52_p5  ;;  %p328_p9 = scmp.eq.s32.totalorder %s13410_s14, 1 }
  0x66   : > { %p334_p10 = scmp.eq.s32.totalorder %s10385_s18, 1  ;;  %p12362_p11 = scmp.lt.s32.totalorder %s13300_s28, 2 }
  0x67   : > { %s16155_s23 = scalar_select %p13526_p6, 1, 0 }
  0x68   : > { %s450_s29 = sand.u32 1, %s13296_s27   ;;  %p13533_p12 = por %p328_p9, %p46_p13 }
  0x69   : > { %p13537_p0 = por %p334_p10, %p52_p5  ;;  %s10394_s1 = sshll.u32 %s450_s29, 7 }
  0x6a   : > { %s16156_s17 = scalar_select %p13533_p12, 1, 0 }
  0x6b   : > { %s16157_s20 = scalar_select %p13537_p0, 1, 0 }
  0x6c   : > { %s11214_s16 = sshll.u32 %s13300_s28, 11  ;;  %s454_s18 = scalar_lea.vmem [#allocation6], %s10394_s1 }
  0x6d   : > { %s13545_s7 = scalar_lea.hbm %s16063_s0, %s11214_s16  ;;  %s461_s9 = sshll.u32 %s454_s18, 4  ;;  %s13547_s9 = int_to_ptr.vmem [resolvable:$true] %s461_s9 }
  0x6e   : > { %p13551_p7 = pnand %p12362_p11, %p13520_p8  ;;  %s13555_s5 = scalar_lea.sflag [#allocation7], %s450_s29 }
  0x6f   : > { %s13196_s27 = scalar_lea.hbm %s13545_s7, 2048  ;;  %s13201_s1 = scalar_lea.hbm %s16063_s0, 4096 }
  0x70   : > { %p13197_p13 = scmp.ne.s32.totalorder %s13545_s7, %s13196_s27  ;;  %p13198_p2 = pneg %p13551_p7 }
  0x71   : > { %p13202_p8 = scmp.lt.s32.totalorder %s13545_s7, %s16063_s0  ;;  %p13203_p10 = scmp.lt.s32.totalorder %s13201_s1, %s13196_s27 }
  0x72   : > { %p13199_p5 = pnand %p13198_p2, %p13197_p13 }
  0x73   : > { %p13204_p11 = por %p13203_p10, %p13202_p8 }
  0x74   : > { %p13200_p9 = pneg %p13199_p5 }
  0x76   : > { %p13205_p4 = pnand %p13204_p11, %p13200_p9 }
  0x78   : > { %13208 = shalt.err (!%p13205_p4)
}
  0x79   : > { %s13209_s19 = scalar_lea.vmem %s13547_s9, 2048  ;;  %s13312_s29 = smov [#allocation6]  }
  0x7a   : > { %p13210_p1 = scmp.ne.s32.totalorder %s13547_s9, %s13209_s19  ;;  %s13214_s21 = sshll.u32 %s13312_s29, 4  ;;  %s13215_s21 = int_to_ptr.vmem [resolvable:$false] %s13214_s21 }
  0x7b   : > { %s13216_s3 = scalar_lea.vmem %s13215_s21, 4096  ;;  %p13217_p5 = scmp.lt.s32.totalorder %s13547_s9, %s13215_s21 }
  0x7c   : > { %p13212_p0 = pnand %p13210_p1, %p13198_p2  ;;  %p13218_p12 = scmp.lt.s32.totalorder %s13216_s3, %s13209_s19 }
  0x7e   : > { %p13213_p13 = pneg %p13212_p0  ;;  %p13219_p6 = por %p13218_p12, %p13217_p5 }
  0x80   : > { %p13220_p3 = pnand %p13219_p6, %p13213_p13 }
  0x82   : > { %13223 = shalt.err (!%p13220_p3)
}
  0x83   : > { %12351 = dma.hbm_to_vmem [thread:$0]  (!%p13551_p7), %s13545_s7, 2048, %s13547_s9, %s13555_s5, %s16148_s22, %s16148_s22, %s16147_s30  }
  0x84   : > { %p16159_p1 = scmp.ne.s32.totalorder %s16141_s15, 0 }
  0x86   : > { %473 = sbr.rel (%p16159_p1) target bundleno = 2158 (0x86e), region = 72 }
  0x8b   : > { %s13582_s27 = sand.u32 1, %s13292_s26   ;;  %p16160_p3 = scmp.ne.s32.totalorder %s16155_s23, 0 }
  0x8c   : > { %s10398_s21 = sshll.u32 %s13582_s27, 7  ;;  %s476_s16 = scalar_lea.sflag [#allocation7], %s13582_s27 }
  0x8d   : > { %s13586_s1 = scalar_lea.vmem [#allocation6], %s10398_s21 }
  0x8e   : > { %13267 = dma.done.wait (%p16160_p3), %s476_s16, 2048  }
  0x8f   : > { %13269 = vsyncadd (%p16160_p3), %s476_s16, 4294965248  ;;  %p16161_p4 = scmp.eq.s32.totalorder %s13410_s14, 0 }
  0x91   : > { %13271 = dma.done.wait (%p16161_p4), [#allocation10], 18432   ;;  %p16162_p6 = pmov %p16161_p4 }
  0x92   : > { %p16163_p12 = pmov %p16161_p4 }
  0x93   : > { %13273 = vsyncadd (%p16162_p6), [#allocation10], 4294948864 }
  0x94   : > { %13275 = dma.done.wait (%p16163_p12), [#allocation13], 18432   ;;  %p16164_p0 = pmov %p16161_p4 }
  0x96   : > { %13277 = vsyncadd (%p16164_p0), [#allocation13], 4294948864  ;;  %p16165_p7 = pmov %p16164_p0 }
  0x97   : > { %p16166_p2 = pmov %p16164_p0 }
  0x98   : > { %13279 = dma.done.wait (%p16165_p7), [#allocation16], 8192  }
  0x99   : > { %13281 = vsyncadd (%p16166_p2), [#allocation16], 4294959104  ;;  %v16088_v0 = vmov 0   ;;  %v12417_v1 = vld [vmem:[#allocation9 + $0x78] sm:$0xff]   ;;  %v12421_v5 = vld [vmem:[#allocation9 + $0x70] sm:$0xff]   ;;  %vm586_vm1 = vcmask 1040384  }
  0x9a   : > { %578 = vst [vmem:[#allocation2] sm:$0xf] %v16088_v0  ;;  %579 = vst [vmem:[#allocation2 + $0x4] sm:$0xf] %v16088_v0  ;;  %v12418_v2 = vld [vmem:[#allocation9 + $0x38] sm:$0xff]   ;;  %11307 = vmatprep.subr.bf16.mxu0 %v12417_v1  ;;  %v12422_v6 = vld [vmem:[#allocation9 + $0x30] sm:$0xff]  }
  0x9b   : > { %580 = vst [vmem:[#allocation2 + $0x8] sm:$0xf] %v16088_v0  ;;  %582 = vst [vmem:[#allocation2 + $0xcc] sm:$0xf] %v16088_v0  ;;  %v12419_v3 = vld [vmem:[#allocation9 + $0xf8] sm:$0xff]   ;;  %11308 = vmatpush3.bf16.msra.mxu0 %v12418_v2  ;;  %v12423_v7 = vld [vmem:[#allocation9 + $0xf0] sm:$0xff]  }
  0x9c   : > { %583 = vst [vmem:[#allocation2 + $0xd0] sm:$0xf] %v16088_v0  ;;  %584 = vst [vmem:[#allocation2 + $0xd4] sm:$0xf] %v16088_v0  ;;  %v12420_v4 = vld [vmem:[#allocation9 + $0xb8] sm:$0xff]   ;;  %11419 = vmatprep.subr.bf16.mxu1 %v12419_v3  ;;  %11309 = vmatprep.subr.bf16.mxu0 %v12421_v5  ;;  %v12424_v8 = vld [vmem:[#allocation9 + $0xb0] sm:$0xff]  }
  0x9d   : > { %4754 = vst [vmem:[#allocation3] sm:$0xf] %v16088_v0  ;;  %4755 = vst [vmem:[#allocation3 + $0x4] sm:$0xf] %v16088_v0  ;;  %11420 = vmatpush3.bf16.msra.mxu1 %v12420_v4  ;;  %v12425_v9 = vld [vmem:[#allocation9 + $0x68] sm:$0xff]   ;;  %v12429_v13 = vld [vmem:[#allocation9 + $0x60] sm:$0xff]  }
  0x9e   : > { %4757 = vst [vmem:[#allocation3 + $0x48] sm:$0xf] %v16088_v0  ;;  %4758 = vst [vmem:[#allocation3 + $0x4c] sm:$0xf] %v16088_v0  ;;  %11421 = vmatprep.subr.bf16.mxu1 %v12423_v7  ;;  %v12426_v10 = vld [vmem:[#allocation9 + $0x28] sm:$0xff]   ;;  %v12430_v14 = vld [vmem:[#allocation9 + $0x20] sm:$0xff]  }
  0x9f   : > { %6967 = vst [vmem:[#allocation4] sm:$0xf] %v16088_v0  ;;  %6969 = vst [vmem:[#allocation4 + $0x14] sm:$0xf] %v16088_v0  ;;  %11310 = vmatpush3.bf16.msra.mxu0 %v12422_v6  ;;  %v12427_v11 = vld [vmem:[#allocation9 + $0xe8] sm:$0xff]   ;;  %v12431_v15 = vld [vmem:[#allocation9 + $0xe0] sm:$0xff]  }
  0xa0   : > { %8444 = vst [vmem:[#allocation5] sm:$0xf] %v16088_v0  ;;  %8446 = vst [vmem:[#allocation5 + $0xc] sm:$0xf] %v16088_v0  ;;  %11311 = vmatprep.subr.bf16.mxu0 %v12425_v9  ;;  %v12428_v12 = vld [vmem:[#allocation9 + $0xa8] sm:$0xff]   ;;  %v12432_v16 = vld [vmem:[#allocation9 + $0xa0] sm:$0xff]  }
  0xa1   : > { %11422 = vmatpush3.bf16.msra.mxu1 %v12424_v8  ;;  %vm587_vm0 = vsmask.f32 256  ;;  %v12433_v17 = vld [vmem:[#allocation9 + $0x58] sm:$0xff]   ;;  %v12437_v21 = vld [vmem:[#allocation9 + $0x50] sm:$0xff]   ;;  %v12441_v25 = vld [vmem:[#allocation9 + $0x48] sm:$0xff]   ;;  %v16167_v27 = vmov 0 }
  0xa2   : > { %11423 = vmatprep.subr.bf16.mxu1 %v12427_v11  ;;  %v12434_v18 = vld [vmem:[#allocation9 + $0x18] sm:$0xff]   ;;  %v12438_v22 = vld [vmem:[#allocation9 + $0x10] sm:$0xff]   ;;  %v12442_v26 = vld [vmem:[#allocation9 + $0x8] sm:$0xff]   ;;  %vm637_vm3 = vsmask.f32 7938  ;;  %v16170_v50 = vmov 0 }
  0xa3   : > { %11312 = vmatpush3.bf16.msra.mxu0 %v12426_v10  ;;  %v12435_v19 = vld [vmem:[#allocation9 + $0xd8] sm:$0xff]   ;;  %v12439_v23 = vld [vmem:[#allocation9 + $0xd0] sm:$0xff]   ;;  %vm13620_vm2 = vmand %vm586_vm1, %vm587_vm0  ;;  %vm687_vm4 = vsmask.f32 4368  ;;  %vm1460_vm6 = vsmask.f32 7424 }
  0xa4   : > { %11313 = vmatprep.subr.bf16.mxu0 %v12429_v13  ;;  %v12436_v20 = vld [vmem:[#allocation9 + $0x98] sm:$0xff]   ;;  %v12440_v24 = vld [vmem:[#allocation9 + $0x90] sm:$0xff]   ;;  %v16168_v27 = vsel %vm13620_vm2, 4294967295, %v16167_v27  ;;  %v12443_v28 = vld [vmem:[#allocation9 + $0xc8] sm:$0xff]   ;;  %vm1009_vm7 = vcmask 1043456   ;;  %vm1717_vm10 = vcmask 1046528  }
  0xa5   : > { %11424 = vmatpush3.bf16.msra.mxu1 %v12428_v12  ;;  %16169 = vst [vmem:[#allocation27_spill] sm:$0xff] %v16168_v27  ;;  %v12444_v29 = vld [vmem:[#allocation9 + $0x88] sm:$0xff]   ;;  %v12445_v30 = vld [vmem:[#allocation9 + $0x40] sm:$0xff]   ;;  %v1123_v33 = vld [vmem:[#allocation2] sm:$0xf]  ;;  %vm5130_vm11 = vcmask 1042434  }
  0xa6   : > { %11425 = vmatprep.subr.bf16.mxu1 %v12431_v15  ;;  %v12446_v31 = vld [vmem:[#allocation9] sm:$0xff]   ;;  %v13624_v34 = vld [vmem:[#allocation2 + $0x4] sm:$0xf]  ;;  %v13627_v36 = vld [vmem:[#allocation2 + $0x8] ss:$0 sps:$4 sm:$0x11]  }
  0xa7   : > { %11314 = vmatpush3.bf16.msra.mxu0 %v12430_v14  ;;  %v12447_v32 = vld [vmem:[#allocation9 + $0xc0] sm:$0xff]   ;;  %v10405_v35 = vcombine.low %v1123_v33, %v13624_v34  ;;  %v1469_v40 = vshll.u32 %v13627_v36, 16  ;;  %v12451_v41 = vld [vmem:[#allocation9 + $0x178] sm:$0xff]   ;;  %vm13636_vm5 = vmand %vm586_vm1, %vm637_vm3  ;;  %v1719_v57 = vrot.slane %v13627_v36, 1  ;;  %v16175_v14 = vmov 0  ;;  %s11211_s16 = sshll.u32 %s13410_s14, 4 }
  0xa8   : > { %11315 = vmatprep.subr.bf16.mxu0 %v12433_v17  ;;  %v12450_v37 = vld [vmem:[#allocation9 + $0x80] sm:$0xff]   ;;  %v589_v44 = vld [vmem:[#allocation2 + $0xc] sm:$0x1]  ;;  %v16171_v50 = vsel %vm13636_vm5, 4294967295, %v16170_v50  ;;  %vm13645_vm8 = vmor %vm587_vm0, %vm687_vm4  ;;  %vm5133_vm12 = vcmask 1043459   ;;  %vm5136_vm13 = vcmask 1044484   ;;  %s10260_s15 = scalar_lea.hbm %s16076_s13, %s11211_s16 }
  0xa9   : > { %11426 = vmatpush3.bf16.msra.mxu1 %v12432_v16  ;;  %v1462_v38 = vshrl.u32 %v10405_v35, 16  ;;  %v1464_v39 = vshll.u32 %v10405_v35, 16  ;;  %v546_v42 = vld [vmem:[%s13586_s1] sm:$0xf]  ;;  %v547_v43 = vld [vmem:[%s13586_s1 + $0x4] sm:$0xf]  ;;  %vm13664_vm9 = vmand %vm1009_vm7, %vm637_vm3 }
  0xaa   : > { %11427 = vmatprep.subr.bf16.mxu1 %v12435_v19  ;;  %v690_v45 = vshrl.u32 %v546_v42, 16  ;;  %v693_v46 = vshll.u32 %v546_v42, 16  ;;  %v1471_v48 = vrot.slane %v1469_v40, 1  ;;  %v590_v49 = vsel %vm13620_vm2, 0, %v589_v44  ;;  %16172 = vst [vmem:[#allocation28_spill] sm:$0xff] %v16171_v50  ;;  %v12454_v56 = vld [vmem:[#allocation9 + $0x138] sm:$0xff]  }
  0xab   : > { %11316 = vmatpush3.bf16.msra.mxu0 %v12434_v18  ;;  %v1466_v47 = vrot.slane %v1464_v39, 1  ;;  %v698_v51 = vshrl.u32 %v547_v43, 16  ;;  %591 = vst [vmem:[#allocation2 + $0xc] sm:$0x1] %v590_v49  ;;  %v701_v53 = vshll.u32 %v547_v43, 16  ;;  %v12463_v8 = vld [vmem:[#allocation9 + $0x170] sm:$0xff]  }
  0xac   : > { %11317 = vmatprep.subr.bf16.mxu0 %v12437_v21  ;;  %v692_v52 = vrot.slane %v690_v45, 7  ;;  %v639_v58 = vld [vmem:[#allocation2 + $0x14] sm:$0x1]  ;;  %v13649_v61 = vld [vmem:[#allocation2] sm:$0xe]  ;;  %v16176_v14 = vsel %vm13664_vm9, 4294967295, %v16175_v14 }
  0xad   : > { %11428 = vmatpush3.bf16.msra.mxu1 %v12436_v20  ;;  %v1467_v54 = vor.u32 %v1466_v47, %v1462_v38  ;;  %v13640_v55 = vrot.slane %v698_v51, 7  ;;  %v640_v62 = vsel %vm13636_vm5, 0, %v639_v58  ;;  %v548_v63 = vld [vmem:[%s13586_s1 + $0x8] sm:$0xf]  ;;  %v549_v1 = vld [vmem:[%s13586_s1 + $0xc] sm:$0xf] }
  0xae   : > { %11429 = vmatprep.subr.bf16.mxu1 %v12439_v23  ;;  %v696_v60 = vrot.slane %v692_v52, 4  ;;  %v695_v3 = vor.u32 %v693_v46, %v692_v52  ;;  %641 = vst [vmem:[#allocation2 + $0x14] sm:$0x1] %v640_v62  ;;  %v592_v5 = vld [vmem:[#allocation2 + $0x18] sm:$0x1]  ;;  %v707_v6 = vshrl.u32 %v548_v63, 16 }
  0xaf   : > { %11318 = vmatpush3.bf16.msra.mxu0 %v12438_v22  ;;  %v1472_v2 = vsel %vm1460_vm6, %v1467_v54, %v1471_v48  ;;  %v703_v4 = vor.u32 %v701_v53, %v13640_v55  ;;  %v642_v7 = vld [vmem:[#allocation2 + $0x20] sm:$0x1]  ;;  %v705_v9 = vrot.slane %v13640_v55, 4  ;;  %v593_v10 = vsel %vm13620_vm2, 0, %v592_v5  ;;  %16177 = vst [vmem:[#allocation29_spill] sm:$0xff] %v16176_v14  ;;  %v12475_v22 = vld [vmem:[#allocation9 + $0x168] sm:$0xff]  }
  0xb0   : > { %11319 = vmatprep.subr.bf16.mxu0 %v12441_v25  ;;  %3325 = vmatprep.mubr.bf16.mxu0 %v1472_v2  ;;  %v710_v11 = vshll.u32 %v548_v63, 16  ;;  %v715_v12 = vshrl.u32 %v549_v1, 16  ;;  %594 = vst [vmem:[#allocation2 + $0x18] sm:$0x1] %v593_v10  ;;  %v709_v15 = vrot.slane %v707_v6, 7  ;;  %v718_v16 = vshll.u32 %v549_v1, 16 }
  0xb1   : > { %11430 = vmatpush3.bf16.msra.mxu1 %v12440_v24  ;;  %v704_v13 = vsel %vm13645_vm8, %v696_v60, %v703_v4  ;;  %v643_v17 = vsel %vm13636_vm5, 0, %v642_v7  ;;  %v12466_v18 = vld [vmem:[#allocation9 + $0x130] sm:$0xff]   ;;  %v10437_v24 = vcombine.low %v13649_v61, %v13624_v34  ;;  %v645_v39 = vld [vmem:[#allocation2 + $0x2c] sm:$0x1]  ;;  %v13683_v43 = vld [vmem:[%s13586_s1 + $0x18] sm:$0xf] }
  0xb2   : > { %11431 = vmatprep.subr.bf16.mxu1 %v12443_v28  ;;  %1014 = vst [vmem:[#allocation2 + $0x10] sm:$0xf] %v704_v13  ;;  %v717_v19 = vrot.slane %v715_v12, 7  ;;  %644 = vst [vmem:[#allocation2 + $0x20] sm:$0x1] %v643_v17  ;;  %v712_v25 = vor.u32 %v710_v11, %v709_v15  ;;  %v646_v42 = vsel %vm13636_vm5, 0, %v645_v39 }
  0xb3   : > { %11320 = vmatpush3.bf16.msra.mxu0 %v12442_v26  ;;  %v550_v20 = vld [vmem:[%s13586_s1 + $0x10] sm:$0xf]  ;;  %v551_v21 = vld [vmem:[%s13586_s1 + $0x14] sm:$0xf]  ;;  %v1011_v23 = vld [vmem:[#allocation2 + $0xc] sm:$0xf] }
  0xb4   : > { %11321 = vmatprep.subr.bf16.mxu0 %v12445_v30  ;;  %v713_v26 = vrot.slane %v709_v15, 4  ;;  %v595_v28 = vld [vmem:[#allocation2 + $0x24] sm:$0x1]  ;;  %v1012_v30 = vsel %vm13664_vm9, %v695_v3, %v1011_v23  ;;  %v732_v34 = vshrl.u32 %v551_v21, 16  ;;  %v735_v38 = vshll.u32 %v551_v21, 16  ;;  %v12478_v44 = vld [vmem:[#allocation9 + $0x128] sm:$0xff]  }
  0xb5   : > { %11432 = vmatpush3.bf16.msra.mxu1 %v12444_v29  ;;  %v724_v29 = vshrl.u32 %v550_v20, 16  ;;  %v596_v33 = vsel %vm13620_vm2, 0, %v595_v28  ;;  %1013 = vst [vmem:[#allocation2 + $0xc] sm:$0xf] %v1012_v30  ;;  %v1015_v40 = vld [vmem:[#allocation2 + $0x14] sm:$0x1] }
  0xb6   : > { %11433 = vmatprep.subr.bf16.mxu1 %v12447_v32  ;;  %v722_v32 = vrot.slane %v717_v19, 4  ;;  %597 = vst [vmem:[#allocation2 + $0x24] sm:$0x1] %v596_v33  ;;  %v1016_v45 = vsel %vm13620_vm2, %v705_v9, %v1015_v40  ;;  %v734_v47 = vrot.slane %v732_v34, 7  ;;  %647 = vst [vmem:[#allocation2 + $0x2c] sm:$0x1] %v646_v42 }
  0xb7   : > { %11322 = vmatpush3.bf16.msra.mxu0 %v12446_v31  ;;  %v720_v31 = vor.u32 %v718_v16, %v717_v19  ;;  %v553_v48 = vld [vmem:[%s13586_s1 + $0x1c] sm:$0xf]  ;;  %v598_v49 = vld [vmem:[#allocation2 + $0x30] sm:$0x1]  ;;  %v1718_v51 = vrot.slane %v10437_v24, 1  ;;  %v741_v54 = vshrl.u32 %v13683_v43, 16 }
  0xb8   : > { %11531 = vmatprep.subr.bf16.mxu0 %v12451_v41  ;;  %1017 = vst [vmem:[#allocation2 + $0x14] sm:$0x1] %v1016_v45  ;;  %v1018_v52 = vld [vmem:[#allocation2 + $0x18] sm:$0xf]  ;;  %v599_v53 = vsel %vm13620_vm2, 0, %v598_v49  ;;  %v749_v55 = vshrl.u32 %v553_v48, 16  ;;  %v737_v62 = vor.u32 %v735_v38, %v734_v47 }
  0xb9   : > { %11434 = vmatpush3.bf16.msra.mxu1 %v12450_v37  ;;  %v727_v37 = vshll.u32 %v550_v20, 16  ;;  %v721_v41 = vsel %vm13645_vm8, %v713_v26, %v720_v31  ;;  %v1126_v58 = vld [vmem:[#allocation2 + $0x10] sm:$0xf]  ;;  %v1019_v60 = vsel %vm13664_vm9, %v712_v25, %v1018_v52  ;;  %v1022_v61 = vld [vmem:[#allocation2 + $0x20] sm:$0x1]  ;;  %v743_v2 = vrot.slane %v741_v54, 7 }
  0xba   : > { %3326 = vmatmul.mubr.bf16.vlgmr.msra.gmra.mxu0 %v10405_v35  ;;  %v726_v35 = vrot.slane %v724_v29, 7  ;;  %1021 = vst [vmem:[#allocation2 + $0x1c] sm:$0xf] %v721_v41  ;;  %600 = vst [vmem:[#allocation2 + $0x30] sm:$0x1] %v599_v53  ;;  %v1023_v63 = vsel %vm13620_vm2, %v722_v32, %v1022_v61  ;;  %v13695_v3 = vrot.slane %v749_v55, 7  ;;  %v1720_v13 = vsel %vm1717_vm10, %v1718_v51, %v1719_v57 }
  0xbb   : > { %11532 = vmatpush3.bf16.msra.mxu0 %v12454_v56  ;;  %v1188_v56 = vld [vmem:[#allocation2 + $0x10] sm:$0xf]  ;;  %1020 = vst [vmem:[#allocation2 + $0x18] sm:$0xf] %v1019_v60  ;;  %v648_v4 = vld [vmem:[#allocation2 + $0x38] sm:$0x1] }
  0xbc   : > { %11533 = vmatprep.subr.bf16.mxu0 %v12463_v8  ;;  %v730_v46 = vrot.slane %v726_v35, 4  ;;  %v729_v1 = vor.u32 %v727_v37, %v726_v35  ;;  %v12487_v5 = vld [vmem:[#allocation9 + $0x160] sm:$0xff]   ;;  %1024 = vst [vmem:[#allocation2 + $0x20] sm:$0x1] %v1023_v63  ;;  %v752_v7 = vshll.u32 %v553_v48, 16  ;;  %v649_v8 = vsel %vm13636_vm5, 0, %v648_v4 }
  0xbd   : > { %v1187_v9 = vld [vmem:[#allocation2 + $0xc] sm:$0xf]  ;;  %v739_v11 = vrot.slane %v734_v47, 4  ;;  %650 = vst [vmem:[#allocation2 + $0x38] sm:$0x1] %v649_v8  ;;  %v12490_v19 = vld [vmem:[#allocation9 + $0x120] sm:$0xff]  }
  0xbe   : > { %v738_v6 = vsel %vm13645_vm8, %v730_v46, %v737_v62  ;;  %v1125_v10 = vld [vmem:[#allocation2 + $0xc] sm:$0xf]  ;;  %v13701_v12 = vcombine.low %v1187_v9, %v1188_v56  ;;  %v1025_v17 = vld [vmem:[#allocation2 + $0x24] sm:$0xf]  ;;  %v744_v24 = vshll.u32 %v13683_v43, 16  ;;  %v754_v25 = vor.u32 %v752_v7, %v13695_v3  ;;  %s10250_s30 = scalar_lea.sflag [#allocation8], %s13582_s27 }
  0xbf   : > { %11534 = vmatpush3.bf16.msra.mxu0 %v12466_v18  ;;  %1028 = vst [vmem:[#allocation2 + $0x28] sm:$0xf] %v738_v6  ;;  %v10406_v15 = vcombine.low %v1125_v10, %v1126_v58  ;;  %v1172_v16 = vld [vmem:[#allocation2 + $0xc] sm:$0xe]  ;;  %v747_v18 = vrot.slane %v743_v2, 4  ;;  %v756_v61 = vrot.slane %v13695_v3, 4 }
  0xc0   : > { %11535 = vmatprep.subr.bf16.mxu0 %v12475_v22  ;;  %v10438_v21 = vcombine.low %v1172_v16, %v1126_v58  ;;  %v1026_v22 = vsel %vm13664_vm9, %v729_v1, %v1025_v17  ;;  %v1029_v23 = vld [vmem:[#allocation2 + $0x2c] sm:$0x1]  ;;  %3486 = vmatprep.mubr.bf16.mxu1 %v13701_v12  ;;  %v12457_v28 = vld [vmem:[#allocation2 + $0x14] ss:$0 sps:$4 sm:$0x11]   ;;  %v746_v40 = vor.u32 %v744_v24, %v743_v2  ;;  %v12513_v16 = vld [vmem:[#allocation9 + $0x150] sm:$0xff]  }
  0xc1   : > { %v1190_v20 = vld [vmem:[#allocation2 + $0x1c] sm:$0xf]  ;;  %v1474_v36 = vshrl.u32 %v10406_v15, 16  ;;  %v1476_v26 = vshll.u32 %v10406_v15, 16  ;;  %1027 = vst [vmem:[#allocation2 + $0x24] sm:$0xf] %v1026_v22  ;;  %3487 = vmatmul.mubr.bf16.vlgmr.msra.gmra.mxu1 %v1720_v13  ;;  %v1030_v30 = vsel %vm13620_vm2, %v739_v11, %v1029_v23  ;;  %v755_v31 = vsel %vm13645_vm8, %v747_v18, %v754_v25 }
  0xc2   : > { %v1128_v57 = vld [vmem:[#allocation2 + $0x1c] sm:$0xf]  ;;  %v1721_v29 = vrot.slane %v10438_v21, 1  ;;  %v12499_v32 = vld [vmem:[#allocation9 + $0x158] sm:$0xff]   ;;  %v1189_v35 = vld [vmem:[#allocation2 + $0x18] sm:$0xf] }
  0xc3   : > { %11536 = vmatpush3.bf16.msra.mxu0 %v12478_v44  ;;  %v1478_v33 = vrot.slane %v1476_v26, 1  ;;  %1031 = vst [vmem:[#allocation2 + $0x2c] sm:$0x1] %v1030_v30  ;;  %1035 = vst [vmem:[#allocation2 + $0x34] sm:$0xf] %v755_v31  ;;  %v1481_v37 = vshll.u32 %v12457_v28, 16  ;;  %v13715_v34 = vcombine.low %v1189_v35, %v1190_v20 }
  0xc4   : > { %11537 = vmatprep.subr.bf16.mxu0 %v12487_v5  ;;  %v1722_v38 = vrot.slane %v12457_v28, 1  ;;  %v1127_v39 = vld [vmem:[#allocation2 + $0x18] sm:$0xf]  ;;  %v12462_v43 = vld [vmem:[#allocation2 + $0x20] ss:$0 sps:$4 sm:$0x11]  }
  0xc5   : > { %v1479_v41 = vor.u32 %v1478_v33, %v1474_v36  ;;  %v13717_v42 = vcombine.low %v1127_v39, %v1128_v57  ;;  %v12502_v45 = vld [vmem:[#allocation9 + $0x118] sm:$0xff]   ;;  %v1483_v46 = vrot.slane %v1481_v37, 1  ;;  %3494 = vmatprep.mubr.bf16.mxu1 %v13715_v34  ;;  %v1173_v48 = vld [vmem:[#allocation2 + $0x18] sm:$0xe]  ;;  %v1493_v53 = vshll.u32 %v12462_v43, 16  ;;  %v12516_v20 = vld [vmem:[#allocation9 + $0x110] sm:$0xff]  }
  0xc6   : > { %v1192_v44 = vld [vmem:[#allocation2 + $0x28] sm:$0xf]  ;;  %v1723_v47 = vsel %vm1717_vm10, %v1721_v29, %v1722_v38  ;;  %v10439_v54 = vcombine.low %v1173_v48, %v1128_v57  ;;  %v1032_v55 = vld [vmem:[#allocation2 + $0x30] sm:$0xf]  ;;  %v1725_v11 = vrot.slane %v12462_v43, 1  ;;  %v12518_v35 = vld [vmem:[#allocation9 + $0x1f0] sm:$0xff]  }
  0xc7   : > { %11538 = vmatpush3.bf16.msra.mxu0 %v12490_v19  ;;  %v1130_v49 = vld [vmem:[#allocation2 + $0x28] sm:$0xf]  ;;  %v1486_v51 = vshrl.u32 %v13717_v42, 16  ;;  %v1488_v52 = vshll.u32 %v13717_v42, 16  ;;  %v1484_v58 = vsel %vm1460_vm6, %v1479_v41, %v1483_v46  ;;  %v1033_v62 = vsel %vm13664_vm9, %v746_v40, %v1032_v55  ;;  %v1036_v13 = vld [vmem:[#allocation2 + $0x38] sm:$0x1] }
  0xc8   : > { %11539 = vmatprep.subr.bf16.mxu0 %v12499_v32  ;;  %v12504_v56 = vld [vmem:[#allocation9 + $0x1f8] sm:$0xff]   ;;  %v1191_v60 = vld [vmem:[#allocation2 + $0x24] sm:$0xf]  ;;  %3333 = vmatprep.mubr.bf16.mxu0 %v1484_v58  ;;  %v1495_v2 = vrot.slane %v1493_v53, 1  ;;  %1034 = vst [vmem:[#allocation2 + $0x30] sm:$0xf] %v1033_v62  ;;  %v1037_v22 = vsel %vm13620_vm2, %v756_v61, %v1036_v13 }
  0xc9   : > { %v12505_v63 = vld [vmem:[#allocation9 + $0x1b8] sm:$0xff]   ;;  %v1490_v1 = vrot.slane %v1488_v52, 1  ;;  %v13727_v4 = vcombine.low %v1191_v60, %v1192_v44  ;;  %v1129_v5 = vld [vmem:[#allocation2 + $0x24] sm:$0xf]  ;;  %11643 = vmatprep.subr.bf16.mxu1 %v12504_v56  ;;  %3334 = vmatmul.mubr.bf16.gmra.mxu0 %v10406_v15  ;;  %v1724_v10 = vrot.slane %v10439_v54, 1  ;;  %v12527_v53 = vld [vmem:[#allocation9 + $0x148] sm:$0xff]  }
  0xca   : > { %v1174_v6 = vld [vmem:[#allocation2 + $0x24] sm:$0xe]  ;;  %3495 = vmatmul.mubr.bf16.gmra.mxu1 %v1723_v47  ;;  %v13729_v7 = vcombine.low %v1129_v5, %v1130_v49  ;;  %v13731_v8 = vld [vmem:[#allocation2 + $0x2c] ss:$0 sps:$4 sm:$0x11]   ;;  %v12530_v60 = vld [vmem:[#allocation9 + $0x108] sm:$0xff]  }
  0xcb   : > { %11540 = vmatpush3.bf16.msra.mxu0 %v12502_v45  ;;  %v10440_v3 = vcombine.low %v1174_v6, %v1130_v49  ;;  %v1491_v9 = vor.u32 %v1490_v1, %v1486_v51  ;;  %3502 = vmatprep.mubr.bf16.mxu1 %v13727_v4  ;;  %v1505_v18 = vshll.u32 %v13731_v8, 16  ;;  %v1194_v19 = vld [vmem:[#allocation2 + $0x34] sm:$0xf]  ;;  %v554_v24 = vld [vmem:[%s13586_s1 + $0x20] sm:$0xf]  ;;  %v1726_v30 = vsel %vm1717_vm10, %v1724_v10, %v1725_v11  ;;  %v12519_v47 = vld [vmem:[#allocation9 + $0x1b0] sm:$0xff]  }
  0xcc   : > { %11644 = vmatpush3.bf16.msra.mxu1 %v12505_v63  ;;  %v1498_v17 = vshrl.u32 %v13729_v7, 16  ;;  %v1500_v15 = vshll.u32 %v13729_v7, 16  ;;  %v13740_v23 = vld [vmem:[#allocation2 + $0x34] sm:$0xf]  ;;  %11541 = vmatprep.subr.bf16.mxu0 %v12513_v16  ;;  %1038 = vst [vmem:[#allocation2 + $0x38] sm:$0x1] %v1037_v22 }
  0xcd   : > { %v1496_v21 = vsel %vm1460_vm6, %v1491_v9, %v1495_v2  ;;  %v555_v25 = vld [vmem:[%s13586_s1 + $0x24] sm:$0xf]  ;;  %v1507_v26 = vrot.slane %v1505_v18, 1  ;;  %v1727_v57 = vrot.slane %v10440_v3, 1  ;;  %v601_v28 = vld [vmem:[#allocation2 + $0x3c] sm:$0x1]  ;;  %11645 = vmatprep.subr.bf16.mxu1 %v12518_v35 }
  0xce   : > { %3341 = vmatprep.mubr.bf16.mxu0 %v1496_v21  ;;  %v1502_v36 = vrot.slane %v1500_v15, 1  ;;  %v758_v29 = vshrl.u32 %v554_v24, 16  ;;  %v1728_v31 = vrot.slane %v13731_v8, 1  ;;  %v602_v32 = vsel %vm13620_vm2, 0, %v601_v28  ;;  %v651_v51 = vld [vmem:[#allocation2 + $0x44] sm:$0x1] }
  0xcf   : > { %11542 = vmatpush3.bf16.msra.mxu0 %v12516_v20  ;;  %v766_v33 = vshrl.u32 %v555_v25, 16  ;;  %v1193_v38 = vld [vmem:[#allocation2 + $0x30] sm:$0xf]  ;;  %603 = vst [vmem:[#allocation2 + $0x3c] sm:$0x1] %v602_v32  ;;  %v761_v40 = vshll.u32 %v554_v24, 16 }
  0xd0   : > { %v1503_v37 = vor.u32 %v1502_v36, %v1498_v17  ;;  %v1131_v39 = vld [vmem:[#allocation2 + $0x30] sm:$0xf]  ;;  %v769_v41 = vshll.u32 %v555_v25, 16  ;;  %v13748_v43 = vcombine.low %v1193_v38, %v1194_v19  ;;  %v760_v45 = vrot.slane %v758_v29, 7  ;;  %v556_v52 = vld [vmem:[%s13586_s1 + $0x28] sm:$0xf]  ;;  %11646 = vmatpush3.bf16.msra.mxu1 %v12519_v47  ;;  %11543 = vmatprep.subr.bf16.mxu0 %v12527_v53 }
  0xd1   : > { %v13751_v44 = vcombine.low %v1131_v39, %v13740_v23  ;;  %v1175_v46 = vld [vmem:[#allocation2 + $0x30] sm:$0xe]  ;;  %3342 = vmatmul.mubr.bf16.gmra.mxu0 %v13717_v42  ;;  %v13755_v49 = vrot.slane %v766_v33, 7  ;;  %v557_v58 = vld [vmem:[%s13586_s1 + $0x2c] sm:$0xf]  ;;  %v1729_v5 = vsel %vm1717_vm10, %v1727_v57, %v1728_v31  ;;  %v652_v9 = vsel %vm13636_vm5, 0, %v651_v51 }
  0xd2   : > { %3503 = vmatmul.mubr.bf16.gmra.mxu1 %v1726_v30  ;;  %v1508_v48 = vsel %vm1460_vm6, %v1503_v37, %v1507_v26  ;;  %v10441_v56 = vcombine.low %v1175_v46, %v13740_v23  ;;  %v763_v42 = vor.u32 %v761_v40, %v760_v45  ;;  %v764_v61 = vrot.slane %v760_v45, 4  ;;  %v604_v1 = vld [vmem:[#allocation2 + $0x48] sm:$0x1]  ;;  %v12532_v2 = vld [vmem:[#allocation9 + $0x1e8] sm:$0xff]   ;;  %v654_v13 = vld [vmem:[#allocation2 + $0x50] sm:$0x1] }
  0xd3   : > { %3349 = vmatprep.mubr.bf16.mxu0 %v1508_v48  ;;  %3510 = vmatprep.mubr.bf16.mxu1 %v13748_v43  ;;  %v1510_v54 = vshrl.u32 %v13751_v44, 16  ;;  %v1512_v55 = vshll.u32 %v13751_v44, 16  ;;  %v771_v62 = vor.u32 %v769_v41, %v13755_v49  ;;  %v773_v63 = vrot.slane %v13755_v49, 4  ;;  %v13766_v6 = vld [vmem:[#allocation2 + $0x38] ss:$0 sps:$4 sm:$0x11]  }
  0xd4   : > { %11544 = vmatpush3.bf16.msra.mxu0 %v12530_v60  ;;  %v605_v10 = vsel %vm13620_vm2, 0, %v604_v1  ;;  %v775_v11 = vshrl.u32 %v556_v52, 16  ;;  %11647 = vmatprep.subr.bf16.mxu1 %v12532_v2  ;;  %v12533_v16 = vld [vmem:[#allocation9 + $0x1a8] sm:$0xff]   ;;  %v1517_v15 = vshll.u32 %v13766_v6, 16  ;;  %v1730_v19 = vrot.slane %v10441_v56, 1  ;;  %v12539_v21 = vld [vmem:[#allocation9 + $0x1e0] sm:$0xff]  }
  0xd5   : > { %v1514_v8 = vrot.slane %v1512_v55, 1  ;;  %v772_v3 = vsel %vm13645_vm8, %v764_v61, %v771_v62  ;;  %653 = vst [vmem:[#allocation2 + $0x44] sm:$0x1] %v652_v9  ;;  %606 = vst [vmem:[#allocation2 + $0x48] sm:$0x1] %v605_v10  ;;  %v778_v20 = vshll.u32 %v556_v52, 16  ;;  %11648 = vmatpush3.bf16.msra.mxu1 %v12533_v16 }
  0xd6   : > { %v1039_v18 = vld [vmem:[#allocation2 + $0x3c] sm:$0xf]  ;;  %1042 = vst [vmem:[#allocation2 + $0x40] sm:$0xf] %v772_v3  ;;  %v777_v23 = vrot.slane %v775_v11, 7  ;;  %v783_v24 = vshrl.u32 %v557_v58, 16  ;;  %11649 = vmatprep.subr.bf16.mxu1 %v12539_v21 }
  0xd7   : > { %v1515_v17 = vor.u32 %v1514_v8, %v1510_v54  ;;  %v1040_v22 = vsel %vm13664_vm9, %v763_v42, %v1039_v18  ;;  %v786_v25 = vshll.u32 %v557_v58, 16  ;;  %v12542_v36 = vld [vmem:[#allocation9 + $0x1a0] sm:$0xff]   ;;  %v1519_v26 = vrot.slane %v1517_v15, 1  ;;  %v558_v28 = vld [vmem:[%s13586_s1 + $0x30] sm:$0xf]  ;;  %v12548_v53 = vld [vmem:[#allocation9 + $0x1d8] sm:$0xff]  }
  0xd8   : > { %1041 = vst [vmem:[#allocation2 + $0x3c] sm:$0xf] %v1040_v22  ;;  %v655_v57 = vsel %vm13636_vm5, 0, %v654_v13  ;;  %v781_v29 = vrot.slane %v777_v23, 4  ;;  %v785_v30 = vrot.slane %v783_v24, 7  ;;  %v1731_v35 = vrot.slane %v13766_v6, 1 }
  0xd9   : > { %3350 = vmatmul.mubr.bf16.gmra.mxu0 %v13729_v7  ;;  %656 = vst [vmem:[#allocation2 + $0x50] sm:$0x1] %v655_v57  ;;  %v559_v31 = vld [vmem:[%s13586_s1 + $0x34] sm:$0xf]  ;;  %v607_v32 = vld [vmem:[#allocation2 + $0x54] sm:$0x1]  ;;  %v1520_v33 = vsel %vm1460_vm6, %v1515_v17, %v1519_v26  ;;  %v780_v40 = vor.u32 %v778_v20, %v777_v23  ;;  %11650 = vmatpush3.bf16.msra.mxu1 %v12542_v36 }
  0xda   : > { %3511 = vmatmul.mubr.bf16.gmra.mxu1 %v1729_v5  ;;  %v608_v37 = vsel %vm13620_vm2, 0, %v607_v32  ;;  %v792_v38 = vshrl.u32 %v558_v28, 16  ;;  %v12543_v39 = vld [vmem:[#allocation9 + $0x140] sm:$0xff]   ;;  %3357 = vmatprep.mubr.bf16.mxu0 %v1520_v33  ;;  %v788_v41 = vor.u32 %v786_v25, %v785_v30  ;;  %v795_v7 = vshll.u32 %v558_v28, 16  ;;  %v657_v52 = vld [vmem:[#allocation2 + $0x5c] sm:$0x1] }
  0xdb   : > { %609 = vst [vmem:[#allocation2 + $0x54] sm:$0x1] %v608_v37  ;;  %v800_v45 = vshrl.u32 %v559_v31, 16  ;;  %v12546_v46 = vld [vmem:[#allocation9 + $0x100] sm:$0xff]   ;;  %v790_v47 = vrot.slane %v785_v30, 4  ;;  %v803_v51 = vshll.u32 %v559_v31, 16  ;;  %11545 = vmatprep.subr.bf16.mxu0 %v12543_v39  ;;  %11651 = vmatprep.subr.bf16.mxu1 %v12548_v53 }
  0xdc   : > { %v794_v48 = vrot.slane %v792_v38, 7  ;;  %v1043_v55 = vld [vmem:[#allocation2 + $0x44] sm:$0x1]  ;;  %v789_v58 = vsel %vm13645_vm8, %v781_v29, %v788_v41  ;;  %11546 = vmatpush3.bf16.msra.mxu0 %v12546_v46  ;;  %v1046_v42 = vld [vmem:[#allocation2 + $0x48] sm:$0xf]  ;;  %v658_v18 = vsel %vm13636_vm5, 0, %v657_v52 }
  0xdd   : > { %v1196_v54 = vld [vmem:[#allocation2 + $0x40] sm:$0xf]  ;;  %v1044_v60 = vsel %vm13620_vm2, %v773_v63, %v1043_v55  ;;  %1049 = vst [vmem:[#allocation2 + $0x4c] sm:$0xf] %v789_v58  ;;  %v13792_v62 = vrot.slane %v800_v45, 7  ;;  %v1047_v6 = vsel %vm13664_vm9, %v780_v40, %v1046_v42  ;;  %v1732_v63 = vsel %vm1717_vm10, %v1730_v19, %v1731_v35  ;;  %p16440_p8 = scmp.ne.s32.totalorder %s16156_s17, 0 }
  0xde   : > { %v1134_v56 = vld [vmem:[#allocation2 + $0x40] sm:$0xf]  ;;  %v798_v61 = vrot.slane %v794_v48, 4  ;;  %v13795_v1 = vld [vmem:[%s13586_s1 + $0x38] sm:$0xf]  ;;  %v797_v8 = vor.u32 %v795_v7, %v794_v48  ;;  %v16189_v14 = vshrl.u32 %v13701_v12, 16 }
  0xdf   : > { %v1195_v2 = vld [vmem:[#allocation2 + $0x3c] sm:$0xf]  ;;  %1045 = vst [vmem:[#allocation2 + $0x44] sm:$0x1] %v1044_v60  ;;  %v561_v3 = vld [vmem:[%s13586_s1 + $0x3c] sm:$0xf]  ;;  %v805_v13 = vor.u32 %v803_v51, %v13792_v62 }
  0xe0   : > { %v1133_v5 = vld [vmem:[#allocation2 + $0x3c] sm:$0xf]  ;;  %v13800_v49 = vcombine.low %v1195_v2, %v1196_v54  ;;  %1048 = vst [vmem:[#allocation2 + $0x48] sm:$0xf] %v1047_v6  ;;  %v1050_v11 = vld [vmem:[#allocation2 + $0x50] sm:$0x1] }
  0xe1   : > { %v13803_v9 = vcombine.low %v1133_v5, %v1134_v56  ;;  %v1176_v10 = vld [vmem:[#allocation2 + $0x3c] sm:$0xe]  ;;  %v610_v16 = vld [vmem:[#allocation2 + $0x60] sm:$0x1]  ;;  %3358 = vmatmul.mubr.bf16.gmra.mxu0 %v13751_v44  ;;  %v1051_v15 = vsel %vm13620_vm2, %v790_v47, %v1050_v11  ;;  %v660_v20 = vld [vmem:[#allocation2 + $0x68] sm:$0x1]  ;;  %v806_v22 = vsel %vm13645_vm8, %v798_v61, %v805_v13 }
  0xe2   : > { %v10442_v17 = vcombine.low %v1176_v10, %v1134_v56  ;;  %3518 = vmatprep.mubr.bf16.mxu1 %v13800_v49  ;;  %1052 = vst [vmem:[#allocation2 + $0x50] sm:$0x1] %v1051_v15  ;;  %v1053_v23 = vld [vmem:[#allocation2 + $0x54] sm:$0xf]  ;;  %659 = vst [vmem:[#allocation2 + $0x5c] sm:$0x1] %v658_v18 }
  0xe3   : > { %v1522_v19 = vshrl.u32 %v13803_v9, 16  ;;  %v1524_v21 = vshll.u32 %v13803_v9, 16  ;;  %v12549_v44 = vld [vmem:[#allocation9 + $0x198] sm:$0xff]   ;;  %3519 = vmatmul.mubr.bf16.gmra.mxu1 %v1732_v63  ;;  %v1054_v25 = vsel %vm13664_vm9, %v797_v8, %v1053_v23  ;;  %1056 = vst [vmem:[#allocation2 + $0x58] sm:$0xf] %v806_v22  ;;  %v611_v36 = vsel %vm13620_vm2, 0, %v610_v16 }
  0xe4   : > { %v1733_v24 = vrot.slane %v10442_v17, 1  ;;  %v809_v26 = vshrl.u32 %v13795_v1, 16  ;;  %v12550_v57 = vld [vmem:[#allocation9 + $0x1d0] sm:$0xff]   ;;  %1055 = vst [vmem:[#allocation2 + $0x54] sm:$0xf] %v1054_v25  ;;  %v812_v29 = vshll.u32 %v13795_v1, 16  ;;  %11652 = vmatpush3.bf16.msra.mxu1 %v12549_v44 }
  0xe5   : > { %v1526_v28 = vrot.slane %v1524_v21, 1  ;;  %612 = vst [vmem:[#allocation2 + $0x60] sm:$0x1] %v611_v36  ;;  %v817_v30 = vshrl.u32 %v561_v3, 16  ;;  %v820_v31 = vshll.u32 %v561_v3, 16  ;;  %v661_v37 = vsel %vm13636_vm5, 0, %v660_v20  ;;  %11653 = vmatprep.subr.bf16.mxu1 %v12550_v57 }
  0xe6   : > { %v1198_v32 = vld [vmem:[#allocation2 + $0x4c] sm:$0xf]  ;;  %v811_v35 = vrot.slane %v809_v26, 7  ;;  %v12481_v38 = vld [vmem:[#allocation2 + $0x44] ss:$0 sps:$4 sm:$0x11]  }
  0xe7   : > { %v1136_v33 = vld [vmem:[#allocation2 + $0x4c] sm:$0xf]  ;;  %v819_v39 = vrot.slane %v817_v30, 7  ;;  %662 = vst [vmem:[#allocation2 + $0x68] sm:$0x1] %v661_v37  ;;  %v807_v7 = vrot.slane %v13792_v62, 4  ;;  %v1527_v45 = vor.u32 %v1526_v28, %v1522_v19 }
  0xe8   : > { %v1197_v40 = vld [vmem:[#allocation2 + $0x48] sm:$0xf]  ;;  %v1529_v46 = vshll.u32 %v12481_v38, 16  ;;  %v1734_v48 = vrot.slane %v12481_v38, 1  ;;  %v815_v55 = vrot.slane %v811_v35, 4  ;;  %v814_v62 = vor.u32 %v812_v29, %v811_v35  ;;  %v12553_v17 = vld [vmem:[#allocation9 + $0x190] sm:$0xff]  }
  0xe9   : > { %v1135_v41 = vld [vmem:[#allocation2 + $0x48] sm:$0xf]  ;;  %v13825_v47 = vcombine.low %v1197_v40, %v1198_v32  ;;  %v12486_v53 = vld [vmem:[#allocation2 + $0x50] ss:$0 sps:$4 sm:$0x11]   ;;  %v822_v56 = vor.u32 %v820_v31, %v819_v39  ;;  %v824_v44 = vrot.slane %v819_v39, 4  ;;  %11654 = vmatpush3.bf16.msra.mxu1 %v12553_v17 }
  0xea   : > { %v1177_v51 = vld [vmem:[#allocation2 + $0x48] sm:$0xe]  ;;  %v13827_v52 = vcombine.low %v1135_v41, %v1136_v33  ;;  %v1531_v58 = vrot.slane %v1529_v46, 1  ;;  %v1735_v60 = vsel %vm1717_vm10, %v1733_v24, %v1734_v48  ;;  %v1200_v42 = vld [vmem:[#allocation2 + $0x58] sm:$0xf]  ;;  %v1541_v5 = vshll.u32 %v12486_v53, 16 }
  0xeb   : > { %v10443_v54 = vcombine.low %v1177_v51, %v1136_v33  ;;  %3526 = vmatprep.mubr.bf16.mxu1 %v13825_v47  ;;  %v1057_v61 = vld [vmem:[#allocation2 + $0x5c] sm:$0x1]  ;;  %v1199_v6 = vld [vmem:[#allocation2 + $0x54] sm:$0xf]  ;;  %v1737_v10 = vrot.slane %v12486_v53, 1  ;;  %v823_v19 = vsel %vm13645_vm8, %v815_v55, %v822_v56  ;;  %vm5139_vm14 = vcmask 1045509  }
  0xec   : > { %3527 = vmatmul.mubr.bf16.gmra.mxu1 %v1735_v60  ;;  %v1534_v1 = vshrl.u32 %v13827_v52, 16  ;;  %v1536_v2 = vshll.u32 %v13827_v52, 16  ;;  %v1532_v3 = vsel %vm1460_vm6, %v1527_v45, %v1531_v58  ;;  %v13834_v63 = vcombine.low %v1199_v6, %v1200_v42  ;;  %v1137_v13 = vld [vmem:[#allocation2 + $0x54] sm:$0xf]  ;;  %v562_v16 = vld [vmem:[%s13586_s1 + $0x40] sm:$0xf] }
  0xed   : > { %v1736_v8 = vrot.slane %v10443_v54, 1  ;;  %v1058_v11 = vsel %vm13620_vm2, %v807_v7, %v1057_v61  ;;  %3365 = vmatprep.mubr.bf16.mxu0 %v1532_v3  ;;  %v1543_v18 = vrot.slane %v1541_v5, 1  ;;  %v1138_v20 = vld [vmem:[#allocation2 + $0x58] sm:$0xf]  ;;  %v1060_v21 = vld [vmem:[#allocation2 + $0x60] sm:$0xf] }
  0xee   : > { %v1538_v15 = vrot.slane %v1536_v2, 1  ;;  %1059 = vst [vmem:[#allocation2 + $0x5c] sm:$0x1] %v1058_v11  ;;  %v563_v22 = vld [vmem:[%s13586_s1 + $0x44] sm:$0xf]  ;;  %3366 = vmatmul.mubr.bf16.gmra.mxu0 %v13803_v9  ;;  %3534 = vmatprep.mubr.bf16.mxu1 %v13834_v63  ;;  %v13844_v23 = vcombine.low %v1137_v13, %v1138_v20  ;;  %v1061_v26 = vsel %vm13664_vm9, %v814_v62, %v1060_v21  ;;  %v826_v29 = vshrl.u32 %v562_v16, 16 }
  0xef   : > { %1063 = vst [vmem:[#allocation2 + $0x64] sm:$0xf] %v823_v19  ;;  %v1178_v24 = vld [vmem:[#allocation2 + $0x54] sm:$0xe]  ;;  %v1064_v25 = vld [vmem:[#allocation2 + $0x68] sm:$0x1]  ;;  %v1738_v31 = vsel %vm1717_vm10, %v1736_v8, %v1737_v10 }
  0xf0   : > { %v1539_v36 = vor.u32 %v1538_v15, %v1534_v1  ;;  %v10444_v57 = vcombine.low %v1178_v24, %v1138_v20  ;;  %v613_v28 = vld [vmem:[#allocation2 + $0x6c] sm:$0x1]  ;;  %v12557_v30 = vld [vmem:[#allocation9 + $0x1c8] sm:$0xff]   ;;  %v1548_v9 = vshll.u32 %v13844_v23, 16  ;;  %1062 = vst [vmem:[#allocation2 + $0x60] sm:$0xf] %v1061_v26  ;;  %v1065_v32 = vsel %vm13620_vm2, %v824_v44, %v1064_v25 }
  0xf1   : > { %v614_v33 = vsel %vm13620_vm2, 0, %v613_v28  ;;  %v12558_v35 = vld [vmem:[#allocation9 + $0x188] sm:$0xff]   ;;  %v1546_v38 = vshrl.u32 %v13844_v23, 16  ;;  %1066 = vst [vmem:[#allocation2 + $0x68] sm:$0x1] %v1065_v32  ;;  %v828_v39 = vrot.slane %v826_v29, 7  ;;  %11655 = vmatprep.subr.bf16.mxu1 %v12557_v30 }
  0xf2   : > { %v1544_v37 = vsel %vm1460_vm6, %v1539_v36, %v1543_v18  ;;  %615 = vst [vmem:[#allocation2 + $0x6c] sm:$0x1] %v614_v33  ;;  %v829_v40 = vshll.u32 %v562_v16, 16  ;;  %v12559_v41 = vld [vmem:[#allocation9 + $0x1c0] sm:$0xff]   ;;  %v1550_v7 = vrot.slane %v1548_v9, 1  ;;  %v1739_v45 = vrot.slane %v10444_v57, 1  ;;  %11656 = vmatpush3.bf16.msra.mxu1 %v12558_v35 }
  0xf3   : > { %3373 = vmatprep.mubr.bf16.mxu0 %v1544_v37  ;;  %v834_v46 = vshrl.u32 %v563_v22, 16  ;;  %v837_v48 = vshll.u32 %v563_v22, 16  ;;  %v832_v51 = vrot.slane %v828_v39, 4  ;;  %v12561_v53 = vld [vmem:[#allocation9 + $0x180] sm:$0xff]   ;;  %11657 = vmatprep.subr.bf16.mxu1 %v12559_v41  ;;  %v564_v5 = vld [vmem:[%s13586_s1 + $0x48] sm:$0xf] }
  0xf4   : > { %3535 = vmatmul.mubr.bf16.gmra.mxu1 %v1738_v31  ;;  %v831_v60 = vor.u32 %v829_v40, %v828_v39  ;;  %v663_v42 = vld [vmem:[#allocation2 + $0x74] sm:$0x1]  ;;  %v1551_v61 = vor.u32 %v1550_v7, %v1546_v38  ;;  %v12562_v6 = vld [vmem:[#allocation9 + $0x238] sm:$0xff]   ;;  %v843_v19 = vshrl.u32 %v564_v5, 16  ;;  %v565_v24 = vld [vmem:[%s13586_s1 + $0x4c] sm:$0xf] }
  0xf5   : > { %v12493_v54 = vld [vmem:[#allocation2 + $0x5c] ss:$0 sps:$4 sm:$0x11]   ;;  %v13856_v55 = vrot.slane %v834_v46, 7  ;;  %12189 = vmatprep.subr.bf16.mxu0 %v12562_v6  ;;  %v664_v20 = vsel %vm13636_vm5, 0, %v663_v42  ;;  %v846_v35 = vshll.u32 %v564_v5, 16 }
  0xf6   : > { %v1202_v56 = vld [vmem:[#allocation2 + $0x64] sm:$0xf]  ;;  %3374 = vmatmul.mubr.bf16.gmra.mxu0 %v13827_v52  ;;  %v1553_v62 = vshll.u32 %v12493_v54, 16  ;;  %v1740_v1 = vrot.slane %v12493_v54, 1  ;;  %11658 = vmatpush3.bf16.msra.mxu1 %v12561_v53  ;;  %665 = vst [vmem:[#allocation2 + $0x74] sm:$0x1] %v664_v20 }
  0xf7   : > { %v1140_v58 = vld [vmem:[#allocation2 + $0x64] sm:$0xf]  ;;  %v839_v2 = vor.u32 %v837_v48, %v13856_v55  ;;  %v1201_v8 = vld [vmem:[#allocation2 + $0x60] sm:$0xf]  ;;  %v616_v25 = vld [vmem:[#allocation2 + $0x78] sm:$0x1] }
  0xf8   : > { %v1139_v3 = vld [vmem:[#allocation2 + $0x60] sm:$0xf]  ;;  %v1555_v10 = vrot.slane %v1553_v62, 1  ;;  %v13861_v11 = vcombine.low %v1201_v8, %v1202_v56  ;;  %v1741_v13 = vsel %vm1717_vm10, %v1739_v45, %v1740_v1  ;;  %v13864_v16 = vld [vmem:[#allocation2 + $0x68] ss:$0 sps:$4 sm:$0x11]  }
  0xf9   : > { %v13866_v52 = vcombine.low %v1139_v3, %v1140_v58  ;;  %v840_v17 = vsel %vm13645_vm8, %v832_v51, %v839_v2  ;;  %v1067_v15 = vld [vmem:[#allocation2 + $0x6c] sm:$0xf]  ;;  %v1179_v18 = vld [vmem:[#allocation2 + $0x60] sm:$0xe]  ;;  %v1565_v22 = vshll.u32 %v13864_v16, 16  ;;  %v841_v57 = vrot.slane %v13856_v55, 4 }
  0xfa   : > { %v1556_v21 = vsel %vm1460_vm6, %v1551_v61, %v1555_v10  ;;  %3542 = vmatprep.mubr.bf16.mxu1 %v13861_v11  ;;  %v1068_v44 = vsel %vm13664_vm9, %v831_v60, %v1067_v15  ;;  %1070 = vst [vmem:[#allocation2 + $0x70] sm:$0xf] %v840_v17  ;;  %v10445_v28 = vcombine.low %v1179_v18, %v1140_v58  ;;  %v666_v29 = vld [vmem:[#allocation2 + $0x80] sm:$0x1]  ;;  %v1743_v31 = vrot.slane %v13864_v16, 1  ;;  %s13318_s14 = smov [#allocation18]  }
  0xfb   : > { %3381 = vmatprep.mubr.bf16.mxu0 %v1556_v21  ;;  %v1558_v36 = vshrl.u32 %v13866_v52, 16  ;;  %v1560_v26 = vshll.u32 %v13866_v52, 16  ;;  %1069 = vst [vmem:[#allocation2 + $0x6c] sm:$0xf] %v1068_v44  ;;  %v1567_v30 = vrot.slane %v1565_v22, 1  ;;  %v617_v9 = vsel %vm13620_vm2, 0, %v616_v25 }
  0xfc   : > { %3543 = vmatmul.mubr.bf16.gmra.mxu1 %v1741_v13  ;;  %v845_v32 = vrot.slane %v843_v19, 7  ;;  %618 = vst [vmem:[#allocation2 + $0x78] sm:$0x1] %v617_v9  ;;  %v851_v37 = vshrl.u32 %v565_v24, 16  ;;  %v854_v38 = vshll.u32 %v565_v24, 16  ;;  %v1742_v39 = vrot.slane %v10445_v28, 1 }
  0xfd   : > { %v1562_v33 = vrot.slane %v1560_v26, 1  ;;  %v667_v40 = vsel %vm13636_vm5, 0, %v666_v29  ;;  %v566_v41 = vld [vmem:[%s13586_s1 + $0x50] sm:$0xf]  ;;  %v567_v7 = vld [vmem:[%s13586_s1 + $0x54] sm:$0xf] }
  0xfe   : > { %3382 = vmatmul.mubr.bf16.gmra.mxu0 %v13844_v23  ;;  %v849_v46 = vrot.slane %v845_v32, 4  ;;  %v853_v48 = vrot.slane %v851_v37, 7  ;;  %668 = vst [vmem:[#allocation2 + $0x80] sm:$0x1] %v667_v40  ;;  %v619_v51 = vld [vmem:[#allocation2 + $0x84] sm:$0x1]  ;;  %v848_v61 = vor.u32 %v846_v35, %v845_v32  ;;  %v1744_v10 = vsel %vm1717_vm10, %v1742_v39, %v1743_v31 }
  0xff   : > { %v1563_v45 = vor.u32 %v1562_v33, %v1558_v36  ;;  %v1929_v53 = vshll.u32 %v13701_v12, 16  ;;  %v620_v54 = vsel %vm13620_vm2, 0, %v619_v51  ;;  %v860_v55 = vshrl.u32 %v566_v41, 16  ;;  %v1071_v60 = vld [vmem:[#allocation2 + $0x74] sm:$0x1]  ;;  %s13228_s5 = sshll.u32 %s13318_s14, 4  ;;  %s13229_s5 = int_to_ptr.vmem [resolvable:$false] %s13228_s5 }
 0x100   : > { %v868_v56 = vshrl.u32 %v567_v7, 16  ;;  %v856_v62 = vor.u32 %v854_v38, %v853_v48  ;;  %621 = vst [vmem:[#allocation2 + $0x84] sm:$0x1] %v620_v54  ;;  %v1072_v2 = vsel %vm13620_vm2, %v841_v57, %v1071_v60  ;;  %v863_v6 = vshll.u32 %v566_v41, 16  ;;  %v669_v32 = vld [vmem:[#allocation2 + $0x8c] sm:$0x1] }
 0x101   : > { %v1568_v23 = vsel %vm1460_vm6, %v1563_v45, %v1567_v30  ;;  %v1204_v58 = vld [vmem:[#allocation2 + $0x70] sm:$0xf]  ;;  %v871_v8 = vshll.u32 %v567_v7, 16  ;;  %1073 = vst [vmem:[#allocation2 + $0x74] sm:$0x1] %v1072_v2  ;;  %v858_v15 = vrot.slane %v853_v48, 4 }
 0x102   : > { %v1142_v42 = vld [vmem:[#allocation2 + $0x70] sm:$0xf]  ;;  %3389 = vmatprep.mubr.bf16.mxu0 %v1568_v23  ;;  %v1203_v1 = vld [vmem:[#allocation2 + $0x6c] sm:$0xf]  ;;  %v857_v16 = vsel %vm13645_vm8, %v849_v46, %v856_v62  ;;  %v862_v19 = vrot.slane %v860_v55, 7  ;;  %v13902_v21 = vrot.slane %v868_v56, 7 }
 0x103   : > { %v1141_v5 = vld [vmem:[#allocation2 + $0x6c] sm:$0xf]  ;;  %v13895_v3 = vcombine.low %v1203_v1, %v1204_v58  ;;  %v1074_v18 = vld [vmem:[#allocation2 + $0x78] sm:$0xf]  ;;  %1077 = vst [vmem:[#allocation2 + $0x7c] sm:$0xf] %v857_v16 }
 0x104   : > { %v13898_v13 = vcombine.low %v1141_v5, %v1142_v42  ;;  %v1180_v17 = vld [vmem:[#allocation2 + $0x6c] sm:$0xe]  ;;  %v13905_v44 = vrot.slane %v1929_v53, 1  ;;  %v1075_v25 = vsel %vm13664_vm9, %v848_v61, %v1074_v18  ;;  %v865_v57 = vor.u32 %v863_v6, %v862_v19  ;;  %v568_v33 = vld [vmem:[%s13586_s1 + $0x58] sm:$0xf]  ;;  %s13230_s23 = scalar_lea.vmem %s13229_s5, 32 }
 0x105   : > { %v10446_v20 = vcombine.low %v1180_v17, %v1142_v42  ;;  %3550 = vmatprep.mubr.bf16.mxu1 %v13895_v3  ;;  %1076 = vst [vmem:[#allocation2 + $0x78] sm:$0xf] %v1075_v25  ;;  %v1078_v26 = vld [vmem:[#allocation2 + $0x80] sm:$0x1]  ;;  %v866_v28 = vrot.slane %v862_v19, 4  ;;  %v873_v29 = vor.u32 %v871_v8, %v13902_v21  ;;  %v670_v37 = vsel %vm13636_vm5, 0, %v669_v32 }
 0x106   : > { %v1572_v24 = vshll.u32 %v13898_v13, 16  ;;  %3390 = vmatmul.mubr.bf16.gmra.mxu0 %v13866_v52  ;;  %3551 = vmatmul.mubr.bf16.gmra.mxu1 %v1744_v10  ;;  %v1570_v36 = vshrl.u32 %v13898_v13, 16  ;;  %v1079_v9 = vsel %vm13620_vm2, %v858_v15, %v1078_v26  ;;  %v569_v38 = vld [vmem:[%s13586_s1 + $0x5c] sm:$0xf]  ;;  %v877_v39 = vshrl.u32 %v568_v33, 16 }
 0x107   : > { %v1745_v31 = vrot.slane %v10446_v20, 1  ;;  %1080 = vst [vmem:[#allocation2 + $0x80] sm:$0x1] %v1079_v9  ;;  %v874_v52 = vsel %vm13645_vm8, %v866_v28, %v873_v29  ;;  %v1081_v35 = vld [vmem:[#allocation2 + $0x84] sm:$0xf]  ;;  %v880_v7 = vshll.u32 %v568_v33, 16 }
 0x108   : > { %v1574_v30 = vrot.slane %v1572_v24, 1  ;;  %v1082_v40 = vsel %vm13664_vm9, %v865_v57, %v1081_v35  ;;  %1084 = vst [vmem:[#allocation2 + $0x88] sm:$0xf] %v874_v52  ;;  %671 = vst [vmem:[#allocation2 + $0x8c] sm:$0x1] %v670_v37  ;;  %v885_v45 = vshrl.u32 %v569_v38, 16 }
 0x109   : > { %v622_v41 = vld [vmem:[#allocation2 + $0x90] sm:$0x1]  ;;  %v672_v46 = vld [vmem:[#allocation2 + $0x98] sm:$0x1]  ;;  %1083 = vst [vmem:[#allocation2 + $0x84] sm:$0xf] %v1082_v40 }
 0x10a   : > { %v12507_v48 = vld [vmem:[#allocation2 + $0x74] ss:$0 sps:$4 sm:$0x11]   ;;  %v623_v51 = vsel %vm13620_vm2, 0, %v622_v41  ;;  %v1575_v53 = vor.u32 %v1574_v30, %v1570_v36  ;;  %v1206_v54 = vld [vmem:[#allocation2 + $0x7c] sm:$0xf] }
 0x10b   : > { %v1144_v55 = vld [vmem:[#allocation2 + $0x7c] sm:$0xf]  ;;  %624 = vst [vmem:[#allocation2 + $0x90] sm:$0x1] %v623_v51  ;;  %v879_v56 = vrot.slane %v877_v39, 7  ;;  %v887_v23 = vrot.slane %v885_v45, 7 }
 0x10c   : > { %v1577_v58 = vshll.u32 %v12507_v48, 16  ;;  %v1746_v60 = vrot.slane %v12507_v48, 1  ;;  %v888_v42 = vshll.u32 %v569_v38, 16  ;;  %v673_v61 = vsel %vm13636_vm5, 0, %v672_v46  ;;  %v1205_v2 = vld [vmem:[#allocation2 + $0x78] sm:$0xf] }
 0x10d   : > { %v1941_v62 = vshll.u32 %v13715_v34, 16  ;;  %v1953_v1 = vshll.u32 %v13727_v4, 16  ;;  %v1143_v5 = vld [vmem:[#allocation2 + $0x78] sm:$0xf]  ;;  %674 = vst [vmem:[#allocation2 + $0x98] sm:$0x1] %v673_v61  ;;  %v13930_v8 = vcombine.low %v1205_v2, %v1206_v54  ;;  %v882_v28 = vor.u32 %v880_v7, %v879_v56 }
 0x10e   : > { %v1579_v6 = vrot.slane %v1577_v58, 1  ;;  %v1747_v10 = vsel %vm1717_vm10, %v1745_v31, %v1746_v60  ;;  %v875_v16 = vrot.slane %v13902_v21, 4  ;;  %v1181_v17 = vld [vmem:[#allocation2 + $0x78] sm:$0xe]  ;;  %v13934_v15 = vcombine.low %v1143_v5, %v1144_v55  ;;  %v1235_v33 = vld [vmem:[#allocation2 + $0xc] sm:$0xe] }
 0x10f   : > { %v12512_v18 = vld [vmem:[#allocation2 + $0x80] ss:$0 sps:$4 sm:$0x11]   ;;  %v10447_v20 = vcombine.low %v1181_v17, %v1144_v55  ;;  %v883_v19 = vrot.slane %v879_v56, 4  ;;  %v890_v24 = vor.u32 %v888_v42, %v887_v23  ;;  %v1965_v25 = vshll.u32 %v13748_v43, 16  ;;  %3558 = vmatprep.mubr.bf16.mxu1 %v13930_v8 }
 0x110   : > { %v1580_v36 = vsel %vm1460_vm6, %v1575_v53, %v1579_v6  ;;  %v1208_v26 = vld [vmem:[#allocation2 + $0x88] sm:$0xf]  ;;  %v1085_v57 = vld [vmem:[#allocation2 + $0x8c] sm:$0x1]  ;;  %v892_v29 = vrot.slane %v887_v23, 4  ;;  %3559 = vmatmul.mubr.bf16.gmra.mxu1 %v1747_v10  ;;  %v1582_v21 = vshrl.u32 %v13934_v15, 16 }
 0x111   : > { %3397 = vmatprep.mubr.bf16.mxu0 %v1580_v36  ;;  %v1584_v30 = vshll.u32 %v13934_v15, 16  ;;  %v1589_v31 = vshll.u32 %v12512_v18, 16  ;;  %v1207_v9 = vld [vmem:[#allocation2 + $0x84] sm:$0xf]  ;;  %v1748_v32 = vrot.slane %v10447_v20, 1  ;;  %v1749_v35 = vrot.slane %v12512_v18, 1 }
 0x112   : > { %3398 = vmatmul.mubr.bf16.gmra.mxu0 %v13898_v13  ;;  %v13942_v52 = vcombine.low %v1207_v9, %v1208_v26  ;;  %v1086_v37 = vsel %vm13620_vm2, %v875_v16, %v1085_v57  ;;  %v1145_v38 = vld [vmem:[#allocation2 + $0x84] sm:$0xf]  ;;  %v891_v39 = vsel %vm13645_vm8, %v883_v19, %v890_v24  ;;  %v1146_v7 = vld [vmem:[#allocation2 + $0x88] sm:$0xf]  ;;  %v1088_v45 = vld [vmem:[#allocation2 + $0x90] sm:$0xf] }
 0x113   : > { %v1586_v40 = vrot.slane %v1584_v30, 1  ;;  %v1591_v41 = vrot.slane %v1589_v31, 1  ;;  %1087 = vst [vmem:[#allocation2 + $0x8c] sm:$0x1] %v1086_v37  ;;  %1091 = vst [vmem:[#allocation2 + $0x94] sm:$0xf] %v891_v39  ;;  %v13950_v46 = vcombine.low %v1145_v38, %v1146_v7  ;;  %v1089_v48 = vsel %vm13664_vm9, %v882_v28, %v1088_v45 }
 0x114   : > { %v1977_v13 = vshll.u32 %v13800_v49, 16  ;;  %3566 = vmatprep.mubr.bf16.mxu1 %v13942_v52  ;;  %v1182_v51 = vld [vmem:[#allocation2 + $0x84] sm:$0xe]  ;;  %v1092_v53 = vld [vmem:[#allocation2 + $0x98] sm:$0x1]  ;;  %v1750_v2 = vsel %vm1717_vm10, %v1748_v32, %v1749_v35  ;;  %v16191_v12 = vshll.u32 %v13825_v47, 16 }
 0x115   : > { %v13025_v54 = vld [vmem:[#allocation2 + $0x10] sm:$0xf]  ;;  %v1587_v56 = vor.u32 %v1586_v40, %v1582_v21  ;;  %1090 = vst [vmem:[#allocation2 + $0x90] sm:$0xf] %v1089_v48  ;;  %v10448_v23 = vcombine.low %v1182_v51, %v1146_v7  ;;  %v1093_v58 = vsel %vm13620_vm2, %v892_v29, %v1092_v53  ;;  %v571_v42 = vld [vmem:[%s13586_s1 + $0x64] sm:$0xf] }
 0x116   : > { %v10485_v55 = vcombine.low %v1235_v33, %v13025_v54  ;;  %v570_v60 = vld [vmem:[%s13586_s1 + $0x60] sm:$0xf]  ;;  %v625_v61 = vld [vmem:[#allocation2 + $0x9c] sm:$0x1]  ;;  %v1596_v5 = vshll.u32 %v13950_v46, 16  ;;  %v902_v20 = vshrl.u32 %v571_v42, 16 }
 0x117   : > { %1094 = vst [vmem:[#allocation2 + $0x98] sm:$0x1] %v1093_v58  ;;  %v626_v6 = vsel %vm13620_vm2, 0, %v625_v61  ;;  %v894_v10 = vshrl.u32 %v570_v60, 16  ;;  %v1592_v17 = vsel %vm1460_vm6, %v1587_v56, %v1591_v41  ;;  %v897_v18 = vshll.u32 %v570_v60, 16 }
 0x118   : > { %627 = vst [vmem:[#allocation2 + $0x9c] sm:$0x1] %v626_v6  ;;  %3405 = vmatprep.mubr.bf16.mxu0 %v1592_v17  ;;  %v1594_v19 = vshrl.u32 %v13950_v46, 16  ;;  %v1598_v24 = vrot.slane %v1596_v5, 1  ;;  %v905_v26 = vshll.u32 %v571_v42, 16  ;;  %3567 = vmatmul.mubr.bf16.gmra.mxu1 %v1750_v2  ;;  %v1751_v57 = vrot.slane %v10448_v23, 1 }
 0x119   : > { %v896_v36 = vrot.slane %v894_v10, 7  ;;  %v13965_v28 = vrot.slane %v902_v20, 7  ;;  %v13967_v29 = vld [vmem:[#allocation2 + $0x18] sm:$0xe]  ;;  %v13972_v37 = vrot.slane %v10485_v55, 1  ;;  %vm5142_vm15 = vcmask 1046534  }
 0x11a   : > { %3406 = vmatmul.mubr.bf16.gmra.mxu0 %v13934_v15  ;;  %v12521_v21 = vld [vmem:[#allocation2 + $0x8c] ss:$0 sps:$4 sm:$0x11]   ;;  %v1210_v9 = vld [vmem:[#allocation2 + $0x94] sm:$0xf]  ;;  %v1599_v39 = vor.u32 %v1598_v24, %v1594_v19  ;;  %vm5145_vm0 = vcmask 1047559  }
 0x11b   : > { %v900_v30 = vrot.slane %v896_v36, 4  ;;  %v1148_v32 = vld [vmem:[#allocation2 + $0x94] sm:$0xf]  ;;  %v899_v33 = vor.u32 %v897_v18, %v896_v36  ;;  %v907_v35 = vor.u32 %v905_v26, %v13965_v28  ;;  %v1601_v40 = vshll.u32 %v12521_v21, 16  ;;  %v13026_v60 = vld [vmem:[#allocation2 + $0x1c] sm:$0xf] }
 0x11c   : > { %v1209_v41 = vld [vmem:[#allocation2 + $0x90] sm:$0xf]  ;;  %v1752_v7 = vrot.slane %v12521_v21, 1  ;;  %v10486_v42 = vcombine.low %v13967_v29, %v13026_v60  ;;  %v675_v6 = vld [vmem:[#allocation2 + $0xa4] sm:$0x1]  ;;  %vm7114_vm4 = vcmask 1042432  }
 0x11d   : > { %v13975_v45 = vcombine.low %v1209_v41, %v1210_v9  ;;  %v1147_v15 = vld [vmem:[#allocation2 + $0x90] sm:$0xf]  ;;  %v908_v48 = vsel %vm13645_vm8, %v900_v30, %v907_v35  ;;  %v1603_v53 = vrot.slane %v1601_v40, 1  ;;  %v1237_v10 = vld [vmem:[#allocation2 + $0x24] sm:$0xe]  ;;  %vm13316_vm7 = vmmov 0  }
 0x11e   : > { %v1183_v51 = vld [vmem:[#allocation2 + $0x90] sm:$0xe]  ;;  %v1753_v54 = vsel %vm1717_vm10, %v1751_v57, %v1752_v7  ;;  %v13980_v56 = vcombine.low %v1147_v15, %v1148_v32  ;;  %v12526_v55 = vld [vmem:[#allocation2 + $0x98] ss:$0 sps:$4 sm:$0x11]   ;;  %v676_v57 = vsel %vm13636_vm5, 0, %v675_v6 }
 0x11f   : > { %16178 = vst [vmem:[#allocation30_spill] sm:$0xff] %v13975_v45  ;;  %v1095_v23 = vld [vmem:[#allocation2 + $0x9c] sm:$0xf]  ;;  %1098 = vst [vmem:[#allocation2 + $0xa0] sm:$0xf] %v908_v48  ;;  %v10449_v58 = vcombine.low %v1183_v51, %v1148_v32  ;;  %3574 = vmatprep.mubr.bf16.mxu1 %v13975_v45  ;;  %v1604_v17 = vsel %vm1460_vm6, %v1599_v39, %v1603_v53  ;;  %v1613_v19 = vshll.u32 %v12526_v55, 16 }
 0x120   : > { %v1096_v5 = vsel %vm13664_vm9, %v899_v33, %v1095_v23  ;;  %v1606_v18 = vshrl.u32 %v13980_v56, 16  ;;  %v1608_v20 = vshll.u32 %v13980_v56, 16  ;;  %v572_v24 = vld [vmem:[%s13586_s1 + $0x68] sm:$0xf]  ;;  %3413 = vmatprep.mubr.bf16.mxu0 %v1604_v17  ;;  %3575 = vmatmul.mubr.bf16.gmra.mxu1 %v1753_v54  ;;  %v573_v29 = vld [vmem:[%s13586_s1 + $0x6c] sm:$0xf] }
 0x121   : > { %1097 = vst [vmem:[#allocation2 + $0x9c] sm:$0xf] %v1096_v5  ;;  %v1754_v26 = vrot.slane %v10449_v58, 1  ;;  %v911_v21 = vshrl.u32 %v572_v24, 16  ;;  %v1615_v9 = vrot.slane %v1613_v19, 1  ;;  %v1755_v32 = vrot.slane %v12526_v55, 1 }
 0x122   : > { %3414 = vmatmul.mubr.bf16.gmra.mxu0 %v13950_v46  ;;  %v1610_v30 = vrot.slane %v1608_v20, 1  ;;  %677 = vst [vmem:[#allocation2 + $0xa4] sm:$0x1] %v676_v57  ;;  %v628_v33 = vld [vmem:[#allocation2 + $0xa8] sm:$0x1]  ;;  %v919_v35 = vshrl.u32 %v573_v29, 16 }
 0x123   : > { %v629_v39 = vsel %vm13620_vm2, 0, %v628_v33  ;;  %v913_v40 = vrot.slane %v911_v21, 7  ;;  %v922_v41 = vshll.u32 %v573_v29, 16  ;;  %v914_v15 = vshll.u32 %v572_v24, 16  ;;  %v678_v51 = vld [vmem:[#allocation2 + $0xb0] sm:$0x1] }
 0x124   : > { %v1611_v7 = vor.u32 %v1610_v30, %v1606_v18  ;;  %630 = vst [vmem:[#allocation2 + $0xa8] sm:$0x1] %v629_v39  ;;  %v921_v48 = vrot.slane %v919_v35, 7  ;;  %v13027_v53 = vld [vmem:[#allocation2 + $0x28] sm:$0xf]  ;;  %v679_v55 = vsel %vm13636_vm5, 0, %v678_v51 }
 0x125   : > { %v10487_v54 = vcombine.low %v1237_v10, %v13027_v53  ;;  %v917_v58 = vrot.slane %v913_v40, 4  ;;  %v909_v5 = vrot.slane %v13965_v28, 4  ;;  %680 = vst [vmem:[#allocation2 + $0xb0] sm:$0x1] %v679_v55  ;;  %v14005_v17 = vrot.slane %v10486_v42, 1 }
 0x126   : > { %v13999_v23 = vld [vmem:[#allocation2 + $0xa0] sm:$0xf]  ;;  %v1616_v60 = vsel %vm1460_vm6, %v1611_v7, %v1615_v9  ;;  %v924_v6 = vor.u32 %v922_v41, %v921_v48  ;;  %v1756_v10 = vsel %vm1717_vm10, %v1754_v26, %v1755_v32  ;;  %v14011_v24 = vrot.slane %v1941_v62, 1  ;;  %v575_v9 = vld [vmem:[%s13586_s1 + $0x74] sm:$0xf] }
 0x127   : > { %v1150_v46 = vld [vmem:[#allocation2 + $0xa0] sm:$0xf]  ;;  %3421 = vmatprep.mubr.bf16.mxu0 %v1616_v60  ;;  %v916_v29 = vor.u32 %v914_v15, %v913_v40  ;;  %v926_v33 = vrot.slane %v921_v48, 4  ;;  %v631_v35 = vld [vmem:[#allocation2 + $0xb4] sm:$0x1]  ;;  %v14027_v39 = vrot.slane %v10487_v54, 1 }
 0x128   : > { %v1211_v18 = vld [vmem:[#allocation2 + $0x9c] sm:$0xf]  ;;  %v925_v42 = vsel %vm13645_vm8, %v917_v58, %v924_v6  ;;  %v574_v26 = vld [vmem:[%s13586_s1 + $0x70] sm:$0xf]  ;;  %v632_v7 = vsel %vm13620_vm2, 0, %v631_v35  ;;  %v936_v54 = vshrl.u32 %v575_v9, 16 }
 0x129   : > { %v1149_v20 = vld [vmem:[#allocation2 + $0x9c] sm:$0xf]  ;;  %v14014_v57 = vcombine.low %v1211_v18, %v13999_v23  ;;  %v1099_v30 = vld [vmem:[#allocation2 + $0xa4] sm:$0x1]  ;;  %1105 = vst [vmem:[#allocation2 + $0xac] sm:$0xf] %v925_v42 }
 0x12a   : > { %v14016_v28 = vcombine.low %v1149_v20, %v1150_v46  ;;  %v1184_v21 = vld [vmem:[#allocation2 + $0x9c] sm:$0xe]  ;;  %3422 = vmatmul.mubr.bf16.gmra.mxu0 %v13980_v56  ;;  %v1100_v62 = vsel %vm13620_vm2, %v909_v5, %v1099_v30  ;;  %v928_v15 = vshrl.u32 %v574_v26, 16  ;;  %v1238_v56 = vld [vmem:[#allocation2 + $0x30] sm:$0xe]  ;;  %v931_v48 = vshll.u32 %v574_v26, 16 }
 0x12b   : > { %16179 = vst [vmem:[#allocation31_spill] sm:$0xff] %v14014_v57  ;;  %3582 = vmatprep.mubr.bf16.mxu1 %v14014_v57  ;;  %1101 = vst [vmem:[#allocation2 + $0xa4] sm:$0x1] %v1100_v62  ;;  %v1102_v40 = vld [vmem:[#allocation2 + $0xa8] sm:$0xf]  ;;  %v10450_v41 = vcombine.low %v1184_v21, %v1150_v46  ;;  %v939_v5 = vshll.u32 %v575_v9, 16 }
 0x12c   : > { %3583 = vmatmul.mubr.bf16.gmra.mxu1 %v1756_v10  ;;  %v1620_v53 = vshll.u32 %v14016_v28, 16  ;;  %v1103_v58 = vsel %vm13664_vm9, %v916_v29, %v1102_v40  ;;  %633 = vst [vmem:[#allocation2 + $0xb4] sm:$0x1] %v632_v7  ;;  %v1106_v60 = vld [vmem:[#allocation2 + $0xb0] sm:$0x1]  ;;  %v930_v46 = vrot.slane %v928_v15, 7 }
 0x12d   : > { %1104 = vst [vmem:[#allocation2 + $0xa8] sm:$0xf] %v1103_v58  ;;  %v14038_v6 = vrot.slane %v1953_v1, 1  ;;  %v2073_v18 = vshll.u32 %v14014_v57, 16  ;;  %v1107_v10 = vsel %vm13620_vm2, %v926_v33, %v1106_v60  ;;  %v14043_v20 = vrot.slane %v936_v54, 7 }
 0x12e   : > { %v1618_v29 = vshrl.u32 %v14016_v28, 16  ;;  %1108 = vst [vmem:[#allocation2 + $0xb0] sm:$0x1] %v1107_v10  ;;  %v934_v42 = vrot.slane %v930_v46, 4  ;;  %v1622_v21 = vrot.slane %v1620_v53, 1  ;;  %v1757_v26 = vrot.slane %v10450_v41, 1 }
 0x12f   : > { %v933_v9 = vor.u32 %v931_v48, %v930_v46  ;;  %v941_v62 = vor.u32 %v939_v5, %v14043_v20  ;;  %v13028_v1 = vld [vmem:[#allocation2 + $0x34] sm:$0xf]  ;;  %v14049_v7 = vrot.slane %v2073_v18, 1  ;;  %v681_v54 = vld [vmem:[#allocation2 + $0xbc] sm:$0x1] }
 0x130   : > { %v14046_v30 = vld [vmem:[#allocation2 + $0xac] sm:$0xf]  ;;  %v10488_v35 = vcombine.low %v1238_v56, %v13028_v1  ;;  %v1239_v60 = vld [vmem:[#allocation2 + $0x3c] sm:$0xe]  ;;  %v1623_v53 = vor.u32 %v1622_v21, %v1618_v29  ;;  %v682_v18 = vsel %vm13636_vm5, 0, %v681_v54  ;;  %v14068_v54 = vrot.slane %v1965_v25, 1 }
 0x131   : > { %v1152_v40 = vld [vmem:[#allocation2 + $0xac] sm:$0xf]  ;;  %16180 = vst [vmem:[#allocation32_spill] sm:$0xff] %v14049_v7  ;;  %v942_v33 = vsel %vm13645_vm8, %v934_v42, %v941_v62  ;;  %683 = vst [vmem:[#allocation2 + $0xbc] sm:$0x1] %v682_v18 }
 0x132   : > { %v12535_v15 = vld [vmem:[#allocation2 + $0xa4] ss:$0 sps:$4 sm:$0x11]   ;;  %1112 = vst [vmem:[#allocation2 + $0xb8] sm:$0xf] %v942_v33  ;;  %v14060_v42 = vrot.slane %v10488_v35, 1 }
 0x133   : > { %v1109_v58 = vld [vmem:[#allocation2 + $0xb4] sm:$0xf]  ;;  %v1625_v10 = vshll.u32 %v12535_v15, 16  ;;  %v1758_v41 = vrot.slane %v12535_v15, 1  ;;  %v1254_v31 = vld [vmem:[#allocation2 + $0x24] sm:$0xf] }
 0x134   : > { %v1213_v0 = vld [vmem:[#allocation2 + $0xa8] sm:$0xf]  ;;  %v1110_v48 = vsel %vm13664_vm9, %v933_v9, %v1109_v58  ;;  %v13029_v9 = vld [vmem:[#allocation2 + $0x40] sm:$0xf]  ;;  %vm6984_vm1 = vsmask.f32 7946 }
 0x135   : > { %v14056_v56 = vcombine.low %v1213_v0, %v14046_v30  ;;  %v1151_v46 = vld [vmem:[#allocation2 + $0xa8] sm:$0xf]  ;;  %1111 = vst [vmem:[#allocation2 + $0xb4] sm:$0xf] %v1110_v48  ;;  %v1627_v62 = vrot.slane %v1625_v10, 1  ;;  %v1759_v29 = vsel %vm1717_vm10, %v1757_v26, %v1758_v41  ;;  %v10489_v33 = vcombine.low %v1239_v60, %v13029_v9  ;;  %vm15733_vm3 = vmand %vm5130_vm11, %vm6984_vm1 }
 0x136   : > { %v1185_v5 = vld [vmem:[#allocation2 + $0xa8] sm:$0xe]  ;;  %v10419_v21 = vcombine.low %v1151_v46, %v1152_v40  ;;  %v12541_v1 = vld [vmem:[#allocation2 + $0xb0] ss:$0 sps:$4 sm:$0x11]  }
 0x137   : > { %16181 = vst [vmem:[#allocation33_spill] sm:$0xff] %v14056_v56  ;;  %v10451_v15 = vcombine.low %v1185_v5, %v1152_v40  ;;  %3590 = vmatprep.mubr.bf16.mxu1 %v14056_v56  ;;  %v576_v0 = vld [vmem:[%s13586_s1 + $0x78] sm:$0xf]  ;;  %v1628_v35 = vsel %vm1460_vm6, %v1623_v53, %v1627_v62  ;;  %v1637_v41 = vshll.u32 %v12541_v1, 16  ;;  %v943_v40 = vrot.slane %v14043_v20, 4 }
 0x138   : > { %3591 = vmatmul.mubr.bf16.gmra.mxu1 %v1759_v29  ;;  %v1630_v26 = vshrl.u32 %v10419_v21, 16  ;;  %v1632_v10 = vshll.u32 %v10419_v21, 16  ;;  %3429 = vmatprep.mubr.bf16.mxu0 %v1628_v35  ;;  %v1761_v60 = vrot.slane %v12541_v1, 1  ;;  %v577_v46 = vld [vmem:[%s13586_s1 + $0x7c] sm:$0xf]  ;;  %v945_v18 = vshrl.u32 %v576_v0, 16 }
 0x139   : > { %v1760_v48 = vrot.slane %v10451_v15, 1  ;;  %v634_v5 = vld [vmem:[#allocation2 + $0xc0] sm:$0x1]  ;;  %3430 = vmatmul.mubr.bf16.gmra.mxu0 %v14016_v28  ;;  %v1639_v55 = vrot.slane %v1637_v41, 1  ;;  %v14074_v25 = vld [vmem:[#allocation2 + $0xb8] sm:$0xf] }
 0x13a   : > { %v1634_v9 = vrot.slane %v1632_v10, 1  ;;  %v1154_v32 = vld [vmem:[#allocation2 + $0xb8] sm:$0xf]  ;;  %v635_v53 = vsel %vm13620_vm2, 0, %v634_v5  ;;  %v947_v62 = vrot.slane %v945_v18, 7  ;;  %v14078_v29 = vrot.slane %v10489_v33, 1 }
 0x13b   : > { %v1240_v35 = vld [vmem:[#allocation2 + $0x48] sm:$0xe]  ;;  %636 = vst [vmem:[#allocation2 + $0xc0] sm:$0x1] %v635_v53  ;;  %v948_v36 = vshll.u32 %v576_v0, 16  ;;  %v2085_v28 = vshll.u32 %v14056_v56, 16  ;;  %v1762_v41 = vsel %vm1717_vm10, %v1760_v48, %v1761_v60 }
 0x13c   : > { %v1635_v20 = vor.u32 %v1634_v9, %v1630_v26  ;;  %v1215_v15 = vld [vmem:[#allocation2 + $0xb4] sm:$0xf]  ;;  %v1113_v61 = vld [vmem:[#allocation2 + $0xbc] sm:$0x1]  ;;  %v953_v18 = vshrl.u32 %v577_v46, 16  ;;  %v14093_v0 = vrot.slane %v1977_v13, 1 }
 0x13d   : > { %v1153_v1 = vld [vmem:[#allocation2 + $0xb4] sm:$0xf]  ;;  %v14083_v10 = vcombine.low %v1215_v15, %v14074_v25  ;;  %v1114_v26 = vsel %vm13620_vm2, %v943_v40, %v1113_v61  ;;  %v951_v60 = vrot.slane %v947_v62, 4  ;;  %v956_v61 = vshll.u32 %v577_v46, 16  ;;  %v13030_v40 = vld [vmem:[#allocation2 + $0x4c] sm:$0xf] }
 0x13e   : > { %v14086_v5 = vcombine.low %v1153_v1, %v1154_v32  ;;  %v1640_v33 = vsel %vm1460_vm6, %v1635_v20, %v1639_v55  ;;  %1115 = vst [vmem:[#allocation2 + $0xbc] sm:$0x1] %v1114_v26  ;;  %v950_v55 = vor.u32 %v948_v36, %v947_v62  ;;  %v14099_v20 = vrot.slane %v953_v18, 7  ;;  %v1186_v1 = vld [vmem:[#allocation2 + $0xb4] sm:$0xe]  ;;  %v13032_v56 = vld [vmem:[#allocation9 + $0x238] sm:$0xff]  }
 0x13f   : > { %16182 = vst [vmem:[#allocation34_spill] sm:$0xff] %v14083_v10  ;;  %3437 = vmatprep.mubr.bf16.mxu0 %v1640_v33  ;;  %v2097_v53 = vshll.u32 %v14083_v10, 16  ;;  %3598 = vmatprep.mubr.bf16.mxu1 %v14083_v10  ;;  %v10490_v15 = vcombine.low %v1240_v35, %v13030_v40  ;;  %v14101_v13 = vrot.slane %v2085_v28, 1  ;;  %v12560_v9 = vld [vmem:[#allocation2 + $0x14] ss:$0 sps:$4 sm:$0x11]   ;;  %v10452_v28 = vcombine.low %v1186_v1, %v1154_v32 }
 0x140   : > { %v1644_v48 = vshll.u32 %v14086_v5, 16  ;;  %3599 = vmatmul.mubr.bf16.gmra.mxu1 %v1762_v41  ;;  %16183 = vst [vmem:[#allocation35_spill] sm:$0xff] %v14099_v20  ;;  %v1642_v2 = vshrl.u32 %v14086_v5, 16  ;;  %v958_v26 = vor.u32 %v956_v61, %v14099_v20  ;;  %v1241_v62 = vld [vmem:[#allocation2 + $0x54] sm:$0xe]  ;;  %v1934_v33 = vshll.u32 %v12560_v9, 16 }
 0x141   : > { %16184 = vst [vmem:[#allocation36_spill] sm:$0xff] %v14101_v13  ;;  %3438 = vmatmul.mubr.bf16.gmra.mxu0 %v10419_v21  ;;  %v14106_v38 = vrot.slane %v2097_v53, 1  ;;  %v1252_v18 = vld [vmem:[#allocation2 + $0x18] sm:$0xf]  ;;  %v14112_v21 = vld [vmem:[#allocation2 + $0x1c] sm:$0xf] }
 0x142   : > { %v1646_v41 = vrot.slane %v1644_v48, 1  ;;  %v1116_v36 = vld [vmem:[#allocation2 + $0xc0] sm:$0xf]  ;;  %v959_v46 = vsel %vm13645_vm8, %v951_v60, %v958_v26  ;;  %16186 = vst [vmem:[#allocation38_spill] sm:$0xff] %v14112_v21  ;;  %v14115_v40 = vcombine.low %v1252_v18, %v14112_v21  ;;  %v14119_v48 = vrot.slane %v10490_v15, 1  ;;  %s544_s1 = scalar_lea.vmem [#allocation18], %s13582_s27 }
 0x143   : > { %16185 = vst [vmem:[#allocation37_spill] sm:$0xff] %v14106_v38  ;;  %v1117_v35 = vsel %vm13664_vm9, %v950_v55, %v1116_v36  ;;  %1119 = vst [vmem:[#allocation2 + $0xc4] sm:$0xf] %v959_v46  ;;  %v14117_v53 = vld [vmem:[#allocation2 + $0x20] ss:$0 sps:$4 sm:$0x11]   ;;  %v1932_v38 = vor.u32 %v13905_v44, %v16189_v14 }
 0x144   : > { %1118 = vst [vmem:[#allocation2 + $0xc0] sm:$0xf] %v1117_v35  ;;  %16187 = vst [vmem:[#allocation39_spill] sm:$0xff] %v14117_v53  ;;  %v2391_v60 = vshrl.u32 %v14115_v40, 16  ;;  %v2393_v32 = vshll.u32 %v14115_v40, 16  ;;  %v2398_v55 = vshll.u32 %v14117_v53, 16  ;;  %v1647_v1 = vor.u32 %v1646_v41, %v1642_v2 }
 0x145   : > { %v12552_v61 = vld [vmem:[#allocation2 + $0xbc] ss:$0 sps:$4 sm:$0x11]   ;;  %v1763_v36 = vrot.slane %v10452_v28, 1  ;;  %v2183_v46 = vrot.slane %v12560_v9, 1  ;;  %v1936_v59 = vrot.slane %v1934_v33, 1 }
 0x146   : > { %v1649_v26 = vshll.u32 %v12552_v61, 16  ;;  %v12565_v35 = vld [vmem:[#allocation2 + $0x20] ss:$0 sps:$4 sm:$0x11]   ;;  %v13031_v18 = vld [vmem:[#allocation2 + $0x58] sm:$0xf] }
 0x147   : > { %v10491_v58 = vcombine.low %v1241_v62, %v13031_v18  ;;  %v1764_v51 = vrot.slane %v12552_v61, 1  ;;  %v2395_v15 = vrot.slane %v2393_v32, 1  ;;  %v14125_v19 = vld [vmem:[#allocation2 + $0x28] sm:$0xf]  ;;  %v2400_v22 = vrot.slane %v2398_v55, 1  ;;  %s10262_s7 = sshll.u32 %s544_s1, 4  ;;  %s10263_s7 = int_to_ptr.vmem [resolvable:$true] %s10262_s7 }
 0x148   : > { %16188 = vst [vmem:[#allocation40_spill] sm:$0xff] %v14125_v19  ;;  %v1651_v16 = vrot.slane %v1649_v26, 1  ;;  %v14131_v2 = vcombine.low %v1254_v31, %v14125_v19  ;;  %v14133_v9 = vld [vmem:[#allocation2 + $0x2c] ss:$0 sps:$4 sm:$0x11]   ;;  %v2184_v33 = vsel %vm1717_vm10, %v13972_v37, %v2183_v46  ;;  %v1946_v32 = vshll.u32 %v12565_v35, 16  ;;  %p13231_p13 = scmp.lt.s32.totalorder %s10263_s7, %s13229_s5 }
 0x149   : > { %v2396_v10 = vor.u32 %v2395_v15, %v2391_v60  ;;  %16190 = vst [vmem:[#allocation41_spill] sm:$0xff] %v14133_v9  ;;  %v14143_v14 = vrot.slane %v16191_v12, 1  ;;  %v1765_v31 = vsel %vm1717_vm10, %v1763_v36, %v1764_v51  ;;  %v2186_v60 = vrot.slane %v12565_v35, 1  ;;  %v14157_v46 = vld [vmem:[#allocation2 + $0x2c] ss:$0 sps:$4 sm:$0x11]  }
 0x14a   : > { %v1652_v62 = vsel %vm1460_vm6, %v1647_v1, %v1651_v16  ;;  %v14137_v61 = vld [vmem:[#allocation2 + $0xc4] sm:$0xf]  ;;  %v14149_v55 = vrot.slane %v10491_v58, 1  ;;  %v2403_v37 = vshrl.u32 %v14131_v2, 16  ;;  %v2405_v1 = vshll.u32 %v14131_v2, 16  ;;  %s13224_s22 = scalar_lea.vmem %s10263_s7, 16 }
 0x14b   : > { %v1217_v28 = vld [vmem:[#allocation2 + $0xc0] sm:$0xf]  ;;  %3445 = vmatprep.mubr.bf16.mxu0 %v1652_v62  ;;  %v2401_v16 = vsel %vm1460_vm6, %v2396_v10, %v2400_v22  ;;  %v2410_v26 = vshll.u32 %v14133_v9, 16  ;;  %v1256_v18 = vld [vmem:[#allocation2 + $0x30] sm:$0xf]  ;;  %v1948_v58 = vrot.slane %v1946_v32, 1  ;;  %v1937_v62 = vsel %vm1460_vm6, %v1932_v38, %v1936_v59  ;;  %p13225_p9 = scmp.ne.s32.totalorder %s10263_s7, %s13224_s22  ;;  %p13232_p5 = scmp.lt.s32.totalorder %s13230_s23, %s13224_s22 }
 0x14c   : > { %v14146_v44 = vcombine.low %v1217_v28, %v14137_v61  ;;  %3446 = vmatmul.mubr.bf16.gmra.mxu0 %v14086_v5  ;;  %v2407_v36 = vrot.slane %v2405_v1, 1  ;;  %v14161_v22 = vld [vmem:[#allocation2 + $0x34] sm:$0xf]  ;;  %v14167_v15 = vld [vmem:[#allocation2 + $0x38] ss:$0 sps:$4 sm:$0x11]  }
 0x14d   : > { %3647 = vmatprep.mubr.bf16.mxu0 %v2184_v33  ;;  %16193 = vst [vmem:[#allocation43_spill] sm:$0xff] %v14161_v22  ;;  %v14165_v35 = vcombine.low %v1256_v18, %v14161_v22  ;;  %16194 = vst [vmem:[#allocation44_spill] sm:$0xff] %v14167_v15  ;;  %v2412_v33 = vrot.slane %v2410_v26, 1  ;;  %v12569_v12 = vld [vmem:[#allocation9 + $0x230] sm:$0xff]   ;;  %v2189_v32 = vrot.slane %v14157_v46, 1  ;;  %v1958_v1 = vshll.u32 %v14157_v46, 16  ;;  %p13226_p10 = pnand %p13225_p9, %p16440_p8  ;;  %p13233_p1 = por %p13232_p5, %p13231_p13 }
 0x14e   : > { %16192 = vst [vmem:[#allocation42_spill] sm:$0xff] %v14146_v44  ;;  %3606 = vmatprep.mubr.bf16.mxu1 %v14146_v44  ;;  %v2109_v10 = vshll.u32 %v14146_v44, 16  ;;  %v2408_v28 = vor.u32 %v2407_v36, %v2403_v37  ;;  %v1258_v5 = vld [vmem:[#allocation2 + $0x3c] sm:$0xf]  ;;  %v2187_v18 = vsel %vm1717_vm10, %v14005_v17, %v2186_v60  ;;  %v2422_v38 = vshll.u32 %v14167_v15, 16 }
 0x14f   : > { %3607 = vmatmul.mubr.bf16.gmra.mxu1 %v1765_v31  ;;  %v14170_v31 = vld [vmem:[#allocation2 + $0x38] ss:$0 sps:$4 sm:$0x11]   ;;  %v2417_v51 = vshll.u32 %v14165_v35, 16  ;;  %v2415_v41 = vshrl.u32 %v14165_v35, 16  ;;  %v1960_v57 = vrot.slane %v1958_v1, 1  ;;  %p13227_p11 = pneg %p13226_p10 }
 0x150   : > { %3808 = vmatprep.mubr.bf16.mxu1 %v2401_v16  ;;  %v14180_v59 = vld [vmem:[#allocation2 + $0x40] sm:$0xf]  ;;  %v1970_v36 = vshll.u32 %v14170_v31, 16  ;;  %v14186_v44 = vld [vmem:[#allocation2 + $0x44] ss:$0 sps:$4 sm:$0x11]   ;;  %v2413_v17 = vsel %vm1460_vm6, %v2408_v28, %v2412_v33 }
 0x151   : > { %16195 = vst [vmem:[#allocation45_spill] sm:$0xff] %v14180_v59  ;;  %v1242_v37 = vld [vmem:[#allocation2 + $0x60] sm:$0xe]  ;;  %v2419_v26 = vrot.slane %v2417_v51, 1  ;;  %v14184_v46 = vcombine.low %v1258_v5, %v14180_v59  ;;  %16196 = vst [vmem:[#allocation46_spill] sm:$0xff] %v14186_v44  ;;  %v14188_v13 = vrot.slane %v2109_v10, 1  ;;  %p13234_p3 = pnand %p13233_p1, %p13227_p11 }
 0x152   : > { %v14191_v60 = vld [vmem:[#allocation2 + $0x44] ss:$0 sps:$4 sm:$0x11]   ;;  %v12576_v16 = vld [vmem:[#allocation9 + $0x228] sm:$0xff]   ;;  %v16198_v51 = vshrl.u32 %v13715_v34, 16  ;;  %v16199_v21 = vshll.u32 %v13834_v63, 16 }
 0x153   : > { %16197 = vst [vmem:[#allocation47_spill] sm:$0xff] %v14188_v13  ;;  %v2429_v28 = vshll.u32 %v14184_v46, 16  ;;  %v1260_v33 = vld [vmem:[#allocation2 + $0x48] sm:$0xf]  ;;  %v2434_v34 = vshll.u32 %v14186_v44, 16  ;;  %vm8454_vm8 = vcmask 1041409  }
 0x154   : > { %3648 = vmatmul.mubr.bf16.vlgmr.msra.gmra.mxu0 %v1937_v62  ;;  %v1944_v7 = vor.u32 %v14011_v24, %v16198_v51  ;;  %v14199_v10 = vrot.slane %v16199_v21, 1  ;;  %v2424_v62 = vrot.slane %v2422_v38, 1  ;;  %v14206_v24 = vld [vmem:[#allocation2 + $0x4c] sm:$0xf]  ;;  %v13033_v1 = vld [vmem:[#allocation2 + $0x64] sm:$0xf] }
 0x155   : > { %12190 = vmatpush3.bf16.msra.mxu0 %v13032_v56  ;;  %3655 = vmatprep.mubr.bf16.mxu0 %v2187_v18  ;;  %v2420_v56 = vor.u32 %v2419_v26, %v2415_v41  ;;  %v14203_v18 = vrot.slane %v1970_v36, 1  ;;  %16200 = vst [vmem:[#allocation48_spill] sm:$0xff] %v14206_v24  ;;  %v10492_v51 = vcombine.low %v1242_v37, %v13033_v1  ;;  %v1982_v21 = vshll.u32 %v14191_v60, 16  ;;  %v12583_v38 = vld [vmem:[#allocation9 + $0x220] sm:$0xff]   ;;  %v12590_v1 = vld [vmem:[#allocation9 + $0x218] sm:$0xff]  }
 0x156   : > { %12191 = vmatprep.subr.bf16.mxu0 %v12569_v12  ;;  %v14210_v5 = vcombine.low %v1260_v33, %v14206_v24  ;;  %v1949_v13 = vsel %vm1460_vm6, %v1944_v7, %v1948_v58  ;;  %v2427_v41 = vshrl.u32 %v14184_v46, 16  ;;  %v14216_v26 = vld [vmem:[#allocation2 + $0x50] ss:$0 sps:$4 sm:$0x11]   ;;  %v1262_v36 = vld [vmem:[#allocation2 + $0x54] sm:$0xf] }
 0x157   : > { %3809 = vmatmul.mubr.bf16.vlgmr.msra.gmra.mxu1 %v14115_v40  ;;  %v14212_v40 = vld [vmem:[#allocation2 + $0x50] ss:$0 sps:$4 sm:$0x11]   ;;  %v2431_v37 = vrot.slane %v2429_v28, 1  ;;  %v14222_v24 = vld [vmem:[#allocation2 + $0x58] sm:$0xf]  ;;  %v2425_v27 = vsel %vm1460_vm6, %v2420_v56, %v2424_v62 }
 0x158   : > { %3816 = vmatprep.mubr.bf16.mxu1 %v2413_v17  ;;  %16201 = vst [vmem:[#allocation49_spill] sm:$0xff] %v14212_v40  ;;  %v2190_v17 = vsel %vm1717_vm10, %v14027_v39, %v2189_v32  ;;  %v2441_v33 = vshll.u32 %v14210_v5, 16  ;;  %16202 = vst [vmem:[#allocation50_spill] sm:$0xff] %v14222_v24  ;;  %v2436_v7 = vrot.slane %v2434_v34, 1  ;;  %v2446_v58 = vshll.u32 %v14212_v40, 16 }
 0x159   : > { %12192 = vmatpush3.bf16.msra.mxu0 %v12569_v12  ;;  %v14227_v12 = vcombine.low %v1262_v36, %v14222_v24  ;;  %v14229_v20 = vrot.slane %v1982_v21, 1  ;;  %v1994_v32 = vshll.u32 %v14216_v26, 16  ;;  %v14233_v28 = vrot.slane %v10492_v51, 1  ;;  %v1243_v9 = vld [vmem:[#allocation2 + $0x6c] sm:$0xe] }
 0x15a   : > { %12193 = vmatprep.subr.bf16.mxu0 %v12576_v16  ;;  %v16203_v62 = vshrl.u32 %v13727_v4, 16  ;;  %v14238_v34 = vld [vmem:[#allocation2 + $0x5c] ss:$0 sps:$4 sm:$0x11]   ;;  %v2432_v51 = vor.u32 %v2431_v37, %v2427_v41  ;;  %v14244_v39 = vrot.slane %v2446_v58, 1 }
 0x15b   : > { %16204 = vst [vmem:[#allocation51_spill] sm:$0xff] %v14238_v34  ;;  %v14240_v36 = vld [vmem:[#allocation2 + $0x5c] ss:$0 sps:$4 sm:$0x11]   ;;  %v1264_v4 = vld [vmem:[#allocation2 + $0x60] sm:$0xf] }
 0x15c   : > { %3656 = vmatmul.mubr.bf16.gmra.mxu0 %v1949_v13  ;;  %v1956_v56 = vor.u32 %v14038_v6, %v16203_v62  ;;  %v2443_v13 = vrot.slane %v2441_v33, 1  ;;  %v14251_v24 = vld [vmem:[#allocation2 + $0x64] sm:$0xf]  ;;  %v2458_v21 = vshll.u32 %v14238_v34, 16  ;;  %v13034_v37 = vld [vmem:[#allocation2 + $0x70] sm:$0xf] }
 0x15d   : > { %3663 = vmatprep.mubr.bf16.mxu0 %v2190_v17  ;;  %12194 = vmatpush3.bf16.msra.mxu0 %v12576_v16  ;;  %v2453_v17 = vshll.u32 %v14227_v12, 16  ;;  %v14248_v16 = vrot.slane %v1994_v32, 1  ;;  %16205 = vst [vmem:[#allocation52_spill] sm:$0xff] %v14251_v24  ;;  %v14258_v41 = vld [vmem:[#allocation2 + $0x68] ss:$0 sps:$4 sm:$0x11]   ;;  %v10493_v58 = vcombine.low %v1243_v9, %v13034_v37 }
 0x15e   : > { %12195 = vmatprep.subr.bf16.mxu0 %v12583_v38  ;;  %v1961_v33 = vsel %vm1460_vm6, %v1956_v56, %v1960_v57  ;;  %16206 = vst [vmem:[#allocation53_spill] sm:$0xff] %v14258_v41  ;;  %v14260_v6 = vld [vmem:[#allocation2 + $0x78] sm:$0xe]  ;;  %v16207_v32 = vrot.slane %v14170_v31, 1  ;;  %v2006_v40 = vshll.u32 %v14240_v36, 16  ;;  %v16209_v37 = vshll.u32 %v13861_v11, 16 }
 0x15f   : > { %3817 = vmatmul.mubr.bf16.gmra.mxu1 %v14131_v2  ;;  %v12597_v2 = vld [vmem:[#allocation9 + $0x210] sm:$0xff]   ;;  %v14267_v57 = vld [vmem:[#allocation2 + $0x68] ss:$0 sps:$4 sm:$0x11]   ;;  %v1266_v56 = vld [vmem:[#allocation2 + $0x6c] sm:$0xf] }
 0x160   : > { %3824 = vmatprep.mubr.bf16.mxu1 %v2425_v27  ;;  %v14256_v27 = vcombine.low %v1264_v4, %v14251_v24  ;;  %v2193_v62 = vsel %vm1717_vm10, %v14060_v42, %v16207_v32  ;;  %v16208_v4 = vshrl.u32 %v13748_v43, 16  ;;  %v14273_v9 = vrot.slane %v2453_v17, 1  ;;  %v14279_v34 = vld [vmem:[#allocation2 + $0x70] sm:$0xf]  ;;  %v1268_v44 = vld [vmem:[#allocation2 + $0x78] sm:$0xf] }
 0x161   : > { %12196 = vmatpush3.bf16.msra.mxu0 %v12583_v38  ;;  %v2437_v38 = vsel %vm1460_vm6, %v2432_v51, %v2436_v7  ;;  %v14277_v31 = vrot.slane %v16209_v37, 1  ;;  %16210 = vst [vmem:[#allocation54_spill] sm:$0xff] %v14279_v34  ;;  %v2470_v59 = vshll.u32 %v14258_v41, 16  ;;  %v14285_v43 = vcombine.low %v1266_v56, %v14279_v34  ;;  %v12604_v7 = vld [vmem:[#allocation9 + $0x208] sm:$0xff]   ;;  %v14352_v53 = vld [vmem:[#allocation2 + $0x88] sm:$0xf] }
 0x162   : > { %12197 = vmatprep.subr.bf16.mxu0 %v12590_v1  ;;  %v1968_v24 = vor.u32 %v14068_v54, %v16208_v4  ;;  %v2465_v32 = vshll.u32 %v14256_v27, 16  ;;  %v14287_v54 = vld [vmem:[#allocation2 + $0x74] ss:$0 sps:$4 sm:$0x11]   ;;  %v2018_v51 = vshll.u32 %v14267_v57, 16  ;;  %v14295_v4 = vrot.slane %v2006_v40, 1 }
 0x163   : > { %16211 = vst [vmem:[#allocation55_spill] sm:$0xff] %v14287_v54  ;;  %v14290_v17 = vld [vmem:[#allocation2 + $0x74] ss:$0 sps:$4 sm:$0x11]   ;;  %v14297_v37 = vrot.slane %v10493_v58, 1  ;;  %v2477_v34 = vshll.u32 %v14285_v43, 16 }
 0x164   : > { %3664 = vmatmul.mubr.bf16.gmra.mxu0 %v1961_v33  ;;  %v14293_v33 = vrot.slane %v2458_v21, 1  ;;  %v13035_v56 = vld [vmem:[#allocation2 + $0x7c] sm:$0xf]  ;;  %v16212_v40 = vshrl.u32 %v14210_v5, 16  ;;  %v2482_v22 = vshll.u32 %v14287_v54, 16  ;;  %v14315_v41 = vrot.slane %v2018_v51, 1 }
 0x165   : > { %3671 = vmatprep.mubr.bf16.mxu0 %v2193_v62  ;;  %12198 = vmatpush3.bf16.msra.mxu0 %v12590_v1  ;;  %v10494_v42 = vcombine.low %v14260_v6, %v13035_v56  ;;  %v1245_v1 = vld [vmem:[#allocation2 + $0x84] sm:$0xe]  ;;  %v14309_v6 = vld [vmem:[#allocation2 + $0x7c] sm:$0xf]  ;;  %v14311_v56 = vrot.slane %v2465_v32, 1  ;;  %v14313_v62 = vrot.slane %v2470_v59, 1 }
 0x166   : > { %12199 = vmatprep.subr.bf16.mxu0 %v12597_v2  ;;  %v2444_v21 = vor.u32 %v2443_v13, %v16212_v40  ;;  %16213 = vst [vmem:[#allocation56_spill] sm:$0xff] %v14309_v6  ;;  %v2030_v19 = vshll.u32 %v14290_v17, 16  ;;  %v14326_v58 = vcombine.low %v1268_v44, %v14309_v6  ;;  %v14328_v32 = vld [vmem:[#allocation2 + $0x80] ss:$0 sps:$4 sm:$0x11]   ;;  %v14330_v59 = vrot.slane %v2477_v34, 1 }
 0x167   : > { %3825 = vmatmul.mubr.bf16.gmra.mxu1 %v14165_v35  ;;  %v1973_v35 = vsel %vm1460_vm6, %v1968_v24, %v14203_v18  ;;  %v14318_v18 = vld [vmem:[#allocation2 + $0x90] sm:$0xe]  ;;  %v16214_v24 = vrot.slane %v14191_v60, 1  ;;  %16215 = vst [vmem:[#allocation57_spill] sm:$0xff] %v14328_v32  ;;  %v2494_v40 = vshll.u32 %v14328_v32, 16  ;;  %v16218_v51 = vshrl.u32 %v13800_v49, 16 }
 0x168   : > { %3832 = vmatprep.mubr.bf16.mxu1 %v2437_v38  ;;  %v12611_v38 = vld [vmem:[#allocation9 + $0x200] sm:$0xff]   ;;  %v14337_v60 = vld [vmem:[#allocation2 + $0x80] ss:$0 sps:$4 sm:$0x11]   ;;  %v2489_v44 = vshll.u32 %v14326_v58, 16  ;;  %v14348_v50 = vrot.slane %v2030_v19, 1 }
 0x169   : > { %12200 = vmatpush3.bf16.msra.mxu0 %v12597_v2  ;;  %v2196_v13 = vsel %vm1717_vm10, %v14078_v29, %v16214_v24  ;;  %v16216_v2 = vshll.u32 %v13895_v3, 16  ;;  %v2449_v29 = vsel %vm1460_vm6, %v2444_v21, %v14244_v39  ;;  %v14341_v24 = vrot.slane %v2482_v22, 1  ;;  %v1270_v34 = vld [vmem:[#allocation2 + $0x84] sm:$0xf]  ;;  %v13036_v6 = vld [vmem:[#allocation2 + $0x88] sm:$0xf] }
 0x16a   : > { %12201 = vmatprep.subr.bf16.mxu0 %v12604_v7  ;;  %v10495_v15 = vcombine.low %v1245_v1, %v13036_v6  ;;  %16220 = vst [vmem:[#allocation60_spill] sm:$0xff] %v14352_v53  ;;  %v14354_v22 = vld [vmem:[#allocation2 + $0x9c] sm:$0xe]  ;;  %v14356_v39 = vld [vmem:[#allocation2 + $0xa8] sm:$0xe]  ;;  %v16221_v49 = vshll.u32 %v13930_v8, 16 }
 0x16b   : > { %v14335_v54 = vrot.slane %v16216_v2, 1  ;;  %16217 = vst [vmem:[#allocation58_spill] sm:$0xff] %v14341_v24  ;;  %v1980_v2 = vor.u32 %v14093_v0, %v16218_v51  ;;  %v14358_v21 = vld [vmem:[#allocation2 + $0xb4] sm:$0xe]  ;;  %v2042_v19 = vshll.u32 %v14337_v60, 16  ;;  %v16224_v32 = vshrl.u32 %v14227_v12, 16 }
 0x16c   : > { %3672 = vmatmul.mubr.bf16.gmra.mxu0 %v1973_v35  ;;  %v14350_v35 = vrot.slane %v10494_v42, 1  ;;  %v14364_v0 = vrot.slane %v16221_v49, 1  ;;  %v14368_v42 = vcombine.low %v1270_v34, %v14352_v53  ;;  %v13037_v6 = vld [vmem:[#allocation2 + $0x94] sm:$0xf]  ;;  %v14384_v24 = vrot.slane %v2494_v40, 1 }
 0x16d   : > { %3679 = vmatprep.mubr.bf16.mxu0 %v2196_v13  ;;  %12202 = vmatpush3.bf16.msra.mxu0 %v12604_v7  ;;  %v14370_v7 = vld [vmem:[#allocation2 + $0x8c] ss:$0 sps:$4 sm:$0x11]   ;;  %v10496_v13 = vcombine.low %v14318_v18, %v13037_v6  ;;  %v2456_v34 = vor.u32 %v14273_v9, %v16224_v32  ;;  %v16225_v9 = vrot.slane %v14216_v26, 1 }
 0x16e   : > { %16219 = vst [vmem:[#allocation59_spill] sm:$0xff] %v14350_v35  ;;  %16222 = vst [vmem:[#allocation61_spill] sm:$0xff] %v14370_v7  ;;  %12203 = vmatprep.subr.bf16.mxu0 %v12611_v38  ;;  %v14377_v49 = vld [vmem:[#allocation2 + $0x8c] ss:$0 sps:$4 sm:$0x11]   ;;  %v14382_v35 = vrot.slane %v2489_v44, 1 }
 0x16f   : > { %3833 = vmatmul.mubr.bf16.gmra.mxu1 %v14184_v46  ;;  %v16223_v46 = vshrl.u32 %v13825_v47, 16  ;;  %v1985_v47 = vsel %vm1460_vm6, %v1980_v2, %v14229_v20  ;;  %v2506_v6 = vshll.u32 %v14370_v7, 16  ;;  %v2199_v40 = vsel %vm1717_vm10, %v14119_v48, %v16225_v9  ;;  %v1272_v20 = vld [vmem:[#allocation2 + $0x90] sm:$0xf]  ;;  %v14411_v48 = vld [vmem:[#allocation2 + $0x94] sm:$0xf] }
 0x170   : > { %3840 = vmatprep.mubr.bf16.mxu1 %v2449_v29  ;;  %v14387_v29 = vld [vmem:[#allocation2 + $0xc0] sm:$0xe]  ;;  %v14399_v44 = vrot.slane %v2042_v19, 1  ;;  %v2054_v1 = vshll.u32 %v14377_v49, 16  ;;  %v10497_v2 = vcombine.low %v14354_v22, %v13999_v23  ;;  %v2461_v19 = vsel %vm1460_vm6, %v2456_v34, %v14293_v33 }
 0x171   : > { %v1992_v51 = vor.u32 %v14143_v14, %v16223_v46  ;;  %v2501_v14 = vshll.u32 %v14368_v42, 16  ;;  %v14393_v46 = vrot.slane %v10495_v15, 1  ;;  %12204 = vmatpush3.bf16.msra.mxu0 %v12611_v38  ;;  %v10498_v15 = vcombine.low %v14356_v39, %v14046_v30  ;;  %v14420_v30 = vld [vmem:[#allocation2 + $0x98] ss:$0 sps:$4 sm:$0x11]  }
 0x172   : > { %v14418_v23 = vcombine.low %v1272_v20, %v14411_v48  ;;  %v16227_v33 = vshll.u32 %v13942_v52, 16  ;;  %v10500_v20 = vcombine.low %v14387_v29, %v14137_v61  ;;  %v2518_v61 = vshll.u32 %v14420_v30, 16  ;;  %v14462_v26 = vld [vmem:[#allocation2 + $0xa4] ss:$0 sps:$4 sm:$0x11]  }
 0x173   : > { %v14425_v39 = vrot.slane %v2501_v14, 1 }
 0x174   : > { %3680 = vmatmul.mubr.bf16.gmra.mxu0 %v1985_v47  ;;  %v14427_v47 = vrot.slane %v2506_v6, 1  ;;  %v14431_v34 = vrot.slane %v16227_v33, 1  ;;  %v2513_v14 = vshll.u32 %v14418_v23, 16  ;;  %v1274_v6 = vld [vmem:[#allocation2 + $0x9c] sm:$0xf]  ;;  %v16228_v33 = vshrl.u32 %v14256_v27, 16 }
 0x175   : > { %3687 = vmatprep.mubr.bf16.mxu0 %v2199_v40 }
 0x176   : > { %v2468_v18 = vor.u32 %v14311_v56, %v16228_v33  ;;  %v16231_v56 = vrot.slane %v14240_v36, 1 }
 0x177   : > { %3841 = vmatmul.mubr.bf16.gmra.mxu1 %v14210_v5  ;;  %v14451_v5 = vrot.slane %v10496_v13, 1 }
 0x178   : > { %3848 = vmatprep.mubr.bf16.mxu1 %v2461_v19 }
 0x17a   : > { %v11323_v53 = vpop.f32.mrf.mxu0 }
 0x17c   : > { %v11324_v32 = vpop.f32.mrf.mxu0 }
 0x17d   : > { %v14409_v38 = vadd.f32 %v11324_v32, %v11323_v53  ;;  %v16226_v53 = vshrl.u32 %v13834_v63, 16  ;;  %v14433_v32 = vld [vmem:[#allocation2 + $0x98] ss:$0 sps:$4 sm:$0x11]   ;;  %v1997_v63 = vsel %vm1460_vm6, %v1992_v51, %v14248_v16  ;;  %v14475_v16 = vrot.slane %v10497_v2, 1 }
 0x17e   : > { %v11326_v9 = vpop.f32.mrf.mxu0  ;;  %v2066_v29 = vshll.u32 %v14433_v32, 16  ;;  %v2530_v2 = vshll.u32 %v14462_v26, 16  ;;  %3688 = vmatmul.mubr.bf16.gmra.mxu0 %v1997_v63 }
 0x17f   : > { %v2004_v22 = vor.u32 %v14199_v10, %v16226_v53  ;;  %v14440_v10 = vrot.slane %v2054_v1, 1  ;;  %v14443_v53 = vld [vmem:[#allocation2 + $0xa0] sm:$0xf]  ;;  %v16229_v1 = vshll.u32 %v13975_v45, 16  ;;  %16233 = vst [vmem:[#allocation63_spill] sm:$0xff] %v14475_v16  ;;  %v14481_v45 = vrot.slane %v2513_v14, 1  ;;  %3849 = vmatmul.mubr.bf16.gmra.mxu1 %v14227_v12 }
 0x180   : > { %v11327_v40 = vpop.f32.mrf.mxu0  ;;  %v14460_v19 = vcombine.low %v1274_v6, %v14443_v53  ;;  %v16234_v6 = vshrl.u32 %v13895_v3, 16  ;;  %v1276_v3 = vld [vmem:[#allocation2 + $0xa8] sm:$0xf]  ;;  %v16236_v14 = vrot.slane %v14267_v57, 1 }
 0x181   : > { %v14448_v7 = vadd.f32 %v11327_v40, %v11326_v9  ;;  %v14456_v51 = vrot.slane %v16229_v1, 1  ;;  %v2202_v9 = vsel %vm1717_vm10, %v14149_v55, %v16231_v56  ;;  %v2009_v13 = vsel %vm1460_vm6, %v2004_v22, %v14295_v4  ;;  %v14473_v1 = vld [vmem:[#allocation2 + $0xa4] ss:$0 sps:$4 sm:$0x11]   ;;  %v11435_v63 = vpop.f32.mrf.mxu1  ;;  %v16247_v55 = vld [vmem:[#allocation58_spill] sm:$0xff] }
 0x182   : > { %v16232_v40 = vshrl.u32 %v13861_v11, 16  ;;  %v14487_v11 = vld [vmem:[%s16065_s2] ss:$0 sm:$0xff]  ;;  %v2525_v4 = vshll.u32 %v14460_v19, 16  ;;  %v14493_v22 = vrot.slane %v10498_v15, 1  ;;  %v2205_v56 = vsel %vm1717_vm10, %v14233_v28, %v16236_v14  ;;  %3695 = vmatprep.mubr.bf16.mxu0 %v2202_v9 }
 0x183   : > { %16230 = vst [vmem:[#allocation62_spill] sm:$0xff] %v14456_v51  ;;  %v2028_v51 = vor.u32 %v14335_v54, %v16234_v6  ;;  %v2473_v54 = vsel %vm1460_vm6, %v2468_v18, %v14313_v62  ;;  %v14504_v6 = vld [vmem:[#allocation2 + $0xac] sm:$0xf]  ;;  %v2078_v62 = vshll.u32 %v14473_v1, 16  ;;  %v16237_v28 = vshrl.u32 %v14285_v43, 16 }
 0x184   : > { %v2016_v33 = vor.u32 %v14277_v31, %v16232_v40  ;;  %v14489_v31 = vrot.slane %v2518_v61, 1  ;;  %16235 = vst [vmem:[#allocation64_spill] sm:$0xff] %v14493_v22  ;;  %v14501_v40 = vrot.slane %v2066_v29, 1  ;;  %v14513_v57 = vcombine.low %v1276_v3, %v14504_v6  ;;  %v14515_v18 = vld [vmem:[#allocation2 + $0xb0] ss:$0 sps:$4 sm:$0x11]   ;;  %3856 = vmatprep.mubr.bf16.mxu1 %v2473_v54 }
 0x185   : > { %v2480_v29 = vor.u32 %v14330_v59, %v16237_v28  ;;  %v16238_v9 = vrot.slane %v14290_v17, 1  ;;  %v14531_v3 = vld [vmem:[#allocation2 + $0xb0] ss:$0 sps:$4 sm:$0x11]   ;;  %v16240_v14 = vcombine.low %v14358_v21, %v14074_v25  ;;  %v16242_v59 = vshrl.u32 %v13930_v8, 16  ;;  %v16250_v22 = vld [vmem:[#allocation59_spill] sm:$0xff] }
 0x186   : > { %v14508_v15 = vsel %vm1460_vm6, %v2016_v33, %v14315_v41  ;;  %v14529_v33 = vsel %vm1460_vm6, %v2028_v51, %v14348_v50  ;;  %16239 = vst [vmem:[#allocation65_spill] sm:$0xff] %v14531_v3  ;;  %v14541_v28 = vrot.slane %v2525_v4, 1  ;;  %v14545_v50 = vrot.slane %v10500_v20, 1  ;;  %v14554_v54 = vld [vmem:[#allocation2 + $0xb8] sm:$0xf]  ;;  %3696 = vmatmul.mubr.bf16.gmra.mxu0 %v2009_v13 }
 0x187   : > { %v14525_v41 = vsel %vm1717_vm10, %v14297_v37, %v16238_v9  ;;  %v14536_v12 = vrot.slane %v16240_v14, 1  ;;  %v2040_v17 = vor.u32 %v14364_v0, %v16242_v59  ;;  %v14543_v37 = vrot.slane %v2530_v2, 1  ;;  %v1278_v9 = vld [vmem:[#allocation2 + $0xb4] sm:$0xf]  ;;  %v11436_v0 = vpop.f32.mrf.mxu1  ;;  %3703 = vmatprep.mubr.bf16.mxu0 %v2205_v56  ;;  %3857 = vmatmul.mubr.bf16.gmra.mxu1 %v14256_v27 }
 0x188   : > { %16243 = vst [vmem:[#allocation67_spill] sm:$0xff] %v14545_v50  ;;  %v16244_v51 = vshrl.u32 %v14326_v58, 16  ;;  %v3328_v25 = vadd.f32 %v14409_v38, %v14487_v11  ;;  %v2537_v21 = vshll.u32 %v14513_v57, 16  ;;  %v2542_v8 = vshll.u32 %v14515_v18, 16 }
 0x189   : > { %16241 = vst [vmem:[#allocation66_spill] sm:$0xff] %v14536_v12  ;;  %v14556_v4 = vrot.slane %v2078_v62, 1  ;;  %v2090_v20 = vshll.u32 %v14531_v3, 16  ;;  %v14565_v36 = vcombine.low %v1278_v9, %v14554_v54  ;;  %v14567_v50 = vld [vmem:[#allocation2 + $0xbc] ss:$0 sps:$4 sm:$0x11]   ;;  %v11438_v12 = vpop.f32.mrf.mxu1  ;;  %v14577_v59 = vsel %vm1460_vm6, %v2040_v17, %v14399_v44 }
 0x18a   : > { %v2492_v61 = vor.u32 %v14382_v35, %v16244_v51  ;;  %v2485_v35 = vsel %vm1460_vm6, %v2480_v29, %v16247_v55  ;;  %v11437_v51 = vadd.f32 %v11436_v0, %v11435_v63  ;;  %v16249_v62 = vrot.slane %v14337_v60, 1  ;;  %v14585_v0 = vld [vmem:[#allocation2 + $0xbc] ss:$0 sps:$4 sm:$0x11]   ;;  %v684_v17 = vld [vmem:[#allocation2 + $0xc8] sm:$0x1] }
 0x18b   : > { %16245 = vst [vmem:[#allocation68_spill] sm:$0xff] %v14556_v4  ;;  %16248 = vst [vmem:[#allocation58_spill] sm:$0xff] %v14565_v36  ;;  %v16251_v55 = vshrl.u32 %v14368_v42, 16  ;;  %v16252_v29 = vshrl.u32 %v13942_v52, 16  ;;  %v14593_v44 = vrot.slane %v2542_v8, 1  ;;  %v11439_v52 = vpop.f32.mrf.mxu1  ;;  %v685_v13 = vsel %vm13636_vm5, 0, %v684_v17  ;;  %3864 = vmatprep.mubr.bf16.mxu1 %v2485_v35  ;;  %v11329_v17 = vpop.f32.mrf.mxu0 }
 0x18c   : > { %v14573_v2 = vsel %vm1717_vm10, %v16250_v22, %v16249_v62  ;;  %16253 = vst [vmem:[#allocation59_spill] sm:$0xff] %v14585_v0  ;;  %v14587_v60 = vadd.f32 %v11437_v51, %v3328_v25  ;;  %v3331_v22 = vadd.f32 %v14448_v7, %v14487_v11  ;;  %v14591_v62 = vrot.slane %v2537_v21, 1  ;;  %v1280_v25 = vld [vmem:[#allocation2 + $0xc0] sm:$0xf]  ;;  %686 = vst [vmem:[#allocation2 + $0xc8] sm:$0x1] %v685_v13 }
 0x18d   : > { %v2504_v63 = vor.u32 %v14425_v39, %v16251_v55  ;;  %v2052_v9 = vor.u32 %v14431_v34, %v16252_v29  ;;  %16255 = vst [vmem:[#allocation70_spill] sm:$0xff] %v14593_v44  ;;  %v14597_v39 = vsel %vm1460_vm6, %v2492_v61, %v14384_v24  ;;  %v14599_v34 = vrot.slane %v2090_v20, 1  ;;  %v16258_v51 = vld [vmem:[#allocation44_spill] sm:$0xff]  ;;  %v14613_v8 = vld [vmem:[#allocation2 + $0xc4] sm:$0xf]  ;;  %v11330_v55 = vpop.f32.mrf.mxu0 }
 0x18e   : > { %16254 = vst [vmem:[#allocation69_spill] sm:$0xff] %v14587_v60  ;;  %v11440_v7 = vadd.f32 %v11439_v52, %v11438_v12  ;;  %v16259_v21 = vrot.slane %v14377_v49, 1  ;;  %v2549_v24 = vshll.u32 %v14565_v36, 16  ;;  %v2554_v61 = vshll.u32 %v14567_v50, 16  ;;  %v1282_v20 = vld [vmem:[#allocation2 + $0xcc] sm:$0xf]  ;;  %v11441_v12 = vpop.f32.mrf.mxu1  ;;  %3704 = vmatmul.mubr.bf16.gmra.mxu0 %v14508_v15 }
 0x18f   : > { %16256 = vst [vmem:[#allocation71_spill] sm:$0xff] %v14599_v34  ;;  %v14617_v27 = vsel %vm1460_vm6, %v2504_v63, %v14427_v47  ;;  %v14622_v52 = vcombine.low %v1280_v25, %v14613_v8  ;;  %v14630_v35 = vsel %vm1460_vm6, %v2052_v9, %v14440_v10  ;;  %v16262_v38 = vshrl.u32 %v14418_v23, 16  ;;  %v14641_v25 = vld [vmem:[#allocation2 + $0xd4] ss:$0 sps:$4 sm:$0x11]   ;;  %v11332_v34 = vpop.f32.mrf.mxu0  ;;  %v16268_v36 = vld [vmem:[#allocation46_spill] sm:$0xff]  ;;  %3711 = vmatprep.mubr.bf16.mxu0 %v14525_v41 }
 0x190   : > { %v14609_v56 = vsel %vm1717_vm10, %v14393_v46, %v16259_v21  ;;  %v2102_v46 = vshll.u32 %v14585_v0, 16  ;;  %v14624_v21 = vld [vmem:[#allocation2 + $0xd0] sm:$0xf]  ;;  %v14626_v13 = vadd.f32 %v11440_v7, %v3331_v22  ;;  %v16263_v63 = vrot.slane %v14433_v32, 1  ;;  %v1301_v29 = vld [vmem:[#allocation2 + $0x24] sm:$0xe]  ;;  %v11442_v22 = vpop.f32.mrf.mxu1  ;;  %3865 = vmatmul.mubr.bf16.gmra.mxu1 %v14285_v43 }
 0x191   : > { %16260 = vst [vmem:[#allocation44_spill] sm:$0xff] %v14622_v52  ;;  %v2516_v47 = vor.u32 %v14481_v45, %v16262_v38  ;;  %v2561_v10 = vshll.u32 %v14622_v52, 16  ;;  %v14646_v9 = vcombine.low %v1282_v20, %v14624_v21  ;;  %v1302_v38 = vld [vmem:[#allocation2 + $0x30] sm:$0xe]  ;;  %v1303_v32 = vld [vmem:[#allocation2 + $0x3c] sm:$0xe]  ;;  %v11331_v60 = vadd.f32 %v11330_v55, %v11329_v17  ;;  %3872 = vmatprep.mubr.bf16.mxu1 %v14597_v39 }
 0x192   : > { %16261 = vst [vmem:[#allocation72_spill] sm:$0xff] %v14626_v13  ;;  %v14639_v49 = vsel %vm1717_vm10, %v14451_v5, %v16263_v63  ;;  %v16264_v13 = vld [vmem:[#allocation40_spill] sm:$0xff]  ;;  %v11443_v14 = vadd.f32 %v11442_v22, %v11441_v12  ;;  %v14649_v5 = vrot.slane %v2549_v24, 1  ;;  %v14651_v63 = vrot.slane %v2554_v61, 1  ;;  %v11444_v3 = vpop.f32.mrf.mxu1  ;;  %v16269_v17 = vld [vmem:[#allocation43_spill] sm:$0xff]  ;;  %v16270_v12 = vld [vmem:[#allocation45_spill] sm:$0xff] }
 0x193   : > { %v10534_v45 = vcombine.low %v1301_v29, %v16264_v13  ;;  %v14653_v4 = vrot.slane %v2102_v46, 1  ;;  %v2656_v20 = vrot.slane %v16268_v36, 1  ;;  %v3336_v29 = vadd.f32 %v11331_v60, %v14487_v11  ;;  %v1304_v13 = vld [vmem:[#allocation2 + $0x48] sm:$0xe]  ;;  %v1305_v22 = vld [vmem:[#allocation2 + $0x54] sm:$0xe]  ;;  %v11333_v46 = vpop.f32.mrf.mxu0 }
 0x194   : > { %16265 = vst [vmem:[#allocation40_spill] sm:$0xff] %v14649_v5  ;;  %16266 = vst [vmem:[#allocation73_spill] sm:$0xff] %v14651_v63  ;;  %v10535_v24 = vcombine.low %v1302_v38, %v16269_v17  ;;  %v10536_v61 = vcombine.low %v1303_v32, %v16270_v12  ;;  %v1120_v7 = vld [vmem:[#allocation2 + $0xc8] sm:$0x1]  ;;  %v11334_v32 = vadd.f32 %v11333_v46, %v11332_v34  ;;  %v16276_v17 = vld [vmem:[#allocation35_spill] sm:$0xff] }
 0x195   : > { %16267 = vst [vmem:[#allocation74_spill] sm:$0xff] %v14653_v4  ;;  %v2649_v0 = vrot.slane %v10534_v45, 1  ;;  %v11445_v4 = vpop.f32.mrf.mxu1  ;;  %v14663_v45 = vrot.slane %v2561_v10, 1  ;;  %v16272_v60 = vld [vmem:[#allocation41_spill] sm:$0xff]  ;;  %v14673_v38 = vadd.f32 %v11443_v14, %v3336_v29  ;;  %v16277_v12 = vrot.slane %v16276_v17, 4  ;;  %v11335_v15 = vpop.f32.mrf.mxu0  ;;  %v16279_v34 = vld [vmem:[#allocation48_spill] sm:$0xff] }
 0x196   : > { %v16273_v52 = vrot.slane %v16272_v60, 1  ;;  %v11446_v41 = vadd.f32 %v11445_v4, %v11444_v3  ;;  %v1306_v36 = vld [vmem:[#allocation2 + $0x60] sm:$0xe]  ;;  %v2652_v43 = vrot.slane %v10535_v24, 1  ;;  %v2655_v14 = vrot.slane %v10536_v61, 1  ;;  %v16281_v17 = vld [vmem:[#allocation50_spill] sm:$0xff]  ;;  %3712 = vmatmul.mubr.bf16.gmra.mxu0 %v14529_v33 }
 0x197   : > { %16271 = vst [vmem:[#allocation46_spill] sm:$0xff] %v14663_v45  ;;  %16275 = vst [vmem:[#allocation45_spill] sm:$0xff] %v14673_v38  ;;  %v1121_v10 = vsel %vm13620_vm2, %v16277_v12, %v1120_v7  ;;  %v1300_v45 = vld [vmem:[#allocation2 + $0x18] sm:$0xe]  ;;  %v10537_v3 = vcombine.low %v1304_v13, %v16279_v34  ;;  %v1307_v4 = vld [vmem:[#allocation2 + $0x6c] sm:$0xe]  ;;  %v3339_v46 = vadd.f32 %v11334_v32, %v14487_v11  ;;  %3719 = vmatprep.mubr.bf16.mxu0 %v14573_v2 }
 0x198   : > { %v14670_v55 = vsel %vm1717_vm10, %v2649_v0, %v16273_v52  ;;  %v14682_v0 = vsel %vm1460_vm6, %v2516_v47, %v14489_v31  ;;  %v11447_v52 = vpop.f32.mrf.mxu1  ;;  %1122 = vst [vmem:[#allocation2 + $0xc8] sm:$0x1] %v1121_v10  ;;  %v1308_v29 = vld [vmem:[#allocation2 + $0x78] sm:$0xe]  ;;  %v16280_v7 = vld [vmem:[#allocation49_spill] sm:$0xff]  ;;  %v10538_v12 = vcombine.low %v1305_v22, %v16281_v17  ;;  %v16283_v47 = vld [vmem:[#allocation38_spill] sm:$0xff]  ;;  %v14696_v13 = vsel %vm1717_vm10, %v2655_v14, %v2656_v20 }
 0x199   : > { %16274 = vst [vmem:[#allocation43_spill] sm:$0xff] %v14670_v55  ;;  %v2659_v60 = vrot.slane %v16280_v7, 1  ;;  %v16282_v39 = vld [vmem:[#allocation51_spill] sm:$0xff]  ;;  %v1309_v38 = vld [vmem:[#allocation2 + $0x84] sm:$0xe]  ;;  %v11336_v55 = vpop.f32.mrf.mxu0  ;;  %v10533_v5 = vcombine.low %v1300_v45, %v16283_v47  ;;  %v16284_v24 = vrot.slane %v16258_v51, 1  ;;  %v14698_v10 = vadd.f32 %v11446_v41, %v3339_v46  ;;  %3873 = vmatmul.mubr.bf16.gmra.mxu1 %v14326_v58 }
 0x19a   : > { %v2662_v63 = vrot.slane %v16282_v39, 1  ;;  %v11448_v31 = vpop.f32.mrf.mxu1  ;;  %v2658_v32 = vrot.slane %v10537_v3, 1  ;;  %v11337_v34 = vadd.f32 %v11336_v55, %v11335_v15  ;;  %v2661_v7 = vrot.slane %v10538_v12, 1  ;;  %v1310_v17 = vld [vmem:[#allocation2 + $0x90] sm:$0xe]  ;;  %v16286_v45 = vld [vmem:[#allocation52_spill] sm:$0xff]  ;;  %3880 = vmatprep.mubr.bf16.mxu1 %v14617_v27 }
 0x19b   : > { %v14693_v61 = vsel %vm1717_vm10, %v2652_v43, %v16284_v24  ;;  %v11449_v22 = vadd.f32 %v11448_v31, %v11447_v52  ;;  %v11338_v39 = vpop.f32.mrf.mxu0  ;;  %v10539_v51 = vcombine.low %v1306_v36, %v16286_v45  ;;  %v16287_v47 = vld [vmem:[#allocation53_spill] sm:$0xff]  ;;  %v16288_v24 = vld [vmem:[#allocation54_spill] sm:$0xff]  ;;  %v16289_v15 = vld [vmem:[#allocation55_spill] sm:$0xff] }
 0x19c   : > { %16285 = vst [vmem:[#allocation41_spill] sm:$0xff] %v14693_v61  ;;  %v11450_v44 = vpop.f32.mrf.mxu1  ;;  %v14701_v16 = vsel %vm1717_vm10, %v2658_v32, %v2659_v60  ;;  %v2665_v43 = vrot.slane %v16287_v47, 1  ;;  %v10540_v61 = vcombine.low %v1307_v4, %v16288_v24  ;;  %v3344_v20 = vadd.f32 %v11337_v34, %v14487_v11  ;;  %v16290_v52 = vld [vmem:[#allocation56_spill] sm:$0xff]  ;;  %v16291_v12 = vld [vmem:[#allocation57_spill] sm:$0xff] }
 0x19d   : > { %v14709_v55 = vsel %vm1717_vm10, %v2661_v7, %v2662_v63  ;;  %v2668_v41 = vrot.slane %v16289_v15, 1  ;;  %v10541_v14 = vcombine.low %v1308_v29, %v16290_v52  ;;  %v11339_v3 = vpop.f32.mrf.mxu0  ;;  %v2664_v36 = vrot.slane %v10539_v51, 1  ;;  %v16292_v4 = vld [vmem:[#allocation60_spill] sm:$0xff]  ;;  %v16293_v24 = vld [vmem:[#allocation61_spill] sm:$0xff]  ;;  %v1313_v52 = vld [vmem:[#allocation2 + $0xb4] sm:$0xe] }
 0x19e   : > { %v11451_v46 = vpop.f32.mrf.mxu1  ;;  %v2667_v60 = vrot.slane %v10540_v61, 1  ;;  %v2671_v31 = vrot.slane %v16291_v12, 1  ;;  %v10542_v32 = vcombine.low %v1309_v38, %v16292_v4  ;;  %v14717_v33 = vadd.f32 %v11449_v22, %v3344_v20  ;;  %v1312_v15 = vld [vmem:[#allocation2 + $0xa8] sm:$0xe]  ;;  %v1314_v4 = vld [vmem:[#allocation2 + $0xc0] sm:$0xe]  ;;  %3720 = vmatmul.mubr.bf16.gmra.mxu0 %v14577_v59 }
 0x19f   : > { %v11340_v63 = vadd.f32 %v11339_v3, %v11338_v39  ;;  %v11452_v34 = vadd.f32 %v11451_v46, %v11450_v44  ;;  %v14719_v7 = vld [vmem:[#allocation2 + $0xc8] ss:$0 sps:$4 sm:$0x11]   ;;  %v2670_v45 = vrot.slane %v10541_v14, 1  ;;  %v11341_v2 = vpop.f32.mrf.mxu0  ;;  %v14725_v61 = vsel %vm1717_vm10, %v2664_v36, %v2665_v43  ;;  %v1311_v39 = vld [vmem:[#allocation2 + $0x9c] sm:$0xe]  ;;  %3727 = vmatprep.mubr.bf16.mxu0 %v14609_v56 }
 0x1a0   : > { %v11453_v29 = vpop.f32.mrf.mxu1  ;;  %v14722_v47 = vld [vmem:[#allocation2 + $0xc8] ss:$0 sps:$4 sm:$0x11]   ;;  %v14728_v38 = vsel %vm1717_vm10, %v2667_v60, %v2668_v41  ;;  %v2673_v58 = vrot.slane %v10542_v32, 1  ;;  %v10543_v22 = vcombine.low %v1310_v17, %v14411_v48  ;;  %v14732_v51 = vrot.slane %v10533_v5, 1 }
 0x1a1   : > { %v3347_v44 = vadd.f32 %v11340_v63, %v14487_v11  ;;  %v14735_v27 = vsel %vm1717_vm10, %v2670_v45, %v2671_v31  ;;  %v2674_v20 = vrot.slane %v16293_v24, 1  ;;  %v11342_v43 = vpop.f32.mrf.mxu0  ;;  %v2566_v41 = vshll.u32 %v14719_v7, 16  ;;  %3881 = vmatmul.mubr.bf16.gmra.mxu1 %v14368_v42 }
 0x1a2   : > { %v11454_v14 = vpop.f32.mrf.mxu1  ;;  %v16294_v3 = vshll.u32 %v14646_v9, 16  ;;  %v2676_v48 = vrot.slane %v10543_v22, 1  ;;  %v2677_v17 = vrot.slane %v14420_v30, 1  ;;  %v16295_v36 = vshrl.u32 %v14460_v19, 16  ;;  %3888 = vmatprep.mubr.bf16.mxu1 %v14682_v0 }
 0x1a3   : > { %v14744_v5 = vadd.f32 %v11452_v34, %v3347_v44  ;;  %v11343_v12 = vadd.f32 %v11342_v43, %v11341_v2  ;;  %v11455_v31 = vadd.f32 %v11454_v14, %v11453_v29  ;;  %v11344_v32 = vpop.f32.mrf.mxu0  ;;  %v2228_v45 = vrot.slane %v14722_v47, 1  ;;  %v1315_v34 = vld [vmem:[#allocation2 + $0xcc] sm:$0xe] }
 0x1a4   : > { %v14741_v46 = vrot.slane %v16294_v3, 1  ;;  %v2528_v60 = vor.u32 %v14541_v28, %v16295_v36  ;;  %v11456_v63 = vpop.f32.mrf.mxu1  ;;  %v16296_v24 = vshll.u32 %v14641_v25, 16  ;;  %v14755_v22 = vsel %vm1717_vm10, %v2673_v58, %v2674_v20 }
 0x1a5   : > { %v14758_v30 = vsel %vm1717_vm10, %v2676_v48, %v2677_v17  ;;  %v3352_v28 = vadd.f32 %v11343_v12, %v14487_v11  ;;  %v2114_v2 = vshll.u32 %v14722_v47, 16  ;;  %v10544_v29 = vcombine.low %v1311_v39, %v14443_v53  ;;  %v11345_v43 = vpop.f32.mrf.mxu0 }
 0x1a6   : > { %v14752_v3 = vrot.slane %v16296_v24, 1  ;;  %v2680_v44 = vrot.slane %v14462_v26, 1  ;;  %v11457_v14 = vpop.f32.mrf.mxu1  ;;  %v14766_v58 = vrot.slane %v2566_v41, 1  ;;  %v10545_v20 = vcombine.low %v1312_v15, %v14504_v6  ;;  %3728 = vmatmul.mubr.bf16.gmra.mxu0 %v14630_v35 }
 0x1a7   : > { %v2683_v48 = vrot.slane %v14515_v18, 1  ;;  %v10546_v59 = vcombine.low %v1313_v52, %v14554_v54  ;;  %v14772_v17 = vadd.f32 %v11455_v31, %v3352_v28  ;;  %v11346_v36 = vadd.f32 %v11345_v43, %v11344_v32  ;;  %v11347_v26 = vpop.f32.mrf.mxu0  ;;  %3735 = vmatprep.mubr.bf16.mxu0 %v14639_v49 }
 0x1a8   : > { %v11458_v53 = vadd.f32 %v11457_v14, %v11456_v63  ;;  %v2679_v39 = vrot.slane %v10544_v29, 1  ;;  %v2682_v56 = vrot.slane %v10545_v20, 1  ;;  %v2686_v41 = vrot.slane %v14567_v50, 1  ;;  %v11459_v31 = vpop.f32.mrf.mxu1  ;;  %v16299_v20 = vld [vmem:[#allocation62_spill] sm:$0xff] }
 0x1a9   : > { %v2685_v12 = vrot.slane %v10546_v59, 1  ;;  %v10547_v6 = vcombine.low %v1314_v4, %v14613_v8  ;;  %v3355_v18 = vadd.f32 %v11346_v36, %v14487_v11  ;;  %v2689_v42 = vrot.slane %v14719_v7, 1  ;;  %v11348_v52 = vpop.f32.mrf.mxu0  ;;  %3889 = vmatmul.mubr.bf16.gmra.mxu1 %v14418_v23 }
 0x1aa   : > { %v14779_v54 = vsel %vm1717_vm10, %v2679_v39, %v2680_v44  ;;  %v10548_v15 = vcombine.low %v1315_v34, %v14624_v21  ;;  %v14784_v0 = vsel %vm1717_vm10, %v2682_v56, %v2683_v48  ;;  %v2692_v8 = vrot.slane %v14641_v25, 1  ;;  %v11460_v29 = vpop.f32.mrf.mxu1 }
 0x1ab   : > { %v14787_v32 = vsel %vm1717_vm10, %v2685_v12, %v2686_v41  ;;  %v2688_v50 = vrot.slane %v10547_v6, 1  ;;  %v14790_v4 = vadd.f32 %v11458_v53, %v3355_v18  ;;  %v11349_v63 = vadd.f32 %v11348_v52, %v11347_v26  ;;  %v11350_v7 = vpop.f32.mrf.mxu0  ;;  %v16302_v6 = vld [vmem:[#allocation63_spill] sm:$0xff] }
 0x1ac   : > { %v14792_v24 = vrot.slane %v2114_v2, 1  ;;  %v2691_v28 = vrot.slane %v10548_v15, 1  ;;  %v2533_v34 = vsel %vm1460_vm6, %v2528_v60, %v14543_v37  ;;  %v11461_v43 = vadd.f32 %v11460_v29, %v11459_v31  ;;  %v16297_v2 = vld [vmem:[#allocation30_spill] sm:$0xff]  ;;  %v11462_v36 = vpop.f32.mrf.mxu1 }
 0x1ad   : > { %v14795_v21 = vsel %vm1717_vm10, %v2688_v50, %v2689_v42  ;;  %v3360_v44 = vadd.f32 %v11349_v63, %v14487_v11  ;;  %v16298_v14 = vshrl.u32 %v16297_v2, 16  ;;  %v11351_v59 = vpop.f32.mrf.mxu0  ;;  %3896 = vmatprep.mubr.bf16.mxu1 %v2533_v34  ;;  %v16300_v60 = vshrl.u32 %v14513_v57, 16  ;;  %v16303_v15 = vld [vmem:[#allocation70_spill] sm:$0xff]  ;;  %v16304_v50 = vld [vmem:[#allocation31_spill] sm:$0xff]  ;;  %v16306_v63 = vld [vmem:[#allocation32_spill] sm:$0xff] }
 0x1ae   : > { %v14802_v25 = vsel %vm1717_vm10, %v2691_v28, %v2692_v8  ;;  %v11352_v53 = vadd.f32 %v11351_v59, %v11350_v7  ;;  %v11463_v37 = vpop.f32.mrf.mxu1  ;;  %v16301_v41 = vrot.slane %v14473_v1, 1  ;;  %v16305_v8 = vshrl.u32 %v16304_v50, 16  ;;  %v16307_v34 = vld [vmem:[#allocation58_spill] sm:$0xff] }
 0x1af   : > { %v2064_v48 = vor.u32 %v16299_v20, %v16298_v14  ;;  %v14809_v35 = vadd.f32 %v11461_v43, %v3360_v44  ;;  %v2540_v39 = vor.u32 %v14591_v62, %v16300_v60  ;;  %v11464_v49 = vadd.f32 %v11463_v37, %v11462_v36  ;;  %v11353_v62 = vpop.f32.mrf.mxu0  ;;  %v16309_v43 = vld [vmem:[#allocation40_spill] sm:$0xff] }
 0x1b0   : > { %v3363_v26 = vadd.f32 %v11352_v53, %v14487_v11  ;;  %v11465_v12 = vpop.f32.mrf.mxu1  ;;  %v2220_v23 = vsel %vm1717_vm10, %v16302_v6, %v16301_v41  ;;  %v16308_v44 = vshrl.u32 %v16307_v34, 16  ;;  %v16310_v20 = vld [vmem:[#allocation68_spill] sm:$0xff]  ;;  %v16311_v53 = vld [vmem:[#allocation65_spill] sm:$0xff] }
 0x1b1   : > { %v2069_v56 = vsel %vm1460_vm6, %v2064_v48, %v14501_v40  ;;  %v2545_v52 = vsel %vm1460_vm6, %v2540_v39, %v16303_v15  ;;  %v2076_v40 = vor.u32 %v16306_v63, %v16305_v8  ;;  %3897 = vmatmul.mubr.bf16.gmra.mxu1 %v14460_v19  ;;  %v11354_v1 = vpop.f32.mrf.mxu0  ;;  %v16312_v37 = vrot.slane %v16311_v53, 1  ;;  %v16313_v60 = vld [vmem:[#allocation64_spill] sm:$0xff]  ;;  %v16314_v41 = vld [vmem:[#allocation73_spill] sm:$0xff] }
 0x1b2   : > { %v14821_v18 = vadd.f32 %v11464_v49, %v3363_v26  ;;  %v11466_v42 = vpop.f32.mrf.mxu1  ;;  %3736 = vmatmul.mubr.bf16.gmra.mxu0 %v2069_v56  ;;  %3904 = vmatprep.mubr.bf16.mxu1 %v2545_v52  ;;  %v11355_v7 = vadd.f32 %v11354_v1, %v11353_v62  ;;  %v2552_v2 = vor.u32 %v16309_v43, %v16308_v44  ;;  %v16315_v15 = vld [vmem:[#allocation33_spill] sm:$0xff]  ;;  %v16317_v62 = vld [vmem:[#allocation36_spill] sm:$0xff]  ;;  %v16320_v44 = vld [vmem:[#allocation46_spill] sm:$0xff] }
 0x1b3   : > { %v11467_v31 = vadd.f32 %v11466_v42, %v11465_v12  ;;  %3743 = vmatprep.mubr.bf16.mxu0 %v2220_v23  ;;  %v11356_v14 = vpop.f32.mrf.mxu0  ;;  %v2081_v48 = vsel %vm1460_vm6, %v2076_v40, %v16310_v20  ;;  %v2223_v19 = vsel %vm1717_vm10, %v16313_v60, %v16312_v37  ;;  %v16316_v52 = vshrl.u32 %v16315_v15, 16 }
 0x1b4   : > { %v11468_v28 = vpop.f32.mrf.mxu1  ;;  %v3368_v59 = vadd.f32 %v11355_v7, %v14487_v11  ;;  %v2557_v6 = vsel %vm1460_vm6, %v2552_v2, %v16314_v41  ;;  %v16318_v7 = vld [vmem:[#allocation44_spill] sm:$0xff] }
 0x1b5   : > { %v11357_v39 = vpop.f32.mrf.mxu0  ;;  %v2088_v50 = vor.u32 %v16317_v62, %v16316_v52  ;;  %v16327_v52 = vld [vmem:[#allocation37_spill] sm:$0xff] }
 0x1b6   : > { %v11469_v29 = vpop.f32.mrf.mxu1  ;;  %v14839_v26 = vadd.f32 %v11467_v31, %v3368_v59  ;;  %v11358_v49 = vadd.f32 %v11357_v39, %v11356_v14  ;;  %v16321_v14 = vld [vmem:[#allocation71_spill] sm:$0xff] }
 0x1b7   : > { %v11470_v56 = vadd.f32 %v11469_v29, %v11468_v28  ;;  %v11359_v23 = vpop.f32.mrf.mxu0  ;;  %v16319_v29 = vshrl.u32 %v16318_v7, 16  ;;  %v2093_v20 = vsel %vm1460_vm6, %v2088_v50, %v16321_v14  ;;  %v16330_v14 = vld [vmem:[#allocation67_spill] sm:$0xff] }
 0x1b8   : > { %v11471_v36 = vpop.f32.mrf.mxu1  ;;  %v3371_v8 = vadd.f32 %v11358_v49, %v14487_v11 }
 0x1b9   : > { %3905 = vmatmul.mubr.bf16.gmra.mxu1 %v14513_v57  ;;  %v11360_v31 = vpop.f32.mrf.mxu0  ;;  %v2564_v43 = vor.u32 %v16320_v44, %v16319_v29  ;;  %v16324_v57 = vld [vmem:[#allocation66_spill] sm:$0xff] }
 0x1ba   : > { %v11472_v12 = vpop.f32.mrf.mxu1  ;;  %3744 = vmatmul.mubr.bf16.gmra.mxu0 %v2081_v48  ;;  %3912 = vmatprep.mubr.bf16.mxu1 %v2557_v6  ;;  %v14848_v40 = vadd.f32 %v11470_v56, %v3371_v8  ;;  %v11361_v28 = vadd.f32 %v11360_v31, %v11359_v23  ;;  %v16325_v23 = vld [vmem:[#allocation34_spill] sm:$0xff] }
 0x1bb   : > { %v11473_v42 = vadd.f32 %v11472_v12, %v11471_v36  ;;  %3751 = vmatprep.mubr.bf16.mxu0 %v2223_v19  ;;  %v11362_v2 = vpop.f32.mrf.mxu0  ;;  %v16322_v36 = vld [vmem:[#allocation59_spill] sm:$0xff]  ;;  %v2569_v12 = vsel %vm1460_vm6, %v2564_v43, %v14766_v58  ;;  %v16326_v15 = vshrl.u32 %v16325_v23, 16  ;;  %v16329_v44 = vld [vmem:[#allocation74_spill] sm:$0xff] }
 0x1bc   : > { %v11474_v63 = vpop.f32.mrf.mxu1  ;;  %v3376_v48 = vadd.f32 %v11361_v28, %v14487_v11  ;;  %v16323_v53 = vrot.slane %v16322_v36, 1  ;;  %v16328_v28 = vshrl.u32 %v14646_v9, 16 }
 0x1bd   : > { %v11363_v60 = vpop.f32.mrf.mxu0  ;;  %v2100_v62 = vor.u32 %v16327_v52, %v16326_v15  ;;  %v14897_v52 = vld [vmem:[%s16065_s2] ss:$0 sm:$0xff] }
 0x1be   : > { %v11475_v1 = vpop.f32.mrf.mxu1  ;;  %v2226_v37 = vsel %vm1717_vm10, %v16324_v57, %v16323_v53  ;;  %v14860_v19 = vadd.f32 %v11473_v42, %v3376_v48  ;;  %v11364_v39 = vadd.f32 %v11363_v60, %v11362_v2  ;;  %v2576_v58 = vor.u32 %v14741_v46, %v16328_v28 }
 0x1bf   : > { %v11476_v49 = vadd.f32 %v11475_v1, %v11474_v63  ;;  %v11365_v41 = vpop.f32.mrf.mxu0  ;;  %v2105_v43 = vsel %vm1460_vm6, %v2100_v62, %v16329_v44 }
 0x1c0   : > { %v11477_v59 = vpop.f32.mrf.mxu1  ;;  %v3379_v50 = vadd.f32 %v11364_v39, %v14487_v11  ;;  %v2581_v46 = vsel %vm1460_vm6, %v2576_v58, %v14752_v3  ;;  %v16333_v39 = vld [vmem:[#allocation47_spill] sm:$0xff] }
 0x1c1   : > { %3913 = vmatmul.mubr.bf16.gmra.mxu1 %v16307_v34  ;;  %v11366_v42 = vpop.f32.mrf.mxu0  ;;  %v2229_v34 = vsel %vm1717_vm10, %v16330_v14, %v2228_v45 }
 0x1c2   : > { %v11478_v56 = vpop.f32.mrf.mxu1  ;;  %3752 = vmatmul.mubr.bf16.gmra.mxu0 %v2093_v20  ;;  %3920 = vmatprep.mubr.bf16.mxu1 %v2569_v12  ;;  %v14869_v63 = vadd.f32 %v11476_v49, %v3379_v50  ;;  %v11367_v31 = vadd.f32 %v11366_v42, %v11365_v41 }
 0x1c3   : > { %v11479_v6 = vadd.f32 %v11478_v56, %v11477_v59  ;;  %3759 = vmatprep.mubr.bf16.mxu0 %v2226_v37  ;;  %v11368_v1 = vpop.f32.mrf.mxu0  ;;  %v16331_v37 = vld [vmem:[#allocation42_spill] sm:$0xff] }
 0x1c4   : > { %v11480_v8 = vpop.f32.mrf.mxu1  ;;  %v3384_v2 = vadd.f32 %v11367_v31, %v14487_v11  ;;  %v16332_v60 = vshrl.u32 %v16331_v37, 16 }
 0x1c5   : > { %v11369_v20 = vpop.f32.mrf.mxu0 }
 0x1c6   : > { %v11481_v29 = vpop.f32.mrf.mxu1  ;;  %v14881_v48 = vadd.f32 %v11479_v6, %v3384_v2  ;;  %v11370_v59 = vadd.f32 %v11369_v20, %v11368_v1  ;;  %v2112_v49 = vor.u32 %v16333_v39, %v16332_v60  ;;  %v16336_v20 = vld [vmem:[#allocation43_spill] sm:$0xff] }
 0x1c7   : > { %v11482_v36 = vadd.f32 %v11481_v29, %v11480_v8  ;;  %v11371_v53 = vpop.f32.mrf.mxu0 }
 0x1c8   : > { %v11483_v57 = vpop.f32.mrf.mxu1  ;;  %v3387_v47 = vadd.f32 %v11370_v59, %v14487_v11  ;;  %v2117_v15 = vsel %vm1460_vm6, %v2112_v49, %v14792_v24 }
 0x1c9   : > { %3921 = vmatmul.mubr.bf16.gmra.mxu1 %v16318_v7  ;;  %v11372_v45 = vpop.f32.mrf.mxu0  ;;  %v16334_v7 = vld [vmem:[#allocation39_spill] sm:$0xff] }
 0x1ca   : > { %3760 = vmatmul.mubr.bf16.gmra.mxu0 %v2105_v43  ;;  %v11484_v56 = vpop.f32.mrf.mxu1  ;;  %3928 = vmatprep.mubr.bf16.mxu1 %v2581_v46  ;;  %v14890_v12 = vadd.f32 %v11482_v36, %v3387_v47  ;;  %v11373_v41 = vadd.f32 %v11372_v45, %v11371_v53  ;;  %v16335_v62 = vrot.slane %v16334_v7, 1  ;;  %v16337_v36 = vld [vmem:[#allocation41_spill] sm:$0xff] }
 0x1cb   : > { %3767 = vmatprep.mubr.bf16.mxu0 %v2229_v34  ;;  %v11485_v6 = vadd.f32 %v11484_v56, %v11483_v57  ;;  %v11374_v23 = vpop.f32.mrf.mxu0 }
 0x1cc   : > { %v11486_v3 = vpop.f32.mrf.mxu1  ;;  %v3392_v11 = vadd.f32 %v14897_v52, %v11373_v41  ;;  %v2648_v50 = vsel %vm1717_vm10, %v14732_v51, %v16335_v62 }
 0x1cd   : > { %v11375_v8 = vpop.f32.mrf.mxu0 }
 0x1ce   : > { %v11487_v42 = vpop.f32.mrf.mxu1  ;;  %v14904_v31 = vadd.f32 %v11485_v6, %v3392_v11  ;;  %v11376_v28 = vadd.f32 %v11375_v8, %v11374_v23 }
 0x1cf   : > { %v11488_v58 = vadd.f32 %v11487_v42, %v11486_v3 }
 0x1d0   : > { %v3395_v24 = vadd.f32 %v14897_v52, %v11376_v28  ;;  %v11489_v29 = vpop.f32.mrf.mxu1 }
 0x1d1   : > { %3929 = vmatmul.mubr.bf16.gmra.mxu1 %v14646_v9 }
 0x1d2   : > { %3768 = vmatmul.mubr.bf16.gmra.mxu0 %v2117_v15  ;;  %v14908_v1 = vadd.f32 %v11488_v58, %v3395_v24  ;;  %v11377_v44 = vpop.f32.mrf.mxu0  ;;  %v11490_v43 = vpop.f32.mrf.mxu1 }
 0x1d3   : > { %12205 = vmatprep.mubr.bf16.mxu0 %v2648_v50  ;;  %v11491_v14 = vadd.f32 %v11490_v43, %v11489_v29  ;;  %v12634_v43 = vld [vmem:[#allocation11 + $0x38] sm:$0xff]  }
 0x1d4   : > { %v11378_v2 = vpop.f32.mrf.mxu0  ;;  %v11492_v34 = vpop.f32.mrf.mxu1 }
 0x1d5   : > { %v11379_v51 = vadd.f32 %v11378_v2, %v11377_v44  ;;  %v12633_v44 = vld [vmem:[#allocation11 + $0x78] sm:$0xff]  }
 0x1d6   : > { %v11380_v59 = vpop.f32.mrf.mxu0  ;;  %v11493_v53 = vpop.f32.mrf.mxu1  ;;  %11779 = vmatprep.subr.bf16.mxu1 %v12633_v44 }
 0x1d7   : > { %v3400_v46 = vadd.f32 %v14897_v52, %v11379_v51  ;;  %v11494_v60 = vadd.f32 %v11493_v53, %v11492_v34  ;;  %11780 = vmatpush3.bf16.msra.mxu1 %v12634_v43 }
 0x1d8   : > { %v11381_v57 = vpop.f32.mrf.mxu0  ;;  %v11495_v39 = vpop.f32.mrf.mxu1 }
 0x1d9   : > { %v14913_v37 = vadd.f32 %v11491_v14, %v3400_v46  ;;  %v11382_v9 = vadd.f32 %v11381_v57, %v11380_v59 }
 0x1da   : > { %12206 = vmatmul.mubr.bf16.vlgmr.msra.gmra.mxu0 %v16336_v20  ;;  %v11383_v49 = vpop.f32.mrf.mxu0  ;;  %v11496_v45 = vpop.f32.mrf.mxu1 }
 0x1db   : > { %12209 = vmatprep.mubr.bf16.mxu0 %v16337_v36  ;;  %v3403_v47 = vadd.f32 %v14897_v52, %v11382_v9  ;;  %v11497_v41 = vadd.f32 %v11496_v45, %v11495_v39 }
 0x1dc   : > { %v11384_v56 = vpop.f32.mrf.mxu0  ;;  %v11498_v3 = vpop.f32.mrf.mxu1 }
 0x1dd   : > { %v14916_v6 = vadd.f32 %v11494_v60, %v3403_v47  ;;  %v11385_v23 = vadd.f32 %v11384_v56, %v11383_v49 }
 0x1de   : > { %v11386_v15 = vpop.f32.mrf.mxu0  ;;  %v11499_v7 = vpop.f32.mrf.mxu1 }
 0x1df   : > { %v3408_v11 = vadd.f32 %v14897_v52, %v11385_v23  ;;  %v11500_v42 = vadd.f32 %v11499_v7, %v11498_v3 }
 0x1e0   : > { %v11387_v62 = vpop.f32.mrf.mxu0  ;;  %v11501_v28 = vpop.f32.mrf.mxu1 }
 0x1e1   : > { %v14921_v50 = vadd.f32 %v11497_v41, %v3408_v11  ;;  %v11388_v8 = vadd.f32 %v11387_v62, %v11386_v15 }
 0x1e2   : > { %12210 = vmatmul.mubr.bf16.gmra.mxu0 %v14696_v13  ;;  %v11389_v58 = vpop.f32.mrf.mxu0  ;;  %v11502_v29 = vpop.f32.mrf.mxu1 }
 0x1e3   : > { %12213 = vmatprep.mubr.bf16.mxu0 %v14701_v16  ;;  %v3411_v24 = vadd.f32 %v14897_v52, %v11388_v8  ;;  %v11503_v13 = vadd.f32 %v11502_v29, %v11501_v28  ;;  %v12636_v28 = vld [vmem:[#allocation11 + $0x30] sm:$0xff]  }
 0x1e4   : > { %v11390_v2 = vpop.f32.mrf.mxu0  ;;  %v11504_v51 = vpop.f32.mrf.mxu1 }
 0x1e5   : > { %v14924_v14 = vadd.f32 %v11500_v42, %v3411_v24  ;;  %v11391_v16 = vadd.f32 %v11390_v2, %v11389_v58  ;;  %v12635_v42 = vld [vmem:[#allocation11 + $0x70] sm:$0xff]  }
 0x1e6   : > { %v11392_v34 = vpop.f32.mrf.mxu0  ;;  %v11505_v59 = vpop.f32.mrf.mxu1  ;;  %11781 = vmatprep.subr.bf16.mxu1 %v12635_v42 }
 0x1e7   : > { %v3416_v20 = vadd.f32 %v14897_v52, %v11391_v16  ;;  %v11506_v57 = vadd.f32 %v11505_v59, %v11504_v51  ;;  %11782 = vmatpush3.bf16.msra.mxu1 %v12636_v28 }
 0x1e8   : > { %v11393_v36 = vpop.f32.mrf.mxu0 }
 0x1e9   : > { %v14929_v46 = vadd.f32 %v11503_v13, %v3416_v20  ;;  %v11394_v53 = vadd.f32 %v11393_v36, %v11392_v34 }
 0x1ea   : > { %12214 = vmatmul.mubr.bf16.gmra.mxu0 %v14709_v55  ;;  %v11395_v9 = vpop.f32.mrf.mxu0 }
 0x1eb   : > { %12217 = vmatprep.mubr.bf16.mxu0 %v14725_v61  ;;  %v3419_v60 = vadd.f32 %v14897_v52, %v11394_v53 }
 0x1ec   : > { %v11507_v39 = vpop.f32.mrf.mxu1  ;;  %v11396_v49 = vpop.f32.mrf.mxu0 }
 0x1ed   : > { %v14932_v47 = vadd.f32 %v11506_v57, %v3419_v60  ;;  %v11397_v55 = vadd.f32 %v11396_v49, %v11395_v9  ;;  %v12637_v60 = vld [vmem:[#allocation11 + $0x68] sm:$0xff]  }
 0x1ee   : > { %v11508_v45 = vpop.f32.mrf.mxu1  ;;  %v11398_v61 = vpop.f32.mrf.mxu0  ;;  %11783 = vmatprep.subr.bf16.mxu1 %v12637_v60  ;;  %v16340_v60 = vld [vmem:[#allocation69_spill] sm:$0xff] }
 0x1ef   : > { %v11509_v56 = vadd.f32 %v11508_v45, %v11507_v39  ;;  %v3424_v41 = vadd.f32 %v14897_v52, %v11397_v55  ;;  %v12638_v39 = vld [vmem:[#allocation11 + $0x28] sm:$0xff]  }
 0x1f0   : > { %v11510_v23 = vpop.f32.mrf.mxu1  ;;  %v11399_v3 = vpop.f32.mrf.mxu0  ;;  %11784 = vmatpush3.bf16.msra.mxu1 %v12638_v39 }
 0x1f1   : > { %v14937_v15 = vadd.f32 %v11509_v56, %v3424_v41  ;;  %v11400_v11 = vadd.f32 %v11399_v3, %v11398_v61 }
 0x1f2   : > { %12218 = vmatmul.mubr.bf16.gmra.mxu0 %v14728_v38  ;;  %v11511_v7 = vpop.f32.mrf.mxu1 }
 0x1f3   : > { %12221 = vmatprep.mubr.bf16.mxu0 %v14735_v27  ;;  %v11512_v62 = vadd.f32 %v11511_v7, %v11510_v23  ;;  %v3427_v8 = vadd.f32 %v14897_v52, %v11400_v11 }
 0x1f5   : > { %v14940_v58 = vadd.f32 %v11512_v62, %v3427_v8 }
 0x1f8   : > { %v11513_v38 = vpop.f32.mrf.mxu1 }
 0x1f9   : > { %v11401_v27 = vpop.f32.mrf.mxu0 }
 0x1fa   : > { %12222 = vmatmul.mubr.bf16.gmra.mxu0 %v14755_v22  ;;  %v11514_v24 = vpop.f32.mrf.mxu1 }
 0x1fb   : > { %12225 = vmatprep.mubr.bf16.mxu0 %v14758_v30  ;;  %v11515_v29 = vadd.f32 %v11514_v24, %v11513_v38  ;;  %v11402_v44 = vpop.f32.mrf.mxu0 }
 0x1fc   : > { %v11516_v43 = vpop.f32.mrf.mxu1  ;;  %v11403_v2 = vadd.f32 %v11402_v44, %v11401_v27  ;;  %v12640_v44 = vld [vmem:[#allocation11 + $0x20] sm:$0xff]  }
 0x1fd   : > { %v11404_v13 = vpop.f32.mrf.mxu0 }
 0x1fe   : > { %v11517_v16 = vpop.f32.mrf.mxu1  ;;  %v3432_v51 = vadd.f32 %v14897_v52, %v11403_v2 }
 0x1ff   : > { %v11405_v34 = vpop.f32.mrf.mxu0  ;;  %v11518_v59 = vadd.f32 %v11517_v16, %v11516_v43 }
 0x200   : > { %v11519_v22 = vpop.f32.mrf.mxu1  ;;  %v14947_v20 = vadd.f32 %v11515_v29, %v3432_v51  ;;  %v11406_v30 = vadd.f32 %v11405_v34, %v11404_v13  ;;  %v12639_v29 = vld [vmem:[#allocation11 + $0x60] sm:$0xff]  }
 0x201   : > { %v11407_v36 = vpop.f32.mrf.mxu0  ;;  %11785 = vmatprep.subr.bf16.mxu1 %v12639_v29  ;;  %v4784_v29 = vld [vmem:[#allocation3 + $0xc] sm:$0x1] }
 0x202   : > { %12226 = vmatmul.mubr.bf16.gmra.mxu0 %v14779_v54  ;;  %v11520_v53 = vpop.f32.mrf.mxu1  ;;  %v3435_v57 = vadd.f32 %v14897_v52, %v11406_v30  ;;  %11786 = vmatpush3.bf16.msra.mxu1 %v12640_v44 }
 0x203   : > { %12229 = vmatprep.mubr.bf16.mxu0 %v14784_v0  ;;  %v11521_v9 = vadd.f32 %v11520_v53, %v11519_v22  ;;  %v11408_v54 = vpop.f32.mrf.mxu0 }
 0x204   : > { %v11522_v49 = vpop.f32.mrf.mxu1  ;;  %v14950_v55 = vadd.f32 %v11518_v59, %v3435_v57  ;;  %v11409_v45 = vadd.f32 %v11408_v54, %v11407_v36 }
 0x205   : > { %v11410_v0 = vpop.f32.mrf.mxu0 }
 0x206   : > { %v11523_v61 = vpop.f32.mrf.mxu1  ;;  %v3440_v56 = vadd.f32 %v14897_v52, %v11409_v45 }
 0x207   : > { %v11411_v41 = vpop.f32.mrf.mxu0  ;;  %v11524_v11 = vadd.f32 %v11523_v61, %v11522_v49 }
 0x208   : > { %v14955_v23 = vadd.f32 %v11521_v9, %v3440_v56  ;;  %v11412_v3 = vadd.f32 %v11411_v41, %v11410_v0 }
 0x20a   : > { %12230 = vmatmul.mubr.bf16.gmra.mxu0 %v14787_v32  ;;  %v3443_v7 = vadd.f32 %v14897_v52, %v11412_v3 }
 0x20b   : > { %12233 = vmatprep.mubr.bf16.mxu0 %v14795_v21 }
 0x20c   : > { %v14958_v62 = vadd.f32 %v11524_v11, %v3443_v7  ;;  %v11413_v8 = vpop.f32.mrf.mxu0 }
 0x20e   : > { %v11414_v32 = vpop.f32.mrf.mxu0 }
 0x20f   : > { %v11525_v42 = vpop.f32.mrf.mxu1  ;;  %v11415_v28 = vadd.f32 %v11414_v32, %v11413_v8  ;;  %v16342_v32 = vld [vmem:[#allocation45_spill] sm:$0xff] }
 0x210   : > { %v11416_v38 = vpop.f32.mrf.mxu0 }
 0x211   : > { %v11526_v27 = vpop.f32.mrf.mxu1  ;;  %v3448_v24 = vadd.f32 %v14897_v52, %v11415_v28 }
 0x212   : > { %12234 = vmatmul.mubr.bf16.gmra.mxu0 %v14802_v25  ;;  %v11527_v21 = vadd.f32 %v11526_v27, %v11525_v42  ;;  %v11417_v43 = vpop.f32.mrf.mxu0 }
 0x213   : > { %v11528_v2 = vpop.f32.mrf.mxu1  ;;  %v11418_v16 = vadd.f32 %v11417_v43, %v11416_v38  ;;  %v4166_v43 = vlaneseq }
 0x214   : > { %v14962_v13 = vadd.f32 %v11527_v21, %v3448_v24  ;;  %v11547_v34 = vpop.f32.mrf.mxu0 }
 0x215   : > { %v11529_v51 = vpop.f32.mrf.mxu1  ;;  %v3451_v25 = vadd.f32 %v14897_v52, %v11418_v16  ;;  %v16341_v52 = vld [vmem:[#allocation72_spill] sm:$0xff] }
 0x216   : > { %16338 = vst [vmem:[#allocation35_spill] sm:$0xff] %v14962_v13  ;;  %v11530_v22 = vadd.f32 %v11529_v51, %v11528_v2  ;;  %v11548_v30 = vpop.f32.mrf.mxu0  ;;  %v4785_v2 = vsel %vm13636_vm5, 0, %v4784_v29 }
 0x217   : > { %v14965_v59 = vpop.f32.mrf.mxu1  ;;  %v11549_v53 = vadd.f32 %v11548_v30, %v11547_v34  ;;  %4786 = vst [vmem:[#allocation3 + $0xc] sm:$0x1] %v4785_v2 }
 0x218   : > { %v14967_v36 = vadd.f32 %v11530_v22, %v3451_v25  ;;  %v11550_v57 = vpop.f32.mrf.mxu0 }
 0x219   : > { %v14969_v9 = vpop.f32.mrf.mxu1  ;;  %v14972_v39 = vadd.f32 %v11549_v53, %v16340_v60  ;;  %v4760_v60 = vld [vmem:[#allocation3 + $0x8] sm:$0x1] }
 0x21a   : > { %16339 = vst [vmem:[#allocation48_spill] sm:$0xff] %v14967_v36  ;;  %v11551_v54 = vpop.f32.mrf.mxu0 }
 0x21b   : > { %v14974_v49 = vpop.f32.mrf.mxu1  ;;  %v11552_v45 = vadd.f32 %v11551_v54, %v11550_v57  ;;  %v12871_v54 = vld [vmem:[#allocation14 + $0xe8] sm:$0xff]  }
 0x21c   : > { %v11553_v0 = vpop.f32.mrf.mxu0 }
 0x21d   : > { %v14976_v61 = vpop.f32.mrf.mxu1  ;;  %v14979_v56 = vadd.f32 %v11552_v45, %v16341_v52  ;;  %v4761_v45 = vsel %vm13620_vm2, 0, %v4760_v60 }
 0x21e   : > { %v11554_v41 = vpop.f32.mrf.mxu0  ;;  %4762 = vst [vmem:[#allocation3 + $0x8] sm:$0x1] %v4761_v45 }
 0x21f   : > { %v14981_v3 = vpop.f32.mrf.mxu1  ;;  %v11555_v11 = vadd.f32 %v11554_v41, %v11553_v0 }
 0x220   : > { %v11556_v7 = vpop.f32.mrf.mxu0 }
 0x221   : > { %v14983_v8 = vpop.f32.mrf.mxu1  ;;  %v14986_v42 = vadd.f32 %v11555_v11, %v16342_v32 }
 0x222   : > { %v11557_v28 = vpop.f32.mrf.mxu0 }
 0x223   : > { %v14988_v38 = vpop.f32.mrf.mxu1  ;;  %v11558_v27 = vadd.f32 %v11557_v28, %v11556_v7 }
 0x224   : > { %v11559_v24 = vpop.f32.mrf.mxu0 }
 0x225   : > { %v14990_v21 = vpop.f32.mrf.mxu1  ;;  %v14993_v44 = vadd.f32 %v11558_v27, %v14698_v10 }
 0x226   : > { %v11560_v16 = vpop.f32.mrf.mxu0 }
 0x227   : > { %v14997_v51 = vpop.f32.mrf.mxu1  ;;  %v11561_v34 = vadd.f32 %v11560_v16, %v11559_v24 }
 0x228   : > { %v11562_v25 = vpop.f32.mrf.mxu0 }
 0x229   : > { %v14999_v22 = vpop.f32.mrf.mxu1  ;;  %v15002_v30 = vadd.f32 %v11561_v34, %v14717_v33 }
 0x22a   : > { %v11563_v53 = vpop.f32.mrf.mxu0 }
 0x22b   : > { %v15004_v57 = vpop.f32.mrf.mxu1  ;;  %v11564_v10 = vadd.f32 %v11563_v53, %v11562_v25 }
 0x22c   : > { %v11565_v0 = vpop.f32.mrf.mxu0 }
 0x22d   : > { %v15008_v52 = vpop.f32.mrf.mxu1  ;;  %v15011_v41 = vadd.f32 %v11564_v10, %v14744_v5 }
 0x22e   : > { %v11566_v11 = vpop.f32.mrf.mxu0 }
 0x22f   : > { %16345 = vst [vmem:[#allocation49_spill] sm:$0xff] %v15011_v41  ;;  %v15013_v7 = vpop.f32.mrf.mxu1  ;;  %v11567_v33 = vadd.f32 %v11566_v11, %v11565_v0  ;;  %v4787_v0 = vld [vmem:[#allocation3 + $0x14] sm:$0x1] }
 0x230   : > { %v11568_v32 = vpop.f32.mrf.mxu0 }
 0x231   : > { %v15015_v28 = vpop.f32.mrf.mxu1  ;;  %v15018_v27 = vadd.f32 %v11567_v33, %v14772_v17 }
 0x232   : > { %v11569_v24 = vpop.f32.mrf.mxu0 }
 0x233   : > { %16346 = vst [vmem:[#allocation50_spill] sm:$0xff] %v15018_v27  ;;  %v15020_v29 = vpop.f32.mrf.mxu1  ;;  %v11570_v2 = vadd.f32 %v11569_v24, %v11568_v32  ;;  %v12641_v32 = vld [vmem:[#allocation11 + $0x58] sm:$0xff]  }
 0x234   : > { %v11571_v16 = vpop.f32.mrf.mxu0  ;;  %v12642_v24 = vld [vmem:[#allocation11 + $0x18] sm:$0xff]   ;;  %11787 = vmatprep.subr.bf16.mxu1 %v12641_v32 }
 0x235   : > { %v15022_v34 = vpop.f32.mrf.mxu1  ;;  %v15025_v5 = vadd.f32 %v11570_v2, %v14790_v4  ;;  %v4788_v4 = vsel %vm13636_vm5, 0, %v4787_v0  ;;  %11788 = vmatpush3.bf16.msra.mxu1 %v12642_v24 }
 0x236   : > { %v11572_v25 = vpop.f32.mrf.mxu0  ;;  %4789 = vst [vmem:[#allocation3 + $0x14] sm:$0x1] %v4788_v4 }
 0x237   : > { %16347 = vst [vmem:[#allocation51_spill] sm:$0xff] %v15025_v5  ;;  %v15027_v53 = vpop.f32.mrf.mxu1  ;;  %v11573_v60 = vadd.f32 %v11572_v25, %v11571_v16 }
 0x238   : > { %v11574_v10 = vpop.f32.mrf.mxu0 }
 0x239   : > { %v15029_v45 = vpop.f32.mrf.mxu1  ;;  %v15032_v17 = vadd.f32 %v11573_v60, %v14809_v35  ;;  %v4763_v60 = vld [vmem:[#allocation3 + $0x10] sm:$0x1] }
 0x23a   : > { %v11575_v11 = vpop.f32.mrf.mxu0  ;;  %v4764_v5 = vsel %vm13620_vm2, 0, %v4763_v60 }
 0x23b   : > { %16348 = vst [vmem:[#allocation38_spill] sm:$0xff] %v15032_v17  ;;  %v15034_v33 = vpop.f32.mrf.mxu1  ;;  %v11576_v2 = vadd.f32 %v11575_v11, %v11574_v10  ;;  %4765 = vst [vmem:[#allocation3 + $0x10] sm:$0x1] %v4764_v5 }
 0x23d   : > { %v15038_v13 = vpop.f32.mrf.mxu1  ;;  %v15041_v16 = vadd.f32 %v11576_v2, %v14821_v18 }
 0x23e   : > { %v11577_v36 = vpop.f32.mrf.mxu0 }
 0x23f   : > { %16349 = vst [vmem:[#allocation52_spill] sm:$0xff] %v15041_v16  ;;  %v15043_v25 = vpop.f32.mrf.mxu1  ;;  %v12645_v16 = vld [vmem:[#allocation11 + $0x138] sm:$0xff]  }
 0x240   : > { %v11578_v35 = vpop.f32.mrf.mxu0 }
 0x241   : > { %v11579_v17 = vadd.f32 %v11578_v35, %v11577_v36  ;;  %v15047_v0 = vpop.f32.mrf.mxu1  ;;  %v12643_v36 = vld [vmem:[#allocation11 + $0x178] sm:$0xff]  }
 0x242   : > { %v11580_v27 = vpop.f32.mrf.mxu0  ;;  %11859 = vmatprep.subr.bf16.mxu0 %v12643_v36  ;;  %v12647_v36 = vld [vmem:[#allocation11 + $0x170] sm:$0xff]  }
 0x243   : > { %v15050_v10 = vadd.f32 %v11579_v17, %v14839_v26  ;;  %v15052_v32 = vpop.f32.mrf.mxu1  ;;  %11860 = vmatpush3.bf16.msra.mxu0 %v12645_v16 }
 0x244   : > { %v11581_v11 = vpop.f32.mrf.mxu0  ;;  %11861 = vmatprep.subr.bf16.mxu0 %v12647_v36 }
 0x245   : > { %16350 = vst [vmem:[#allocation53_spill] sm:$0xff] %v15050_v10  ;;  %v11582_v18 = vadd.f32 %v11581_v11, %v11580_v27  ;;  %v15054_v4 = vpop.f32.mrf.mxu1  ;;  %v4790_v10 = vld [vmem:[#allocation3 + $0x1c] sm:$0x1] }
 0x246   : > { %v11583_v24 = vpop.f32.mrf.mxu0 }
 0x247   : > { %v15057_v2 = vadd.f32 %v11582_v18, %v14848_v40  ;;  %v15059_v60 = vpop.f32.mrf.mxu1  ;;  %v4791_v18 = vsel %vm13636_vm5, 0, %v4790_v10 }
 0x248   : > { %v11584_v35 = vpop.f32.mrf.mxu0  ;;  %16352 = vst [vmem:[#allocation55_spill] sm:$0xff] %v15059_v60  ;;  %4792 = vst [vmem:[#allocation3 + $0x1c] sm:$0x1] %v4791_v18  ;;  %v12644_v18 = vld [vmem:[#allocation11 + $0x50] sm:$0xff]  }
 0x249   : > { %16351 = vst [vmem:[#allocation54_spill] sm:$0xff] %v15057_v2  ;;  %v11585_v41 = vadd.f32 %v11584_v35, %v11583_v24  ;;  %v15061_v26 = vpop.f32.mrf.mxu1  ;;  %11789 = vmatprep.subr.bf16.mxu1 %v12644_v18 }
 0x24a   : > { %v11586_v5 = vpop.f32.mrf.mxu0 }
 0x24b   : > { %v15064_v17 = vadd.f32 %v11585_v41, %v14860_v19  ;;  %v15066_v11 = vpop.f32.mrf.mxu1  ;;  %v12648_v19 = vld [vmem:[#allocation11 + $0x130] sm:$0xff]  }
 0x24c   : > { %v11587_v27 = vpop.f32.mrf.mxu0  ;;  %16354 = vst [vmem:[#allocation57_spill] sm:$0xff] %v15066_v11  ;;  %11862 = vmatpush3.bf16.msra.mxu0 %v12648_v19 }
 0x24d   : > { %16353 = vst [vmem:[#allocation56_spill] sm:$0xff] %v15064_v17  ;;  %v11588_v40 = vadd.f32 %v11587_v27, %v11586_v5  ;;  %v15070_v60 = vpop.f32.mrf.mxu1  ;;  %v4766_v5 = vld [vmem:[#allocation3 + $0x18] sm:$0x1] }
 0x24e   : > { %v11589_v2 = vpop.f32.mrf.mxu0  ;;  %v4767_v27 = vsel %vm13620_vm2, 0, %v4766_v5 }
 0x24f   : > { %v15073_v24 = vadd.f32 %v11588_v40, %v14869_v63  ;;  %4768 = vst [vmem:[#allocation3 + $0x18] sm:$0x1] %v4767_v27 }
 0x250   : > { %v11590_v16 = vpop.f32.mrf.mxu0  ;;  %v15075_v35 = vpop.f32.mrf.mxu1 }
 0x251   : > { %16355 = vst [vmem:[#allocation60_spill] sm:$0xff] %v15073_v24  ;;  %16356 = vst [vmem:[#allocation61_spill] sm:$0xff] %v15075_v35  ;;  %v11591_v41 = vadd.f32 %v11590_v16, %v11589_v2  ;;  %v12646_v35 = vld [vmem:[#allocation11 + $0x10] sm:$0xff]  }
 0x252   : > { %v11592_v17 = vpop.f32.mrf.mxu0  ;;  %v15077_v11 = vpop.f32.mrf.mxu1  ;;  %11790 = vmatpush3.bf16.msra.mxu1 %v12646_v35 }
 0x253   : > { %v15080_v10 = vadd.f32 %v11591_v41, %v14881_v48 }
 0x254   : > { %v11593_v63 = vpop.f32.mrf.mxu0  ;;  %v15084_v40 = vpop.f32.mrf.mxu1 }
 0x255   : > { %16357 = vst [vmem:[#allocation30_spill] sm:$0xff] %v15080_v10  ;;  %16358 = vst [vmem:[#allocation62_spill] sm:$0xff] %v15084_v40  ;;  %v11594_v24 = vadd.f32 %v11593_v63, %v11592_v17  ;;  %v4793_v40 = vld [vmem:[#allocation3 + $0x24] sm:$0x1] }
 0x256   : > { %v11595_v2 = vpop.f32.mrf.mxu0  ;;  %v15086_v36 = vpop.f32.mrf.mxu1  ;;  %v4794_v17 = vsel %vm13636_vm5, 0, %v4793_v40  ;;  %v12649_v63 = vld [vmem:[#allocation11 + $0x168] sm:$0xff]   ;;  %v12651_v40 = vld [vmem:[#allocation11 + $0x160] sm:$0xff]  }
 0x257   : > { %16359 = vst [vmem:[#allocation63_spill] sm:$0xff] %v15086_v36  ;;  %v15089_v16 = vadd.f32 %v11594_v24, %v14890_v12  ;;  %4795 = vst [vmem:[#allocation3 + $0x24] sm:$0x1] %v4794_v17  ;;  %v12650_v12 = vld [vmem:[#allocation11 + $0x128] sm:$0xff]   ;;  %11863 = vmatprep.subr.bf16.mxu0 %v12649_v63  ;;  %v12652_v17 = vld [vmem:[#allocation11 + $0x120] sm:$0xff]  }
 0x258   : > { %v11596_v48 = vpop.f32.mrf.mxu0  ;;  %11864 = vmatpush3.bf16.msra.mxu0 %v12650_v12 }
 0x259   : > { %16360 = vst [vmem:[#allocation70_spill] sm:$0xff] %v15089_v16  ;;  %v15091_v19 = vpop.f32.mrf.mxu1  ;;  %v11597_v41 = vadd.f32 %v11596_v48, %v11595_v2  ;;  %v4769_v48 = vld [vmem:[#allocation3 + $0x20] sm:$0x1]  ;;  %11865 = vmatprep.subr.bf16.mxu0 %v12651_v40 }
 0x25a   : > { %v11598_v5 = vpop.f32.mrf.mxu0 }
 0x25b   : > { %v15093_v10 = vpop.f32.mrf.mxu1  ;;  %v15096_v27 = vadd.f32 %v11597_v41, %v14904_v31  ;;  %v4770_v31 = vsel %vm13620_vm2, 0, %v4769_v48 }
 0x25c   : > { %v11599_v18 = vpop.f32.mrf.mxu0  ;;  %4771 = vst [vmem:[#allocation3 + $0x20] sm:$0x1] %v4770_v31  ;;  %11866 = vmatpush3.bf16.msra.mxu0 %v12652_v17 }
 0x25d   : > { %16361 = vst [vmem:[#allocation31_spill] sm:$0xff] %v15096_v27  ;;  %v15100_v36 = vpop.f32.mrf.mxu1  ;;  %v11600_v24 = vadd.f32 %v11599_v18, %v11598_v5 }
 0x25e   : > { %16362 = vst [vmem:[#allocation32_spill] sm:$0xff] %v15100_v36  ;;  %v11601_v35 = vpop.f32.mrf.mxu0 }
 0x25f   : > { %v15102_v2 = vpop.f32.mrf.mxu1  ;;  %v15105_v16 = vadd.f32 %v11600_v24, %v14908_v1 }
 0x260   : > { %v11602_v41 = vpop.f32.mrf.mxu0 }
 0x261   : > { %16363 = vst [vmem:[#allocation58_spill] sm:$0xff] %v15105_v16  ;;  %v15109_v27 = vpop.f32.mrf.mxu1  ;;  %v11603_v36 = vadd.f32 %v11602_v41, %v11601_v35  ;;  %v12653_v41 = vld [vmem:[#allocation11 + $0x158] sm:$0xff]  }
 0x262   : > { %16364 = vst [vmem:[#allocation40_spill] sm:$0xff] %v15109_v27  ;;  %v11604_v5 = vpop.f32.mrf.mxu0  ;;  %11867 = vmatprep.subr.bf16.mxu0 %v12653_v41 }
 0x263   : > { %v15111_v63 = vpop.f32.mrf.mxu1  ;;  %v15114_v18 = vadd.f32 %v11603_v36, %v14913_v37  ;;  %v4796_v37 = vld [vmem:[#allocation3 + $0x2c] sm:$0x1]  ;;  %v12654_v36 = vld [vmem:[#allocation11 + $0x48] sm:$0xff]  }
 0x264   : > { %16365 = vst [vmem:[#allocation68_spill] sm:$0xff] %v15111_v63  ;;  %v11605_v1 = vpop.f32.mrf.mxu0  ;;  %11791 = vmatprep.subr.bf16.mxu1 %v12654_v36 }
 0x265   : > { %16366 = vst [vmem:[#allocation65_spill] sm:$0xff] %v15114_v18  ;;  %v15116_v12 = vpop.f32.mrf.mxu1  ;;  %v11606_v24 = vadd.f32 %v11605_v1, %v11604_v5  ;;  %v12655_v18 = vld [vmem:[#allocation11 + $0x118] sm:$0xff]   ;;  %v4797_v5 = vsel %vm13636_vm5, 0, %v4796_v37 }
 0x266   : > { %16367 = vst [vmem:[#allocation64_spill] sm:$0xff] %v15116_v12  ;;  %v11607_v48 = vpop.f32.mrf.mxu0  ;;  %4798 = vst [vmem:[#allocation3 + $0x2c] sm:$0x1] %v4797_v5  ;;  %11868 = vmatpush3.bf16.msra.mxu0 %v12655_v18  ;;  %v12657_v5 = vld [vmem:[#allocation11 + $0x150] sm:$0xff]  }
 0x267   : > { %v15118_v16 = vpop.f32.mrf.mxu1  ;;  %v15121_v27 = vadd.f32 %v11606_v24, %v14916_v6  ;;  %11869 = vmatprep.subr.bf16.mxu0 %v12657_v5 }
 0x268   : > { %v11608_v31 = vpop.f32.mrf.mxu0 }
 0x269   : > { %16368 = vst [vmem:[#allocation73_spill] sm:$0xff] %v15121_v27  ;;  %v15123_v35 = vpop.f32.mrf.mxu1  ;;  %v11609_v40 = vadd.f32 %v11608_v31, %v11607_v48 }
 0x26a   : > { %v11610_v63 = vpop.f32.mrf.mxu0 }
 0x26b   : > { %v15125_v17 = vpop.f32.mrf.mxu1  ;;  %v15128_v12 = vadd.f32 %v11609_v40, %v14921_v50 }
 0x26c   : > { %16369 = vst [vmem:[#allocation33_spill] sm:$0xff] %v15125_v17  ;;  %v11611_v6 = vpop.f32.mrf.mxu0  ;;  %v12656_v17 = vld [vmem:[#allocation11 + $0x8] sm:$0xff]  }
 0x26d   : > { %16370 = vst [vmem:[#allocation36_spill] sm:$0xff] %v15128_v12  ;;  %v15132_v1 = vpop.f32.mrf.mxu1  ;;  %v11612_v24 = vadd.f32 %v11611_v6, %v11610_v63  ;;  %v4772_v12 = vld [vmem:[#allocation3 + $0x28] sm:$0x1]  ;;  %11792 = vmatpush3.bf16.msra.mxu1 %v12656_v17  ;;  %v12658_v63 = vld [vmem:[#allocation11 + $0x40] sm:$0xff]  }
 0x26e   : > { %v4773_v41 = vsel %vm13620_vm2, 0, %v4772_v12  ;;  %v12659_v6 = vld [vmem:[#allocation11 + $0x110] sm:$0xff]   ;;  %11793 = vmatprep.subr.bf16.mxu1 %v12658_v63 }
 0x26f   : > { %v15134_v31 = vpop.f32.mrf.mxu1  ;;  %v15137_v27 = vadd.f32 %v11612_v24, %v14924_v14  ;;  %4774 = vst [vmem:[#allocation3 + $0x28] sm:$0x1] %v4773_v41  ;;  %v12660_v24 = vld [vmem:[#allocation11] sm:$0xff]   ;;  %11870 = vmatpush3.bf16.msra.mxu0 %v12659_v6 }
 0x271   : > { %16371 = vst [vmem:[#allocation44_spill] sm:$0xff] %v15137_v27  ;;  %v15139_v40 = vpop.f32.mrf.mxu1  ;;  %11794 = vmatpush3.bf16.msra.mxu1 %v12660_v24 }
 0x272   : > { %v11613_v48 = vpop.f32.mrf.mxu0  ;;  %16372 = vst [vmem:[#allocation46_spill] sm:$0xff] %v15139_v40 }
 0x273   : > { %v15143_v18 = vpop.f32.mrf.mxu1 }
 0x274   : > { %v11614_v50 = vpop.f32.mrf.mxu0  ;;  %16373 = vst [vmem:[#allocation71_spill] sm:$0xff] %v15143_v18 }
 0x275   : > { %v11615_v37 = vadd.f32 %v11614_v50, %v11613_v48  ;;  %v15148_v40 = vpop.f32.mrf.mxu1 }
 0x276   : > { %v11616_v36 = vpop.f32.mrf.mxu0 }
 0x277   : > { %v15146_v14 = vadd.f32 %v11615_v37, %v14929_v46  ;;  %v15150_v17 = vpop.f32.mrf.mxu1 }
 0x278   : > { %v11617_v27 = vpop.f32.mrf.mxu0 }
 0x279   : > { %16374 = vst [vmem:[#allocation59_spill] sm:$0xff] %v15146_v14  ;;  %v11618_v48 = vadd.f32 %v11617_v27, %v11616_v36  ;;  %v15155_v18 = vpop.f32.mrf.mxu1  ;;  %v4799_v27 = vld [vmem:[#allocation3 + $0x34] sm:$0x1] }
 0x27a   : > { %v11619_v12 = vpop.f32.mrf.mxu0  ;;  %v4800_v24 = vsel %vm13636_vm5, 0, %v4799_v27 }
 0x27b   : > { %v15153_v50 = vadd.f32 %v11618_v48, %v14932_v47  ;;  %v15157_v5 = vpop.f32.mrf.mxu1  ;;  %4801 = vst [vmem:[#allocation3 + $0x34] sm:$0x1] %v4800_v24 }
 0x27c   : > { %v11620_v41 = vpop.f32.mrf.mxu0 }
 0x27d   : > { %16375 = vst [vmem:[#allocation66_spill] sm:$0xff] %v15153_v50  ;;  %v11621_v46 = vadd.f32 %v11620_v41, %v11619_v12  ;;  %v15162_v6 = vpop.f32.mrf.mxu1 }
 0x27e   : > { %v11622_v37 = vpop.f32.mrf.mxu0  ;;  %16377 = vst [vmem:[#allocation37_spill] sm:$0xff] %v15162_v6 }
 0x27f   : > { %v15160_v14 = vadd.f32 %v11621_v46, %v14937_v15  ;;  %v15166_v48 = vpop.f32.mrf.mxu1  ;;  %v4775_v15 = vld [vmem:[#allocation3 + $0x30] sm:$0x1] }
 0x280   : > { %v11623_v63 = vpop.f32.mrf.mxu0  ;;  %16378 = vst [vmem:[#allocation74_spill] sm:$0xff] %v15166_v48 }
 0x281   : > { %16376 = vst [vmem:[#allocation34_spill] sm:$0xff] %v15160_v14  ;;  %v11624_v36 = vadd.f32 %v11623_v63, %v11622_v37  ;;  %v15171_v50 = vpop.f32.mrf.mxu1  ;;  %v4776_v14 = vsel %vm13620_vm2, 0, %v4775_v15 }
 0x282   : > { %v11625_v47 = vpop.f32.mrf.mxu0  ;;  %16380 = vst [vmem:[#allocation42_spill] sm:$0xff] %v15171_v50  ;;  %4777 = vst [vmem:[#allocation3 + $0x30] sm:$0x1] %v4776_v14 }
 0x283   : > { %v15169_v12 = vadd.f32 %v11624_v36, %v14940_v58  ;;  %v15175_v37 = vpop.f32.mrf.mxu1  ;;  %v13314_v36 = vmov 1983009808  }
 0x284   : > { %v11626_v41 = vpop.f32.mrf.mxu0 }
 0x285   : > { %16379 = vst [vmem:[#allocation67_spill] sm:$0xff] %v15169_v12  ;;  %v11627_v46 = vadd.f32 %v11626_v41, %v11625_v47  ;;  %v15180_v24 = vpop.f32.mrf.mxu1  ;;  %v4164_v12 = vunpack.c.l.s4 %v13314_v36 }
 0x286   : > { %v11628_v6 = vpop.f32.mrf.mxu0 }
 0x287   : > { %v15178_v63 = vadd.f32 %v11627_v46, %v14947_v20  ;;  %v15182_v48 = vpop.f32.mrf.mxu1  ;;  %v11661_v20 = vadd.f32 %v14969_v9, %v14965_v59  ;;  %v4165_v46 = vunpack.c.0.s8 %v4164_v12  ;;  %v11676_v59 = vadd.f32 %v15008_v52, %v15004_v57 }
 0x288   : > { %v11629_v27 = vpop.f32.mrf.mxu0 }
 0x289   : > { %16381 = vst [vmem:[#allocation47_spill] sm:$0xff] %v15178_v63  ;;  %v11630_v58 = vadd.f32 %v11629_v27, %v11628_v6  ;;  %v15187_v15 = vpop.f32.mrf.mxu1  ;;  %v15191_v63 = vshrl.u32 %v4166_v43, 7  ;;  %v11664_v6 = vadd.f32 %v14976_v61, %v14974_v49  ;;  %v11667_v27 = vadd.f32 %v14983_v8, %v14981_v3 }
 0x28a   : > { %v11631_v50 = vpop.f32.mrf.mxu0  ;;  %v11679_v49 = vadd.f32 %v15015_v28, %v15013_v7  ;;  %v11682_v61 = vadd.f32 %v15022_v34, %v15020_v29  ;;  %v11685_v3 = vadd.f32 %v15029_v45, %v15027_v53  ;;  %v11688_v8 = vadd.f32 %v15038_v13, %v15034_v33  ;;  %v16384_v53 = vld [vmem:[#allocation49_spill] sm:$0xff] }
 0x28b   : > { %v15185_v47 = vadd.f32 %v11630_v58, %v14950_v55  ;;  %16383 = vst [vmem:[#allocation43_spill] sm:$0xff] %v15191_v63  ;;  %v11670_v55 = vadd.f32 %v14990_v21, %v14988_v38  ;;  %v15199_v36 = vpop.f32.mrf.mxu1  ;;  %v3819_v52 = vadd.f32 %v11667_v27, %v14986_v42  ;;  %v15231_v13 = vadd.f32 %v11664_v6, %v14979_v56  ;;  %v5318_v42 = vld [vmem:[#allocation3] sm:$0xf]  ;;  %v16385_v56 = vld [vmem:[#allocation50_spill] sm:$0xff]  ;;  %v16391_v6 = vld [vmem:[#allocation61_spill] sm:$0xff] }
 0x28c   : > { %v11632_v41 = vpop.f32.mrf.mxu0  ;;  %v11694_v28 = vadd.f32 %v15054_v4, %v15052_v32  ;;  %v15244_v45 = vadd.f32 %v11676_v59, %v16384_v53  ;;  %v11703_v27 = vadd.f32 %v15077_v11, %v16391_v6  ;;  %v16393_v59 = vld [vmem:[#allocation63_spill] sm:$0xff]  ;;  %v16396_v53 = vld [vmem:[#allocation40_spill] sm:$0xff] }
 0x28d   : > { %16382 = vst [vmem:[#allocation39_spill] sm:$0xff] %v15185_v47  ;;  %v11633_v14 = vadd.f32 %v11632_v41, %v11631_v50  ;;  %v11673_v47 = vadd.f32 %v14999_v22, %v14997_v51  ;;  %v15216_v21 = vpop.f32.mrf.mxu1  ;;  %v15219_v51 = vadd.f32 %v11661_v20, %v14972_v39  ;;  %v11691_v22 = vadd.f32 %v15047_v0, %v15043_v25  ;;  %v16386_v0 = vld [vmem:[#allocation51_spill] sm:$0xff]  ;;  %v16388_v50 = vld [vmem:[#allocation52_spill] sm:$0xff] }
 0x28e   : > { %v11634_v58 = vpop.f32.mrf.mxu0  ;;  %v15228_v7 = vadd.f32 %v11670_v55, %v14993_v44  ;;  %v15246_v44 = vld [vmem:[#allocation3 + $0x4] sm:$0x1]  ;;  %v15249_v25 = vadd.f32 %v11679_v49, %v16385_v56  ;;  %v15252_v32 = vadd.f32 %v11682_v61, %v16386_v0  ;;  %v15258_v12 = vadd.f32 %v11688_v8, %v16388_v50  ;;  %v16389_v41 = vld [vmem:[#allocation55_spill] sm:$0xff]  ;;  %v16394_v8 = vld [vmem:[#allocation53_spill] sm:$0xff] }
 0x28f   : > { %v15206_v9 = vadd.f32 %v11633_v14, %v14955_v23  ;;  %v15222_v23 = vsub.s32 %v4165_v46, %v15191_v63  ;;  %v15238_v29 = vpop.f32.mrf.mxu1  ;;  %v15241_v34 = vadd.f32 %v11673_v47, %v15002_v30  ;;  %v12666_v30 = vld [vmem:[#allocation11 + $0x148] sm:$0xff]   ;;  %v11697_v20 = vadd.f32 %v15061_v26, %v16389_v41  ;;  %v16390_v14 = vld [vmem:[#allocation57_spill] sm:$0xff] }
 0x290   : > { %v11635_v38 = vpop.f32.mrf.mxu0  ;;  %v12667_v47 = vld [vmem:[#allocation11 + $0x108] sm:$0xff]   ;;  %v11700_v46 = vadd.f32 %v15070_v60, %v16390_v14  ;;  %v11709_v61 = vadd.f32 %v15093_v10, %v15091_v19  ;;  %11871 = vmatprep.subr.bf16.mxu0 %v12666_v30  ;;  %v16402_v30 = vld [vmem:[#allocation46_spill] sm:$0xff] }
 0x291   : > { %v11636_v43 = vadd.f32 %v11635_v38, %v11634_v58  ;;  %v16392_v58 = vld [vmem:[#allocation62_spill] sm:$0xff]  ;;  %v15271_v38 = vadd.f32 %v11691_v22, %v16394_v8  ;;  %v16395_v26 = vld [vmem:[#allocation32_spill] sm:$0xff]  ;;  %v11749_v0 = vpop.f32.mrf.mxu1  ;;  %11872 = vmatpush3.bf16.msra.mxu0 %v12667_v47  ;;  %v16403_v41 = vld [vmem:[#allocation71_spill] sm:$0xff] }
 0x292   : > { %v11637_v57 = vpop.f32.mrf.mxu0  ;;  %v11706_v49 = vadd.f32 %v16393_v59, %v16392_v58  ;;  %v11712_v60 = vadd.f32 %v15102_v2, %v16395_v26  ;;  %v16397_v11 = vld [vmem:[#allocation68_spill] sm:$0xff]  ;;  %v11724_v2 = vadd.f32 %v15134_v31, %v15132_v1  ;;  %v11727_v14 = vadd.f32 %v16403_v41, %v16402_v30  ;;  %v16404_v58 = vld [vmem:[#allocation30_spill] sm:$0xff] }
 0x293   : > { %v15236_v39 = vadd.f32 %v11636_v43, %v14958_v62  ;;  %v16387_v62 = vld [vmem:[#allocation38_spill] sm:$0xff]  ;;  %v15274_v43 = vcombine.low %v5318_v42, %v15246_v44  ;;  %v16400_v19 = vld [vmem:[#allocation64_spill] sm:$0xff]  ;;  %v16401_v42 = vld [vmem:[#allocation33_spill] sm:$0xff]  ;;  %v15295_v59 = vadd.f32 %v11703_v27, %v16404_v58 }
 0x294   : > { %v11638_v33 = vpop.f32.mrf.mxu0  ;;  %v15255_v4 = vadd.f32 %v11685_v3, %v16387_v62  ;;  %v16399_v62 = vld [vmem:[#allocation54_spill] sm:$0xff]  ;;  %v11718_v22 = vadd.f32 %v15118_v16, %v16400_v19  ;;  %v11721_v50 = vadd.f32 %v16401_v42, %v15123_v35  ;;  %v16406_v47 = vld [vmem:[#allocation60_spill] sm:$0xff]  ;;  %v11730_v35 = vadd.f32 %v15150_v17, %v15148_v40  ;;  %v16412_v17 = vld [vmem:[#allocation73_spill] sm:$0xff] }
 0x295   : > { %v11639_v55 = vadd.f32 %v11638_v33, %v11637_v57  ;;  %v11715_v57 = vadd.f32 %v16397_v11, %v16396_v53  ;;  %v16398_v33 = vld [vmem:[#allocation35_spill] sm:$0xff]  ;;  %v15284_v10 = vadd.f32 %v11694_v28, %v16399_v62  ;;  %v16405_v28 = vld [vmem:[#allocation56_spill] sm:$0xff]  ;;  %v15301_v26 = vadd.f32 %v11700_v46, %v16406_v47  ;;  %v16407_v1 = vld [vmem:[#allocation70_spill] sm:$0xff] }
 0x296   : > { %v11640_v3 = vpop.f32.mrf.mxu0  ;;  %v15298_v8 = vadd.f32 %v11697_v20, %v16405_v28  ;;  %v12668_v16 = vld [vmem:[#allocation11 + $0x140] sm:$0xff]   ;;  %v15306_v31 = vadd.f32 %v11706_v49, %v16407_v1  ;;  %v5434_v27 = vshll.u32 %v15274_v43, 16  ;;  %v16409_v62 = vld [vmem:[#allocation48_spill] sm:$0xff]  ;;  %v16410_v46 = vld [vmem:[#allocation65_spill] sm:$0xff]  ;;  %v15322_v49 = vadd.f32 %v11718_v22, %v16412_v17 }
 0x297   : > { %v15281_v56 = vadd.f32 %v11639_v55, %v16398_v33  ;;  %v16408_v11 = vld [vmem:[#allocation31_spill] sm:$0xff]  ;;  %v15316_v42 = vadd.f32 %v11715_v57, %v16410_v46  ;;  %v16411_v30 = vld [vmem:[#allocation58_spill] sm:$0xff]  ;;  %11873 = vmatprep.subr.bf16.mxu0 %v12668_v16  ;;  %v16414_v58 = vld [vmem:[#allocation36_spill] sm:$0xff]  ;;  %v5432_v22 = vshrl.u32 %v15274_v43, 16 }
 0x298   : > { %v11641_v6 = vpop.f32.mrf.mxu0  ;;  %v15309_v33 = vadd.f32 %v11709_v61, %v16408_v11  ;;  %v15319_v41 = vadd.f32 %v11712_v60, %v16411_v30  ;;  %v16413_v61 = vld [vmem:[#allocation59_spill] sm:$0xff]  ;;  %v15328_v28 = vadd.f32 %v11721_v50, %v16414_v58  ;;  %v16416_v57 = vld [vmem:[#allocation37_spill] sm:$0xff]  ;;  %v16417_v60 = vld [vmem:[#allocation74_spill] sm:$0xff] }
 0x299   : > { %v11642_v55 = vadd.f32 %v11641_v6, %v11640_v3  ;;  %v11750_v3 = vpop.f32.mrf.mxu1  ;;  %v15325_v6 = vadd.f32 %v11727_v14, %v16413_v61  ;;  %v5334_v1 = vld [vmem:[#allocation3] sm:$0xe]  ;;  %v16418_v11 = vld [vmem:[#allocation42_spill] sm:$0xff]  ;;  %v4802_v61 = vld [vmem:[#allocation3 + $0x3c] sm:$0x1] }
 0x29a   : > { %v12207_v53 = vpop.f32.mrf.mxu0  ;;  %v11739_v14 = vadd.f32 %v15175_v37, %v16418_v11  ;;  %v16419_v46 = vld [vmem:[#allocation66_spill] sm:$0xff]  ;;  %v4803_v43 = vsel %vm13636_vm5, 0, %v4802_v61  ;;  %v11742_v37 = vadd.f32 %v15182_v48, %v15180_v24  ;;  %v11751_v24 = vadd.f32 %v11750_v3, %v11749_v0 }
 0x29b   : > { %v15313_v20 = vadd.f32 %v11642_v55, %v16409_v62  ;;  %v3980_v19 = vadd.f32 %v12207_v53, %v3819_v52  ;;  %v16415_v55 = vld [vmem:[#allocation44_spill] sm:$0xff]  ;;  %v11733_v52 = vadd.f32 %v15157_v5, %v15155_v18  ;;  %v11736_v53 = vadd.f32 %v16417_v60, %v16416_v57  ;;  %v4778_v17 = vld [vmem:[#allocation3 + $0x38] sm:$0x1]  ;;  %v11752_v18 = vpop.f32.mrf.mxu1  ;;  %4804 = vst [vmem:[#allocation3 + $0x3c] sm:$0x1] %v4803_v43 }
 0x29c   : > { %v3971_v40 = vpop.f32.mrf.mxu0  ;;  %v15331_v47 = vadd.f32 %v11724_v2, %v16415_v55  ;;  %v15342_v30 = vadd.f32 %v11730_v35, %v16419_v46  ;;  %v5436_v2 = vrot.slane %v5434_v27, 1  ;;  %v11745_v35 = vadd.f32 %v15199_v36, %v15187_v15  ;;  %v16423_v46 = vld [vmem:[#allocation47_spill] sm:$0xff] }
 0x29d   : > { %v3972_v16 = vadd.f32 %v3971_v40, %v15219_v51  ;;  %v4100_v62 = vmax.f32 %v3980_v19, 0.0  ;;  %v4779_v51 = vsel %vm13620_vm2, 0, %v4778_v17  ;;  %v11748_v27 = vadd.f32 %v15238_v29, %v15216_v21 }
 0x29e   : > { %v12208_v50 = vpop.f32.mrf.mxu0  ;;  %v10766_v55 = vcombine.low %v5334_v1, %v15246_v44  ;;  %4780 = vst [vmem:[#allocation3 + $0x38] sm:$0x1] %v4779_v51  ;;  %v15364_v21 = vadd.f32 %v11739_v14, %v16423_v46  ;;  %v15366_v29 = vor.u32 %v5436_v2, %v5432_v22  ;;  %v11753_v44 = vpop.f32.mrf.mxu1  ;;  %v15376_v3 = vadd.f32 %v11745_v35, %v15206_v9 }
 0x29f   : > { %v4098_v5 = vmax.f32 %v3972_v16, 0.0  ;;  %v3983_v58 = vadd.f32 %v12208_v50, %v15228_v7  ;;  %v12673_v7 = vld [vmem:[#allocation11 + $0x100] sm:$0xff]   ;;  %v15379_v22 = vadd.f32 %v11748_v27, %v15236_v39  ;;  %v15382_v51 = vadd.f32 %v11753_v44, %v11752_v18 }
 0x2a0   : > { %v3974_v19 = vpop.f32.mrf.mxu0  ;;  %v16421_v16 = vld [vmem:[#allocation34_spill] sm:$0xff]  ;;  %v16422_v50 = vld [vmem:[#allocation67_spill] sm:$0xff]  ;;  %11874 = vmatpush3.bf16.msra.mxu0 %v12673_v7  ;;  %v15370_v61 = vrot.slane %v10766_v55, 1 }
 0x2a1   : > { %v4130_v57 = vmax.f32 %v4098_v5, %v4100_v62  ;;  %v3975_v60 = vadd.f32 %v3974_v19, %v15231_v13  ;;  %v15358_v11 = vadd.f32 %v11733_v52, %v16421_v16  ;;  %v15361_v48 = vadd.f32 %v11736_v53, %v16422_v50  ;;  %v16424_v53 = vld [vmem:[#allocation39_spill] sm:$0xff]  ;;  %16425 = vst [vmem:[#allocation41_spill] sm:$0xff] %v15379_v22 }
 0x2a2   : > { %v4101_v15 = vmax.f32 %v3983_v58, 0.0  ;;  %v12211_v36 = vpop.f32.mrf.mxu0  ;;  %v15373_v0 = vadd.f32 %v11742_v37, %v16424_v53  ;;  %v15386_v37 = vadd.f32 %v11751_v24, %v15281_v56 }
 0x2a3   : > { %v4162_v1 = vcombine.high %v4130_v57, %v4130_v57  ;;  %v4169_v62 = vrot.slane %v4130_v57, %v15222_v23  ;;  %v4099_v13 = vmax.f32 %v3975_v60, 0.0  ;;  %v3996_v52 = vadd.f32 %v12211_v36, %v15249_v25 }
 0x2a4   : > { %v3987_v17 = vpop.f32.mrf.mxu0 }
 0x2a5   : > { %v4176_v14 = vrot.slane %v4162_v1, %v15222_v23  ;;  %v4177_v2 = vcombine.high %v4169_v62, %v4169_v62  ;;  %v10622_v5 = vrot.slane %v4169_v62, 9  ;;  %v4131_v58 = vmax.f32 %v4099_v13, %v4101_v15 }
 0x2a6   : > { %v4104_v25 = vmax.f32 %v3996_v52, 0.0  ;;  %v3988_v43 = vadd.f32 %v3987_v17, %v15241_v34  ;;  %v12212_v19 = vpop.f32.mrf.mxu0 }
 0x2a7   : > { %v4178_v9 = vcombine.high %v4176_v14, %v4176_v14  ;;  %v10623_v35 = vrot.slane %v4177_v2, 9  ;;  %v10624_v55 = vrot.slane %v4176_v14, 9  ;;  %v4690_v39 = vmax.f32 %v4169_v62, %v10622_v5 }
 0x2a8   : > { %v4179_v27 = vcombine.high %v4131_v58, %v4131_v58  ;;  %v4186_v7 = vrot.slane %v4131_v58, %v15222_v23  ;;  %v4102_v57 = vmax.f32 %v3988_v43, 0.0  ;;  %v15390_v18 = vadd.f32 %v12212_v19, %v15252_v32  ;;  %v15392_v60 = vpop.f32.mrf.mxu0 }
 0x2a9   : > { %v10625_v34 = vrot.slane %v4178_v9, 9  ;;  %v4691_v16 = vmax.f32 %v4177_v2, %v10623_v35  ;;  %v4692_v50 = vmax.f32 %v4176_v14, %v10624_v55  ;;  %v11215_v56 = vpack.c.bf16 %v4690_v39, %v4690_v39 }
 0x2aa   : > { %v4193_v24 = vrot.slane %v4179_v27, %v15222_v23  ;;  %v4194_v15 = vcombine.high %v4186_v7, %v4186_v7  ;;  %v10626_v36 = vrot.slane %v4186_v7, 9  ;;  %v4132_v46 = vmax.f32 %v4102_v57, %v4104_v25  ;;  %v15395_v44 = vpop.f32.mrf.mxu0 }
 0x2ab   : > { %v4693_v1 = vmax.f32 %v4178_v9, %v10625_v34  ;;  %v11216_v62 = vpack.c.bf16 %v4691_v16, %v4691_v16  ;;  %v11217_v13 = vpack.c.bf16 %v4692_v50, %v4692_v50  ;;  %v5064_v52 = vunpack.c.l.b16 %v11215_v56 }
 0x2ac   : > { %v4195_v32 = vcombine.high %v4193_v24, %v4193_v24  ;;  %v10627_v17 = vrot.slane %v4194_v15, 9  ;;  %v10628_v53 = vrot.slane %v4193_v24, 9  ;;  %v4694_v5 = vmax.f32 %v4186_v7, %v10626_v36  ;;  %v4003_v14 = vpop.f32.mrf.mxu0 }
 0x2ad   : > { %v11218_v2 = vpack.c.bf16 %v4693_v1, %v4693_v1  ;;  %v5065_v58 = vunpack.c.l.b16 %v11216_v62  ;;  %v5066_v43 = vunpack.c.l.b16 %v11217_v13  ;;  %v5128_v19 = vrot.slane %v5064_v52, 7 }
 0x2ae   : > { %v10629_v35 = vrot.slane %v4195_v32, 9  ;;  %v4695_v55 = vmax.f32 %v4194_v15, %v10627_v17  ;;  %v4696_v25 = vmax.f32 %v4193_v24, %v10628_v53  ;;  %v11219_v39 = vpack.c.bf16 %v4694_v5, %v4694_v5  ;;  %v15397_v27 = vpop.f32.mrf.mxu0  ;;  %v5273_v53 = vld [vmem:[#allocation3 + $0xc] sm:$0x1] }
 0x2af   : > { %v5067_v9 = vunpack.c.l.b16 %v11218_v2  ;;  %v5129_v57 = vrot.slane %v5065_v58, 6  ;;  %v5132_v34 = vrot.slane %v5066_v43, 5  ;;  %v4196_v16 = vcombine.high %v4132_v46, %v4132_v46 }
 0x2b0   : > { %v4697_v50 = vmax.f32 %v4195_v32, %v10629_v35  ;;  %v11220_v56 = vpack.c.bf16 %v4695_v55, %v4695_v55  ;;  %v11221_v63 = vpack.c.bf16 %v4696_v25, %v4696_v25  ;;  %v5068_v7 = vunpack.c.l.b16 %v11219_v39  ;;  %v4006_v5 = vpop.f32.mrf.mxu0 }
 0x2b1   : > { %v5131_v36 = vsel %vm5130_vm11, %v5129_v57, %v5128_v19  ;;  %v5135_v1 = vrot.slane %v5067_v9, 4  ;;  %v4203_v62 = vrot.slane %v4132_v46, %v15222_v23  ;;  %v4210_v13 = vrot.slane %v4196_v16, %v15222_v23 }
 0x2b2   : > { %v5134_v24 = vsel %vm5133_vm12, %v5132_v34, %v5131_v36  ;;  %v5069_v15 = vunpack.c.l.b16 %v11220_v56  ;;  %v5070_v52 = vunpack.c.l.b16 %v11221_v63  ;;  %v5138_v17 = vrot.slane %v5068_v7, 3  ;;  %v15411_v56 = vpop.f32.mrf.mxu0  ;;  %v5270_v36 = vld [vmem:[#allocation3 + $0x8] sm:$0xf] }
 0x2b3   : > { %v5137_v2 = vsel %vm5136_vm13, %v5135_v1, %v5134_v24  ;;  %v11279_v32 = vpack.c.bf16 %v4697_v50, %v4697_v50  ;;  %v4211_v58 = vcombine.high %v4203_v62, %v4203_v62  ;;  %v4212_v43 = vcombine.high %v4210_v13, %v4210_v13 }
 0x2b4   : > { %v5140_v35 = vsel %vm5139_vm14, %v5138_v17, %v5137_v2  ;;  %v5141_v19 = vrot.slane %v5069_v15, 2  ;;  %v5144_v55 = vrot.slane %v5070_v52, 1  ;;  %v10630_v25 = vrot.slane %v4203_v62, 9 }
 0x2b5   : > { %v5274_v46 = vsel %vm13620_vm2, %v11279_v32, %v5273_v53  ;;  %v10631_v39 = vrot.slane %v4211_v58, 9  ;;  %v10632_v9 = vrot.slane %v4210_v13, 9  ;;  %v10633_v57 = vrot.slane %v4212_v43, 9 }
 0x2b6   : > { %v5143_v63 = vsel %vm5142_vm15, %v5141_v19, %v5140_v35  ;;  %5275 = vst [vmem:[#allocation3 + $0xc] sm:$0x1] %v5274_v46  ;;  %v4698_v34 = vmax.f32 %v4203_v62, %v10630_v25  ;;  %v4105_v16 = vmax.f32 %v15390_v18, 0.0  ;;  %v3991_v50 = vadd.f32 %v15392_v60, %v15244_v45 }
 0x2b7   : > { %v5146_v7 = vsel %vm5145_vm0, %v5144_v55, %v5143_v63  ;;  %v4699_v1 = vmax.f32 %v4211_v58, %v10631_v39  ;;  %v4700_v24 = vmax.f32 %v4210_v13, %v10632_v9  ;;  %v4701_v15 = vmax.f32 %v4212_v43, %v10633_v57  ;;  %v15419_v58 = vpop.f32.mrf.mxu0  ;;  %v12681_v9 = vld [vmem:[#allocation11 + $0xf8] sm:$0xff]  }
 0x2b8   : > { %v5238_v52 = vpack.c.b16 %v5146_v7, %v5146_v7  ;;  %v11223_v17 = vpack.c.bf16 %v4698_v34, %v4698_v34  ;;  %v4103_v53 = vmax.f32 %v3991_v50, 0.0  ;;  %v4012_v2 = vadd.f32 %v15395_v44, %v15271_v38  ;;  %11819 = vmatprep.subr.bf16.mxu1 %v12681_v9 }
 0x2b9   : > { %v11224_v62 = vpack.c.bf16 %v4699_v1, %v4699_v1  ;;  %v11225_v32 = vpack.c.bf16 %v4700_v24, %v4700_v24  ;;  %v11226_v18 = vpack.c.bf16 %v4701_v15, %v4701_v15  ;;  %v4004_v35 = vadd.f32 %v4003_v14, %v15255_v4  ;;  %v15428_v24 = vpop.f32.mrf.mxu0 }
 0x2ba   : > { %v5271_v60 = vsel %vm13664_vm9, %v5238_v52, %v5270_v36  ;;  %v5072_v19 = vunpack.c.l.b16 %v11223_v17  ;;  %v4133_v55 = vmax.f32 %v4103_v53, %v4105_v16  ;;  %v4108_v25 = vmax.f32 %v4012_v2, 0.0 }
 0x2bb   : > { %5272 = vst [vmem:[#allocation3 + $0x8] sm:$0xf] %v5271_v60  ;;  %v5073_v13 = vunpack.c.l.b16 %v11224_v62  ;;  %v5074_v43 = vunpack.c.l.b16 %v11225_v32  ;;  %v5075_v46 = vunpack.c.l.b16 %v11226_v18  ;;  %v4106_v39 = vmax.f32 %v4004_v35, 0.0 }
 0x2bc   : > { %v5147_v38 = vrot.slane %v5072_v19, 7  ;;  %v4213_v44 = vcombine.high %v4133_v55, %v4133_v55  ;;  %v4220_v57 = vrot.slane %v4133_v55, %v15222_v23  ;;  %v15424_v4 = vadd.f32 %v15397_v27, %v15284_v10  ;;  %v15433_v27 = vld [vmem:[#allocation11 + $0x238] sm:$0xff]  }
 0x2bd   : > { %v5148_v14 = vrot.slane %v5073_v13, 6  ;;  %v5150_v63 = vrot.slane %v5074_v43, 5  ;;  %v5152_v34 = vrot.slane %v5075_v46, 4  ;;  %v4134_v16 = vmax.f32 %v4106_v39, %v4108_v25  ;;  %16427 = vst [vmem:[#allocation69_spill] sm:$0xff] %v15433_v27  ;;  %12237 = vmatprep.subr.bf16.mxu0 %v15433_v27 }
 0x2be   : > { %v4227_v50 = vrot.slane %v4213_v44, %v15222_v23  ;;  %v4228_v7 = vcombine.high %v4220_v57, %v4220_v57  ;;  %v10634_v36 = vrot.slane %v4220_v57, 9  ;;  %v4007_v10 = vadd.f32 %v4006_v5, %v15258_v12  ;;  %v4022_v12 = vpop.f32.mrf.mxu0 }
 0x2bf   : > { %v5149_v15 = vsel %vm5130_vm11, %v5148_v14, %v5147_v38  ;;  %v4230_v52 = vcombine.high %v4134_v16, %v4134_v16  ;;  %v4237_v17 = vrot.slane %v4134_v16, %v15222_v23 }
 0x2c0   : > { %v5151_v53 = vsel %vm5133_vm12, %v5150_v63, %v5149_v15  ;;  %v4229_v2 = vcombine.high %v4227_v50, %v4227_v50  ;;  %v10635_v62 = vrot.slane %v4228_v7, 9  ;;  %v10636_v32 = vrot.slane %v4227_v50, 9 }
 0x2c1   : > { %v4702_v18 = vmax.f32 %v4220_v57, %v10634_v36  ;;  %v5153_v35 = vsel %vm5136_vm13, %v5152_v34, %v5151_v53  ;;  %v4244_v60 = vrot.slane %v4230_v52, %v15222_v23  ;;  %v4245_v19 = vcombine.high %v4237_v17, %v4237_v17  ;;  %v5279_v34 = vld [vmem:[#allocation3 + $0x14] sm:$0x1] }
 0x2c2   : > { %v10637_v55 = vrot.slane %v4229_v2, 9  ;;  %v4703_v25 = vmax.f32 %v4228_v7, %v10635_v62  ;;  %v4704_v13 = vmax.f32 %v4227_v50, %v10636_v32  ;;  %v10638_v43 = vrot.slane %v4237_v17, 9  ;;  %v12223_v50 = vpop.f32.mrf.mxu0 }
 0x2c3   : > { %v11227_v5 = vpack.c.bf16 %v4702_v18, %v4702_v18  ;;  %v4246_v46 = vcombine.high %v4244_v60, %v4244_v60  ;;  %v10639_v39 = vrot.slane %v4245_v19, 9  ;;  %v10640_v9 = vrot.slane %v4244_v60, 9 }
 0x2c4   : > { %v4705_v38 = vmax.f32 %v4229_v2, %v10637_v55  ;;  %v11228_v44 = vpack.c.bf16 %v4703_v25, %v4703_v25  ;;  %v11229_v14 = vpack.c.bf16 %v4704_v13, %v4704_v13  ;;  %v4706_v57 = vmax.f32 %v4237_v17, %v10638_v43 }
 0x2c5   : > { %v5076_v63 = vunpack.c.l.b16 %v11227_v5  ;;  %v10641_v16 = vrot.slane %v4246_v46, 9  ;;  %v4707_v36 = vmax.f32 %v4245_v19, %v10639_v39  ;;  %v4708_v15 = vmax.f32 %v4244_v60, %v10640_v9  ;;  %v4035_v39 = vpop.f32.mrf.mxu0 }
 0x2c6   : > { %v5077_v52 = vunpack.c.l.b16 %v11228_v44  ;;  %v5078_v53 = vunpack.c.l.b16 %v11229_v14  ;;  %v11280_v1 = vpack.c.bf16 %v4705_v38, %v4705_v38  ;;  %v11231_v7 = vpack.c.bf16 %v4706_v57, %v4706_v57  ;;  %v5276_v38 = vld [vmem:[#allocation3 + $0x10] sm:$0xf] }
 0x2c7   : > { %v5154_v62 = vrot.slane %v5076_v63, 3  ;;  %v4709_v32 = vmax.f32 %v4246_v46, %v10641_v16  ;;  %v11232_v18 = vpack.c.bf16 %v4707_v36, %v4707_v36  ;;  %v11233_v27 = vpack.c.bf16 %v4708_v15, %v4708_v15  ;;  %v12224_v15 = vpop.f32.mrf.mxu0 }
 0x2c8   : > { %v5156_v40 = vrot.slane %v5077_v52, 2  ;;  %v5158_v22 = vrot.slane %v5078_v53, 1  ;;  %v5280_v2 = vsel %vm13620_vm2, %v11280_v1, %v5279_v34  ;;  %v5080_v17 = vunpack.c.l.b16 %v11231_v7 }
 0x2c9   : > { %v5155_v55 = vsel %vm5139_vm14, %v5154_v62, %v5153_v35  ;;  %5281 = vst [vmem:[#allocation3 + $0x14] sm:$0x1] %v5280_v2  ;;  %v11234_v19 = vpack.c.bf16 %v4709_v32, %v4709_v32  ;;  %v5081_v60 = vunpack.c.l.b16 %v11232_v18  ;;  %v5082_v25 = vunpack.c.l.b16 %v11233_v27 }
 0x2ca   : > { %v5157_v13 = vsel %vm5142_vm15, %v5156_v40, %v5155_v55  ;;  %v5160_v43 = vrot.slane %v5080_v17, 7  ;;  %v4107_v5 = vmax.f32 %v4007_v10, 0.0  ;;  %v4028_v46 = vadd.f32 %v15411_v56, %v15295_v59 }
 0x2cb   : > { %v5159_v9 = vsel %vm5145_vm0, %v5158_v22, %v5157_v13  ;;  %v5083_v44 = vunpack.c.l.b16 %v11234_v19  ;;  %v5161_v1 = vrot.slane %v5081_v60, 6  ;;  %v5163_v14 = vrot.slane %v5082_v25, 5 }
 0x2cc   : > { %v5240_v57 = vpack.c.b16 %v5159_v9, %v5159_v9  ;;  %v16428_v35 = vmax.f32 %v15424_v4, 0.0  ;;  %v4112_v34 = vmax.f32 %v4028_v46, 0.0  ;;  %v4020_v40 = vadd.f32 %v15419_v58, %v15298_v8 }
 0x2cd   : > { %v5162_v10 = vsel %vm5130_vm11, %v5161_v1, %v5160_v43  ;;  %v5165_v27 = vrot.slane %v5083_v44, 4  ;;  %v4031_v59 = vadd.f32 %v15428_v24, %v15306_v31  ;;  %v4023_v22 = vadd.f32 %v4022_v12, %v15301_v26 }
 0x2ce   : > { %v4135_v63 = vmax.f32 %v4107_v5, %v16428_v35  ;;  %v5277_v56 = vsel %vm13664_vm9, %v5240_v57, %v5276_v38  ;;  %v5164_v16 = vsel %vm5133_vm12, %v5163_v14, %v5162_v10  ;;  %v4110_v58 = vmax.f32 %v4020_v40, 0.0  ;;  %v15473_v38 = vpop.f32.mrf.mxu0  ;;  %v5285_v35 = vld [vmem:[#allocation3 + $0x1c] sm:$0x1] }
 0x2cf   : > { %5278 = vst [vmem:[#allocation3 + $0x10] sm:$0xf] %v5277_v56  ;;  %v5166_v8 = vsel %vm5136_vm13, %v5165_v27, %v5164_v16  ;;  %v4113_v52 = vmax.f32 %v4031_v59, 0.0  ;;  %v4111_v53 = vmax.f32 %v4023_v22, 0.0  ;;  %v15461_v26 = vadd.f32 %v12223_v50, %v15316_v42 }
 0x2d0   : > { %v4247_v36 = vcombine.high %v4135_v63, %v4135_v63  ;;  %v4254_v4 = vrot.slane %v4135_v63, %v15222_v23  ;;  %v4136_v12 = vmax.f32 %v4110_v58, %v4112_v34  ;;  %v15464_v32 = vadd.f32 %v4035_v39, %v15309_v33  ;;  %v12227_v58 = vpop.f32.mrf.mxu0 }
 0x2d1   : > { %v4137_v62 = vmax.f32 %v4111_v53, %v4113_v52  ;;  %v15467_v18 = vadd.f32 %v12224_v15, %v15322_v49 }
 0x2d2   : > { %v4261_v7 = vrot.slane %v4247_v36, %v15222_v23  ;;  %v4262_v31 = vcombine.high %v4254_v4, %v4254_v4  ;;  %v10642_v24 = vrot.slane %v4254_v4, 9  ;;  %v4264_v60 = vcombine.high %v4136_v12, %v4136_v12 }
 0x2d3   : > { %v4271_v25 = vrot.slane %v4136_v12, %v15222_v23  ;;  %v4281_v13 = vcombine.high %v4137_v62, %v4137_v62  ;;  %v4288_v43 = vrot.slane %v4137_v62, %v15222_v23 }
 0x2d4   : > { %v4263_v2 = vcombine.high %v4261_v7, %v4261_v7  ;;  %v10643_v17 = vrot.slane %v4262_v31, 9  ;;  %v10644_v55 = vrot.slane %v4261_v7, 9  ;;  %v4710_v19 = vmax.f32 %v4254_v4, %v10642_v24 }
 0x2d5   : > { %v4278_v33 = vrot.slane %v4264_v60, %v15222_v23  ;;  %v4279_v39 = vcombine.high %v4271_v25, %v4271_v25  ;;  %v10646_v9 = vrot.slane %v4271_v25, 9  ;;  %v4295_v49 = vrot.slane %v4281_v13, %v15222_v23  ;;  %v5282_v13 = vld [vmem:[#allocation3 + $0x18] sm:$0xf] }
 0x2d6   : > { %v10645_v42 = vrot.slane %v4263_v2, 9  ;;  %v4711_v50 = vmax.f32 %v4262_v31, %v10643_v17  ;;  %v4712_v5 = vmax.f32 %v4261_v7, %v10644_v55  ;;  %v11235_v46 = vpack.c.bf16 %v4710_v19, %v4710_v19 }
 0x2d7   : > { %v4280_v63 = vcombine.high %v4278_v33, %v4278_v33  ;;  %v10647_v34 = vrot.slane %v4279_v39, 9  ;;  %v10648_v40 = vrot.slane %v4278_v33, 9  ;;  %v4714_v10 = vmax.f32 %v4271_v25, %v10646_v9 }
 0x2d8   : > { %v4713_v44 = vmax.f32 %v4263_v2, %v10645_v42  ;;  %v11236_v1 = vpack.c.bf16 %v4711_v50, %v4711_v50  ;;  %v11237_v14 = vpack.c.bf16 %v4712_v5, %v4712_v5  ;;  %v5084_v57 = vunpack.c.l.b16 %v11235_v46  ;;  %v4051_v5 = vpop.f32.mrf.mxu0 }
 0x2d9   : > { %v10649_v16 = vrot.slane %v4280_v63, 9  ;;  %v4715_v36 = vmax.f32 %v4279_v39, %v10647_v34  ;;  %v4716_v4 = vmax.f32 %v4278_v33, %v10648_v40  ;;  %v11239_v15 = vpack.c.bf16 %v4714_v10, %v4714_v10 }
 0x2da   : > { %v5085_v27 = vunpack.c.l.b16 %v11236_v1  ;;  %v5086_v59 = vunpack.c.l.b16 %v11237_v14  ;;  %v5167_v22 = vrot.slane %v5084_v57, 3  ;;  %v11281_v56 = vpack.c.bf16 %v4713_v44, %v4713_v44 }
 0x2db   : > { %v4717_v24 = vmax.f32 %v4280_v63, %v10649_v16  ;;  %v11240_v12 = vpack.c.bf16 %v4715_v36, %v4715_v36  ;;  %v11241_v62 = vpack.c.bf16 %v4716_v4, %v4716_v4  ;;  %v5088_v2 = vunpack.c.l.b16 %v11239_v15 }
 0x2dc   : > { %v5168_v52 = vsel %vm5139_vm14, %v5167_v22, %v5166_v8  ;;  %v5169_v53 = vrot.slane %v5085_v27, 2  ;;  %v5171_v7 = vrot.slane %v5086_v59, 1  ;;  %v5286_v31 = vsel %vm13620_vm2, %v11281_v56, %v5285_v35  ;;  %v12228_v56 = vpop.f32.mrf.mxu0 }
 0x2dd   : > { %5287 = vst [vmem:[#allocation3 + $0x1c] sm:$0x1] %v5286_v31  ;;  %v4296_v55 = vcombine.high %v4288_v43, %v4288_v43  ;;  %v4297_v19 = vcombine.high %v4295_v49, %v4295_v49  ;;  %v10650_v60 = vrot.slane %v4288_v43, 9  ;;  %v11242_v42 = vpack.c.bf16 %v4717_v24, %v4717_v24 }
 0x2de   : > { %v5170_v17 = vsel %vm5142_vm15, %v5169_v53, %v5168_v52  ;;  %v5089_v8 = vunpack.c.l.b16 %v11240_v12  ;;  %v5090_v50 = vunpack.c.l.b16 %v11241_v62  ;;  %v5173_v33 = vrot.slane %v5088_v2, 7  ;;  %v5291_v52 = vld [vmem:[#allocation3 + $0x24] sm:$0x1] }
 0x2df   : > { %v5172_v25 = vsel %vm5145_vm0, %v5171_v7, %v5170_v17  ;;  %v10651_v39 = vrot.slane %v4296_v55, 9  ;;  %v10652_v9 = vrot.slane %v4295_v49, 9  ;;  %v5091_v44 = vunpack.c.l.b16 %v11242_v42 }
 0x2e0   : > { %v5242_v46 = vpack.c.b16 %v5172_v25, %v5172_v25  ;;  %v5174_v1 = vrot.slane %v5089_v8, 6  ;;  %v5176_v14 = vrot.slane %v5090_v50, 5  ;;  %v10653_v57 = vrot.slane %v4297_v19, 9 }
 0x2e1   : > { %v4718_v63 = vmax.f32 %v4288_v43, %v10650_v60  ;;  %v4719_v34 = vmax.f32 %v4296_v55, %v10651_v39  ;;  %v4720_v40 = vmax.f32 %v4295_v49, %v10652_v9  ;;  %v5178_v27 = vrot.slane %v5091_v44, 4  ;;  %v5288_v9 = vld [vmem:[#allocation3 + $0x20] sm:$0xf] }
 0x2e2   : > { %v5283_v35 = vsel %vm13664_vm9, %v5242_v46, %v5282_v13  ;;  %v5175_v10 = vsel %vm5130_vm11, %v5174_v1, %v5173_v33  ;;  %v4721_v59 = vmax.f32 %v4297_v19, %v10653_v57  ;;  %v4116_v22 = vmax.f32 %v15461_v26, 0.0  ;;  %v4054_v19 = vpop.f32.mrf.mxu0 }
 0x2e3   : > { %5284 = vst [vmem:[#allocation3 + $0x18] sm:$0xf] %v5283_v35  ;;  %v5177_v16 = vsel %vm5133_vm12, %v5176_v14, %v5175_v10  ;;  %v11243_v36 = vpack.c.bf16 %v4718_v63, %v4718_v63  ;;  %v11244_v4 = vpack.c.bf16 %v4719_v34, %v4719_v34  ;;  %v11245_v15 = vpack.c.bf16 %v4720_v40, %v4720_v40 }
 0x2e4   : > { %v5179_v53 = vsel %vm5136_vm13, %v5178_v27, %v5177_v16  ;;  %v11282_v7 = vpack.c.bf16 %v4721_v59, %v4721_v59  ;;  %v4114_v43 = vmax.f32 %v15464_v32, 0.0  ;;  %v4117_v49 = vmax.f32 %v15467_v18, 0.0 }
 0x2e5   : > { %v5092_v31 = vunpack.c.l.b16 %v11243_v36  ;;  %v5093_v24 = vunpack.c.l.b16 %v11244_v4  ;;  %v5094_v12 = vunpack.c.l.b16 %v11245_v15  ;;  %v4039_v26 = vadd.f32 %v15473_v38, %v15319_v41 }
 0x2e6   : > { %v5292_v62 = vsel %vm13620_vm2, %v11282_v7, %v5291_v52  ;;  %v4138_v2 = vmax.f32 %v4114_v43, %v4116_v22  ;;  %v4060_v17 = vadd.f32 %v12227_v58, %v15325_v6  ;;  %v4052_v55 = vadd.f32 %v4051_v5, %v15328_v28 }
 0x2e7   : > { %v5180_v60 = vrot.slane %v5092_v31, 3  ;;  %v5182_v25 = vrot.slane %v5093_v24, 2  ;;  %v5184_v32 = vrot.slane %v5094_v12, 1  ;;  %5293 = vst [vmem:[#allocation3 + $0x24] sm:$0x1] %v5292_v62  ;;  %v4115_v18 = vmax.f32 %v4039_v26, 0.0 }
 0x2e8   : > { %v4298_v13 = vcombine.high %v4138_v2, %v4138_v2  ;;  %v4305_v42 = vrot.slane %v4138_v2, %v15222_v23  ;;  %v4120_v8 = vmax.f32 %v4060_v17, 0.0  ;;  %v4118_v50 = vmax.f32 %v4052_v55, 0.0 }
 0x2e9   : > { %v5181_v41 = vsel %vm5139_vm14, %v5180_v60, %v5179_v53  ;;  %v4139_v38 = vmax.f32 %v4115_v18, %v4117_v49  ;;  %v15497_v46 = vadd.f32 %v12228_v56, %v15342_v30  ;;  %v15500_v6 = vadd.f32 %v4054_v19, %v15331_v47 }
 0x2ea   : > { %v5183_v28 = vsel %vm5142_vm15, %v5182_v25, %v5181_v41  ;;  %v4312_v58 = vrot.slane %v4298_v13, %v15222_v23  ;;  %v4313_v5 = vcombine.high %v4305_v42, %v4305_v42  ;;  %v10654_v33 = vrot.slane %v4305_v42, 9 }
 0x2eb   : > { %v5185_v39 = vsel %vm5145_vm0, %v5184_v32, %v5183_v28  ;;  %v4315_v44 = vcombine.high %v4139_v38, %v4139_v38  ;;  %v4322_v1 = vrot.slane %v4139_v38, %v15222_v23  ;;  %v4140_v14 = vmax.f32 %v4118_v50, %v4120_v8  ;;  %v5297_v8 = vld [vmem:[#allocation3 + $0x2c] sm:$0x1] }
 0x2ec   : > { %v5244_v57 = vpack.c.b16 %v5185_v39, %v5185_v39  ;;  %v4314_v35 = vcombine.high %v4312_v58, %v4312_v58  ;;  %v10655_v30 = vrot.slane %v4313_v5, 9  ;;  %v10656_v63 = vrot.slane %v4312_v58, 9 }
 0x2ed   : > { %v4722_v34 = vmax.f32 %v4305_v42, %v10654_v33  ;;  %v4329_v47 = vrot.slane %v4315_v44, %v15222_v23  ;;  %v4330_v40 = vcombine.high %v4322_v1, %v4322_v1  ;;  %v10658_v10 = vrot.slane %v4322_v1, 9 }
 0x2ee   : > { %v5289_v27 = vsel %vm13664_vm9, %v5244_v57, %v5288_v9  ;;  %v10657_v59 = vrot.slane %v4314_v35, 9  ;;  %v4723_v22 = vmax.f32 %v4313_v5, %v10655_v30  ;;  %v4724_v56 = vmax.f32 %v4312_v58, %v10656_v63  ;;  %v12231_v9 = vpop.f32.mrf.mxu0 }
 0x2ef   : > { %5290 = vst [vmem:[#allocation3 + $0x20] sm:$0xf] %v5289_v27  ;;  %v11247_v16 = vpack.c.bf16 %v4722_v34, %v4722_v34  ;;  %v4331_v36 = vcombine.high %v4329_v47, %v4329_v47  ;;  %v10659_v4 = vrot.slane %v4330_v40, 9  ;;  %v10660_v15 = vrot.slane %v4329_v47, 9 }
 0x2f0   : > { %v4725_v52 = vmax.f32 %v4314_v35, %v10657_v59  ;;  %v11248_v53 = vpack.c.bf16 %v4723_v22, %v4723_v22  ;;  %v11249_v7 = vpack.c.bf16 %v4724_v56, %v4724_v56  ;;  %v4726_v43 = vmax.f32 %v4322_v1, %v10658_v10 }
 0x2f1   : > { %v5096_v49 = vunpack.c.l.b16 %v11247_v16  ;;  %v10661_v31 = vrot.slane %v4331_v36, 9  ;;  %v4727_v24 = vmax.f32 %v4330_v40, %v10659_v4  ;;  %v4728_v12 = vmax.f32 %v4329_v47, %v10660_v15  ;;  %v5294_v15 = vld [vmem:[#allocation3 + $0x28] sm:$0xf] }
 0x2f2   : > { %v11250_v26 = vpack.c.bf16 %v4725_v52, %v4725_v52  ;;  %v5097_v62 = vunpack.c.l.b16 %v11248_v53  ;;  %v5098_v2 = vunpack.c.l.b16 %v11249_v7  ;;  %v11251_v17 = vpack.c.bf16 %v4726_v43, %v4726_v43 }
 0x2f3   : > { %v5186_v55 = vrot.slane %v5096_v49, 7  ;;  %v4729_v19 = vmax.f32 %v4331_v36, %v10661_v31  ;;  %v11252_v60 = vpack.c.bf16 %v4727_v24, %v4727_v24  ;;  %v11253_v25 = vpack.c.bf16 %v4728_v12, %v4728_v12  ;;  %v4067_v36 = vpop.f32.mrf.mxu0 }
 0x2f4   : > { %v5099_v32 = vunpack.c.l.b16 %v11250_v26  ;;  %v5187_v18 = vrot.slane %v5097_v62, 6  ;;  %v5189_v13 = vrot.slane %v5098_v2, 5  ;;  %v5100_v42 = vunpack.c.l.b16 %v11251_v17 }
 0x2f5   : > { %v5101_v50 = vunpack.c.l.b16 %v11252_v60  ;;  %v5102_v41 = vunpack.c.l.b16 %v11253_v25  ;;  %v11283_v38 = vpack.c.bf16 %v4729_v19, %v4729_v19  ;;  %v4332_v28 = vcombine.high %v4140_v14, %v4140_v14 }
 0x2f6   : > { %v5188_v58 = vsel %vm5130_vm11, %v5187_v18, %v5186_v55  ;;  %v5191_v5 = vrot.slane %v5099_v32, 4  ;;  %v5193_v33 = vrot.slane %v5100_v42, 3  ;;  %v4339_v39 = vrot.slane %v4140_v14, %v15222_v23 }
 0x2f7   : > { %v5190_v44 = vsel %vm5133_vm12, %v5189_v13, %v5188_v58  ;;  %v5195_v1 = vrot.slane %v5101_v50, 2  ;;  %v5197_v57 = vrot.slane %v5102_v41, 1  ;;  %v5298_v35 = vsel %vm13620_vm2, %v11283_v38, %v5297_v8  ;;  %v15527_v38 = vld [vmem:[#allocation3 + $0x8] sm:$0xf] }
 0x2f8   : > { %v5192_v30 = vsel %vm5136_vm13, %v5191_v5, %v5190_v44  ;;  %5299 = vst [vmem:[#allocation3 + $0x2c] sm:$0x1] %v5298_v35  ;;  %v4346_v63 = vrot.slane %v4332_v28, %v15222_v23  ;;  %v4347_v34 = vcombine.high %v4339_v39, %v4339_v39  ;;  %v10662_v47 = vrot.slane %v4339_v39, 9  ;;  %v15529_v35 = vpop.f32.mrf.mxu0 }
 0x2f9   : > { %v5194_v40 = vsel %vm5139_vm14, %v5193_v33, %v5192_v30  ;;  %v4121_v10 = vmax.f32 %v15497_v46, 0.0  ;;  %v4119_v14 = vmax.f32 %v15500_v6, 0.0  ;;  %v4076_v27 = vadd.f32 %v12231_v9, %v15364_v21 }
 0x2fa   : > { %v5196_v59 = vsel %vm5142_vm15, %v5195_v1, %v5194_v40  ;;  %v4348_v22 = vcombine.high %v4346_v63, %v4346_v63  ;;  %v10663_v56 = vrot.slane %v4347_v34, 9  ;;  %v10664_v16 = vrot.slane %v4346_v63, 9 }
 0x2fb   : > { %v5198_v4 = vsel %vm5145_vm0, %v5197_v57, %v5196_v59  ;;  %v4730_v52 = vmax.f32 %v4339_v39, %v10662_v47  ;;  %v4141_v53 = vmax.f32 %v4119_v14, %v4121_v10  ;;  %v4124_v7 = vmax.f32 %v4076_v27, 0.0  ;;  %v5327_v57 = vld [vmem:[#allocation3 + $0xc] sm:$0x1] }
 0x2fc   : > { %v5246_v43 = vpack.c.b16 %v5198_v4, %v5198_v4  ;;  %v10665_v49 = vrot.slane %v4348_v22, 9  ;;  %v4731_v31 = vmax.f32 %v4347_v34, %v10663_v56  ;;  %v4732_v46 = vmax.f32 %v4346_v63, %v10664_v16  ;;  %v5303_v56 = vld [vmem:[#allocation3 + $0x34] sm:$0x1] }
 0x2fd   : > { %v11255_v24 = vpack.c.bf16 %v4730_v52, %v4730_v52  ;;  %v4349_v6 = vcombine.high %v4141_v53, %v4141_v53  ;;  %v4356_v21 = vrot.slane %v4141_v53, %v15222_v23  ;;  %v4068_v12 = vadd.f32 %v4067_v36, %v15358_v11 }
 0x2fe   : > { %v5295_v26 = vsel %vm13664_vm9, %v5246_v43, %v5294_v15  ;;  %v4733_v62 = vmax.f32 %v4348_v22, %v10665_v49  ;;  %v11256_v2 = vpack.c.bf16 %v4731_v31, %v4731_v31  ;;  %v11257_v17 = vpack.c.bf16 %v4732_v46, %v4732_v46 }
 0x2ff   : > { %5296 = vst [vmem:[#allocation3 + $0x28] sm:$0xf] %v5295_v26  ;;  %v5104_v55 = vunpack.c.l.b16 %v11255_v24  ;;  %v4363_v19 = vrot.slane %v4349_v6, %v15222_v23  ;;  %v4364_v60 = vcombine.high %v4356_v21, %v4356_v21  ;;  %v10666_v25 = vrot.slane %v4356_v21, 9  ;;  %v5335_v24 = vld [vmem:[#allocation3 + $0x8] sm:$0xe] }
 0x300   : > { %v11258_v32 = vpack.c.bf16 %v4733_v62, %v4733_v62  ;;  %v5105_v18 = vunpack.c.l.b16 %v11256_v2  ;;  %v5106_v13 = vunpack.c.l.b16 %v11257_v17  ;;  %v4122_v42 = vmax.f32 %v4068_v12, 0.0 }
 0x301   : > { %v5199_v8 = vrot.slane %v5104_v55, 7  ;;  %v4365_v50 = vcombine.high %v4363_v19, %v4363_v19  ;;  %v10667_v41 = vrot.slane %v4364_v60, 9  ;;  %v10668_v11 = vrot.slane %v4363_v19, 9 }
 0x302   : > { %v5107_v28 = vunpack.c.l.b16 %v11258_v32  ;;  %v5200_v58 = vrot.slane %v5105_v18, 6  ;;  %v5202_v5 = vrot.slane %v5106_v13, 5  ;;  %v4734_v33 = vmax.f32 %v4356_v21, %v10666_v25 }
 0x303   : > { %v10669_v39 = vrot.slane %v4365_v50, 9  ;;  %v4735_v9 = vmax.f32 %v4364_v60, %v10667_v41  ;;  %v4736_v44 = vmax.f32 %v4363_v19, %v10668_v11  ;;  %v4142_v1 = vmax.f32 %v4122_v42, %v4124_v7  ;;  %v4070_v7 = vpop.f32.mrf.mxu0  ;;  %v5300_v42 = vld [vmem:[#allocation3 + $0x30] sm:$0xf] }
 0x304   : > { %v5201_v30 = vsel %vm5130_vm11, %v5200_v58, %v5199_v8  ;;  %v5204_v63 = vrot.slane %v5107_v28, 4  ;;  %v11259_v34 = vpack.c.bf16 %v4734_v33, %v4734_v33  ;;  %v10759_v47 = vcombine.low %v15527_v38, %v5327_v57 }
 0x305   : > { %v5203_v40 = vsel %vm5133_vm12, %v5202_v5, %v5201_v30  ;;  %v4737_v10 = vmax.f32 %v4365_v50, %v10669_v39  ;;  %v11260_v14 = vpack.c.bf16 %v4735_v9, %v4735_v9  ;;  %v11261_v27 = vpack.c.bf16 %v4736_v44, %v4736_v44  ;;  %v15541_v18 = vpop.f32.mrf.mxu0  ;;  %v13039_v44 = vld [vmem:[#allocation3] sm:$0xf]  ;;  %v15549_v30 = vld [vmem:[#allocation3 + $0x10] sm:$0xf] }
 0x306   : > { %v5108_v59 = vunpack.c.l.b16 %v11259_v34  ;;  %v5205_v22 = vsel %vm5136_vm13, %v5204_v63, %v5203_v40  ;;  %v4366_v16 = vcombine.high %v4142_v1, %v4142_v1  ;;  %v4373_v36 = vrot.slane %v4142_v1, %v15222_v23 }
 0x307   : > { %v5109_v4 = vunpack.c.l.b16 %v11260_v14  ;;  %v5110_v15 = vunpack.c.l.b16 %v11261_v27  ;;  %v11284_v52 = vpack.c.bf16 %v4737_v10, %v4737_v10  ;;  %v5439_v53 = vshrl.u32 %v10759_v47, 16  ;;  %v4083_v10 = vpop.f32.mrf.mxu0  ;;  %v12682_v14 = vld [vmem:[#allocation11 + $0xb8] sm:$0xff]  }
 0x308   : > { %v5206_v43 = vrot.slane %v5108_v59, 3  ;;  %v4380_v49 = vrot.slane %v4366_v16, %v15222_v23  ;;  %v4381_v31 = vcombine.high %v4373_v36, %v4373_v36  ;;  %v10670_v46 = vrot.slane %v4373_v36, 9  ;;  %v5351_v16 = vld [vmem:[#allocation3 + $0x14] sm:$0x1] }
 0x309   : > { %v5208_v6 = vrot.slane %v5109_v4, 2  ;;  %v5210_v21 = vrot.slane %v5110_v15, 1  ;;  %v5304_v12 = vsel %vm13620_vm2, %v11284_v52, %v5303_v56  ;;  %v5441_v26 = vshll.u32 %v10759_v47, 16  ;;  %v5350_v56 = vld [vmem:[#allocation3 + $0xc] sm:$0x1] }
 0x30a   : > { %v5207_v62 = vsel %vm5139_vm14, %v5206_v43, %v5205_v22  ;;  %5305 = vst [vmem:[#allocation3 + $0x34] sm:$0x1] %v5304_v12  ;;  %v4382_v2 = vcombine.high %v4380_v49, %v4380_v49  ;;  %v10671_v17 = vrot.slane %v4381_v31, 9  ;;  %v10672_v55 = vrot.slane %v4380_v49, 9  ;;  %v5358_v15 = vld [vmem:[#allocation3 + $0x8] sm:$0xe] }
 0x30b   : > { %v5209_v19 = vsel %vm5142_vm15, %v5208_v6, %v5207_v62  ;;  %v4738_v60 = vmax.f32 %v4373_v36, %v10670_v46  ;;  %v5443_v25 = vrot.slane %v5441_v26, 1  ;;  %v10767_v32 = vcombine.low %v5335_v24, %v5327_v57  ;;  %v15547_v57 = vld [vmem:[#allocation3 + $0x8] sm:$0xf] }
 0x30c   : > { %v5211_v13 = vsel %vm5145_vm0, %v5210_v21, %v5209_v19  ;;  %v10673_v8 = vrot.slane %v4382_v2, 9  ;;  %v4739_v50 = vmax.f32 %v4381_v31, %v10671_v17  ;;  %v4740_v41 = vmax.f32 %v4380_v49, %v10672_v55  ;;  %v12683_v36 = vld [vmem:[#allocation11 + $0xf0] sm:$0xff]  }
 0x30d   : > { %v5248_v11 = vpack.c.b16 %v5211_v13, %v5211_v13  ;;  %v11263_v28 = vpack.c.bf16 %v4738_v60, %v4738_v60  ;;  %v5444_v58 = vor.u32 %v5443_v25, %v5439_v53  ;;  %v15544_v5 = vrot.slane %v10767_v32, 1 }
 0x30e   : > { %v4741_v33 = vmax.f32 %v4382_v2, %v10673_v8  ;;  %v11264_v39 = vpack.c.bf16 %v4739_v50, %v4739_v50  ;;  %v11265_v9 = vpack.c.bf16 %v4740_v41, %v4740_v41  ;;  %v10807_v1 = vcombine.low %v13039_v44, %v15527_v38  ;;  %v12696_v44 = vld [vmem:[#allocation11 + $0xe0] sm:$0xff]  }
 0x30f   : > { %v5301_v63 = vsel %vm13664_vm9, %v5248_v11, %v5300_v42  ;;  %v5112_v34 = vunpack.c.l.b16 %v11263_v28  ;;  %v10808_v47 = vcombine.low %v15366_v29, %v5444_v58  ;;  %v10809_v40 = vcombine.low %v15370_v61, %v15544_v5  ;;  %v12690_v28 = vld [vmem:[#allocation11 + $0xa8] sm:$0xff]   ;;  %v5339_v61 = vld [vmem:[#allocation3 + $0x28] sm:$0xe]  ;;  %v15698_v5 = vld [vmem:[#allocation3 + $0x18] sm:$0xf] }
 0x310   : > { %5302 = vst [vmem:[#allocation3 + $0x30] sm:$0xf] %v5301_v63  ;;  %v11266_v27 = vpack.c.bf16 %v4741_v33, %v4741_v33  ;;  %v5113_v59 = vunpack.c.l.b16 %v11264_v39  ;;  %v5114_v22 = vunpack.c.l.b16 %v11265_v9  ;;  %v4079_v38 = vadd.f32 %v15529_v35, %v15373_v0  ;;  %v5359_v0 = vld [vmem:[#allocation3 + $0x10] sm:$0xe] }
 0x311   : > { %6510 = vmatprep.mubr.bf16.mxu1 %v10808_v47  ;;  %v4071_v4 = vadd.f32 %v4070_v7, %v15361_v48  ;;  %v10774_v29 = vcombine.low %v15547_v57, %v5350_v56  ;;  %v10775_v52 = vcombine.low %v15549_v30, %v5351_v16  ;;  %v3934_v53 = vadd.f32 %v15382_v51, %v15313_v20  ;;  %v12236_v48 = vpop.f32.mrf.mxu0  ;;  %v12684_v7 = vld [vmem:[#allocation11 + $0xb0] sm:$0xff]   ;;  %v12689_v20 = vld [vmem:[#allocation11 + $0xe8] sm:$0xff]  }
 0x312   : > { %v15563_v43 = vunpack.c.l.b16 %v11266_v27  ;;  %v5212_v49 = vrot.slane %v5112_v34, 7  ;;  %v5213_v31 = vrot.slane %v5113_v59, 6  ;;  %v5215_v46 = vrot.slane %v5114_v22, 5  ;;  %6511 = vmatmul.mubr.bf16.vlgmr.msra.gmra.mxu1 %v10807_v1  ;;  %v4805_v47 = vld [vmem:[#allocation3 + $0x44] sm:$0x1]  ;;  %v16429_v22 = vld [vmem:[#allocation41_spill] sm:$0xff] }
 0x313   : > { %v4125_v35 = vmax.f32 %v4079_v38, 0.0  ;;  %v4123_v24 = vmax.f32 %v4071_v4, 0.0  ;;  %v5560_v6 = vshrl.u32 %v10774_v29, 16  ;;  %v5562_v21 = vshll.u32 %v10774_v29, 16  ;;  %11820 = vmatpush3.bf16.msra.mxu1 %v12682_v14  ;;  %v4086_v11 = vpop.f32.mrf.mxu0 }
 0x314   : > { %v5214_v12 = vsel %vm5130_vm11, %v5213_v31, %v5212_v49  ;;  %v5567_v26 = vshrl.u32 %v10775_v52, 16  ;;  %v5569_v62 = vshll.u32 %v10775_v52, 16  ;;  %v10782_v2 = vcombine.low %v5358_v15, %v5350_v56  ;;  %11821 = vmatprep.subr.bf16.mxu1 %v12683_v36  ;;  %v12695_v56 = vld [vmem:[#allocation11 + $0x230] sm:$0xff]   ;;  %v12699_v49 = vld [vmem:[#allocation11 + $0xd8] sm:$0xff]  }
 0x315   : > { %v5217_v51 = vrot.slane %v15563_v43, 4  ;;  %v4143_v17 = vmax.f32 %v4123_v24, %v4125_v35  ;;  %v5564_v55 = vrot.slane %v5562_v21, 1  ;;  %v10783_v19 = vcombine.low %v5359_v0, %v5351_v16  ;;  %v16431_v24 = vld [vmem:[#allocation69_spill] sm:$0xff] }
 0x316   : > { %v5216_v60 = vsel %vm5133_vm12, %v5215_v46, %v5214_v12  ;;  %v5571_v25 = vrot.slane %v5569_v62, 1  ;;  %v5639_v32 = vrot.slane %v10782_v2, 1  ;;  %v4092_v13 = vadd.f32 %v15541_v18, %v15386_v37  ;;  %v4781_v18 = vld [vmem:[#allocation3 + $0x40] sm:$0x1] }
 0x317   : > { %v4383_v42 = vcombine.high %v4143_v17, %v4143_v17  ;;  %v4390_v8 = vrot.slane %v4143_v17, %v15222_v23  ;;  %v5565_v50 = vor.u32 %v5564_v55, %v5560_v6  ;;  %v5640_v41 = vrot.slane %v10783_v19, 1  ;;  %11822 = vmatpush3.bf16.msra.mxu1 %v12684_v7  ;;  %v12698_v12 = vld [vmem:[#allocation11 + $0x228] sm:$0xff]   ;;  %v12700_v17 = vld [vmem:[#allocation11 + $0x98] sm:$0xff]   ;;  %v5309_v55 = vld [vmem:[#allocation3 + $0x3c] sm:$0x1] }
 0x318   : > { %v5572_v58 = vor.u32 %v5571_v25, %v5567_v26  ;;  %v4128_v33 = vmax.f32 %v4092_v13, 0.0  ;;  %v4084_v39 = vadd.f32 %v4083_v10, %v15376_v3  ;;  %v4095_v9 = vadd.f32 %v12236_v48, %v3934_v53  ;;  %11823 = vmatprep.subr.bf16.mxu1 %v12689_v20  ;;  %v12697_v10 = vld [vmem:[#allocation11 + $0xa0] sm:$0xff]  }
 0x319   : > { %v4397_v1 = vrot.slane %v4383_v42, %v15222_v23  ;;  %v4398_v63 = vcombine.high %v4390_v8, %v4390_v8  ;;  %v10674_v34 = vrot.slane %v4390_v8, 9  ;;  %v10812_v37 = vcombine.low %v5639_v32, %v5640_v41 }
 0x31a   : > { %v10811_v14 = vcombine.low %v5565_v50, %v5572_v58  ;;  %v4126_v27 = vmax.f32 %v4084_v39, 0.0  ;;  %v4129_v59 = vmax.f32 %v4095_v9, 0.0  ;;  %v4087_v38 = vadd.f32 %v4086_v11, %v16429_v22  ;;  %v12701_v39 = vld [vmem:[#allocation11 + $0x220] sm:$0xff]  }
 0x31b   : > { %v4399_v16 = vcombine.high %v4397_v1, %v4397_v1  ;;  %v10675_v36 = vrot.slane %v4398_v63, 9  ;;  %v10676_v4 = vrot.slane %v4397_v1, 9  ;;  %v4742_v3 = vmax.f32 %v4390_v8, %v10674_v34  ;;  %6640 = vmatprep.mubr.bf16.mxu0 %v10812_v37  ;;  %11824 = vmatpush3.bf16.msra.mxu1 %v12690_v28  ;;  %v12703_v34 = vld [vmem:[#allocation11 + $0x90] sm:$0xff]  }
 0x31c   : > { %v4144_v15 = vmax.f32 %v4126_v27, %v4128_v33  ;;  %6641 = vmatmul.mubr.bf16.vlgmr.msra.gmra.mxu0 %v10811_v14  ;;  %v4127_v29 = vmax.f32 %v4087_v38, 0.0  ;;  %v4782_v52 = vsel %vm13620_vm2, 0, %v4781_v18  ;;  %v4806_v43 = vsel %vm13636_vm5, 0, %v4805_v47  ;;  %11825 = vmatprep.subr.bf16.mxu1 %v12696_v44  ;;  %v15582_v33 = vld [vmem:[#allocation3 + $0x10] sm:$0xf] }
 0x31d   : > { %v10677_v31 = vrot.slane %v4399_v16, 9  ;;  %v4743_v46 = vmax.f32 %v4398_v63, %v10675_v36  ;;  %v4744_v0 = vmax.f32 %v4397_v1, %v10676_v4  ;;  %v11267_v35 = vpack.c.bf16 %v4742_v3, %v4742_v3  ;;  %4783 = vst [vmem:[#allocation3 + $0x40] sm:$0x1] %v4782_v52  ;;  %4807 = vst [vmem:[#allocation3 + $0x44] sm:$0x1] %v4806_v43 }
 0x31e   : > { %12238 = vmatpush3.bf16.msra.mxu0 %v16431_v24  ;;  %v5218_v6 = vsel %vm5136_vm13, %v5217_v51, %v5216_v60  ;;  %v4400_v21 = vcombine.high %v4144_v15, %v4144_v15  ;;  %v4407_v48 = vrot.slane %v4144_v15, %v15222_v23  ;;  %v4145_v7 = vmax.f32 %v4127_v29, %v4129_v59  ;;  %v12702_v51 = vld [vmem:[#allocation11 + $0xd0] sm:$0xff]   ;;  %v15587_v27 = vld [vmem:[#allocation3 + $0x14] sm:$0x1]  ;;  %v12708_v59 = vld [vmem:[#allocation11 + $0xc8] sm:$0xff]  }
 0x31f   : > { %12239 = vmatprep.subr.bf16.mxu0 %v12695_v56  ;;  %v4745_v26 = vmax.f32 %v4399_v16, %v10677_v31  ;;  %v11268_v62 = vpack.c.bf16 %v4743_v46, %v4743_v46  ;;  %v11269_v2 = vpack.c.bf16 %v4744_v0, %v4744_v0  ;;  %v5116_v20 = vunpack.c.l.b16 %v11267_v35  ;;  %11826 = vmatpush3.bf16.msra.mxu1 %v12697_v10  ;;  %v5306_v4 = vld [vmem:[#allocation3 + $0x38] sm:$0xf]  ;;  %v12706_v29 = vld [vmem:[#allocation11 + $0x218] sm:$0xff]   ;;  %v12709_v31 = vld [vmem:[#allocation11 + $0x88] sm:$0xff]  }
 0x320   : > { %v4414_v19 = vrot.slane %v4400_v21, %v15222_v23  ;;  %v4415_v25 = vcombine.high %v4407_v48, %v4407_v48  ;;  %v10678_v32 = vrot.slane %v4407_v48, 9  ;;  %v4417_v13 = vcombine.high %v4145_v7, %v4145_v7  ;;  %11827 = vmatprep.subr.bf16.mxu1 %v12699_v49  ;;  %v12716_v21 = vld [vmem:[#allocation11 + $0xc0] sm:$0xff]  }
 0x321   : > { %v5117_v60 = vunpack.c.l.b16 %v11268_v62  ;;  %v5118_v42 = vunpack.c.l.b16 %v11269_v2  ;;  %v5219_v8 = vrot.slane %v5116_v20, 3  ;;  %v11285_v50 = vpack.c.bf16 %v4745_v26, %v4745_v26 }
 0x322   : > { %12240 = vmatpush3.bf16.msra.mxu0 %v12695_v56  ;;  %v4416_v41 = vcombine.high %v4414_v19, %v4414_v19  ;;  %v10679_v11 = vrot.slane %v4415_v25, 9  ;;  %v10680_v28 = vrot.slane %v4414_v19, 9  ;;  %v4746_v58 = vmax.f32 %v4407_v48, %v10678_v32 }
 0x323   : > { %12241 = vmatprep.subr.bf16.mxu0 %v12698_v12  ;;  %v5220_v9 = vsel %vm5139_vm14, %v5219_v8, %v5218_v6  ;;  %v5221_v44 = vrot.slane %v5117_v60, 2  ;;  %v5223_v1 = vrot.slane %v5118_v42, 1  ;;  %v5310_v63 = vsel %vm13620_vm2, %v11285_v50, %v5309_v55  ;;  %11828 = vmatpush3.bf16.msra.mxu1 %v12700_v17  ;;  %v15597_v6 = vld [vmem:[#allocation3 + $0x18] sm:$0xf]  ;;  %v15601_v55 = vld [vmem:[#allocation3 + $0x1c] sm:$0x1] }
 0x324   : > { %5311 = vst [vmem:[#allocation3 + $0x3c] sm:$0x1] %v5310_v63  ;;  %v10681_v37 = vrot.slane %v4416_v41, 9  ;;  %v4747_v18 = vmax.f32 %v4415_v25, %v10679_v11  ;;  %v4748_v47 = vmax.f32 %v4414_v19, %v10680_v28  ;;  %v11271_v14 = vpack.c.bf16 %v4746_v58, %v4746_v58  ;;  %11829 = vmatprep.subr.bf16.mxu1 %v12702_v51  ;;  %v12715_v19 = vld [vmem:[#allocation11 + $0x210] sm:$0xff]   ;;  %v12717_v60 = vld [vmem:[#allocation11 + $0x80] sm:$0xff]   ;;  %v12719_v11 = vld [vmem:[#allocation11 + $0x1f8] sm:$0xff]  }
 0x325   : > { %v5222_v22 = vsel %vm5142_vm15, %v5221_v44, %v5220_v9  ;;  %v4424_v38 = vrot.slane %v4145_v7, %v15222_v23  ;;  %v4431_v56 = vrot.slane %v4417_v13, %v15222_v23  ;;  %v15594_v16 = vcombine.low %v15582_v33, %v15587_v27  ;;  %v5315_v44 = vld [vmem:[#allocation3 + $0x44] sm:$0x1] }
 0x326   : > { %12242 = vmatpush3.bf16.msra.mxu0 %v12698_v12  ;;  %v5224_v36 = vsel %vm5145_vm0, %v5223_v1, %v5222_v22  ;;  %v4749_v3 = vmax.f32 %v4416_v41, %v10681_v37  ;;  %v11272_v10 = vpack.c.bf16 %v4747_v18, %v4747_v18  ;;  %v11273_v15 = vpack.c.bf16 %v4748_v47, %v4748_v47  ;;  %v15608_v1 = vld [vmem:[#allocation3 + $0x18] sm:$0xf]  ;;  %v5352_v47 = vld [vmem:[#allocation3 + $0x1c] sm:$0x1] }
 0x327   : > { %12243 = vmatprep.subr.bf16.mxu0 %v12701_v39  ;;  %v5250_v52 = vpack.c.b16 %v5224_v36, %v5224_v36  ;;  %v5120_v53 = vunpack.c.l.b16 %v11271_v14  ;;  %v4432_v43 = vcombine.high %v4424_v38, %v4424_v38  ;;  %v4433_v49 = vcombine.high %v4431_v56, %v4431_v56  ;;  %11830 = vmatpush3.bf16.msra.mxu1 %v12703_v34  ;;  %v12718_v14 = vld [vmem:[#allocation11 + $0x208] sm:$0xff]  }
 0x328   : > { %v11274_v46 = vpack.c.bf16 %v4749_v3, %v4749_v3  ;;  %v5121_v0 = vunpack.c.l.b16 %v11272_v10  ;;  %v5122_v35 = vunpack.c.l.b16 %v11273_v15  ;;  %v10682_v24 = vrot.slane %v4424_v38, 9  ;;  %11831 = vmatprep.subr.bf16.mxu1 %v12708_v59  ;;  %v15612_v36 = vld [vmem:[#allocation3 + $0x20] sm:$0xf] }
 0x329   : > { %v5307_v48 = vsel %vm13664_vm9, %v5250_v52, %v5306_v4  ;;  %v5225_v7 = vrot.slane %v5120_v53, 7  ;;  %v10683_v12 = vrot.slane %v4432_v43, 9  ;;  %v10684_v26 = vrot.slane %v4431_v56, 9  ;;  %v5360_v4 = vld [vmem:[#allocation3 + $0x18] sm:$0xe] }
 0x32a   : > { %12244 = vmatpush3.bf16.msra.mxu0 %v12701_v39  ;;  %5308 = vst [vmem:[#allocation3 + $0x38] sm:$0xf] %v5307_v48  ;;  %v5123_v62 = vunpack.c.l.b16 %v11274_v46  ;;  %v5226_v2 = vrot.slane %v5121_v0, 6  ;;  %v5228_v20 = vrot.slane %v5122_v35, 5  ;;  %v10685_v17 = vrot.slane %v4433_v49, 9 }
 0x32b   : > { %12245 = vmatprep.subr.bf16.mxu0 %v12706_v29  ;;  %v4750_v25 = vmax.f32 %v4424_v38, %v10682_v24  ;;  %v4751_v32 = vmax.f32 %v4432_v43, %v10683_v12  ;;  %v4752_v13 = vmax.f32 %v4431_v56, %v10684_v26  ;;  %v10761_v51 = vcombine.low %v15597_v6, %v15601_v55  ;;  %v15617_v52 = vld [vmem:[#allocation3 + $0x20] sm:$0xf]  ;;  %v5353_v46 = vld [vmem:[#allocation3 + $0x24] sm:$0x1] }
 0x32c   : > { %11832 = vmatpush3.bf16.msra.mxu1 %v12709_v31  ;;  %v5227_v42 = vsel %vm5130_vm11, %v5226_v2, %v5225_v7  ;;  %v5230_v8 = vrot.slane %v5123_v62, 4  ;;  %v4753_v50 = vmax.f32 %v4433_v49, %v10685_v17  ;;  %v5448_v41 = vshll.u32 %v15594_v16, 16  ;;  %v15622_v48 = vld [vmem:[#allocation3 + $0x24] sm:$0x1]  ;;  %v12727_v7 = vld [vmem:[#allocation11 + $0x200] sm:$0xff]  }
 0x32d   : > { %11833 = vmatprep.subr.bf16.mxu1 %v12716_v21  ;;  %v5229_v28 = vsel %vm5133_vm12, %v5228_v20, %v5227_v42  ;;  %v11275_v58 = vpack.c.bf16 %v4750_v25, %v4750_v25  ;;  %v11276_v39 = vpack.c.bf16 %v4751_v32, %v4751_v32  ;;  %v11277_v9 = vpack.c.bf16 %v4752_v13, %v4752_v13  ;;  %v15625_v2 = vld [vmem:[#allocation3 + $0x28] sm:$0xf]  ;;  %v15630_v25 = vld [vmem:[#allocation3 + $0x2c] sm:$0x1]  ;;  %v5312_v13 = vld [vmem:[#allocation3 + $0x40] sm:$0xf] }
 0x32e   : > { %12246 = vmatpush3.bf16.msra.mxu0 %v12706_v29  ;;  %v5231_v63 = vsel %vm5136_vm13, %v5230_v8, %v5229_v28  ;;  %v11286_v34 = vpack.c.bf16 %v4753_v50, %v4753_v50  ;;  %v5446_v37 = vshrl.u32 %v15594_v16, 16  ;;  %v5450_v18 = vrot.slane %v5448_v41, 1  ;;  %v5361_v29 = vld [vmem:[#allocation3 + $0x20] sm:$0xe]  ;;  %v15633_v8 = vld [vmem:[#allocation3 + $0x28] sm:$0xf] }
 0x32f   : > { %12247 = vmatprep.subr.bf16.mxu0 %v12715_v19  ;;  %v5124_v59 = vunpack.c.l.b16 %v11275_v58  ;;  %v5125_v22 = vunpack.c.l.b16 %v11276_v39  ;;  %v5126_v38 = vunpack.c.l.b16 %v11277_v9  ;;  %v5455_v56 = vshll.u32 %v10761_v51, 16  ;;  %v15637_v58 = vld [vmem:[#allocation3 + $0x30] sm:$0xf]  ;;  %v5362_v39 = vld [vmem:[#allocation3 + $0x28] sm:$0xe] }
 0x330   : > { %11834 = vmatpush3.bf16.msra.mxu1 %v12717_v60  ;;  %v5316_v3 = vsel %vm13620_vm2, %v11286_v34, %v5315_v44  ;;  %v5451_v10 = vor.u32 %v5450_v18, %v5446_v37  ;;  %v5453_v15 = vshrl.u32 %v10761_v51, 16  ;;  %v10776_v16 = vcombine.low %v15608_v1, %v5352_v47  ;;  %v5363_v37 = vld [vmem:[#allocation3 + $0x30] sm:$0xe] }
 0x331   : > { %11899 = vmatprep.subr.bf16.mxu1 %v12719_v11  ;;  %v5232_v53 = vrot.slane %v5124_v59, 3  ;;  %v5234_v43 = vrot.slane %v5125_v22, 2  ;;  %v5236_v49 = vrot.slane %v5126_v38, 1  ;;  %5317 = vst [vmem:[#allocation3 + $0x44] sm:$0x1] %v5316_v3  ;;  %v5457_v31 = vrot.slane %v5455_v56, 1 }
 0x332   : > { %12248 = vmatpush3.bf16.msra.mxu0 %v12715_v19  ;;  %v10816_v0 = vcombine.low %v15582_v33, %v15597_v6  ;;  %v10777_v35 = vcombine.low %v15612_v36, %v5353_v46  ;;  %v5576_v24 = vshll.u32 %v10776_v16, 16  ;;  %v10784_v21 = vcombine.low %v5360_v4, %v5352_v47  ;;  %v15639_v18 = vld [vmem:[#allocation3 + $0x30] sm:$0xf]  ;;  %v5354_v38 = vld [vmem:[#allocation3 + $0x2c] sm:$0x1] }
 0x333   : > { %12249 = vmatprep.subr.bf16.mxu0 %v12718_v14  ;;  %v5233_v12 = vsel %vm5139_vm14, %v5232_v53, %v5231_v63  ;;  %v5458_v26 = vor.u32 %v5457_v31, %v5453_v15  ;;  %v10785_v62 = vcombine.low %v5361_v29, %v5353_v46  ;;  %v10762_v20 = vcombine.low %v15617_v52, %v15622_v48  ;;  %v5355_v56 = vld [vmem:[#allocation3 + $0x34] sm:$0x1] }
 0x334   : > { %v5235_v17 = vsel %vm5142_vm15, %v5234_v43, %v5233_v12  ;;  %v5574_v33 = vshrl.u32 %v10776_v16, 16  ;;  %v5578_v6 = vrot.slane %v5576_v24, 1  ;;  %v5583_v19 = vshll.u32 %v10777_v35, 16  ;;  %v15645_v29 = vld [vmem:[#allocation3 + $0x34] sm:$0x1] }
 0x335   : > { %v5237_v32 = vsel %vm5145_vm0, %v5236_v49, %v5235_v17  ;;  %v10817_v51 = vcombine.low %v5451_v10, %v5458_v26  ;;  %v5641_v60 = vrot.slane %v10784_v21, 1  ;;  %v5642_v42 = vrot.slane %v10785_v62, 1  ;;  %v15647_v43 = vld [vmem:[#allocation3 + $0x38] sm:$0xf]  ;;  %v15651_v12 = vld [vmem:[#allocation3 + $0x3c] sm:$0x1] }
 0x336   : > { %12250 = vmatpush3.bf16.msra.mxu0 %v12718_v14  ;;  %v5252_v50 = vpack.c.b16 %v5237_v32, %v5237_v32  ;;  %v5581_v41 = vshrl.u32 %v10777_v35, 16  ;;  %v5585_v11 = vrot.slane %v5583_v19, 1  ;;  %v10763_v28 = vcombine.low %v15625_v2, %v15630_v25  ;;  %v15655_v17 = vld [vmem:[#allocation3 + $0x38] sm:$0xf] }
 0x337   : > { %12251 = vmatprep.subr.bf16.mxu0 %v12727_v7  ;;  %6518 = vmatprep.mubr.bf16.mxu1 %v10817_v51  ;;  %v10821_v9 = vcombine.low %v5641_v60, %v5642_v42  ;;  %v5579_v44 = vor.u32 %v5578_v6, %v5574_v33  ;;  %v5460_v63 = vshrl.u32 %v10762_v20, 16  ;;  %v5462_v34 = vshll.u32 %v10762_v20, 16 }
 0x338   : > { %v5313_v47 = vsel %vm13664_vm9, %v5252_v50, %v5312_v13  ;;  %6519 = vmatmul.mubr.bf16.gmra.mxu1 %v10816_v0  ;;  %v5586_v14 = vor.u32 %v5585_v11, %v5581_v41  ;;  %v5467_v59 = vshrl.u32 %v10763_v28, 16  ;;  %v5469_v22 = vshll.u32 %v10763_v28, 16  ;;  %v5364_v13 = vld [vmem:[#allocation3 + $0x38] sm:$0xe]  ;;  %v5356_v50 = vld [vmem:[#allocation3 + $0x3c] sm:$0x1] }
 0x339   : > { %5314 = vst [vmem:[#allocation3 + $0x40] sm:$0xf] %v5313_v47  ;;  %6648 = vmatprep.mubr.bf16.mxu0 %v10821_v9  ;;  %v5464_v4 = vrot.slane %v5462_v34, 1  ;;  %v10778_v3 = vcombine.low %v15633_v8, %v5354_v38  ;;  %v10779_v10 = vcombine.low %v15637_v58, %v5355_v56  ;;  %v10786_v15 = vcombine.low %v5362_v39, %v5354_v38  ;;  %v5357_v41 = vld [vmem:[#allocation3 + $0x44] sm:$0x1] }
 0x33a   : > { %12252 = vmatpush3.bf16.msra.mxu0 %v12727_v7  ;;  %v10820_v16 = vcombine.low %v5579_v44, %v5586_v14  ;;  %v5471_v45 = vrot.slane %v5469_v22, 1  ;;  %v10787_v53 = vcombine.low %v5363_v37, %v5355_v56  ;;  %v10764_v49 = vcombine.low %v15639_v18, %v15645_v29  ;;  %v5383_v22 = vld [vmem:[#allocation3 + $0x10] sm:$0xe]  ;;  %v5384_v38 = vld [vmem:[#allocation3 + $0x18] sm:$0xe] }
 0x33b   : > { %v5465_v31 = vor.u32 %v5464_v4, %v5460_v63  ;;  %v5590_v46 = vshll.u32 %v10778_v3, 16  ;;  %v5597_v35 = vshll.u32 %v10779_v10, 16  ;;  %v5643_v24 = vrot.slane %v10786_v15, 1  ;;  %v15663_v15 = vld [vmem:[#allocation3 + $0x14] sm:$0x1] }
 0x33c   : > { %6649 = vmatmul.mubr.bf16.gmra.mxu0 %v10820_v16  ;;  %v5472_v0 = vor.u32 %v5471_v45, %v5467_v59  ;;  %v5644_v21 = vrot.slane %v10787_v53, 1  ;;  %v5588_v26 = vshrl.u32 %v10778_v3, 16  ;;  %v10765_v7 = vcombine.low %v15647_v43, %v15651_v12 }
 0x33d   : > { %v5592_v62 = vrot.slane %v5590_v46, 1  ;;  %v5476_v20 = vshll.u32 %v10764_v49, 16  ;;  %v5595_v6 = vshrl.u32 %v10779_v10, 16  ;;  %v5599_v19 = vrot.slane %v5597_v35, 1 }
 0x33e   : > { %v10826_v33 = vcombine.low %v5465_v31, %v5472_v0  ;;  %v10830_v32 = vcombine.low %v5643_v24, %v5644_v21  ;;  %v10825_v51 = vcombine.low %v15617_v52, %v15625_v2  ;;  %v5483_v42 = vshll.u32 %v10765_v7, 16  ;;  %v15665_v31 = vld [vmem:[#allocation3 + $0x1c] sm:$0x1] }
 0x33f   : > { %v5478_v60 = vrot.slane %v5476_v20, 1  ;;  %v5593_v11 = vor.u32 %v5592_v62, %v5588_v26  ;;  %v5600_v28 = vor.u32 %v5599_v19, %v5595_v6  ;;  %v5474_v39 = vshrl.u32 %v10764_v49, 16  ;;  %v5388_v19 = vld [vmem:[#allocation3 + $0x38] sm:$0xe] }
 0x340   : > { %6526 = vmatprep.mubr.bf16.mxu1 %v10826_v33  ;;  %6656 = vmatprep.mubr.bf16.mxu0 %v10830_v32  ;;  %v15659_v9 = vld [vmem:[#allocation3 + $0x40] sm:$0xf]  ;;  %v10780_v63 = vcombine.low %v15655_v17, %v5356_v50  ;;  %v5481_v34 = vshrl.u32 %v10765_v7, 16  ;;  %v5485_v37 = vrot.slane %v5483_v42, 1  ;;  %v10788_v52 = vcombine.low %v5364_v13, %v5356_v50  ;;  %v5386_v33 = vld [vmem:[#allocation3 + $0x28] sm:$0xe] }
 0x341   : > { %v5365_v44 = vld [vmem:[#allocation3 + $0x40] sm:$0xe]  ;;  %6527 = vmatmul.mubr.bf16.gmra.mxu1 %v10825_v51  ;;  %v10781_v47 = vcombine.low %v15659_v9, %v5357_v41  ;;  %v10829_v2 = vcombine.low %v5593_v11, %v5600_v28  ;;  %v5479_v56 = vor.u32 %v5478_v60, %v5474_v39  ;;  %v10798_v35 = vcombine.low %v5383_v22, %v15663_v15  ;;  %v15673_v51 = vld [vmem:[#allocation3 + $0x2c] sm:$0x1]  ;;  %v15676_v50 = vld [vmem:[#allocation3 + $0x3c] sm:$0x1] }
 0x342   : > { %v5604_v14 = vshll.u32 %v10780_v63, 16  ;;  %v10789_v59 = vcombine.low %v5365_v44, %v5357_v41  ;;  %v5486_v4 = vor.u32 %v5485_v37, %v5481_v34  ;;  %v5602_v3 = vshrl.u32 %v10780_v63, 16  ;;  %v5385_v60 = vld [vmem:[#allocation3 + $0x20] sm:$0xe]  ;;  %v15678_v41 = vld [vmem:[#allocation3 + $0x24] sm:$0x1] }
 0x343   : > { %v5611_v10 = vshll.u32 %v10781_v47, 16  ;;  %v5609_v45 = vshrl.u32 %v10781_v47, 16  ;;  %v5645_v53 = vrot.slane %v10788_v52, 1  ;;  %v10799_v24 = vcombine.low %v5384_v38, %v15665_v31  ;;  %v15682_v28 = vld [vmem:[#allocation3 + $0x34] sm:$0x1]  ;;  %v12728_v47 = vld [vmem:[#allocation11 + $0x1f0] sm:$0xff]  }
 0x344   : > { %6657 = vmatmul.mubr.bf16.gmra.mxu0 %v10829_v2  ;;  %v5606_v16 = vrot.slane %v5604_v14, 1  ;;  %v5646_v49 = vrot.slane %v10789_v59, 1  ;;  %v10835_v46 = vcombine.low %v5479_v56, %v5486_v4  ;;  %v10834_v26 = vcombine.low %v15639_v18, %v15647_v43  ;;  %v5387_v18 = vld [vmem:[#allocation3 + $0x30] sm:$0xe]  ;;  %v15685_v37 = vld [vmem:[#allocation3 + $0x4c] sm:$0x1] }
 0x345   : > { %v5613_v0 = vrot.slane %v5611_v10, 1  ;;  %v5768_v20 = vrot.slane %v10799_v24, 1  ;;  %v10810_v6 = vcombine.low %v15547_v57, %v15549_v30  ;;  %v5767_v13 = vrot.slane %v10798_v35, 1  ;;  %v5337_v30 = vld [vmem:[#allocation3 + $0x18] sm:$0xe]  ;;  %v12726_v44 = vld [vmem:[#allocation11 + $0x1b8] sm:$0xff]  }
 0x346   : > { %v10839_v21 = vcombine.low %v5645_v53, %v5646_v49  ;;  %6534 = vmatprep.mubr.bf16.mxu1 %v10835_v46  ;;  %v5607_v62 = vor.u32 %v5606_v16, %v5602_v3  ;;  %v10801_v42 = vcombine.low %v5386_v33, %v15673_v51  ;;  %v10803_v11 = vcombine.low %v5388_v19, %v15676_v50  ;;  %v5336_v34 = vld [vmem:[#allocation3 + $0x10] sm:$0xe]  ;;  %v5389_v14 = vld [vmem:[#allocation3 + $0x40] sm:$0xe]  ;;  %v5390_v59 = vld [vmem:[#allocation3 + $0x48] sm:$0xe] }
 0x347   : > { %v5614_v7 = vor.u32 %v5613_v0, %v5609_v45  ;;  %v10815_v43 = vcombine.low %v5767_v13, %v5768_v20  ;;  %v10800_v57 = vcombine.low %v5385_v60, %v15678_v41  ;;  %v10802_v39 = vcombine.low %v5387_v18, %v15682_v28  ;;  %v15694_v3 = vld [vmem:[#allocation3 + $0x44] sm:$0x1]  ;;  %v12729_v10 = vld [vmem:[#allocation11 + $0x1b0] sm:$0xff]   ;;  %v5338_v0 = vld [vmem:[#allocation3 + $0x20] sm:$0xe] }
 0x348   : > { %6664 = vmatprep.mubr.bf16.mxu0 %v10839_v21  ;;  %v5770_v63 = vrot.slane %v10801_v42, 1  ;;  %v10769_v52 = vcombine.low %v5337_v30, %v15601_v55  ;;  %v5772_v2 = vrot.slane %v10803_v11, 1  ;;  %v10819_v22 = vcombine.low %v15608_v1, %v15612_v36  ;;  %v12734_v36 = vld [vmem:[#allocation11 + $0x1e8] sm:$0xff]   ;;  %v15700_v35 = vld [vmem:[#allocation3 + $0x10] sm:$0xf]  ;;  %v12741_v21 = vld [vmem:[#allocation11 + $0x1e0] sm:$0xff]  }
 0x349   : > { %6535 = vmatmul.mubr.bf16.gmra.mxu1 %v10834_v26  ;;  %v10838_v32 = vcombine.low %v5607_v62, %v5614_v7  ;;  %v5769_v38 = vrot.slane %v10800_v57, 1  ;;  %v10768_v56 = vcombine.low %v5336_v34, %v15587_v27  ;;  %v5771_v4 = vrot.slane %v10802_v39, 1  ;;  %v12740_v27 = vld [vmem:[#allocation11 + $0x1a8] sm:$0xff]   ;;  %v12747_v13 = vld [vmem:[#allocation11 + $0x1d8] sm:$0xff]   ;;  %v15710_v42 = vld [vmem:[#allocation3 + $0x28] sm:$0xf] }
 0x34a   : > { %6575 = vmatprep.mubr.bf16.mxu1 %v10810_v6  ;;  %v10804_v16 = vcombine.low %v5389_v14, %v15694_v3  ;;  %v10805_v45 = vcombine.low %v5390_v59, %v15685_v37  ;;  %v5514_v1 = vrot.slane %v10769_v52, 1  ;;  %v10771_v26 = vcombine.low %v5339_v61, %v15630_v25  ;;  %v12742_v6 = vld [vmem:[#allocation11 + $0x1a0] sm:$0xff]   ;;  %v15713_v11 = vld [vmem:[#allocation3 + $0x20] sm:$0xf] }
 0x34b   : > { %v10824_v55 = vcombine.low %v5769_v38, %v5770_v63  ;;  %v10833_v53 = vcombine.low %v5771_v4, %v5772_v2  ;;  %v10791_v62 = vcombine.low %v15698_v5, %v15665_v31  ;;  %v10828_v7 = vcombine.low %v15633_v8, %v15637_v58  ;;  %v5341_v25 = vld [vmem:[#allocation3 + $0x38] sm:$0xe]  ;;  %v12749_v8 = vld [vmem:[#allocation11 + $0x198] sm:$0xff]   ;;  %v12751_v63 = vld [vmem:[#allocation11 + $0x190] sm:$0xff]  }
 0x34c   : > { %6665 = vmatmul.mubr.bf16.gmra.mxu0 %v10838_v32  ;;  %v5773_v49 = vrot.slane %v10804_v16, 1  ;;  %v5774_v46 = vrot.slane %v10805_v45, 1  ;;  %v10770_v20 = vcombine.low %v5338_v0, %v15622_v48  ;;  %v10790_v33 = vcombine.low %v15700_v35, %v15663_v15  ;;  %v5340_v58 = vld [vmem:[#allocation3 + $0x30] sm:$0xe]  ;;  %v12750_v15 = vld [vmem:[#allocation11 + $0x1d0] sm:$0xff]   ;;  %v12754_v2 = vld [vmem:[#allocation11 + $0x1c8] sm:$0xff]  }
 0x34d   : > { %12253 = vmatprep.mubr.bf16.mxu0 %v10815_v43  ;;  %v5516_v32 = vrot.slane %v10771_v26, 1  ;;  %v5697_v60 = vshll.u32 %v10791_v62, 16  ;;  %v10773_v43 = vcombine.low %v5341_v25, %v15651_v12  ;;  %v10837_v57 = vcombine.low %v15655_v17, %v15659_v9  ;;  %v5372_v59 = vld [vmem:[#allocation3 + $0x38] sm:$0xf] }
 0x34e   : > { %v10842_v19 = vcombine.low %v5773_v49, %v5774_v46  ;;  %v5515_v31 = vrot.slane %v10770_v20, 1  ;;  %v5690_v48 = vshll.u32 %v10790_v33, 16  ;;  %v10793_v39 = vcombine.low %v15710_v42, %v15673_v51  ;;  %v12755_v51 = vld [vmem:[#allocation11 + $0x188] sm:$0xff]   ;;  %v5374_v46 = vld [vmem:[#allocation3 + $0x48] sm:$0xf] }
 0x34f   : > { %v5699_v30 = vrot.slane %v5697_v60, 1  ;;  %v10792_v12 = vcombine.low %v15713_v11, %v15678_v41  ;;  %v5518_v52 = vrot.slane %v10773_v43, 1  ;;  %v5688_v14 = vshrl.u32 %v10790_v33, 16  ;;  %v5373_v49 = vld [vmem:[#allocation3 + $0x40] sm:$0xf] }
 0x350   : > { %v10827_v18 = vcombine.low %v5515_v31, %v5516_v32  ;;  %v5692_v34 = vrot.slane %v5690_v48, 1  ;;  %v5711_v9 = vshll.u32 %v10793_v39, 16  ;;  %v10822_v25 = vcombine.low %v15713_v11, %v15710_v42  ;;  %v6986_v43 = vld [vmem:[#allocation4 + $0x4] sm:$0x4] }
 0x351   : > { %6576 = vmatmul.mubr.bf16.vlgmr.msra.gmra.mxu1 %v10809_v40  ;;  %v5513_v40 = vrot.slane %v10768_v56, 1  ;;  %v5371_v56 = vld [vmem:[#allocation3 + $0x30] sm:$0xf]  ;;  %v5702_v61 = vshrl.u32 %v10792_v12, 16  ;;  %vm7115_vm5 = vsmask.f32 2306 }
 0x352   : > { %6583 = vmatprep.mubr.bf16.mxu1 %v10819_v22  ;;  %11900 = vmatpush3.bf16.msra.mxu1 %v12726_v44  ;;  %v10772_v44 = vcombine.low %v5340_v58, %v15645_v29  ;;  %v5693_v38 = vor.u32 %v5692_v34, %v5688_v14  ;;  %v5704_v29 = vshll.u32 %v10792_v12, 16  ;;  %v5713_v41 = vrot.slane %v5711_v9, 1  ;;  %v6977_v34 = vld [vmem:[#allocation4 + $0xc] sm:$0x1]  ;;  %v6995_v14 = vld [vmem:[#allocation4 + $0x10] sm:$0x4]  ;;  %vm15878_vm6 = vmand %vm7114_vm4, %vm7115_vm5 }
 0x353   : > { %11901 = vmatprep.subr.bf16.mxu1 %v12728_v47  ;;  %v10818_v24 = vcombine.low %v5513_v40, %v5514_v1  ;;  %v5695_v47 = vshrl.u32 %v10791_v62, 16  ;;  %v10794_v45 = vcombine.low %v5371_v56, %v15682_v28  ;;  %v12757_v1 = vld [vmem:[#allocation11 + $0x180] sm:$0xff]   ;;  %v10796_v28 = vcombine.low %v5373_v49, %v15694_v3 }
 0x354   : > { %12254 = vmatmul.mubr.bf16.vlgmr.msra.gmra.mxu0 %v10824_v55  ;;  %v5517_v22 = vrot.slane %v10772_v44, 1  ;;  %v10795_v55 = vcombine.low %v5372_v59, %v15676_v50  ;;  %v10813_v50 = vcombine.low %v15700_v35, %v15698_v5  ;;  %v10797_v62 = vcombine.low %v5374_v46, %v15685_v37 }
 0x355   : > { %12257 = vmatprep.mubr.bf16.mxu0 %v10833_v53  ;;  %v5700_v17 = vor.u32 %v5699_v30, %v5695_v47  ;;  %v5709_v53 = vshrl.u32 %v10793_v39, 16  ;;  %v5716_v33 = vshrl.u32 %v10794_v45, 16  ;;  %v5730_v3 = vshrl.u32 %v10796_v28, 16  ;;  %v6974_v30 = vld [vmem:[#allocation4 + $0x8] sm:$0x1] }
 0x356   : > { %11902 = vmatpush3.bf16.msra.mxu1 %v12729_v10  ;;  %v10836_v4 = vcombine.low %v5517_v22, %v5518_v52  ;;  %v12756_v10 = vld [vmem:[#allocation11 + $0x1c0] sm:$0xff]   ;;  %v5723_v20 = vshrl.u32 %v10795_v55, 16  ;;  %v5739_v32 = vshll.u32 %v10797_v62, 16  ;;  %v5737_v35 = vshrl.u32 %v10797_v62, 16 }
 0x357   : > { %11903 = vmatprep.subr.bf16.mxu1 %v12734_v36  ;;  %v10814_v16 = vcombine.low %v5693_v38, %v5700_v17  ;;  %v5706_v36 = vrot.slane %v5704_v29, 1  ;;  %v5714_v40 = vor.u32 %v5713_v41, %v5709_v53  ;;  %v10831_v58 = vcombine.low %v5371_v56, %v5372_v59  ;;  %v6989_v39 = vld [vmem:[#allocation4 + $0x8] sm:$0x4]  ;;  %v6992_v47 = vld [vmem:[#allocation4 + $0xc] sm:$0x4]  ;;  %v12765_v29 = vld [vmem:[#allocation12 + $0x78] sm:$0xff]  }
 0x358   : > { %v5741_v31 = vrot.slane %v5739_v32, 1  ;;  %v6975_v44 = vsel %vm13620_vm2, 0, %v6974_v30  ;;  %v6978_v12 = vsel %vm13620_vm2, 0, %v6977_v34  ;;  %v6993_v52 = vsel %vm15733_vm3, 0, %v6992_v47  ;;  %v12766_v56 = vld [vmem:[#allocation12 + $0xf8] sm:$0xff]   ;;  %v12770_v41 = vld [vmem:[#allocation12 + $0xf0] sm:$0xff]  }
 0x359   : > { %6584 = vmatmul.mubr.bf16.gmra.mxu1 %v10818_v24  ;;  %v5707_v0 = vor.u32 %v5706_v36, %v5702_v61  ;;  %v5718_v24 = vshll.u32 %v10794_v45, 16  ;;  %6976 = vst [vmem:[#allocation4 + $0x8] sm:$0x1] %v6975_v44  ;;  %6979 = vst [vmem:[#allocation4 + $0xc] sm:$0x1] %v6978_v12  ;;  %v6996_v59 = vsel %vm15733_vm3, 0, %v6995_v14  ;;  %11973 = vmatprep.subr.bf16.mxu0 %v12766_v56 }
 0x35a   : > { %6591 = vmatprep.mubr.bf16.mxu1 %v10828_v7  ;;  %11904 = vmatpush3.bf16.msra.mxu1 %v12740_v27  ;;  %v5725_v27 = vshll.u32 %v10795_v55, 16  ;;  %6994 = vst [vmem:[#allocation4 + $0xc] sm:$0x4] %v6993_v52  ;;  %6997 = vst [vmem:[#allocation4 + $0x10] sm:$0x4] %v6996_v59  ;;  %v12768_v55 = vld [vmem:[#allocation12 + $0xb8] sm:$0xff]  }
 0x35b   : > { %11905 = vmatprep.subr.bf16.mxu1 %v12741_v21  ;;  %v10823_v21 = vcombine.low %v5707_v0, %v5714_v40  ;;  %v5720_v7 = vrot.slane %v5718_v24, 1  ;;  %11974 = vmatpush3.bf16.msra.mxu0 %v12768_v55  ;;  %v12772_v36 = vld [vmem:[#allocation12 + $0xb0] sm:$0xff]   ;;  %v12773_v61 = vld [vmem:[#allocation12 + $0x68] sm:$0xff]   ;;  %v12780_v62 = vld [vmem:[#allocation12 + $0xa0] sm:$0xff]   ;;  %vm8455_vm9 = vsmask.f32 7942 }
 0x35c   : > { %12258 = vmatmul.mubr.bf16.gmra.mxu0 %v10842_v19  ;;  %v5727_v26 = vrot.slane %v5725_v27, 1  ;;  %v5732_v19 = vshll.u32 %v10796_v28, 16  ;;  %11975 = vmatprep.subr.bf16.mxu0 %v12770_v41  ;;  %v12774_v40 = vld [vmem:[#allocation12 + $0xe8] sm:$0xff]   ;;  %v12779_v28 = vld [vmem:[#allocation12 + $0x20] sm:$0xff]   ;;  %v12805_v59 = vld [vmem:[#allocation12 + $0x178] sm:$0xff]  }
 0x35d   : > { %v12776_v0 = vld [vmem:[#allocation12 + $0xa8] sm:$0xff]   ;;  %v12793_v44 = vld [vmem:[#allocation12 + $0x40] sm:$0xff]   ;;  %vm8456_vm10 = vmand %vm8454_vm8, %vm8455_vm9 }
 0x35e   : > { %11906 = vmatpush3.bf16.msra.mxu1 %v12742_v6  ;;  %v5728_v6 = vor.u32 %v5727_v26, %v5723_v20  ;;  %v5734_v5 = vrot.slane %v5732_v19, 1  ;;  %v12792_v30 = vld [vmem:[#allocation12 + $0x88] sm:$0xff]   ;;  %v12795_v52 = vld [vmem:[#allocation12] sm:$0xff]  }
 0x35f   : > { %11907 = vmatprep.subr.bf16.mxu1 %v12747_v13  ;;  %v5721_v13 = vor.u32 %v5720_v7, %v5716_v33  ;;  %11976 = vmatpush3.bf16.msra.mxu0 %v12772_v36  ;;  %v12781_v33 = vld [vmem:[#allocation12 + $0x58] sm:$0xff]  }
 0x360   : > { %v5735_v37 = vor.u32 %v5734_v5, %v5730_v3  ;;  %11977 = vmatprep.subr.bf16.mxu0 %v12774_v40 }
 0x361   : > { %6592 = vmatmul.mubr.bf16.gmra.mxu1 %v10827_v18  ;;  %v10832_v60 = vcombine.low %v5721_v13, %v5728_v6  ;;  %v10840_v18 = vcombine.low %v5373_v49, %v5374_v46  ;;  %v12775_v46 = vld [vmem:[#allocation12 + $0x28] sm:$0xff]   ;;  %v12782_v6 = vld [vmem:[#allocation12 + $0xd8] sm:$0xff]  }
 0x362   : > { %6599 = vmatprep.mubr.bf16.mxu1 %v10837_v57  ;;  %11908 = vmatpush3.bf16.msra.mxu1 %v12749_v8  ;;  %v5742_v8 = vor.u32 %v5741_v31, %v5737_v35  ;;  %v6987_v57 = vsel %vm15733_vm3, 0, %v6986_v43  ;;  %v12785_v35 = vld [vmem:[#allocation12 + $0x50] sm:$0xff]  }
 0x363   : > { %11909 = vmatprep.subr.bf16.mxu1 %v12750_v15  ;;  %v6971_v15 = vld [vmem:[#allocation4 + $0x4] sm:$0x1]  ;;  %6988 = vst [vmem:[#allocation4 + $0x4] sm:$0x4] %v6987_v57  ;;  %11978 = vmatpush3.bf16.msra.mxu0 %v12776_v0  ;;  %v12786_v31 = vld [vmem:[#allocation12 + $0xd0] sm:$0xff]   ;;  %v12791_v57 = vld [vmem:[#allocation12 + $0x8] sm:$0xff]  }
 0x364   : > { %v10841_v48 = vcombine.low %v5735_v37, %v5742_v8  ;;  %v6972_v42 = vsel %vm13620_vm2, 0, %v6971_v15  ;;  %v12787_v8 = vld [vmem:[#allocation12 + $0x10] sm:$0xff]   ;;  %v12790_v15 = vld [vmem:[#allocation12 + $0xc8] sm:$0xff]  }
 0x365   : > { %6973 = vst [vmem:[#allocation4 + $0x4] sm:$0x1] %v6972_v42 }
 0x366   : > { %11910 = vmatpush3.bf16.msra.mxu1 %v12751_v63  ;;  %v6990_v63 = vsel %vm15733_vm3, 0, %v6989_v39 }
 0x367   : > { %11911 = vmatprep.subr.bf16.mxu1 %v12754_v2  ;;  %6991 = vst [vmem:[#allocation4 + $0x8] sm:$0x4] %v6990_v63  ;;  %v6980_v2 = vld [vmem:[#allocation4 + $0x10] sm:$0x1]  ;;  %v12794_v63 = vld [vmem:[#allocation12 + $0xc0] sm:$0xff]  }
 0x368   : > { %v6981_v9 = vsel %vm13620_vm2, 0, %v6980_v2  ;;  %v12796_v2 = vld [vmem:[#allocation12 + $0x80] sm:$0xff]  }
 0x369   : > { %6600 = vmatmul.mubr.bf16.gmra.mxu1 %v10836_v4  ;;  %6982 = vst [vmem:[#allocation4 + $0x10] sm:$0x1] %v6981_v9  ;;  %v12767_v4 = vld [vmem:[#allocation12 + $0x38] sm:$0xff]  }
 0x36a   : > { %11912 = vmatpush3.bf16.msra.mxu1 %v12755_v51  ;;  %6705 = vmatprep.mubr.bf16.mxu1 %v10814_v16  ;;  %v12769_v16 = vld [vmem:[#allocation12 + $0x70] sm:$0xff]  }
 0x36b   : > { %11913 = vmatprep.subr.bf16.mxu1 %v12756_v10 }
 0x36e   : > { %11914 = vmatpush3.bf16.msra.mxu1 %v12757_v1  ;;  %v12771_v1 = vld [vmem:[#allocation12 + $0x30] sm:$0xff]  }
 0x36f   : > { %11951 = vmatprep.subr.bf16.mxu1 %v12765_v29  ;;  %v12806_v29 = vld [vmem:[#allocation12 + $0x1f8] sm:$0xff]  }
 0x371   : > { %6706 = vmatmul.mubr.bf16.vlgmr.msra.gmra.mxu1 %v10813_v50  ;;  %v12777_v50 = vld [vmem:[#allocation12 + $0x60] sm:$0xff]  }
 0x372   : > { %6713 = vmatprep.mubr.bf16.mxu1 %v10823_v21  ;;  %11952 = vmatpush3.bf16.msra.mxu1 %v12767_v4  ;;  %v12778_v21 = vld [vmem:[#allocation12 + $0xe0] sm:$0xff]  }
 0x373   : > { %11953 = vmatprep.subr.bf16.mxu1 %v12769_v16  ;;  %11979 = vmatprep.subr.bf16.mxu0 %v12778_v21 }
 0x374   : > { %11980 = vmatpush3.bf16.msra.mxu0 %v12780_v62 }
 0x375   : > { %11981 = vmatprep.subr.bf16.mxu0 %v12782_v6 }
 0x376   : > { %11954 = vmatpush3.bf16.msra.mxu1 %v12771_v1 }
 0x377   : > { %11955 = vmatprep.subr.bf16.mxu1 %v12773_v61 }
 0x379   : > { %6714 = vmatmul.mubr.bf16.gmra.mxu1 %v10822_v25  ;;  %v12783_v25 = vld [vmem:[#allocation12 + $0x18] sm:$0xff]  }
 0x37a   : > { %6721 = vmatprep.mubr.bf16.mxu1 %v10832_v60  ;;  %11956 = vmatpush3.bf16.msra.mxu1 %v12775_v46  ;;  %v12784_v60 = vld [vmem:[#allocation12 + $0x98] sm:$0xff]  }
 0x37b   : > { %11957 = vmatprep.subr.bf16.mxu1 %v12777_v50  ;;  %11982 = vmatpush3.bf16.msra.mxu0 %v12784_v60 }
 0x37c   : > { %11983 = vmatprep.subr.bf16.mxu0 %v12786_v31 }
 0x37e   : > { %11958 = vmatpush3.bf16.msra.mxu1 %v12779_v28 }
 0x37f   : > { %11959 = vmatprep.subr.bf16.mxu1 %v12781_v33 }
 0x381   : > { %6722 = vmatmul.mubr.bf16.gmra.mxu1 %v10831_v58  ;;  %v12788_v58 = vld [vmem:[#allocation12 + $0x90] sm:$0xff]  }
 0x382   : > { %6729 = vmatprep.mubr.bf16.mxu1 %v10841_v48  ;;  %11960 = vmatpush3.bf16.msra.mxu1 %v12783_v25  ;;  %v15814_v25 = vld [vmem:[%s16067_s4] ss:$0 sm:$0xff] }
 0x383   : > { %11961 = vmatprep.subr.bf16.mxu1 %v12785_v35  ;;  %11984 = vmatpush3.bf16.msra.mxu0 %v12788_v58 }
 0x384   : > { %11985 = vmatprep.subr.bf16.mxu0 %v12790_v15 }
 0x386   : > { %11962 = vmatpush3.bf16.msra.mxu1 %v12787_v8 }
 0x387   : > { %11986 = vmatpush3.bf16.msra.mxu0 %v12792_v30 }
 0x388   : > { %11987 = vmatprep.subr.bf16.mxu0 %v12794_v63 }
 0x389   : > { %6730 = vmatmul.mubr.bf16.gmra.mxu1 %v10840_v18  ;;  %v12789_v18 = vld [vmem:[#allocation12 + $0x48] sm:$0xff]  }
 0x38a   : > { %11963 = vmatprep.subr.bf16.mxu1 %v12789_v18 }
 0x38b   : > { %11964 = vmatpush3.bf16.msra.mxu1 %v12791_v57  ;;  %11988 = vmatpush3.bf16.msra.mxu0 %v12796_v2 }
 0x38c   : > { %11965 = vmatprep.subr.bf16.mxu1 %v12793_v44  ;;  %12017 = vmatprep.subr.bf16.mxu0 %v12806_v29 }
 0x38f   : > { %11966 = vmatpush3.bf16.msra.mxu1 %v12795_v52 }
 0x390   : > { %11995 = vmatprep.subr.bf16.mxu1 %v12805_v59 }
 0x3d2   : > { %v15747_v17 = vpop.f32.mrf.mxu1 }
 0x3d4   : > { %v15753_v22 = vpop.f32.mrf.mxu1 }
 0x3d6   : > { %v15755_v51 = vpop.f32.mrf.mxu1 }
 0x3d8   : > { %v15759_v10 = vpop.f32.mrf.mxu1 }
 0x3dc   : > { %v15757_v38 = vpop.f32.mrf.mxu0 }
 0x3de   : > { %v15763_v53 = vpop.f32.mrf.mxu0 }
 0x3df   : > { %v11877_v30 = vadd.f32 %v15763_v53, %v15757_v38 }
 0x3e0   : > { %v15769_v24 = vpop.f32.mrf.mxu0 }
 0x3e2   : > { %v15773_v7 = vpop.f32.mrf.mxu0 }
 0x3f8   : > { %v15761_v45 = vpop.f32.mrf.mxu1 }
 0x3fa   : > { %v15765_v27 = vpop.f32.mrf.mxu1 }
 0x3fc   : > { %v15767_v49 = vpop.f32.mrf.mxu1  ;;  %v15775_v19 = vpop.f32.mrf.mxu0 }
 0x3fe   : > { %v15771_v26 = vpop.f32.mrf.mxu1  ;;  %v15781_v3 = vpop.f32.mrf.mxu0 }
 0x3ff   : > { %v11806_v59 = vadd.f32 %v15771_v26, %v15767_v49 }
 0x400   : > { %v15785_v43 = vpop.f32.mrf.mxu0 }
 0x401   : > { %v11807_v20 = vpop.f32.mrf.mxu1 }
 0x402   : > { %v15789_v34 = vpop.f32.mrf.mxu0 }
 0x403   : > { %v11808_v32 = vpop.f32.mrf.mxu1 }
 0x404   : > { %v15777_v13 = vadd.f32 %v11808_v32, %v11807_v20  ;;  %v15793_v14 = vpop.f32.mrf.mxu0  ;;  %v11797_v32 = vadd.f32 %v15753_v22, %v15747_v17 }
 0x405   : > { %v15779_v5 = vpop.f32.mrf.mxu1 }
 0x406   : > { %v15795_v4 = vpop.f32.mrf.mxu0  ;;  %v6513_v58 = vadd.f32 %v11797_v32, %v15814_v25 }
 0x407   : > { %v15783_v37 = vpop.f32.mrf.mxu1 }
 0x408   : > { %v15797_v41 = vpop.f32.mrf.mxu0  ;;  %v11812_v49 = vadd.f32 %v15783_v37, %v15779_v5 }
 0x409   : > { %v11813_v48 = vpop.f32.mrf.mxu1 }
 0x40a   : > { %v15799_v61 = vpop.f32.mrf.mxu0 }
 0x40b   : > { %v11814_v42 = vpop.f32.mrf.mxu1 }
 0x40c   : > { %v15787_v11 = vadd.f32 %v11814_v42, %v11813_v48  ;;  %v15801_v46 = vpop.f32.mrf.mxu0  ;;  %v11800_v48 = vadd.f32 %v15759_v10, %v15755_v51 }
 0x40d   : > { %v11816_v39 = vpop.f32.mrf.mxu1 }
 0x40e   : > { %v15803_v21 = vpop.f32.mrf.mxu0  ;;  %v6516_v57 = vadd.f32 %v11800_v48, %v15814_v25 }
 0x40f   : > { %v11817_v47 = vpop.f32.mrf.mxu1 }
 0x410   : > { %v15791_v12 = vadd.f32 %v11817_v47, %v11816_v39  ;;  %v15805_v20 = vpop.f32.mrf.mxu0  ;;  %v11803_v39 = vadd.f32 %v15765_v27, %v15761_v45 }
 0x411   : > { %v11835_v9 = vpop.f32.mrf.mxu1 }
 0x412   : > { %v15816_v60 = vpop.f32.mrf.mxu0 }
 0x413   : > { %v11836_v56 = vpop.f32.mrf.mxu1 }
 0x414   : > { %v11837_v31 = vadd.f32 %v11836_v56, %v11835_v9  ;;  %v15823_v18 = vpop.f32.mrf.mxu0  ;;  %v11880_v9 = vadd.f32 %v15773_v7, %v15769_v24  ;;  %v6521_v56 = vadd.f32 %v11803_v39, %v15814_v25  ;;  %v11883_v24 = vadd.f32 %v15781_v3, %v15775_v19 }
 0x415   : > { %v11838_v55 = vpop.f32.mrf.mxu1  ;;  %v6529_v19 = vadd.f32 %v15777_v13, %v15814_v25  ;;  %v6532_v3 = vadd.f32 %v11812_v49, %v15814_v25 }
 0x416   : > { %v6578_v17 = vadd.f32 %v11837_v31, %v6513_v58  ;;  %v6772_v44 = vpop.f32.mrf.mxu0  ;;  %v6524_v31 = vadd.f32 %v11806_v59, %v15814_v25 }
 0x417   : > { %v11839_v16 = vpop.f32.mrf.mxu1 }
 0x418   : > { %v11840_v22 = vadd.f32 %v11839_v16, %v11838_v55  ;;  %v6643_v52 = vadd.f32 %v11877_v30, %v6578_v17  ;;  %v12256_v38 = vpop.f32.mrf.mxu0 }
 0x419   : > { %v11841_v1 = vpop.f32.mrf.mxu1 }
 0x41a   : > { %v6581_v47 = vadd.f32 %v11840_v22, %v6516_v57  ;;  %v6775_v26 = vpop.f32.mrf.mxu0  ;;  %v11886_v57 = vadd.f32 %v15789_v34, %v15785_v43  ;;  %v11892_v43 = vadd.f32 %v15799_v61, %v15797_v41  ;;  %v15863_v41 = vadd.f32 %v15816_v60, %v15805_v20 }
 0x41b   : > { %v11842_v36 = vpop.f32.mrf.mxu1 }
 0x41c   : > { %v11843_v10 = vadd.f32 %v11842_v36, %v11841_v1  ;;  %v6646_v45 = vadd.f32 %v11880_v9, %v6581_v47 }
 0x41d   : > { %v11844_v40 = vpop.f32.mrf.mxu1 }
 0x41e   : > { %v6586_v16 = vadd.f32 %v11843_v10, %v6521_v56 }
 0x41f   : > { %v11845_v0 = vpop.f32.mrf.mxu1 }
 0x420   : > { %v11846_v55 = vadd.f32 %v11845_v0, %v11844_v40  ;;  %v6651_v22 = vadd.f32 %v11883_v24, %v6586_v16 }
 0x421   : > { %v11847_v50 = vpop.f32.mrf.mxu1 }
 0x422   : > { %v6589_v58 = vadd.f32 %v11846_v55, %v6524_v31 }
 0x423   : > { %v11848_v28 = vpop.f32.mrf.mxu1 }
 0x424   : > { %v11849_v40 = vadd.f32 %v11848_v28, %v11847_v50  ;;  %v6654_v28 = vadd.f32 %v11886_v57, %v6589_v58 }
 0x425   : > { %v11850_v62 = vpop.f32.mrf.mxu1 }
 0x426   : > { %v6594_v34 = vadd.f32 %v11849_v40, %v6529_v19 }
 0x427   : > { %v11851_v33 = vpop.f32.mrf.mxu1 }
 0x428   : > { %v11852_v0 = vadd.f32 %v11851_v33, %v11850_v62 }
 0x429   : > { %v15807_v6 = vpop.f32.mrf.mxu1 }
 0x42a   : > { %v6597_v33 = vadd.f32 %v11852_v0, %v6532_v3 }
 0x42b   : > { %v11854_v35 = vpop.f32.mrf.mxu1 }
 0x42c   : > { %v11855_v47 = vadd.f32 %v11854_v35, %v15807_v6 }
 0x42d   : > { %v15818_v8 = vpop.f32.mrf.mxu1 }
 0x42f   : > { %v15825_v15 = vpop.f32.mrf.mxu1 }
 0x430   : > { %v11858_v20 = vadd.f32 %v15825_v15, %v15818_v8 }
 0x431   : > { %v11915_v42 = vpop.f32.mrf.mxu1 }
 0x433   : > { %v11916_v63 = vpop.f32.mrf.mxu1 }
 0x434   : > { %v11917_v51 = vadd.f32 %v11916_v63, %v11915_v42  ;;  %v15849_v63 = vpop.f32.mrf.mxu0 }
 0x435   : > { %v11918_v2 = vpop.f32.mrf.mxu1 }
 0x436   : > { %v6708_v29 = vadd.f32 %v11917_v51, %v6643_v52  ;;  %v6537_v52 = vadd.f32 %v15787_v11, %v15814_v25  ;;  %v6788_v35 = vpop.f32.mrf.mxu0 }
 0x437   : > { %v11919_v53 = vpop.f32.mrf.mxu1 }
 0x438   : > { %v11920_v27 = vadd.f32 %v11919_v53, %v11918_v2  ;;  %v6773_v1 = vadd.f32 %v6772_v44, %v6708_v29  ;;  %v11889_v44 = vadd.f32 %v15795_v4, %v15793_v14  ;;  %v6540_v4 = vadd.f32 %v15791_v12, %v15814_v25  ;;  %v15869_v31 = vpop.f32.mrf.mxu0 }
 0x439   : > { %v11921_v32 = vpop.f32.mrf.mxu1  ;;  %v11895_v2 = vadd.f32 %v15803_v21, %v15801_v46  ;;  %v6602_v56 = vadd.f32 %v11855_v47, %v6537_v52  ;;  %v6662_v25 = vadd.f32 %v11892_v43, %v6597_v33 }
 0x43a   : > { %v6711_v36 = vadd.f32 %v11920_v27, %v6646_v45  ;;  %v6803_v30 = vmax.f32 %v6773_v1, 0.0  ;;  %v6659_v53 = vadd.f32 %v11889_v44, %v6594_v34  ;;  %v6605_v0 = vadd.f32 %v11858_v20, %v6540_v4 }
 0x43b   : > { %v11922_v7 = vpop.f32.mrf.mxu1 }
 0x43c   : > { %v6776_v48 = vadd.f32 %v6775_v26, %v6711_v36  ;;  %v11923_v17 = vadd.f32 %v11922_v7, %v11921_v32 }
 0x43d   : > { %v11924_v42 = vpop.f32.mrf.mxu1 }
 0x43e   : > { %v6804_v39 = vmax.f32 %v6776_v48, 0.0  ;;  %v6716_v5 = vadd.f32 %v11923_v17, %v6651_v22  ;;  %v6667_v48 = vadd.f32 %v11895_v2, %v6602_v56 }
 0x43f   : > { %v11925_v37 = vpop.f32.mrf.mxu1 }
 0x440   : > { %v6811_v50 = vmax.f32 %v6803_v30, %v6804_v39  ;;  %v11926_v62 = vadd.f32 %v11925_v37, %v11924_v42  ;;  %v6781_v61 = vadd.f32 %v15823_v18, %v6716_v5  ;;  %v6791_v30 = vpop.f32.mrf.mxu0 }
 0x441   : > { %v11927_v13 = vpop.f32.mrf.mxu1 }
 0x442   : > { %v6819_v51 = vcombine.high %v6811_v50, %v6811_v50  ;;  %v6826_v10 = vrot.slane %v6811_v50, %v15222_v23  ;;  %v6719_v14 = vadd.f32 %v11926_v62, %v6654_v28  ;;  %v6805_v60 = vmax.f32 %v6781_v61, 0.0 }
 0x443   : > { %v11928_v6 = vpop.f32.mrf.mxu1 }
 0x444   : > { %v6833_v11 = vrot.slane %v6819_v51, %v15222_v23  ;;  %v6834_v9 = vcombine.high %v6826_v10, %v6826_v10  ;;  %v10915_v59 = vrot.slane %v6826_v10, 9  ;;  %v6784_v29 = vadd.f32 %v12256_v38, %v6719_v14 }
 0x445   : > { %v11929_v55 = vadd.f32 %v11928_v6, %v11927_v13  ;;  %v11930_v12 = vpop.f32.mrf.mxu1 }
 0x446   : > { %v6835_v45 = vcombine.high %v6833_v11, %v6833_v11  ;;  %v10916_v46 = vrot.slane %v6834_v9, 9  ;;  %v10917_v21 = vrot.slane %v6833_v11, 9  ;;  %v6951_v27 = vmax.f32 %v6826_v10, %v10915_v59 }
 0x447   : > { %v6806_v18 = vmax.f32 %v6784_v29, 0.0  ;;  %v6724_v16 = vadd.f32 %v11929_v55, %v6659_v53  ;;  %v11931_v32 = vpop.f32.mrf.mxu1  ;;  %v7117_v53 = vld [vmem:[#allocation4 + $0x4] sm:$0x7] }
 0x448   : > { %v10918_v38 = vrot.slane %v6835_v45, 9  ;;  %v6952_v1 = vmax.f32 %v6834_v9, %v10916_v46  ;;  %v6953_v36 = vmax.f32 %v6833_v11, %v10917_v21  ;;  %v11287_v24 = vpack.c.bf16 %v6951_v27, %v6951_v27 }
 0x449   : > { %v6812_v49 = vmax.f32 %v6805_v60, %v6806_v18  ;;  %v6789_v26 = vadd.f32 %v6788_v35, %v6724_v16  ;;  %v11932_v7 = vadd.f32 %v11931_v32, %v11930_v12  ;;  %v11933_v58 = vpop.f32.mrf.mxu1 }
 0x44a   : > { %v6954_v17 = vmax.f32 %v6835_v45, %v10918_v38  ;;  %v11288_v40 = vpack.c.bf16 %v6952_v1, %v6952_v1  ;;  %v11289_v8 = vpack.c.bf16 %v6953_v36, %v6953_v36  ;;  %v7062_v15 = vunpack.c.l.b16 %v11287_v24 }
 0x44b   : > { %v6836_v22 = vcombine.high %v6812_v49, %v6812_v49  ;;  %v6843_v42 = vrot.slane %v6812_v49, %v15222_v23  ;;  %v6727_v57 = vadd.f32 %v11932_v7, %v6662_v25  ;;  %v6807_v5 = vmax.f32 %v6789_v26, 0.0  ;;  %v11934_v37 = vpop.f32.mrf.mxu1 }
 0x44c   : > { %v11290_v39 = vpack.c.bf16 %v6954_v17, %v6954_v17  ;;  %v7063_v19 = vunpack.c.l.b16 %v11288_v40  ;;  %v7064_v3 = vunpack.c.l.b16 %v11289_v8  ;;  %v7078_v34 = vrot.slane %v7062_v15, 7 }
 0x44d   : > { %v6850_v44 = vrot.slane %v6836_v22, %v15222_v23  ;;  %v6851_v50 = vcombine.high %v6843_v42, %v6843_v42  ;;  %v10919_v28 = vrot.slane %v6843_v42, 9  ;;  %v6792_v62 = vadd.f32 %v6791_v30, %v6727_v57  ;;  %v11936_v6 = vpop.f32.mrf.mxu1 }
 0x44e   : > { %v7065_v43 = vunpack.c.l.b16 %v11290_v39  ;;  %v7079_v33 = vrot.slane %v7063_v19, 6  ;;  %v7081_v47 = vrot.slane %v7064_v3, 5  ;;  %v11935_v61 = vadd.f32 %v11934_v37, %v11933_v58 }
 0x44f   : > { %v6852_v13 = vcombine.high %v6850_v44, %v6850_v44  ;;  %v10920_v52 = vrot.slane %v6851_v50, 9  ;;  %v10921_v51 = vrot.slane %v6850_v44, 9  ;;  %v6955_v10 = vmax.f32 %v6843_v42, %v10919_v28  ;;  %v11937_v32 = vpop.f32.mrf.mxu1 }
 0x450   : > { %v7080_v14 = vsel %vm5130_vm11, %v7079_v33, %v7078_v34  ;;  %v7083_v4 = vrot.slane %v7065_v43, 4  ;;  %v6808_v2 = vmax.f32 %v6792_v62, 0.0  ;;  %v6670_v25 = vadd.f32 %v15863_v41, %v6605_v0  ;;  %v12797_v43 = vld [vmem:[#allocation4] ss:$0 sps:$4 sm:$0x77]  }
 0x451   : > { %v7082_v35 = vsel %vm5133_vm12, %v7081_v47, %v7080_v14  ;;  %v10922_v11 = vrot.slane %v6852_v13, 9  ;;  %v6956_v9 = vmax.f32 %v6851_v50, %v10920_v52  ;;  %v6957_v59 = vmax.f32 %v6850_v44, %v10921_v51  ;;  %v7120_v50 = vld [vmem:[#allocation4 + $0x8] sm:$0x7] }
 0x452   : > { %v7084_v29 = vsel %vm5136_vm13, %v7083_v4, %v7082_v35  ;;  %v11291_v55 = vpack.c.bf16 %v6955_v10, %v6955_v10  ;;  %v6813_v12 = vmax.f32 %v6807_v5, %v6808_v2  ;;  %v6732_v16 = vadd.f32 %v11935_v61, %v6667_v48 }
 0x453   : > { %v7106_v45 = vpack.c.b16 %v7084_v29, %v7084_v29  ;;  %v6958_v46 = vmax.f32 %v6852_v13, %v10922_v11  ;;  %v11292_v21 = vpack.c.bf16 %v6956_v9, %v6956_v9  ;;  %v11293_v27 = vpack.c.bf16 %v6957_v59, %v6957_v59 }
 0x454   : > { %v7066_v20 = vunpack.c.l.b16 %v11291_v55  ;;  %v6853_v60 = vcombine.high %v6813_v12, %v6813_v12  ;;  %v6860_v18 = vrot.slane %v6813_v12, %v15222_v23  ;;  %v11938_v8 = vadd.f32 %v11937_v32, %v11936_v6 }
 0x455   : > { %v7118_v38 = vsel %vm15878_vm6, %v7106_v45, %v7117_v53  ;;  %v11294_v1 = vpack.c.bf16 %v6958_v46, %v6958_v46  ;;  %v7067_v36 = vunpack.c.l.b16 %v11292_v21  ;;  %v7068_v24 = vunpack.c.l.b16 %v11293_v27  ;;  %v7123_v46 = vld [vmem:[#allocation4 + $0xc] sm:$0x7] }
 0x456   : > { %7119 = vst [vmem:[#allocation4 + $0x4] sm:$0x7] %v7118_v38  ;;  %v7085_v49 = vrot.slane %v7066_v20, 7  ;;  %v6867_v41 = vrot.slane %v6853_v60, %v15222_v23  ;;  %v6868_v26 = vcombine.high %v6860_v18, %v6860_v18  ;;  %v10923_v7 = vrot.slane %v6860_v18, 9 }
 0x457   : > { %v7069_v58 = vunpack.c.l.b16 %v11294_v1  ;;  %v7086_v17 = vrot.slane %v7067_v36, 6  ;;  %v7088_v40 = vrot.slane %v7068_v24, 5  ;;  %v6797_v30 = vadd.f32 %v15849_v63, %v6732_v16  ;;  %v12801_v60 = vld [vmem:[#allocation4] ss:$0 sps:$4 sm:$0x66]  }
 0x458   : > { %v6869_v15 = vcombine.high %v6867_v41, %v6867_v41  ;;  %v10924_v0 = vrot.slane %v6868_v26, 9  ;;  %v10925_v48 = vrot.slane %v6867_v41, 9  ;;  %v6959_v22 = vmax.f32 %v6860_v18, %v10923_v7  ;;  %v15899_v38 = vld [vmem:[#allocation4 + $0x14] ss:$0 sps:$4 sm:$0x77]  }
 0x459   : > { %v7087_v42 = vsel %vm5130_vm11, %v7086_v17, %v7085_v49  ;;  %v7090_v57 = vrot.slane %v7069_v58, 4  ;;  %v6735_v39 = vadd.f32 %v11938_v8, %v6670_v25  ;;  %v6809_v51 = vmax.f32 %v6797_v30, 0.0 }
 0x45a   : > { %v7089_v19 = vsel %vm5133_vm12, %v7088_v40, %v7087_v42  ;;  %v10926_v3 = vrot.slane %v6869_v15, 9  ;;  %v6960_v5 = vmax.f32 %v6868_v26, %v10924_v0  ;;  %v6961_v37 = vmax.f32 %v6867_v41, %v10925_v48 }
 0x45b   : > { %v7091_v44 = vsel %vm5136_vm13, %v7090_v57, %v7089_v19  ;;  %v11295_v28 = vpack.c.bf16 %v6959_v22, %v6959_v22  ;;  %v6800_v62 = vadd.f32 %v15869_v31, %v6735_v39  ;;  %v7181_v35 = vshll.u32 %v12797_v43, 16 }
 0x45c   : > { %v7107_v34 = vpack.c.b16 %v7091_v44, %v7091_v44  ;;  %v6962_v33 = vmax.f32 %v6869_v15, %v10926_v3  ;;  %v11296_v47 = vpack.c.bf16 %v6960_v5, %v6960_v5  ;;  %v11297_v13 = vpack.c.bf16 %v6961_v37, %v6961_v37  ;;  %v7129_v3 = vld [vmem:[#allocation4] sm:$0x3] }
 0x45d   : > { %v7070_v52 = vunpack.c.l.b16 %v11295_v28  ;;  %v6810_v63 = vmax.f32 %v6800_v62, 0.0  ;;  %v12798_v61 = vld [vmem:[#allocation4 + $0x4] ss:$0 sps:$4 sm:$0x77]   ;;  %v7179_v16 = vshrl.u32 %v12797_v43, 16  ;;  %v7183_v32 = vrot.slane %v7181_v35, 1 }
 0x45e   : > { %v7121_v10 = vsel %vm15878_vm6, %v7107_v34, %v7120_v50  ;;  %v11298_v14 = vpack.c.bf16 %v6962_v33, %v6962_v33  ;;  %v7071_v4 = vunpack.c.l.b16 %v11296_v47  ;;  %v7072_v2 = vunpack.c.l.b16 %v11297_v13  ;;  %v12802_v41 = vld [vmem:[#allocation4 + $0x4] ss:$0 sps:$4 sm:$0x66]  }
 0x45f   : > { %7122 = vst [vmem:[#allocation4 + $0x8] sm:$0x7] %v7121_v10  ;;  %v6814_v6 = vmax.f32 %v6809_v51, %v6810_v63  ;;  %v7092_v31 = vrot.slane %v7070_v52, 7  ;;  %v7188_v25 = vshll.u32 %v12798_v61, 16  ;;  %v7186_v48 = vshrl.u32 %v12798_v61, 16 }
 0x460   : > { %v7073_v11 = vunpack.c.l.b16 %v11298_v14  ;;  %v7093_v9 = vrot.slane %v7071_v4, 6  ;;  %v7095_v59 = vrot.slane %v7072_v2, 5  ;;  %v7218_v22 = vrot.slane %v12801_v60, 1  ;;  %v7130_v43 = vld [vmem:[#allocation4 + $0x4] sm:$0x3] }
 0x461   : > { %v6870_v29 = vcombine.high %v6814_v6, %v6814_v6  ;;  %v6877_v53 = vrot.slane %v6814_v6, %v15222_v23  ;;  %v7190_v7 = vrot.slane %v7188_v25, 1  ;;  %v7184_v39 = vor.u32 %v7183_v32, %v7179_v16  ;;  %v7141_v34 = vld [vmem:[#allocation4 + $0x4] sm:$0x3] }
 0x462   : > { %v7094_v55 = vsel %vm5130_vm11, %v7093_v9, %v7092_v31  ;;  %v7097_v12 = vrot.slane %v7073_v11, 4  ;;  %v7314_v44 = vshll.u32 %v15899_v38, 16  ;;  %v7219_v33 = vrot.slane %v12802_v41, 1  ;;  %v12814_v52 = vld [vmem:[#allocation4 + $0x4] ss:$0 sps:$4 sm:$0x77]  }
 0x463   : > { %v7096_v45 = vsel %vm5133_vm12, %v7095_v59, %v7094_v55  ;;  %v6884_v21 = vrot.slane %v6870_v29, %v15222_v23  ;;  %v6885_v27 = vcombine.high %v6877_v53, %v6877_v53  ;;  %v10927_v20 = vrot.slane %v6877_v53, 9 }
 0x464   : > { %v7098_v18 = vsel %vm5136_vm13, %v7097_v12, %v7096_v45  ;;  %v7191_v5 = vor.u32 %v7190_v7, %v7186_v48  ;;  %v7346_v2 = vcombine.low %v7129_v3, %v7184_v39  ;;  %v7312_v35 = vshrl.u32 %v15899_v38, 16  ;;  %v12818_v38 = vld [vmem:[#allocation4 + $0x4] ss:$0 sps:$4 sm:$0x66]  }
 0x465   : > { %v7108_v1 = vpack.c.b16 %v7098_v18, %v7098_v18  ;;  %v6886_v36 = vcombine.high %v6884_v21, %v6884_v21  ;;  %v10928_v24 = vrot.slane %v6885_v27, 9  ;;  %v10929_v49 = vrot.slane %v6884_v21, 9 }
 0x466   : > { %v6963_v26 = vmax.f32 %v6877_v53, %v10927_v20  ;;  %v12799_v15 = vld [vmem:[#allocation4 + $0x8] ss:$0 sps:$4 sm:$0x77]   ;;  %v7387_v61 = vcombine.low %v7130_v43, %v7191_v5  ;;  %v7316_v11 = vrot.slane %v7314_v44, 1  ;;  %v7347_v12 = vcombine.low %v7218_v22, %v7141_v34 }
 0x467   : > { %v7124_v58 = vsel %vm15878_vm6, %v7108_v1, %v7123_v46  ;;  %v10930_v17 = vrot.slane %v6886_v36, 9  ;;  %v6964_v40 = vmax.f32 %v6885_v27, %v10928_v24  ;;  %v6965_v8 = vmax.f32 %v6884_v21, %v10929_v49  ;;  %v7142_v13 = vld [vmem:[#allocation4 + $0x8] sm:$0x3]  ;;  %v7126_v46 = vld [vmem:[#allocation4 + $0x10] sm:$0x7] }
 0x468   : > { %7125 = vst [vmem:[#allocation4 + $0xc] sm:$0x7] %v7124_v58  ;;  %v11299_v0 = vpack.c.bf16 %v6963_v26, %v6963_v26  ;;  %v7195_v37 = vshll.u32 %v12799_v15, 16  ;;  %v12815_v4 = vld [vmem:[#allocation4 + $0x8] ss:$0 sps:$4 sm:$0x77]   ;;  %v7388_v29 = vcombine.low %v7219_v33, %v7142_v13  ;;  %v7354_v1 = vrot.slane %v7346_v2, %v15222_v23 }
 0x469   : > { %v6966_v42 = vmax.f32 %v6886_v36, %v10930_v17  ;;  %v11300_v57 = vpack.c.bf16 %v6964_v40, %v6964_v40  ;;  %v11301_v30 = vpack.c.bf16 %v6965_v8, %v6965_v8  ;;  %v12803_v6 = vld [vmem:[#allocation4 + $0x8] ss:$0 sps:$4 sm:$0x66]   ;;  %v7193_v59 = vshrl.u32 %v12799_v15, 16 }
 0x46a   : > { %v7074_v19 = vunpack.c.l.b16 %v11299_v0  ;;  %v7197_v14 = vrot.slane %v7195_v37, 1  ;;  %v7237_v25 = vshll.u32 %v12814_v52, 16  ;;  %v7235_v27 = vshrl.u32 %v12814_v52, 16  ;;  %v7131_v18 = vld [vmem:[#allocation4 + $0x8] sm:$0x3] }
 0x46b   : > { %v11302_v50 = vpack.c.bf16 %v6966_v42, %v6966_v42  ;;  %v7075_v28 = vunpack.c.l.b16 %v11300_v57  ;;  %v7076_v62 = vunpack.c.l.b16 %v11301_v30  ;;  %v7244_v20 = vshll.u32 %v12815_v4, 16  ;;  %v12823_v41 = vld [vmem:[#allocation4 + $0x8] ss:$0 sps:$4 sm:$0x77]   ;;  %v15918_v52 = vld [vmem:[#allocation4 + $0x14] sm:$0x3] }
 0x46c   : > { %v7099_v47 = vrot.slane %v7074_v19, 7  ;;  %v7198_v21 = vor.u32 %v7197_v14, %v7193_v59  ;;  %v7220_v32 = vrot.slane %v12803_v6, 1  ;;  %v7395_v36 = vrot.slane %v7387_v61, %v15222_v23  ;;  %v12819_v42 = vld [vmem:[#allocation4 + $0x8] ss:$0 sps:$4 sm:$0x66]  }
 0x46d   : > { %v7077_v51 = vunpack.c.l.b16 %v11302_v50  ;;  %v7100_v63 = vrot.slane %v7075_v28, 6  ;;  %v7102_v10 = vrot.slane %v7076_v62, 5  ;;  %v7402_v24 = vrot.slane %v7388_v29, %v15222_v23 }
 0x46e   : > { %v7239_v40 = vrot.slane %v7237_v25, 1  ;;  %v7428_v8 = vcombine.low %v7131_v18, %v7198_v21  ;;  %v7361_v15 = vrot.slane %v7347_v12, %v15222_v23  ;;  %v7246_v0 = vrot.slane %v7244_v20, 1 }
 0x46f   : > { %v7101_v31 = vsel %vm5130_vm11, %v7100_v63, %v7099_v47  ;;  %v7104_v9 = vrot.slane %v7077_v51, 4  ;;  %v12800_v55 = vld [vmem:[#allocation4 + $0xc] ss:$0 sps:$4 sm:$0x77]   ;;  %v15914_v30 = vor.u32 %v7316_v11, %v7312_v35  ;;  %v10972_v19 = vcombine.low %v7354_v1, %v7395_v36  ;;  %v12807_v36 = vld [vmem:[#allocation12 + $0x138] sm:$0xff]  }
 0x470   : > { %v7103_v53 = vsel %vm5133_vm12, %v7102_v10, %v7101_v31  ;;  %v7202_v16 = vshll.u32 %v12800_v55, 16  ;;  %v12816_v49 = vld [vmem:[#allocation4 + $0xc] ss:$0 sps:$4 sm:$0x77]   ;;  %v7200_v7 = vshrl.u32 %v12800_v55, 16  ;;  %v10973_v3 = vcombine.low %v7361_v15, %v7402_v24 }
 0x471   : > { %v7105_v45 = vsel %vm5136_vm13, %v7104_v9, %v7103_v53  ;;  %v12804_v17 = vld [vmem:[#allocation4 + $0xc] ss:$0 sps:$4 sm:$0x66]   ;;  %v7251_v48 = vshll.u32 %v12816_v49, 16  ;;  %v7242_v56 = vshrl.u32 %v12815_v4, 16  ;;  %v7293_v5 = vshll.u32 %v12823_v41, 16 }
 0x472   : > { %v7109_v60 = vpack.c.b16 %v7105_v45, %v7105_v45  ;;  %v7204_v58 = vrot.slane %v7202_v16, 1  ;;  %v12824_v57 = vld [vmem:[#allocation4 + $0xc] ss:$0 sps:$4 sm:$0x77]   ;;  %v7240_v50 = vor.u32 %v7239_v40, %v7235_v27  ;;  %v7274_v28 = vrot.slane %v12818_v38, 1 }
 0x473   : > { %v7132_v39 = vld [vmem:[#allocation4 + $0xc] sm:$0x3]  ;;  %v7300_v62 = vshll.u32 %v12824_v57, 16  ;;  %v7436_v43 = vrot.slane %v7428_v8, %v15222_v23  ;;  %v7221_v34 = vrot.slane %v12804_v17, 1  ;;  %v7247_v33 = vor.u32 %v7246_v0, %v7242_v56  ;;  %v7154_v17 = vld [vmem:[#allocation4 + $0x8] sm:$0x3] }
 0x474   : > { %v7127_v26 = vsel %vm15878_vm6, %v7109_v60, %v7126_v46  ;;  %v7205_v22 = vor.u32 %v7204_v58, %v7200_v7  ;;  %v7143_v44 = vld [vmem:[#allocation4 + $0xc] sm:$0x3]  ;;  %v7253_v47 = vrot.slane %v7251_v48, 1  ;;  %v7295_v51 = vrot.slane %v7293_v5, 1 }
 0x475   : > { %7128 = vst [vmem:[#allocation4 + $0x10] sm:$0x7] %v7127_v26  ;;  %v7298_v63 = vshrl.u32 %v12824_v57, 16  ;;  %v7302_v10 = vrot.slane %v7300_v62, 1  ;;  %v7429_v14 = vcombine.low %v7220_v32, %v7143_v44  ;;  %v7249_v4 = vshrl.u32 %v12816_v49, 16  ;;  %v12809_v26 = vld [vmem:[#allocation12 + $0x170] sm:$0xff]  }
 0x476   : > { %v7469_v37 = vcombine.low %v7132_v39, %v7205_v22  ;;  %v12820_v2 = vld [vmem:[#allocation4 + $0xc] ss:$0 sps:$4 sm:$0x66]   ;;  %v7275_v61 = vrot.slane %v12819_v42, 1  ;;  %v7291_v6 = vshrl.u32 %v12823_v41, 16  ;;  %v7671_v9 = vrot.slane %v10972_v19, %v15222_v23  ;;  %v12811_v39 = vld [vmem:[#allocation12 + $0x130] sm:$0xff]  }
 0x477   : > { %v7303_v31 = vor.u32 %v7302_v10, %v7298_v63  ;;  %v7678_v29 = vrot.slane %v10973_v3, %v15222_v23  ;;  %v7487_v12 = vcombine.low %v15918_v52, %v15914_v30  ;;  %v7254_v45 = vor.u32 %v7253_v47, %v7249_v4  ;;  %v7155_v16 = vld [vmem:[#allocation4 + $0xc] sm:$0x3]  ;;  %v12813_v44 = vld [vmem:[#allocation12 + $0x168] sm:$0xff]   ;;  %v12810_v62 = vld [vmem:[#allocation12 + $0x1f0] sm:$0xff]  }
 0x478   : > { %v7477_v13 = vrot.slane %v7469_v37, %v15222_v23  ;;  %v7404_v46 = vcombine.low %v7247_v33, %v7275_v61  ;;  %v7296_v21 = vor.u32 %v7295_v51, %v7291_v6  ;;  %v7443_v27 = vrot.slane %v7429_v14, %v15222_v23  ;;  %v12808_v37 = vld [vmem:[#allocation12 + $0x1b8] sm:$0xff]   ;;  %v12827_v63 = vld [vmem:[#allocation12 + $0x128] sm:$0xff]   ;;  %v12812_v10 = vld [vmem:[#allocation12 + $0x1b0] sm:$0xff]  }
 0x479   : > { %v7363_v18 = vcombine.low %v7240_v50, %v7274_v28  ;;  %v7276_v24 = vrot.slane %v12820_v2, 1  ;;  %v7405_v49 = vcombine.low %v7155_v16, %v7303_v31  ;;  %v7501_v33 = vrot.slane %v7487_v12, %v15222_v23  ;;  %v12829_v61 = vld [vmem:[#allocation12 + $0x160] sm:$0xff]   ;;  %v12822_v6 = vld [vmem:[#allocation12 + $0x1e8] sm:$0xff]  }
 0x47a   : > { %v10974_v35 = vcombine.low %v7436_v43, %v7477_v13  ;;  %v7412_v15 = vrot.slane %v7404_v46, %v15222_v23  ;;  %v7364_v48 = vcombine.low %v7154_v17, %v7296_v21  ;;  %v12830_v12 = vld [vmem:[#allocation12 + $0x1e0] sm:$0xff]   ;;  %v12835_v46 = vld [vmem:[#allocation12 + $0x118] sm:$0xff]   ;;  %v12841_v16 = vld [vmem:[#allocation12 + $0x148] sm:$0xff]   ;;  %vm8494_vm12 = vsmask.f32 1282 }
 0x47b   : > { %v7445_v0 = vcombine.low %v7254_v45, %v7276_v24  ;;  %v7371_v19 = vrot.slane %v7363_v18, %v15222_v23  ;;  %v7419_v3 = vrot.slane %v7405_v49, %v15222_v23  ;;  %v12832_v21 = vld [vmem:[#allocation12 + $0x1a0] sm:$0xff]   ;;  %v12836_v18 = vld [vmem:[#allocation12 + $0x198] sm:$0xff]   ;;  %v12842_v24 = vld [vmem:[#allocation12 + $0x1c8] sm:$0xff]  }
 0x47c   : > { %v7144_v11 = vld [vmem:[#allocation4 + $0x10] sm:$0x3]  ;;  %v7685_v25 = vrot.slane %v10974_v35, %v15222_v23  ;;  %v7378_v52 = vrot.slane %v7364_v48, %v15222_v23  ;;  %v12847_v49 = vld [vmem:[#allocation12 + $0x100] sm:$0xff]  }
 0x47d   : > { %v7470_v59 = vcombine.low %v7221_v34, %v7144_v11  ;;  %v12817_v53 = vld [vmem:[#allocation4 + $0x10] ss:$0 sps:$4 sm:$0x77]   ;;  %v10976_v43 = vcombine.low %v7371_v19, %v7412_v15  ;;  %v7453_v47 = vrot.slane %v7445_v0, %v15222_v23  ;;  %v12848_v17 = vld [vmem:[#allocation12 + $0x180] sm:$0xff]  }
 0x47e   : > { %v12821_v55 = vld [vmem:[#allocation4 + $0x10] ss:$0 sps:$4 sm:$0x66]   ;;  %v7258_v60 = vshll.u32 %v12817_v53, 16  ;;  %v7693_v38 = vcombine.low %v7671_v9, %v7685_v25  ;;  %v7694_v1 = vcombine.high %v7671_v9, %v7685_v25  ;;  %v7256_v7 = vshrl.u32 %v12817_v53, 16  ;;  %v12831_v9 = vld [vmem:[#allocation12 + $0x120] sm:$0xff]  }
 0x47f   : > { %v7484_v20 = vrot.slane %v7470_v59, %v15222_v23  ;;  %v12825_v32 = vld [vmem:[#allocation4 + $0x10] ss:$0 sps:$4 sm:$0x77]   ;;  %v7277_v8 = vrot.slane %v12821_v55, 1  ;;  %v10977_v2 = vcombine.low %v7378_v52, %v7419_v3  ;;  %v7707_v35 = vrot.slane %v10976_v43, %v15222_v23  ;;  %v12833_v25 = vld [vmem:[#allocation12 + $0x158] sm:$0xff]   ;;  %v12852_v48 = vld [vmem:[#allocation12 + $0x220] sm:$0xff]  }
 0x480   : > { %v7260_v58 = vrot.slane %v7258_v60, 1  ;;  %v7307_v40 = vshll.u32 %v12825_v32, 16  ;;  %8223 = vmatprep.mubr.bf16.mxu1 %v7694_v1  ;;  %v7305_v57 = vshrl.u32 %v12825_v32, 16  ;;  %v7156_v34 = vld [vmem:[#allocation4 + $0x10] sm:$0x3]  ;;  %v12839_v60 = vld [vmem:[#allocation12 + $0x110] sm:$0xff]  }
 0x481   : > { %v10975_v41 = vcombine.low %v7443_v27, %v7484_v20  ;;  %8224 = vmatmul.mubr.bf16.vlgmr.msra.gmra.mxu1 %v7693_v38  ;;  %v12828_v55 = vld [vmem:[#allocation12 + $0x1a8] sm:$0xff]   ;;  %v12837_v27 = vld [vmem:[#allocation12 + $0x150] sm:$0xff]   ;;  %v12834_v20 = vld [vmem:[#allocation12 + $0x1d8] sm:$0xff]  }
 0x482   : > { %v7261_v42 = vor.u32 %v7260_v58, %v7256_v7  ;;  %v7309_v30 = vrot.slane %v7307_v40, 1  ;;  %11996 = vmatpush3.bf16.msra.mxu1 %v12807_v36  ;;  %v12838_v32 = vld [vmem:[#allocation12 + $0x1d0] sm:$0xff]   ;;  %v12843_v38 = vld [vmem:[#allocation12 + $0x108] sm:$0xff]   ;;  %v12845_v36 = vld [vmem:[#allocation12 + $0x140] sm:$0xff]   ;;  %v13315_v40 = vmov 0.0  }
 0x483   : > { %v7692_v22 = vrot.slane %v10975_v41, %v15222_v23  ;;  %11997 = vmatprep.subr.bf16.mxu1 %v12809_v26  ;;  %v12840_v1 = vld [vmem:[#allocation12 + $0x190] sm:$0xff]   ;;  %v12844_v41 = vld [vmem:[#allocation12 + $0x188] sm:$0xff]   ;;  %v12846_v26 = vld [vmem:[#allocation12 + $0x1c0] sm:$0xff]  }
 0x484   : > { %v7486_v50 = vcombine.low %v7261_v42, %v7277_v8  ;;  %v7310_v28 = vor.u32 %v7309_v30, %v7305_v57  ;;  %v12849_v7 = vld [vmem:[#allocation12 + $0x238] sm:$0xff]   ;;  %v12850_v8 = vld [vmem:[#allocation12 + $0x230] sm:$0xff]   ;;  %v12851_v0 = vld [vmem:[#allocation12 + $0x228] sm:$0xff]  }
 0x485   : > { %v7695_v56 = vcombine.low %v7678_v29, %v7692_v22  ;;  %v7696_v5 = vcombine.high %v7678_v29, %v7692_v22  ;;  %v7714_v29 = vrot.slane %v10977_v2, %v15222_v23  ;;  %v12859_v22 = vld [vmem:[#allocation4 + $0x10] ss:$0 sps:$4 sm:$0x66]   ;;  %v12860_v42 = vld [vmem:[#allocation4 + $0x14] ss:$0 sps:$4 sm:$0x66]  }
 0x486   : > { %v7494_v13 = vrot.slane %v7486_v50, %v15222_v23  ;;  %v7446_v51 = vcombine.low %v7156_v34, %v7310_v28  ;;  %11998 = vmatpush3.bf16.msra.mxu1 %v12811_v39  ;;  %v12858_v57 = vld [vmem:[#allocation4 + $0xc] ss:$0 sps:$4 sm:$0x66]   ;;  %v12853_v30 = vld [vmem:[#allocation12 + $0x218] sm:$0xff]   ;;  %v7332_v19 = vrot.slane %v12859_v22, 1  ;;  %v7333_v3 = vrot.slane %v12860_v42, 1 }
 0x487   : > { %8264 = vmatprep.mubr.bf16.mxu0 %v7696_v5  ;;  %11999 = vmatprep.subr.bf16.mxu1 %v12813_v44  ;;  %v12857_v39 = vld [vmem:[#allocation4 + $0x8] ss:$0 sps:$4 sm:$0x66]   ;;  %v12854_v5 = vld [vmem:[#allocation12 + $0x210] sm:$0xff]   ;;  %v8451_v2 = vld [vmem:[#allocation5 + $0x8] sm:$0x1] }
 0x488   : > { %8265 = vmatmul.mubr.bf16.vlgmr.msra.gmra.mxu0 %v7695_v56  ;;  %v10978_v14 = vcombine.low %v7453_v47, %v7494_v13  ;;  %v7460_v4 = vrot.slane %v7446_v51, %v15222_v23  ;;  %v7331_v56 = vrot.slane %v12858_v57, 1  ;;  %v7468_v44 = vrot.slane %v7332_v19, %v15222_v23  ;;  %v12856_v47 = vld [vmem:[#allocation12 + $0x200] sm:$0xff]   ;;  %v12899_v22 = vld [vmem:[#allocation14 + $0x1f8] sm:$0xff]  }
 0x489   : > { %12018 = vmatpush3.bf16.msra.mxu0 %v12808_v37  ;;  %v7330_v37 = vrot.slane %v12857_v39, 1  ;;  %v7509_v50 = vrot.slane %v7333_v3, %v15222_v23 }
 0x48a   : > { %12019 = vmatprep.subr.bf16.mxu0 %v12810_v62  ;;  %v7721_v11 = vrot.slane %v10978_v14, %v15222_v23  ;;  %v10979_v31 = vcombine.low %v7460_v4, %v7501_v33  ;;  %12000 = vmatpush3.bf16.msra.mxu1 %v12827_v63  ;;  %v7427_v28 = vrot.slane %v7331_v56, %v15222_v23  ;;  %v12855_v62 = vld [vmem:[#allocation12 + $0x208] sm:$0xff]   ;;  %v8448_v63 = vld [vmem:[#allocation5 + $0x4] sm:$0x1]  ;;  %v8457_v14 = vld [vmem:[#allocation5 + $0x4] sm:$0x2] }
 0x48b   : > { %12001 = vmatprep.subr.bf16.mxu1 %v12829_v61  ;;  %v7386_v43 = vrot.slane %v7330_v37, %v15222_v23  ;;  %v7734_v34 = vcombine.low %v7468_v44, %v7509_v50  ;;  %v8458_v4 = vsel %vm8456_vm10, 0, %v8457_v14  ;;  %v8460_v61 = vld [vmem:[#allocation5 + $0x8] sm:$0x2] }
 0x48c   : > { %v7730_v59 = vcombine.high %v7707_v35, %v7721_v11  ;;  %v7728_v53 = vrot.slane %v10979_v31, %v15222_v23  ;;  %v7729_v58 = vcombine.low %v7707_v35, %v7721_v11  ;;  %8459 = vst [vmem:[#allocation5 + $0x4] sm:$0x2] %v8458_v4  ;;  %v8461_v35 = vsel %vm8456_vm10, 0, %v8460_v61  ;;  %v12861_v11 = vld [vmem:[#allocation14 + $0x78] sm:$0xff]  }
 0x48d   : > { %12020 = vmatpush3.bf16.msra.mxu0 %v12812_v10  ;;  %v7733_v33 = vcombine.low %v7386_v43, %v7427_v28  ;;  %v7748_v13 = vrot.slane %v7734_v34, %v15222_v23  ;;  %v8449_v10 = vsel %vm13620_vm2, 0, %v8448_v63  ;;  %8462 = vst [vmem:[#allocation5 + $0x8] sm:$0x2] %v8461_v35  ;;  %v12862_v31 = vld [vmem:[#allocation14 + $0x38] sm:$0xff]  }
 0x48e   : > { %12021 = vmatprep.subr.bf16.mxu0 %v12822_v6  ;;  %8305 = vmatprep.mubr.bf16.mxu1 %v7730_v59  ;;  %v7732_v45 = vcombine.high %v7714_v29, %v7728_v53  ;;  %v7731_v15 = vcombine.low %v7714_v29, %v7728_v53  ;;  %8450 = vst [vmem:[#allocation5 + $0x4] sm:$0x1] %v8449_v10  ;;  %v8452_v6 = vsel %vm13620_vm2, 0, %v8451_v2  ;;  %v12864_v59 = vld [vmem:[#allocation14 + $0xb8] sm:$0xff]   ;;  %v12865_v29 = vld [vmem:[#allocation14 + $0x70] sm:$0xff]   ;;  %vm8493_vm2 = vcmask 1041408  }
 0x48f   : > { %12002 = vmatpush3.bf16.msra.mxu1 %v12831_v9  ;;  %v7741_v52 = vrot.slane %v7733_v33, %v15222_v23  ;;  %8453 = vst [vmem:[#allocation5 + $0x8] sm:$0x1] %v8452_v6  ;;  %v12863_v9 = vld [vmem:[#allocation14 + $0xf8] sm:$0xff]   ;;  %v12867_v53 = vld [vmem:[#allocation14 + $0xf0] sm:$0xff]   ;;  %vm15966_vm13 = vmand %vm8493_vm2, %vm8494_vm12 }
 0x490   : > { %8346 = vmatprep.mubr.bf16.mxu0 %v7732_v45  ;;  %12003 = vmatprep.subr.bf16.mxu1 %v12833_v25  ;;  %v12869_v25 = vld [vmem:[#allocation14 + $0x68] sm:$0xff]  }
 0x491   : > { %12022 = vmatpush3.bf16.msra.mxu0 %v12828_v55  ;;  %v7749_v51 = vcombine.low %v7741_v52, %v7748_v13  ;;  %v12866_v55 = vld [vmem:[#allocation14 + $0x30] sm:$0xff]   ;;  %v12870_v45 = vld [vmem:[#allocation14 + $0x28] sm:$0xff]  }
 0x492   : > { %12023 = vmatprep.subr.bf16.mxu0 %v12830_v12  ;;  %v12868_v12 = vld [vmem:[#allocation14 + $0xb0] sm:$0xff]  }
 0x493   : > { %12004 = vmatpush3.bf16.msra.mxu1 %v12835_v46  ;;  %v12872_v46 = vld [vmem:[#allocation14 + $0xa8] sm:$0xff]  }
 0x494   : > { %12005 = vmatprep.subr.bf16.mxu1 %v12837_v27  ;;  %v12875_v27 = vld [vmem:[#allocation14 + $0xe0] sm:$0xff]  }
 0x495   : > { %12024 = vmatpush3.bf16.msra.mxu0 %v12832_v21  ;;  %v12873_v21 = vld [vmem:[#allocation14 + $0x60] sm:$0xff]  }
 0x496   : > { %12025 = vmatprep.subr.bf16.mxu0 %v12834_v20  ;;  %v12874_v20 = vld [vmem:[#allocation14 + $0x20] sm:$0xff]  }
 0x497   : > { %12006 = vmatpush3.bf16.msra.mxu1 %v12839_v60  ;;  %v12876_v60 = vld [vmem:[#allocation14 + $0xa0] sm:$0xff]  }
 0x498   : > { %12007 = vmatprep.subr.bf16.mxu1 %v12841_v16  ;;  %v12879_v16 = vld [vmem:[#allocation14 + $0xd8] sm:$0xff]  }
 0x499   : > { %12026 = vmatpush3.bf16.msra.mxu0 %v12836_v18  ;;  %v12877_v18 = vld [vmem:[#allocation14 + $0x58] sm:$0xff]  }
 0x49a   : > { %12027 = vmatprep.subr.bf16.mxu0 %v12838_v32  ;;  %v12878_v32 = vld [vmem:[#allocation14 + $0x18] sm:$0xff]  }
 0x49b   : > { %12008 = vmatpush3.bf16.msra.mxu1 %v12843_v38  ;;  %v12880_v38 = vld [vmem:[#allocation14 + $0x98] sm:$0xff]  }
 0x49c   : > { %12009 = vmatprep.subr.bf16.mxu1 %v12845_v36  ;;  %v12883_v36 = vld [vmem:[#allocation14 + $0xd0] sm:$0xff]  }
 0x49d   : > { %12028 = vmatpush3.bf16.msra.mxu0 %v12840_v1  ;;  %v12881_v1 = vld [vmem:[#allocation14 + $0x50] sm:$0xff]  }
 0x49e   : > { %12029 = vmatprep.subr.bf16.mxu0 %v12842_v24  ;;  %v12882_v24 = vld [vmem:[#allocation14 + $0x10] sm:$0xff]  }
 0x49f   : > { %12010 = vmatpush3.bf16.msra.mxu1 %v12847_v49  ;;  %v12884_v49 = vld [vmem:[#allocation14 + $0x90] sm:$0xff]  }
 0x4a0   : > { %12261 = vmatprep.subr.bf16.mxu1 %v13315_v40 }
 0x4a1   : > { %12030 = vmatpush3.bf16.msra.mxu0 %v12844_v41  ;;  %v12885_v41 = vld [vmem:[#allocation14 + $0x48] sm:$0xff]  }
 0x4a2   : > { %12031 = vmatprep.subr.bf16.mxu0 %v12846_v26  ;;  %8306 = vmatmul.mubr.bf16.vlgmr.msra.gmra.mxu1 %v7729_v58  ;;  %v12887_v26 = vld [vmem:[#allocation14 + $0xc8] sm:$0xff]  }
 0x4a3   : > { %12262 = vmatpush3.bf16.msra.mxu1 %v12849_v7  ;;  %12277 = vmatprep.mubr.msk.bf16.mxu1 %vm13316_vm7, %v13315_v40  ;;  %v12886_v7 = vld [vmem:[#allocation14 + $0x8] sm:$0xff]  }
 0x4a4   : > { %12263 = vmatprep.subr.bf16.mxu1 %v13315_v40  ;;  %v12888_v58 = vld [vmem:[#allocation14 + $0x88] sm:$0xff]  }
 0x4a5   : > { %12032 = vmatpush3.bf16.msra.mxu0 %v12848_v17  ;;  %v12889_v17 = vld [vmem:[#allocation14 + $0x40] sm:$0xff]  }
 0x4a6   : > { %12048 = vmatprep.subr.bf16.mxu0 %v12861_v11 }
 0x4a7   : > { %12264 = vmatpush3.bf16.msra.mxu1 %v12850_v8  ;;  %v12891_v8 = vld [vmem:[#allocation14 + $0xc0] sm:$0xff]  }
 0x4a8   : > { %8347 = vmatmul.mubr.bf16.vlgmr.msra.gmra.mxu0 %v7731_v15  ;;  %12265 = vmatprep.subr.bf16.mxu1 %v13315_v40  ;;  %v12890_v15 = vld [vmem:[#allocation14] sm:$0xff]  }
 0x4a9   : > { %12049 = vmatpush3.bf16.msra.mxu0 %v12862_v31 }
 0x4aa   : > { %12050 = vmatprep.subr.bf16.mxu0 %v12865_v29 }
 0x4ab   : > { %12266 = vmatpush3.bf16.msra.mxu1 %v12851_v0  ;;  %v12892_v0 = vld [vmem:[#allocation14 + $0x80] sm:$0xff]  }
 0x4ac   : > { %12267 = vmatprep.subr.bf16.mxu1 %v13315_v40 }
 0x4ad   : > { %12051 = vmatpush3.bf16.msra.mxu0 %v12866_v55 }
 0x4ae   : > { %12052 = vmatprep.subr.bf16.mxu0 %v12869_v25 }
 0x4af   : > { %12268 = vmatpush3.bf16.msra.mxu1 %v12852_v48  ;;  %v12897_v48 = vld [vmem:[#allocation14 + $0x178] sm:$0xff]  }
 0x4b0   : > { %12269 = vmatprep.subr.bf16.mxu1 %v13315_v40 }
 0x4b1   : > { %12053 = vmatpush3.bf16.msra.mxu0 %v12870_v45 }
 0x4b2   : > { %12054 = vmatprep.subr.bf16.mxu0 %v12873_v21 }
 0x4b3   : > { %12270 = vmatpush3.bf16.msra.mxu1 %v12853_v30 }
 0x4b4   : > { %12271 = vmatprep.subr.bf16.mxu1 %v13315_v40 }
 0x4b5   : > { %12055 = vmatpush3.bf16.msra.mxu0 %v12874_v20 }
 0x4b6   : > { %12056 = vmatprep.subr.bf16.mxu0 %v12877_v18 }
 0x4b7   : > { %12272 = vmatpush3.bf16.msra.mxu1 %v12854_v5 }
 0x4b8   : > { %12273 = vmatprep.subr.bf16.mxu1 %v13315_v40 }
 0x4b9   : > { %12057 = vmatpush3.bf16.msra.mxu0 %v12878_v32 }
 0x4ba   : > { %12058 = vmatprep.subr.bf16.mxu0 %v12881_v1 }
 0x4bb   : > { %12274 = vmatpush3.bf16.msra.mxu1 %v12855_v62  ;;  %v10971_v62 = vld [vmem:[%s16069_s6] ss:$0 sm:$0xff] }
 0x4bc   : > { %12275 = vmatprep.subr.bf16.mxu1 %v13315_v40 }
 0x4bd   : > { %12059 = vmatpush3.bf16.msra.mxu0 %v12882_v24 }
 0x4be   : > { %12060 = vmatprep.subr.bf16.mxu0 %v12885_v41 }
 0x4bf   : > { %12276 = vmatpush3.bf16.msra.mxu1 %v12856_v47 }
 0x4c0   : > { %12070 = vmatprep.subr.bf16.mxu1 %v12863_v9 }
 0x4c1   : > { %12061 = vmatpush3.bf16.msra.mxu0 %v12886_v7 }
 0x4c2   : > { %12278 = vmatmul.mubr.bf16.vlgmr.msra.gmra.mxu1 %v7749_v51  ;;  %12062 = vmatprep.subr.bf16.mxu0 %v12889_v17 }
 0x4c3   : > { %12071 = vmatpush3.bf16.msra.mxu1 %v12864_v59 }
 0x4c4   : > { %12072 = vmatprep.subr.bf16.mxu1 %v12867_v53 }
 0x4c5   : > { %12063 = vmatpush3.bf16.msra.mxu0 %v12890_v15 }
 0x4c6   : > { %12092 = vmatprep.subr.bf16.mxu0 %v12897_v48 }
 0x4c7   : > { %12073 = vmatpush3.bf16.msra.mxu1 %v12868_v12 }
 0x4c8   : > { %12074 = vmatprep.subr.bf16.mxu1 %v12871_v54 }
 0x4cb   : > { %12075 = vmatpush3.bf16.msra.mxu1 %v12872_v46 }
 0x4cc   : > { %12076 = vmatprep.subr.bf16.mxu1 %v12875_v27 }
 0x4cf   : > { %12077 = vmatpush3.bf16.msra.mxu1 %v12876_v60 }
 0x4d0   : > { %12078 = vmatprep.subr.bf16.mxu1 %v12879_v16 }
 0x4d3   : > { %12079 = vmatpush3.bf16.msra.mxu1 %v12880_v38 }
 0x4d4   : > { %12080 = vmatprep.subr.bf16.mxu1 %v12883_v36 }
 0x4d7   : > { %12081 = vmatpush3.bf16.msra.mxu1 %v12884_v49 }
 0x4d8   : > { %12082 = vmatprep.subr.bf16.mxu1 %v12887_v26 }
 0x4db   : > { %12083 = vmatpush3.bf16.msra.mxu1 %v12888_v58 }
 0x4dc   : > { %12084 = vmatprep.subr.bf16.mxu1 %v12891_v8 }
 0x4df   : > { %12085 = vmatpush3.bf16.msra.mxu1 %v12892_v0 }
 0x4e0   : > { %12114 = vmatprep.subr.bf16.mxu1 %v12899_v22 }
 0x541   : > { %v11967_v42 = vpop.f32.mrf.mxu1 }
 0x543   : > { %v11968_v30 = vpop.f32.mrf.mxu1 }
 0x544   : > { %v11969_v28 = vadd.f32 %v11968_v30, %v11967_v42  ;;  %v12893_v42 = vld [vmem:[#allocation5] ss:$0 sps:$4 sm:$0x33]  }
 0x545   : > { %v11970_v19 = vpop.f32.mrf.mxu1 }
 0x546   : > { %v8226_v33 = vadd.f32 %v11969_v28, %v10971_v62 }
 0x547   : > { %v11971_v56 = vpop.f32.mrf.mxu1 }
 0x548   : > { %v11989_v57 = vpop.f32.mrf.mxu0  ;;  %v11972_v13 = vadd.f32 %v11971_v56, %v11970_v19  ;;  %v8496_v56 = vld [vmem:[#allocation5 + $0x4] sm:$0x3] }
 0x54a   : > { %v11990_v39 = vpop.f32.mrf.mxu0  ;;  %v8229_v14 = vadd.f32 %v11972_v13, %v10971_v62  ;;  %v8528_v13 = vshrl.u32 %v12893_v42, 16 }
 0x54b   : > { %v11991_v47 = vadd.f32 %v11990_v39, %v11989_v57 }
 0x54c   : > { %v11992_v3 = vpop.f32.mrf.mxu0 }
 0x54d   : > { %v8267_v10 = vadd.f32 %v11991_v47, %v8226_v33  ;;  %v12907_v33 = vld [vmem:[#allocation5 + $0xc] ss:$0 sps:$4 sm:$0x33]  }
 0x54e   : > { %v11993_v37 = vpop.f32.mrf.mxu0 }
 0x54f   : > { %v11994_v4 = vadd.f32 %v11993_v37, %v11992_v3 }
 0x551   : > { %v8270_v11 = vadd.f32 %v11994_v4, %v8229_v14  ;;  %v8593_v4 = vshll.u32 %v12907_v33, 16 }
 0x562   : > { %v12011_v5 = vpop.f32.mrf.mxu1 }
 0x564   : > { %v12012_v50 = vpop.f32.mrf.mxu1 }
 0x565   : > { %v12013_v52 = vadd.f32 %v12012_v50, %v12011_v5 }
 0x566   : > { %v12014_v34 = vpop.f32.mrf.mxu1 }
 0x567   : > { %v8308_v2 = vadd.f32 %v12013_v52, %v8267_v10 }
 0x568   : > { %v12033_v44 = vpop.f32.mrf.mxu0  ;;  %v12015_v63 = vpop.f32.mrf.mxu1 }
 0x569   : > { %v12016_v6 = vadd.f32 %v12015_v63, %v12014_v34  ;;  %v8499_v34 = vld [vmem:[#allocation5 + $0x8] sm:$0x3]  ;;  %v13317_v63 = vmov 1966171168  }
 0x56a   : > { %v12034_v43 = vpop.f32.mrf.mxu0  ;;  %v8616_v10 = vunpack.c.l.s4 %v13317_v63 }
 0x56b   : > { %v12035_v61 = vadd.f32 %v12034_v43, %v12033_v44  ;;  %v8311_v31 = vadd.f32 %v12016_v6, %v8270_v11  ;;  %v8530_v44 = vshll.u32 %v12893_v42, 16  ;;  %v8591_v11 = vshrl.u32 %v12907_v33, 16 }
 0x56c   : > { %v12036_v51 = vpop.f32.mrf.mxu0  ;;  %v8617_v6 = vunpack.c.0.s8 %v8616_v10 }
 0x56d   : > { %v8349_v59 = vadd.f32 %v12035_v61, %v8308_v2  ;;  %v8532_v52 = vrot.slane %v8530_v44, 1 }
 0x56e   : > { %v12037_v35 = vpop.f32.mrf.mxu0 }
 0x56f   : > { %v12038_v9 = vadd.f32 %v12037_v35, %v12036_v51  ;;  %v12895_v51 = vld [vmem:[#allocation5] ss:$0 sps:$4 sm:$0x22]   ;;  %v8533_v2 = vor.u32 %v8532_v52, %v8528_v13 }
 0x570   : > { %v8547_v61 = vrot.slane %v12895_v51, 1  ;;  %v8502_v35 = vld [vmem:[#allocation5] sm:$0x1] }
 0x571   : > { %v8352_v25 = vadd.f32 %v12038_v9, %v8311_v31 }
 0x582   : > { %v8389_v29 = vpop.f32.mrf.mxu1 }
 0x583   : > { %v8390_v53 = vadd.f32 %v8389_v29, %v8349_v59  ;;  %v8595_v59 = vrot.slane %v8593_v4, 1 }
 0x584   : > { %v12279_v55 = vpop.f32.mrf.mxu1 }
 0x585   : > { %v8396_v12 = vmax.f32 %v8390_v53, 0.0  ;;  %v8611_v53 = vcombine.low %v8502_v35, %v8533_v2 }
 0x586   : > { %v8392_v54 = vpop.f32.mrf.mxu1 }
 0x587   : > { %v8400_v45 = vcombine.high %v8396_v12, %v8396_v12  ;;  %v8393_v46 = vadd.f32 %v8392_v54, %v8352_v25 }
 0x588   : > { %v12280_v21 = vpop.f32.mrf.mxu1 }
 0x589   : > { %v8404_v27 = vmax.f32 %v8396_v12, %v8400_v45  ;;  %v8397_v20 = vmax.f32 %v8393_v46, 0.0  ;;  %v16438_v12 = vld [vmem:[#allocation43_spill] sm:$0xff] }
 0x58a   : > { %v15976_v25 = vsub.s32 %v8617_v6, %v16438_v12 }
 0x58b   : > { %v8414_v60 = vrot.slane %v8404_v27, %v15222_v23  ;;  %v8401_v18 = vcombine.high %v8397_v20, %v8397_v20 }
 0x58d   : > { %v8415_v16 = vcombine.high %v8414_v60, %v8414_v60  ;;  %v11052_v32 = vrot.slane %v8414_v60, 9  ;;  %v8405_v38 = vmax.f32 %v8397_v20, %v8401_v18  ;;  %v8516_v20 = vld [vmem:[#allocation5 + $0xc] sm:$0x1]  ;;  %v8621_v18 = vrot.slane %v8611_v53, %v15976_v25 }
 0x58e   : > { %v12900_v53 = vld [vmem:[#allocation14 + $0x1b8] sm:$0xff]  }
 0x58f   : > { %v11053_v1 = vrot.slane %v8415_v16, 9  ;;  %v8440_v36 = vmax.f32 %v8414_v60, %v11052_v32  ;;  %v8422_v24 = vrot.slane %v8405_v38, %v15222_v23  ;;  %v8596_v60 = vor.u32 %v8595_v59, %v8591_v11  ;;  %v12901_v59 = vld [vmem:[#allocation14 + $0x170] sm:$0xff]  }
 0x591   : > { %v8441_v49 = vmax.f32 %v8415_v16, %v11053_v1  ;;  %v11303_v41 = vpack.c.bf16 %v8440_v36, %v8440_v36  ;;  %v8423_v26 = vcombine.high %v8422_v24, %v8422_v24  ;;  %v11054_v7 = vrot.slane %v8422_v24, 9 }
 0x593   : > { %v11304_v58 = vpack.c.bf16 %v8441_v49, %v8441_v49  ;;  %v8479_v17 = vunpack.c.l.b16 %v11303_v41  ;;  %v11055_v8 = vrot.slane %v8423_v26, 9  ;;  %v8442_v15 = vmax.f32 %v8422_v24, %v11054_v7 }
 0x595   : > { %v8480_v0 = vunpack.c.l.b16 %v11304_v58  ;;  %v8443_v48 = vmax.f32 %v8423_v26, %v11055_v8  ;;  %v11305_v22 = vpack.c.bf16 %v8442_v15, %v8442_v15  ;;  %v8483_v57 = vrot.slane %v8479_v17, 7 }
 0x596   : > { %v8677_v8 = vcombine.low %v8516_v20, %v8596_v60  ;;  %v12910_v60 = vld [vmem:[#allocation14 + $0x1b0] sm:$0xff]  }
 0x597   : > { %v8484_v30 = vrot.slane %v8480_v0, 6  ;;  %v11306_v39 = vpack.c.bf16 %v8443_v48, %v8443_v48  ;;  %v8481_v19 = vunpack.c.l.b16 %v11305_v22 }
 0x599   : > { %v8485_v23 = vsel %vm5130_vm11, %v8484_v30, %v8483_v57  ;;  %v8482_v5 = vunpack.c.l.b16 %v11306_v39  ;;  %v8486_v50 = vrot.slane %v8481_v19, 7 }
 0x59a   : > { %v8489_v37 = vpack.c.b16 %v8485_v23, %v8485_v23 }
 0x59b   : > { %v8487_v28 = vrot.slane %v8482_v5, 6 }
 0x59c   : > { %v8497_v62 = vsel %vm15966_vm13, %v8489_v37, %v8496_v56 }
 0x59d   : > { %8498 = vst [vmem:[#allocation5 + $0x4] sm:$0x3] %v8497_v62  ;;  %v8488_v43 = vsel %vm5130_vm11, %v8487_v28, %v8486_v50  ;;  %v8705_v28 = vrot.slane %v8677_v8, %v15976_v25  ;;  %v12922_v8 = vld [vmem:[#allocation14 + $0x198] sm:$0xff]  }
 0x59e   : > { %v8490_v47 = vpack.c.b16 %v8488_v43, %v8488_v43 }
 0x5a0   : > { %v8500_v14 = vsel %vm15966_vm13, %v8490_v47, %v8499_v34 }
 0x5a1   : > { %8501 = vst [vmem:[#allocation5 + $0x8] sm:$0x3] %v8500_v14 }
 0x5a4   : > { %v8508_v31 = vld [vmem:[#allocation5 + $0x4] sm:$0x1] }
 0x5a5   : > { %v12894_v9 = vld [vmem:[#allocation5 + $0x4] ss:$0 sps:$4 sm:$0x33]   ;;  %v8612_v55 = vcombine.low %v8547_v61, %v8508_v31  ;;  %v12898_v31 = vld [vmem:[#allocation14 + $0x138] sm:$0xff]  }
 0x5a6   : > { %v12896_v29 = vld [vmem:[#allocation5 + $0x4] ss:$0 sps:$4 sm:$0x22]   ;;  %v8537_v54 = vshll.u32 %v12894_v9, 16  ;;  %v8535_v21 = vshrl.u32 %v12894_v9, 16 }
 0x5a7   : > { %v8548_v46 = vrot.slane %v12896_v29, 1  ;;  %v8628_v16 = vrot.slane %v8612_v55, %v15976_v25  ;;  %v12902_v38 = vld [vmem:[#allocation5 + $0x4] ss:$0 sps:$4 sm:$0x33]  }
 0x5a8   : > { %v8509_v45 = vld [vmem:[#allocation5 + $0x8] sm:$0x1]  ;;  %v8539_v27 = vrot.slane %v8537_v54, 1  ;;  %v12904_v24 = vld [vmem:[#allocation5 + $0x4] ss:$0 sps:$4 sm:$0x22]  }
 0x5a9   : > { %v8675_v32 = vcombine.low %v8548_v46, %v8509_v45  ;;  %v12903_v36 = vld [vmem:[#allocation5 + $0x8] ss:$0 sps:$4 sm:$0x33]   ;;  %v8503_v49 = vld [vmem:[#allocation5 + $0x4] sm:$0x1]  ;;  %v8558_v41 = vshll.u32 %v12902_v38, 16  ;;  %v8643_v15 = vcombine.low %v8621_v18, %v8628_v16 }
 0x5aa   : > { %v8540_v1 = vor.u32 %v8539_v27, %v8535_v21  ;;  %v12905_v26 = vld [vmem:[#allocation5 + $0x8] ss:$0 sps:$4 sm:$0x22]   ;;  %v8565_v58 = vshll.u32 %v12903_v36, 16  ;;  %v8556_v48 = vshrl.u32 %v12902_v38, 16  ;;  %v8563_v57 = vshrl.u32 %v12903_v36, 16 }
 0x5ab   : > { %v12906_v17 = vld [vmem:[#allocation5 + $0x8] ss:$0 sps:$4 sm:$0x33]   ;;  %v8691_v0 = vrot.slane %v8675_v32, %v15976_v25  ;;  %v8560_v22 = vrot.slane %v8558_v41, 1  ;;  %v8575_v23 = vrot.slane %v12904_v24, 1  ;;  %v8576_v3 = vrot.slane %v12905_v26, 1 }
 0x5ac   : > { %v8674_v7 = vcombine.low %v8503_v49, %v8540_v1  ;;  %v8567_v30 = vrot.slane %v8565_v58, 1  ;;  %v8586_v39 = vshll.u32 %v12906_v17, 16  ;;  %v8584_v37 = vshrl.u32 %v12906_v17, 16  ;;  %v8515_v47 = vld [vmem:[#allocation5 + $0x8] sm:$0x1]  ;;  %v12909_v45 = vld [vmem:[#allocation14 + $0x1f0] sm:$0xff]  }
 0x5ad   : > { %v8561_v19 = vor.u32 %v8560_v22, %v8556_v48  ;;  %v8651_v50 = vrot.slane %v8643_v15, %v15976_v25  ;;  %v12908_v21 = vld [vmem:[#allocation14 + $0x130] sm:$0xff]   ;;  %v12911_v27 = vld [vmem:[#allocation14 + $0x168] sm:$0xff]   ;;  %v12915_v38 = vld [vmem:[#allocation14 + $0x160] sm:$0xff]  }
 0x5ae   : > { %v8684_v42 = vrot.slane %v8674_v7, %v15976_v25  ;;  %v8568_v5 = vor.u32 %v8567_v30, %v8563_v57  ;;  %v8588_v44 = vrot.slane %v8586_v39, 1  ;;  %v12913_v18 = vld [vmem:[#allocation14 + $0x1e8] sm:$0xff]   ;;  %v12917_v24 = vld [vmem:[#allocation14 + $0x1e0] sm:$0xff]   ;;  %v12919_v41 = vld [vmem:[#allocation14 + $0x158] sm:$0xff]  }
 0x5af   : > { %v8613_v34 = vcombine.low %v8561_v19, %v8575_v23  ;;  %v12912_v32 = vld [vmem:[#allocation14 + $0x128] sm:$0xff]   ;;  %v12916_v49 = vld [vmem:[#allocation14 + $0x120] sm:$0xff]   ;;  %v12921_v7 = vld [vmem:[#allocation14 + $0x1d8] sm:$0xff]  }
 0x5b0   : > { %v8706_v56 = vcombine.low %v8684_v42, %v8691_v0  ;;  %v8589_v43 = vor.u32 %v8588_v44, %v8584_v37  ;;  %v8676_v33 = vcombine.low %v8568_v5, %v8576_v3  ;;  %v12914_v36 = vld [vmem:[#allocation14 + $0x1a8] sm:$0xff]   ;;  %v12918_v26 = vld [vmem:[#allocation14 + $0x1a0] sm:$0xff]   ;;  %v12920_v58 = vld [vmem:[#allocation14 + $0x118] sm:$0xff]  }
 0x5b1   : > { %v8635_v10 = vrot.slane %v8613_v34, %v15976_v25  ;;  %v12923_v17 = vld [vmem:[#allocation14 + $0x150] sm:$0xff]   ;;  %v12927_v48 = vld [vmem:[#allocation14 + $0x148] sm:$0xff]   ;;  %v12931_v30 = vld [vmem:[#allocation14 + $0x140] sm:$0xff]  }
 0x5b2   : > { %v8714_v62 = vrot.slane %v8706_v56, %v15976_v25  ;;  %v8614_v52 = vcombine.low %v8515_v47, %v8589_v43  ;;  %v8698_v51 = vrot.slane %v8676_v33, %v15976_v25  ;;  %v12925_v15 = vld [vmem:[#allocation14 + $0x1d0] sm:$0xff]   ;;  %v12929_v42 = vld [vmem:[#allocation14 + $0x1c8] sm:$0xff]   ;;  %v12933_v19 = vld [vmem:[#allocation14 + $0x1c0] sm:$0xff]  }
 0x5b3   : > { %v12924_v0 = vld [vmem:[#allocation14 + $0x110] sm:$0xff]   ;;  %v12928_v57 = vld [vmem:[#allocation14 + $0x108] sm:$0xff]   ;;  %v12932_v23 = vld [vmem:[#allocation14 + $0x100] sm:$0xff]  }
 0x5b4   : > { %v11073_v13 = vcombine.low %v8651_v50, %v8714_v62  ;;  %v8642_v14 = vrot.slane %v8614_v52, %v15976_v25  ;;  %v8707_v4 = vcombine.low %v8698_v51, %v8705_v28  ;;  %v12926_v22 = vld [vmem:[#allocation14 + $0x190] sm:$0xff]   ;;  %v12930_v39 = vld [vmem:[#allocation14 + $0x188] sm:$0xff]   ;;  %v12934_v3 = vld [vmem:[#allocation14 + $0x180] sm:$0xff]   ;;  %v16439_v50 = vmov 0  }
 0x5b5   : > { %v12935_v5 = vld [vmem:[#allocation14 + $0x238] sm:$0xff]   ;;  %v12936_v44 = vld [vmem:[#allocation14 + $0x230] sm:$0xff]   ;;  %v12937_v28 = vld [vmem:[#allocation14 + $0x228] sm:$0xff]  }
 0x5b6   : > { %v8896_v63 = vrot.slane %v11073_v13, %v15976_v25  ;;  %v8644_v61 = vcombine.low %v8635_v10, %v8642_v14  ;;  %v8721_v6 = vrot.slane %v8707_v4, %v15976_v25  ;;  %v12943_v62 = vld [vmem:[#allocation5 + $0x8] ss:$0 sps:$4 sm:$0x22]   ;;  %v12944_v43 = vld [vmem:[#allocation5 + $0xc] ss:$0 sps:$4 sm:$0x22]  }
 0x5b7   : > { %v12938_v34 = vld [vmem:[#allocation14 + $0x220] sm:$0xff]   ;;  %v8603_v33 = vrot.slane %v12943_v62, 1  ;;  %v8604_v47 = vrot.slane %v12944_v43, 1  ;;  %v12939_v13 = vld [vmem:[#allocation14 + $0x218] sm:$0xff]   ;;  %v12941_v4 = vld [vmem:[#allocation14 + $0x208] sm:$0xff]  }
 0x5b8   : > { %v8904_v2 = vcombine.high %v8896_v63, %v8896_v63  ;;  %v8912_v35 = vrot.slane %v8896_v63, %v15976_v25  ;;  %v8658_v9 = vrot.slane %v8644_v61, %v15976_v25  ;;  %v12940_v63 = vld [vmem:[#allocation14 + $0x210] sm:$0xff]   ;;  %v12942_v61 = vld [vmem:[#allocation14 + $0x200] sm:$0xff]  }
 0x5b9   : > { %v8666_v52 = vrot.slane %v8603_v33, %v15976_v25  ;;  %v8729_v51 = vrot.slane %v8604_v47, %v15976_v25  ;;  %v11072_v47 = vld [vmem:[%s16071_s8] ss:$0 sm:$0xff] }
 0x5ba   : > { %v8926_v11 = vrot.slane %v8904_v2, %v15976_v25  ;;  %v11074_v55 = vcombine.low %v8658_v9, %v8721_v6  ;;  %v8934_v54 = vcombine.high %v8912_v35, %v8912_v35  ;;  %v12948_v9 = vld [vmem:[#allocation15 + $0xe8] ss:$16 sps:$4 sm:$0xff]  }
 0x5bb   : > { %v8673_v10 = vrot.slane %v8666_v52, %v15976_v25  ;;  %v8736_v14 = vrot.slane %v8729_v51, %v15976_v25 }
 0x5bc   : > { %9426 = vmatprep.mubr.bf16.mxu0 %v8926_v11  ;;  %v8936_v29 = vcombine.high %v8926_v11, %v8926_v11  ;;  %v8903_v46 = vrot.slane %v11074_v55, %v15976_v25  ;;  %v12945_v11 = vld [vmem:[#allocation15 + $0xe0] ss:$16 sps:$4 sm:$0xff]  }
 0x5bd   : > { %9427 = vmatmul.mubr.bf16.vlgmr.msra.gmra.mxu0 %v8912_v35  ;;  %v8938_v2 = vcombine.low %v8673_v10, %v8736_v14  ;;  %v12951_v55 = vld [vmem:[#allocation15 + $0xc0] ss:$16 sps:$4 sm:$0xff]  }
 0x5be   : > { %12093 = vmatpush3.bf16.msra.mxu0 %v12898_v31  ;;  %9466 = vmatprep.mubr.bf16.mxu1 %v8936_v29  ;;  %v8905_v20 = vcombine.high %v8903_v46, %v8903_v46  ;;  %v8919_v56 = vrot.slane %v8903_v46, %v15976_v25  ;;  %v12947_v31 = vld [vmem:[#allocation15 + $0xe4] ss:$16 sps:$4 sm:$0xff]   ;;  %v12960_v46 = vld [vmem:[#allocation15 + $0xa8] ss:$16 sps:$4 sm:$0xff]  }
 0x5bf   : > { %9467 = vmatmul.mubr.bf16.vlgmr.msra.gmra.mxu1 %v8934_v54  ;;  %12094 = vmatprep.subr.bf16.mxu0 %v12901_v59  ;;  %v8945_v6 = vrot.slane %v8938_v2, %v15976_v25  ;;  %v12950_v59 = vld [vmem:[#allocation15 + $0xec] ss:$16 sps:$4 sm:$0xff]   ;;  %v12953_v29 = vld [vmem:[#allocation15 + $0xc4] ss:$16 sps:$4 sm:$0xff]  }
 0x5c0   : > { %12115 = vmatpush3.bf16.msra.mxu1 %v12900_v53  ;;  %v8933_v16 = vrot.slane %v8905_v20, %v15976_v25  ;;  %v8935_v37 = vcombine.high %v8919_v56, %v8919_v56  ;;  %v12956_v53 = vld [vmem:[#allocation15 + $0xcc] ss:$16 sps:$4 sm:$0xff]   ;;  %v12959_v54 = vld [vmem:[#allocation15 + $0xa4] ss:$16 sps:$4 sm:$0xff]   ;;  %v12963_v20 = vld [vmem:[#allocation15 + $0x80] ss:$16 sps:$4 sm:$0xff]  }
 0x5c1   : > { %12116 = vmatprep.subr.bf16.mxu1 %v12909_v45  ;;  %v8952_v35 = vrot.slane %v8945_v6, %v15976_v25  ;;  %v12962_v45 = vld [vmem:[#allocation15 + $0xac] ss:$16 sps:$4 sm:$0xff]   ;;  %v12957_v25 = vld [vmem:[#allocation15 + $0xa0] ss:$16 sps:$4 sm:$0xff]  }
 0x5c2   : > { %12095 = vmatpush3.bf16.msra.mxu0 %v12908_v21  ;;  %9506 = vmatprep.mubr.bf16.mxu0 %v8933_v16  ;;  %v8937_v1 = vcombine.high %v8933_v16, %v8933_v16  ;;  %v12965_v21 = vld [vmem:[#allocation15 + $0x84] ss:$16 sps:$4 sm:$0xff]  }
 0x5c3   : > { %12096 = vmatprep.subr.bf16.mxu0 %v12911_v27  ;;  %v12968_v27 = vld [vmem:[#allocation15 + $0x8c] ss:$16 sps:$4 sm:$0xff]   ;;  %v12971_v16 = vld [vmem:[#allocation15 + $0x64] ss:$16 sps:$4 sm:$0xff]  }
 0x5c4   : > { %12117 = vmatpush3.bf16.msra.mxu1 %v12910_v60  ;;  %9546 = vmatprep.mubr.bf16.mxu1 %v8937_v1  ;;  %v12966_v60 = vld [vmem:[#allocation15 + $0x88] ss:$16 sps:$4 sm:$0xff]   ;;  %v12977_v1 = vld [vmem:[#allocation15 + $0x44] ss:$16 sps:$4 sm:$0xff]  }
 0x5c5   : > { %12118 = vmatprep.subr.bf16.mxu1 %v12913_v18  ;;  %v12969_v18 = vld [vmem:[#allocation15 + $0x60] ss:$16 sps:$4 sm:$0xff]  }
 0x5c6   : > { %12097 = vmatpush3.bf16.msra.mxu0 %v12912_v32  ;;  %v12972_v32 = vld [vmem:[#allocation15 + $0x68] ss:$16 sps:$4 sm:$0xff]  }
 0x5c7   : > { %12098 = vmatprep.subr.bf16.mxu0 %v12915_v38  ;;  %v12974_v38 = vld [vmem:[#allocation15 + $0x6c] ss:$16 sps:$4 sm:$0xff]  }
 0x5c8   : > { %12119 = vmatpush3.bf16.msra.mxu1 %v12914_v36  ;;  %v12980_v36 = vld [vmem:[#allocation15 + $0x4c] ss:$16 sps:$4 sm:$0xff]  }
 0x5c9   : > { %12120 = vmatprep.subr.bf16.mxu1 %v12917_v24  ;;  %v12975_v24 = vld [vmem:[#allocation15 + $0x40] ss:$16 sps:$4 sm:$0xff]  }
 0x5ca   : > { %12099 = vmatpush3.bf16.msra.mxu0 %v12916_v49  ;;  %v12978_v49 = vld [vmem:[#allocation15 + $0x48] ss:$16 sps:$4 sm:$0xff]  }
 0x5cb   : > { %12100 = vmatprep.subr.bf16.mxu0 %v12919_v41  ;;  %v12983_v41 = vld [vmem:[#allocation15 + $0x24] ss:$16 sps:$4 sm:$0xff]  }
 0x5cc   : > { %12121 = vmatpush3.bf16.msra.mxu1 %v12918_v26  ;;  %v12986_v26 = vld [vmem:[#allocation15 + $0x2c] ss:$16 sps:$4 sm:$0xff]  }
 0x5cd   : > { %12122 = vmatprep.subr.bf16.mxu1 %v12921_v7  ;;  %v12981_v7 = vld [vmem:[#allocation15 + $0x20] ss:$16 sps:$4 sm:$0xff]  }
 0x5ce   : > { %12101 = vmatpush3.bf16.msra.mxu0 %v12920_v58  ;;  %v12984_v58 = vld [vmem:[#allocation15 + $0x28] ss:$16 sps:$4 sm:$0xff]  }
 0x5cf   : > { %12102 = vmatprep.subr.bf16.mxu0 %v12923_v17  ;;  %v12989_v17 = vld [vmem:[#allocation15 + $0x4] ss:$16 sps:$4 sm:$0xff]  }
 0x5d0   : > { %12123 = vmatpush3.bf16.msra.mxu1 %v12922_v8  ;;  %v12992_v8 = vld [vmem:[#allocation15 + $0xc] ss:$16 sps:$4 sm:$0xff]  }
 0x5d1   : > { %12124 = vmatprep.subr.bf16.mxu1 %v12925_v15  ;;  %v12987_v15 = vld [vmem:[#allocation15] ss:$16 sps:$4 sm:$0xff]  }
 0x5d2   : > { %12103 = vmatpush3.bf16.msra.mxu0 %v12924_v0  ;;  %v12990_v0 = vld [vmem:[#allocation15 + $0x8] ss:$16 sps:$4 sm:$0xff]  }
 0x5d3   : > { %12104 = vmatprep.subr.bf16.mxu0 %v12927_v48  ;;  %v12993_v48 = vld [vmem:[#allocation17 + $0x78] sm:$0xff]  }
 0x5d4   : > { %12125 = vmatpush3.bf16.msra.mxu1 %v12926_v22  ;;  %v12994_v22 = vld [vmem:[#allocation17 + $0xf8] sm:$0xff]  }
 0x5d5   : > { %12126 = vmatprep.subr.bf16.mxu1 %v12929_v42 }
 0x5d6   : > { %12105 = vmatpush3.bf16.msra.mxu0 %v12928_v57 }
 0x5d7   : > { %12106 = vmatprep.subr.bf16.mxu0 %v12931_v30 }
 0x5d8   : > { %12127 = vmatpush3.bf16.msra.mxu1 %v12930_v39 }
 0x5d9   : > { %12128 = vmatprep.subr.bf16.mxu1 %v12933_v19 }
 0x5da   : > { %12107 = vmatpush3.bf16.msra.mxu0 %v12932_v23 }
 0x5db   : > { %12281 = vmatprep.subr.bf16.mxu0 %v13315_v40 }
 0x5dc   : > { %12129 = vmatpush3.bf16.msra.mxu1 %v12934_v3 }
 0x5dd   : > { %9507 = vmatmul.mubr.bf16.vlgmr.msra.gmra.mxu0 %v8919_v56  ;;  %9821 = vmatprep.subr.bf16.mxu1 %v12947_v31 }
 0x5de   : > { %12282 = vmatpush3.bf16.msra.mxu0 %v12935_v5  ;;  %12297 = vmatprep.mubr.msk.bf16.mxu0 %vm13316_vm7, %v13315_v40 }
 0x5df   : > { %9547 = vmatmul.mubr.bf16.vlgmr.msra.gmra.mxu1 %v8935_v37  ;;  %12283 = vmatprep.subr.bf16.mxu0 %v13315_v40 }
 0x5e0   : > { %9853 = vmatprep.mubr.bf16.mxu1 %v16439_v50  ;;  %9822 = vmatpush1.bf16.msra.mxu1 %v12945_v11 }
 0x5e1   : > { %9823 = vmatprep.subr.bf16.mxu1 %v12953_v29 }
 0x5e2   : > { %12284 = vmatpush3.bf16.msra.mxu0 %v12936_v44 }
 0x5e3   : > { %12285 = vmatprep.subr.bf16.mxu0 %v13315_v40 }
 0x5e4   : > { %9824 = vmatpush1.bf16.msra.mxu1 %v12951_v55 }
 0x5e5   : > { %9825 = vmatprep.subr.bf16.mxu1 %v12959_v54 }
 0x5e6   : > { %12286 = vmatpush3.bf16.msra.mxu0 %v12937_v28 }
 0x5e7   : > { %12287 = vmatprep.subr.bf16.mxu0 %v13315_v40 }
 0x5e8   : > { %9826 = vmatpush1.bf16.msra.mxu1 %v12957_v25  ;;  %v12996_v25 = vld [vmem:[#allocation17 + $0xb8] sm:$0xff]  }
 0x5e9   : > { %9827 = vmatprep.subr.bf16.mxu1 %v12965_v21  ;;  %v12997_v21 = vld [vmem:[#allocation17 + $0x70] sm:$0xff]  }
 0x5ea   : > { %12288 = vmatpush3.bf16.msra.mxu0 %v12938_v34 }
 0x5eb   : > { %12289 = vmatprep.subr.bf16.mxu0 %v13315_v40 }
 0x5ec   : > { %9828 = vmatpush1.bf16.msra.mxu1 %v12963_v20  ;;  %v12999_v20 = vld [vmem:[#allocation17 + $0x30] sm:$0xff]  }
 0x5ed   : > { %9829 = vmatprep.subr.bf16.mxu1 %v12971_v16  ;;  %v13002_v16 = vld [vmem:[#allocation17 + $0xe8] sm:$0xff]  }
 0x5ee   : > { %12290 = vmatpush3.bf16.msra.mxu0 %v12939_v13 }
 0x5ef   : > { %12291 = vmatprep.subr.bf16.mxu0 %v13315_v40 }
 0x5f0   : > { %9830 = vmatpush1.bf16.msra.mxu1 %v12969_v18  ;;  %v13001_v18 = vld [vmem:[#allocation17 + $0x68] sm:$0xff]  }
 0x5f1   : > { %9831 = vmatprep.subr.bf16.mxu1 %v12977_v1  ;;  %v13005_v1 = vld [vmem:[#allocation17 + $0x60] sm:$0xff]  }
 0x5f2   : > { %12292 = vmatpush3.bf16.msra.mxu0 %v12940_v63 }
 0x5f3   : > { %12293 = vmatprep.subr.bf16.mxu0 %v13315_v40 }
 0x5f4   : > { %9832 = vmatpush1.bf16.msra.mxu1 %v12975_v24  ;;  %v13007_v24 = vld [vmem:[#allocation17 + $0x20] sm:$0xff]  }
 0x5f5   : > { %9833 = vmatprep.subr.bf16.mxu1 %v12983_v41  ;;  %v13009_v41 = vld [vmem:[#allocation17 + $0x58] sm:$0xff]  }
 0x5f6   : > { %12294 = vmatpush3.bf16.msra.mxu0 %v12941_v4 }
 0x5f7   : > { %12295 = vmatprep.subr.bf16.mxu0 %v13315_v40  ;;  %v12954_v40 = vld [vmem:[#allocation15 + $0xc8] ss:$16 sps:$4 sm:$0xff]  }
 0x5f8   : > { %9834 = vmatpush1.bf16.msra.mxu1 %v12981_v7  ;;  %v13011_v7 = vld [vmem:[#allocation17 + $0x18] sm:$0xff]  }
 0x5f9   : > { %9835 = vmatprep.subr.bf16.mxu1 %v12989_v17  ;;  %v13013_v17 = vld [vmem:[#allocation17 + $0x50] sm:$0xff]  }
 0x5fa   : > { %12296 = vmatpush3.bf16.msra.mxu0 %v12942_v61 }
 0x5fb   : > { %9862 = vmatprep.subr.bf16.mxu0 %v12950_v59 }
 0x5fc   : > { %9836 = vmatpush1.bf16.msra.mxu1 %v12987_v15  ;;  %v13015_v15 = vld [vmem:[#allocation17 + $0x10] sm:$0xff]  }
 0x5fd   : > { %12298 = vmatmul.mubr.bf16.vlgmr.msra.gmra.mxu0 %v8952_v35  ;;  %12145 = vmatprep.subr.bf16.mxu1 %v12993_v48  ;;  %v13017_v48 = vld [vmem:[#allocation17 + $0x48] sm:$0xff]  }
 0x5fe   : > { %9894 = vmatprep.mubr.bf16.mxu0 %v16439_v50  ;;  %9863 = vmatpush1.bf16.msra.mxu0 %v12948_v9 }
 0x5ff   : > { %9864 = vmatprep.subr.bf16.mxu0 %v12956_v53 }
 0x602   : > { %9865 = vmatpush1.bf16.msra.mxu0 %v12954_v40 }
 0x603   : > { %9866 = vmatprep.subr.bf16.mxu0 %v12962_v45  ;;  %v12995_v45 = vld [vmem:[#allocation17 + $0x38] sm:$0xff]  }
 0x606   : > { %9867 = vmatpush1.bf16.msra.mxu0 %v12960_v46 }
 0x607   : > { %9868 = vmatprep.subr.bf16.mxu0 %v12968_v27  ;;  %v12998_v27 = vld [vmem:[#allocation17 + $0xf0] sm:$0xff]  }
 0x60a   : > { %9869 = vmatpush1.bf16.msra.mxu0 %v12966_v60  ;;  %v13000_v60 = vld [vmem:[#allocation17 + $0xb0] sm:$0xff]  }
 0x60b   : > { %9870 = vmatprep.subr.bf16.mxu0 %v12974_v38  ;;  %v13004_v38 = vld [vmem:[#allocation17 + $0xa8] sm:$0xff]  }
 0x60e   : > { %9871 = vmatpush1.bf16.msra.mxu0 %v12972_v32  ;;  %v13003_v32 = vld [vmem:[#allocation17 + $0x28] sm:$0xff]  }
 0x60f   : > { %9872 = vmatprep.subr.bf16.mxu0 %v12980_v36  ;;  %v13006_v36 = vld [vmem:[#allocation17 + $0xe0] sm:$0xff]  }
 0x612   : > { %9873 = vmatpush1.bf16.msra.mxu0 %v12978_v49  ;;  %v13008_v49 = vld [vmem:[#allocation17 + $0xa0] sm:$0xff]  }
 0x613   : > { %9874 = vmatprep.subr.bf16.mxu0 %v12986_v26  ;;  %v13010_v26 = vld [vmem:[#allocation17 + $0xd8] sm:$0xff]  }
 0x616   : > { %9875 = vmatpush1.bf16.msra.mxu0 %v12984_v58  ;;  %v13012_v58 = vld [vmem:[#allocation17 + $0x98] sm:$0xff]  }
 0x617   : > { %9876 = vmatprep.subr.bf16.mxu0 %v12992_v8  ;;  %v13014_v8 = vld [vmem:[#allocation17 + $0xd0] sm:$0xff]  }
 0x61a   : > { %9877 = vmatpush1.bf16.msra.mxu0 %v12990_v0  ;;  %v13016_v0 = vld [vmem:[#allocation17 + $0x90] sm:$0xff]  }
 0x61b   : > { %12167 = vmatprep.subr.bf16.mxu0 %v12994_v22  ;;  %v13018_v22 = vld [vmem:[#allocation17 + $0xc8] sm:$0xff]  }
 0x67d   : > { %v12064_v42 = vpop.f32.mrf.mxu0 }
 0x67f   : > { %v12065_v57 = vpop.f32.mrf.mxu0  ;;  %v12086_v30 = vpop.f32.mrf.mxu1 }
 0x680   : > { %v12066_v33 = vadd.f32 %v12065_v57, %v12064_v42  ;;  %v13019_v42 = vld [vmem:[#allocation17 + $0x8] sm:$0xff]  }
 0x681   : > { %v12067_v39 = vpop.f32.mrf.mxu0  ;;  %v12087_v19 = vpop.f32.mrf.mxu1  ;;  %v13020_v57 = vld [vmem:[#allocation17 + $0x88] sm:$0xff]  }
 0x682   : > { %v9429_v13 = vadd.f32 %v12066_v33, %v11072_v47  ;;  %v12088_v52 = vadd.f32 %v12087_v19, %v12086_v30  ;;  %v13021_v30 = vld [vmem:[#allocation17 + $0x40] sm:$0xff]  }
 0x683   : > { %v12068_v23 = vpop.f32.mrf.mxu0  ;;  %v12089_v3 = vpop.f32.mrf.mxu1  ;;  %v13022_v39 = vld [vmem:[#allocation17 + $0xc0] sm:$0xff]  }
 0x684   : > { %v9469_v63 = vadd.f32 %v12088_v52, %v9429_v13  ;;  %v13023_v19 = vld [vmem:[#allocation17] sm:$0xff]   ;;  %v9803_v3 = vsub.s32 0, %v16438_v12 }
 0x685   : > { %v12090_v56 = vpop.f32.mrf.mxu1  ;;  %v13024_v23 = vld [vmem:[#allocation17 + $0x80] sm:$0xff]  }
 0x686   : > { %v9811_v56 = vsub.s32 2, %v16438_v12 }
 0x69d   : > { %v12108_v5 = vpop.f32.mrf.mxu0 }
 0x69f   : > { %v12109_v37 = vpop.f32.mrf.mxu0  ;;  %v12130_v44 = vpop.f32.mrf.mxu1 }
 0x6a0   : > { %v12110_v51 = vadd.f32 %v12109_v37, %v12108_v5  ;;  %v9639_v5 = vld [vmem:[%s16073_s10] sm:$0xf]  ;;  %v9807_v37 = vsub.s32 1, %v16438_v12 }
 0x6a1   : > { %v12111_v50 = vpop.f32.mrf.mxu0  ;;  %v12131_v28 = vpop.f32.mrf.mxu1 }
 0x6a2   : > { %v9509_v10 = vadd.f32 %v12110_v51, %v9469_v63  ;;  %v12132_v14 = vadd.f32 %v12131_v28, %v12130_v44  ;;  %v9815_v44 = vsub.s32 3, %v16438_v12  ;;  %v9804_v50 = vrot.slane %v9639_v5, %v9803_v3 }
 0x6a3   : > { %v12112_v62 = vpop.f32.mrf.mxu0  ;;  %v12133_v43 = vpop.f32.mrf.mxu1  ;;  %v9812_v28 = vrot.slane %v9639_v5, %v9811_v56 }
 0x6a4   : > { %v9549_v4 = vadd.f32 %v12132_v14, %v9509_v10  ;;  %v9808_v62 = vrot.slane %v9639_v5, %v9807_v37  ;;  %v9816_v43 = vrot.slane %v9639_v5, %v9815_v44 }
 0x6a5   : > { %v12134_v34 = vpop.f32.mrf.mxu1 }
 0x6bd   : > { %v9588_v2 = vpop.f32.mrf.mxu0 }
 0x6be   : > { %v9589_v61 = vadd.f32 %v9588_v2, %v9549_v4 }
 0x6bf   : > { %v12299_v6 = vpop.f32.mrf.mxu0 }
 0x6c0   : > { %v9594_v35 = vmax.f32 %v9589_v61, 0.0 }
 0x6c1   : > { %v9591_v11 = vpop.f32.mrf.mxu0 }
 0x6c2   : > { %v9596_v31 = vrot.slane %v9594_v35, 1  ;;  %v9599_v29 = vrot.slane %v9594_v35, 2  ;;  %v9602_v55 = vrot.slane %v9594_v35, 3 }
 0x6c3   : > { %v12300_v9 = vpop.f32.mrf.mxu0 }
 0x6c4   : > { %v9598_v59 = vadd.f32 %v9596_v31, %v9594_v35 }
 0x6c6   : > { %v9601_v53 = vadd.f32 %v9599_v29, %v9598_v59 }
 0x6c8   : > { %v9604_v40 = vadd.f32 %v9602_v55, %v9601_v53 }
 0x6ca   : > { %v9605_v54 = vmul.f32 0.25, %v9604_v40  ;;  %v9975_v40 = vld [vmem:[%s16075_s12] sm:$0x1] }
 0x6cc   : > { %v9606_v46 = vpack.c.bf16 %v9605_v54, %v9605_v54 }
 0x6ce   : > { %9854 = vmatmul.mubr.bf16.vlgmr.msra.gmra.mxu1 %v9606_v46  ;;  %9895 = vmatmul.mubr.bf16.vlgmr.msra.gmra.mxu0 %v9606_v46 }
 0x6cf   : > { %12146 = vmatpush3.bf16.msra.mxu1 %v12995_v45  ;;  %12168 = vmatpush3.bf16.msra.mxu0 %v12996_v25 }
 0x6d0   : > { %12147 = vmatprep.subr.bf16.mxu1 %v12997_v21  ;;  %12169 = vmatprep.subr.bf16.mxu0 %v12998_v27 }
 0x6d3   : > { %12148 = vmatpush3.bf16.msra.mxu1 %v12999_v20  ;;  %12170 = vmatpush3.bf16.msra.mxu0 %v13000_v60 }
 0x6d4   : > { %12149 = vmatprep.subr.bf16.mxu1 %v13001_v18  ;;  %12171 = vmatprep.subr.bf16.mxu0 %v13002_v16 }
 0x6d7   : > { %12150 = vmatpush3.bf16.msra.mxu1 %v13003_v32  ;;  %12172 = vmatpush3.bf16.msra.mxu0 %v13004_v38 }
 0x6d8   : > { %12151 = vmatprep.subr.bf16.mxu1 %v13005_v1  ;;  %12173 = vmatprep.subr.bf16.mxu0 %v13006_v36 }
 0x6db   : > { %12152 = vmatpush3.bf16.msra.mxu1 %v13007_v24  ;;  %12174 = vmatpush3.bf16.msra.mxu0 %v13008_v49 }
 0x6dc   : > { %12153 = vmatprep.subr.bf16.mxu1 %v13009_v41  ;;  %12175 = vmatprep.subr.bf16.mxu0 %v13010_v26 }
 0x6df   : > { %12154 = vmatpush3.bf16.msra.mxu1 %v13011_v7  ;;  %12176 = vmatpush3.bf16.msra.mxu0 %v13012_v58 }
 0x6e0   : > { %12155 = vmatprep.subr.bf16.mxu1 %v13013_v17  ;;  %12177 = vmatprep.subr.bf16.mxu0 %v13014_v8 }
 0x6e3   : > { %12156 = vmatpush3.bf16.msra.mxu1 %v13015_v15  ;;  %12178 = vmatpush3.bf16.msra.mxu0 %v13016_v0 }
 0x6e4   : > { %12157 = vmatprep.subr.bf16.mxu1 %v13017_v48  ;;  %12179 = vmatprep.subr.bf16.mxu0 %v13018_v22 }
 0x6e7   : > { %12158 = vmatpush3.bf16.msra.mxu1 %v13019_v42  ;;  %12180 = vmatpush3.bf16.msra.mxu0 %v13020_v57 }
 0x6e8   : > { %12159 = vmatprep.subr.bf16.mxu1 %v13021_v30  ;;  %12181 = vmatprep.subr.bf16.mxu0 %v13022_v39 }
 0x6eb   : > { %12160 = vmatpush3.bf16.msra.mxu1 %v13023_v19  ;;  %12182 = vmatpush3.bf16.msra.mxu0 %v13024_v23 }
 0x78e   : > { %v9855_v34 = vpop.f32.mrf.mxu1  ;;  %v9896_v33 = vpop.f32.mrf.mxu0 }
 0x78f   : > { %v9856_v47 = vadd.f32 %v9855_v34, %v9804_v50  ;;  %v9897_v13 = vadd.f32 %v9896_v33, %v9812_v28 }
 0x790   : > { %v9857_v52 = vpop.f32.mrf.mxu1  ;;  %v9898_v51 = vpop.f32.mrf.mxu0 }
 0x791   : > { %v9858_v63 = vadd.f32 %v9857_v52, %v9808_v62  ;;  %v9899_v10 = vadd.f32 %v9898_v51, %v9816_v43  ;;  %v9903_v14 = vmax.f32 %v9856_v47, 0.0  ;;  %v9905_v4 = vmax.f32 %v9897_v13, 0.0 }
 0x792   : > { %v9859_v2 = vpop.f32.mrf.mxu1  ;;  %v9900_v61 = vpop.f32.mrf.mxu0 }
 0x793   : > { %v9904_v6 = vmax.f32 %v9858_v63, 0.0  ;;  %v9906_v35 = vmax.f32 %v9899_v10, 0.0  ;;  %v9907_v59 = vpack.c.bf16 %v9903_v14, %v9903_v14  ;;  %v9909_v29 = vpack.c.bf16 %v9905_v4, %v9905_v4 }
 0x794   : > { %v9860_v11 = vpop.f32.mrf.mxu1  ;;  %v9901_v12 = vpop.f32.mrf.mxu0 }
 0x795   : > { %v9908_v31 = vpack.c.bf16 %v9904_v6, %v9904_v6  ;;  %v9910_v9 = vpack.c.bf16 %v9906_v35, %v9906_v35 }
 0x797   : > { %10200 = vmatprep.mubr.bf16.mxu1 %v9908_v31  ;;  %10240 = vmatprep.mubr.bf16.mxu0 %v9910_v9 }
 0x798   : > { %10201 = vmatmul.mubr.bf16.vlgmr.msra.gmra.mxu1 %v9907_v59  ;;  %10241 = vmatmul.mubr.bf16.vlgmr.msra.gmra.mxu0 %v9909_v29 }
 0x858   : > { %v12161_v53 = vpop.f32.mrf.mxu1  ;;  %v12183_v55 = vpop.f32.mrf.mxu0 }
 0x85a   : > { %v12162_v54 = vpop.f32.mrf.mxu1  ;;  %v12184_v45 = vpop.f32.mrf.mxu0 }
 0x85b   : > { %v12163_v25 = vadd.f32 %v12162_v54, %v12161_v53  ;;  %v12185_v20 = vadd.f32 %v12184_v45, %v12183_v55 }
 0x85c   : > { %v12164_v46 = vpop.f32.mrf.mxu1  ;;  %v12186_v21 = vpop.f32.mrf.mxu0 }
 0x85d   : > { %v10203_v27 = vadd.f32 %v12163_v25, %v9975_v40 }
 0x85e   : > { %v12165_v60 = vpop.f32.mrf.mxu1  ;;  %v12187_v18 = vpop.f32.mrf.mxu0 }
 0x85f   : > { %v10243_v16 = vadd.f32 %v12185_v20, %v10203_v27 }
 0x861   : > { %10248 = vst [vmem:[%s544_s1] sm:$0x1] %v10243_v16 }
 0x862   : > { %13237 = shalt.err (!%p13234_p3)
}
 0x863   : > { %s13238_s24 = scalar_lea.hbm %s10260_s15, 16  ;;  %s13242_s19 = scalar_lea.hbm %s16076_s13, 32 }
 0x864   : > { %p13239_p4 = scmp.ne.s32.totalorder %s10260_s15, %s13238_s24  ;;  %p13243_p0 = scmp.lt.s32.totalorder %s10260_s15, %s16076_s13 }
 0x865   : > { %p13244_p7 = scmp.lt.s32.totalorder %s13242_s19, %s13238_s24 }
 0x866   : > { %p13240_p6 = pnand %p13239_p4, %p16440_p8 }
 0x867   : > { %p13245_p2 = por %p13244_p7, %p13243_p0 }
 0x868   : > { %p13241_p12 = pneg %p13240_p6 }
 0x86a   : > { %p13246_p9 = pnand %p13245_p2, %p13241_p12 }
 0x86c   : > { %13249 = shalt.err (!%p13246_p9)
}
 0x86d   : > { %12327 = dma.vmem_to_hbm [thread:$0]  (%p16440_p8), %s10263_s7, 16, %s10260_s15, %s10250_s30  }
 0x86e PF: > { %s10274_s21 = sand.u32 1, %s13288_s25   ;;  %p16441_p10 = scmp.ne.s32.totalorder %s16157_s20, 0 }
 0x86f   : > { %p16442_p11 = scmp.ge.s32.totalorder %s13300_s28, 2  ;;  %s10275_s16 = scalar_lea.sflag [#allocation8], %s10274_s21 }
 0x871   : > { %p12353_p13 = pnand %p16442_p11, %p16441_p10 }
 0x873   : > { %p12354_p5 = pneg %p12353_p13 }
 0x875   : > { %13283 = dma.done.wait (%p12354_p5), %s10275_s16, 16  }
 0x876   : > { %13285 = vsyncadd (%p12354_p5), %s10275_s16, 4294967280  ;;  %s16443_s28 = sld [smem:[#allocation25_spill]]  ;;  %s16446_s25 = smov %s13292_s26 }
 0x877   : > { %s16444_s1 = sld [smem:[#allocation24_spill]] }
 0x878   : > { %s16445_s27 = sld [smem:[#allocation26_spill]] }
 0x87c   : > { %p29_p1 = scmp.ge.s32.totalorder %s16443_s28, 4  }
 0x87d   : > { %s16447_s26 = smov %s16444_s1 }
 0x87e   :  { %31 = sbr.rel (!%p29_p1) target bundleno = 15 (0xf), region = 153 }
 0x883   :  { %10279 = vsyncpa [#allocation7], 1 }
 0x884   :  { %10281 = vsyncpa [#allocation7 + $0x1], 1 }
 0x885   :  { %10282 = vsyncpa [#allocation10], 1 }
 0x886   :  { %10283 = vsyncpa [#allocation13], 1 }
 0x887   :  { %10284 = vsyncpa [#allocation16], 1 }
 0x888   :  { %10285 = vsyncpa [#allocation8], 1 }
 0x889   :  { %10287 = vsyncpa [#allocation8 + $0x1], 1 }

</bundles_post_ra>
